<compile_context>
chip_gen: v7x
topology: tpu7x:2x2x1
jax: 0.10.0
libtpu: 0.0.40
codegen_flags: <defaults>
</compile_context>

<pallas_src>
import functools
import inspect
import math

import jax
import jax.numpy as jnp
from jax import lax
from jax.experimental import pallas as pl
from jax.experimental.pallas import tpu as pltpu

NUM_HEADS = 12
HEAD_DIM = 64
HIDDEN = NUM_HEADS * HEAD_DIM  # 768


def _round_up(x, m):
    return ((x + m - 1) // m) * m


# --------------------------- Fused attention kernel ------------------------- #
def _attn_body(x_ref, wqkv_ref, bqkv_ref, wo_ref, bo_ref,
               o_ref, probs_ref, q16_ref, kv16_ref, ctx16_ref, *, seq_len):
    """One batch-block: fused QKV -> per-head softmax(QK^T)V -> fused out proj.

    x_ref     : (BB, S_kv, 768)     f32  zero-padded along sequence
    wqkv_ref  : (768, 2304)         bf16 [Wq*scale | Wk | Wv]   ([in, out])
    bqkv_ref  : (1, 2304)           f32  [bq*scale | bk | bv]
    wo_ref    : (768, 768)          bf16
    bo_ref    : (1, 768)            f32
    o_ref     : (BB, S_q, 768)      f32
    probs_ref : (BB, H, S_q, S_kv)  f32 or None (vis=False variant)
    q16_ref   : (BB, S_q, 768)      bf16 VMEM scratch (scaled Q)
    kv16_ref  : (BB, S_kv, 1536)    bf16 VMEM scratch ([K | V])
    ctx16_ref : (BB, S_q, 768)      bf16 VMEM scratch (per-head ctx slots)
    """
    BB, S_kv, D = x_ref.shape
    S_q = o_ref.shape[1]

    xb = x_ref[...].astype(jnp.bfloat16)            # (BB, S_kv, 768)
    xq = xb[:, :S_q, :].reshape(BB * S_q, D)        # queries: only real-ish rows
    xkv = xb.reshape(BB * S_kv, D)

    # Fused projections; bias added and cast to bf16 exactly once, then staged
    # in VMEM scratch so per-head slices are cheap bf16 loads.
    q = jnp.dot(xq, wqkv_ref[:, :HIDDEN], preferred_element_type=jnp.float32)
    q = q + bqkv_ref[:, :HIDDEN]
    q16_ref[...] = q.astype(jnp.bfloat16).reshape(BB, S_q, HIDDEN)

    kv = jnp.dot(xkv, wqkv_ref[:, HIDDEN:], preferred_element_type=jnp.float32)
    kv = kv + bqkv_ref[:, HIDDEN:]
    kv16_ref[...] = kv.astype(jnp.bfloat16).reshape(BB, S_kv, 2 * HIDDEN)

    # Additive mask for padded key positions (hoisted out of the head loop).
    if S_kv != seq_len:
        key_idx = lax.broadcasted_iota(jnp.int32, (1, 1, S_kv), 2)
        kmask = jnp.where(key_idx < seq_len, 0.0, -1e30).astype(jnp.float32)
        kmask = jnp.broadcast_to(kmask, (BB, S_q, S_kv))
    else:
        kmask = None

    for h in range(NUM_HEADS):                       # static unroll, 12 heads
        lo = h * HEAD_DIM
        qh = q16_ref[:, :, lo:lo + HEAD_DIM]                     # (BB, S_q, Dh)
        kh = kv16_ref[:, :, lo:lo + HEAD_DIM]                    # (BB, S_kv, Dh)
        vh = kv16_ref[:, :, HIDDEN + lo:HIDDEN + lo + HEAD_DIM]  # (BB, S_kv, Dh)

        # Scaled scores (1/sqrt(Dh) already folded into Wq/bq).
        s = jnp.einsum("bqd,bkd->bqk", qh, kh,
                       preferred_element_type=jnp.float32)       # (BB, S_q, S_kv)
        if kmask is not None:
            s = s + kmask

        # Stable softmax in f32; divide on the EUP.
        m = jnp.max(s, axis=-1, keepdims=True)
        e = jnp.exp(s - m)
        p = e * pl.reciprocal(jnp.sum(e, axis=-1, keepdims=True), approx=True)
        if probs_ref is not None:
            probs_ref[:, h, :, :] = p

        # attn_dropout(p=0.0) is identity.
        ctx_h = jnp.einsum("bqk,bkd->bqd", p.astype(jnp.bfloat16), vh,
                           preferred_element_type=jnp.float32)   # (BB, S_q, Dh)
        # Stage this head's context at lane offset h*64 for the fused out proj.
        ctx16_ref[:, :, lo:lo + HEAD_DIM] = ctx_h.astype(jnp.bfloat16)

    # Single fused K=768 output projection (replaces 12 K=64 matmuls).
    ctx = ctx16_ref[...].reshape(BB * S_q, HIDDEN)
    out = jnp.dot(ctx, wo_ref[...], preferred_element_type=jnp.float32)
    out = out + bo_ref[...]
    # proj_dropout(p=0.0) is identity.
    o_ref[...] = out.reshape(BB, S_q, HIDDEN).astype(o_ref.dtype)


def _make_kernel(seq_len, vis):
    if vis:
        def kernel(x_ref, wqkv_ref, bqkv_ref, wo_ref, bo_ref,
                   o_ref, probs_ref, q16_ref, kv16_ref, ctx16_ref):
            _attn_body(x_ref, wqkv_ref, bqkv_ref, wo_ref, bo_ref,
                       o_ref, probs_ref, q16_ref, kv16_ref, ctx16_ref,
                       seq_len=seq_len)
    else:
        def kernel(x_ref, wqkv_ref, bqkv_ref, wo_ref, bo_ref,
                   o_ref, q16_ref, kv16_ref, ctx16_ref):
            _attn_body(x_ref, wqkv_ref, bqkv_ref, wo_ref, bo_ref,
                       o_ref, None, q16_ref, kv16_ref, ctx16_ref,
                       seq_len=seq_len)
    return kernel


def _resident_spec_kwargs():
    """Single-buffer grid-constant weight operands when the API allows it."""
    try:
        if hasattr(pl, "Buffered") and \
           "pipeline_mode" in inspect.signature(pl.BlockSpec).parameters:
            return {"pipeline_mode": pl.Buffered(1)}
    except (TypeError, ValueError):
        pass
    return {}  # fall back to default double buffering (still correct)


# ------------------------------ Module forward ------------------------------ #
@functools.partial(jax.jit, static_argnames=("vis",))
def attention_forward(hidden_states, params, vis=True):
    B, S, D = hidden_states.shape
    assert D == HIDDEN

    # ---- static geometry: lane/sublane-friendly padding + batch blocking ----
    S_kv = _round_up(S, 128)   # key dim: lane-dense scores / probs stores
    S_q = _round_up(S, 8)      # query dim: sublane aligned
    BB = max(1, 256 // S_kv)   # aim for >= ~256 MXU rows per step
    BB = min(BB, B)
    if B >= 2:                 # keep >=2 grid steps so both v7x TCs get work
        BB = min(BB, (B + 1) // 2)
    B_pad = ((B + BB - 1) // BB) * BB
    grid = (B_pad // BB,)

    # ---- parameter prep: fused QKV weight, scale folded into Wq/bq ----------
    scale = 1.0 / math.sqrt(HEAD_DIM)    # 0.125 — power of two, exact in bf16
    wqkv = jnp.concatenate(
        [params["wq"] * scale, params["wk"], params["wv"]], axis=1
    ).astype(jnp.bfloat16)                                   # (768, 2304)
    bqkv = jnp.concatenate(
        [params["bq"] * scale, params["bk"], params["bv"]]
    ).reshape(1, 3 * D).astype(jnp.float32)                  # (1, 2304)
    wo = params["wo"].astype(jnp.bfloat16)                   # (768, 768)
    bo = params["bo"].reshape(1, D).astype(jnp.float32)      # (1, 768)

    x_pad = jnp.pad(hidden_states, ((0, B_pad - B), (0, S_kv - S), (0, 0)))

    resident = _resident_spec_kwargs()
    in_specs = [
        pl.BlockSpec((BB, S_kv, D), lambda b: (b, 0, 0)),                 # x
        pl.BlockSpec((D, 3 * D), lambda b: (0, 0), **resident),           # wqkv
        pl.BlockSpec((1, 3 * D), lambda b: (0, 0), **resident),           # bqkv
        pl.BlockSpec((D, D), lambda b: (0, 0), **resident),               # wo
        pl.BlockSpec((1, D), lambda b: (0, 0), **resident),               # bo
    ]
    scratch_shapes = [
        pltpu.VMEM((BB, S_q, HIDDEN), jnp.bfloat16),        # Q (scaled) bf16
        pltpu.VMEM((BB, S_kv, 2 * HIDDEN), jnp.bfloat16),   # [K | V] bf16
        pltpu.VMEM((BB, S_q, HIDDEN), jnp.bfloat16),        # ctx (all heads)
    ]
    # 32 MiB fits the worst realistic per-step footprint here (~<20 MiB) and is
    # safe on v7x (64 MiB physical / 32 MiB default scoped VMEM).
    compiler_params = pltpu.CompilerParams(
        dimension_semantics=("parallel",),
        vmem_limit_bytes=32 * 1024 * 1024,
    )

    flops = (2 * B_pad * S_q * D * D                               # Q proj
             + 2 * B_pad * S_kv * D * 2 * D                        # K,V proj
             + 2 * 2 * B_pad * NUM_HEADS * S_q * S_kv * HEAD_DIM   # QK^T + PV
             + 2 * B_pad * S_q * D * D)                            # out proj
    transcendentals = B_pad * NUM_HEADS * S_q * S_kv
    bytes_accessed = (x_pad.size * 4 + wqkv.size * 2 + bqkv.size * 4
                      + wo.size * 2 + bo.size * 4
                      + B_pad * S_q * D * 4
                      + (B_pad * NUM_HEADS * S_q * S_kv * 4 if vis else 0))
    cost = pl.CostEstimate(flops=flops, transcendentals=transcendentals,
                           bytes_accessed=bytes_accessed)

    kernel = _make_kernel(S, vis)

    if vis:
        out_shape = (
            jax.ShapeDtypeStruct((B_pad, S_q, D), hidden_states.dtype),
            jax.ShapeDtypeStruct((B_pad, NUM_HEADS, S_q, S_kv), jnp.float32),
        )
        out_specs = (
            pl.BlockSpec((BB, S_q, D), lambda b: (b, 0, 0)),
            pl.BlockSpec((BB, NUM_HEADS, S_q, S_kv), lambda b: (b, 0, 0, 0)),
        )
        out_pad, probs_pad = pl.pallas_call(
            kernel, grid=grid, out_shape=out_shape,
            in_specs=in_specs, out_specs=out_specs,
            scratch_shapes=scratch_shapes,
            compiler_params=compiler_params, cost_estimate=cost,
        )(x_pad, wqkv, bqkv, wo, bo)
        return out_pad[:B, :S, :], probs_pad[:B, :, :S, :S]
    else:
        out_pad = pl.pallas_call(
            kernel, grid=grid,
            out_shape=jax.ShapeDtypeStruct((B_pad, S_q, D), hidden_states.dtype),
            in_specs=in_specs,
            out_specs=pl.BlockSpec((BB, S_q, D), lambda b: (b, 0, 0)),
            scratch_shapes=scratch_shapes,
            compiler_params=compiler_params, cost_estimate=cost,
        )(x_pad, wqkv, bqkv, wo, bo)
        return out_pad[:B, :S, :], None


# ------------------------------ Pure-JAX reference -------------------------- #
def attention_reference(hidden_states, params):
    B, S, D = hidden_states.shape

    def lin(x, w, b):
        return x @ w + b

    q = lin(hidden_states, params["wq"], params["bq"])
    k = lin(hidden_states, params["wk"], params["bk"])
    v = lin(hidden_states, params["wv"], params["bv"])

    def split(t):
        return t.reshape(B, S, NUM_HEADS, HEAD_DIM).transpose(0, 2, 1, 3)

    qh, kh, vh = split(q), split(k), split(v)
    scores = jnp.einsum("bhqd,bhkd->bhqk", qh, kh) / math.sqrt(HEAD_DIM)
    probs = jax.nn.softmax(scores, axis=-1)
    ctx = jnp.einsum("bhqk,bhkd->bhqd", probs, vh)
    ctx = ctx.transpose(0, 2, 1, 3).reshape(B, S, D)
    out = lin(ctx, params["wo"], params["bo"])
    return out, probs


# ---------------------------------- Main ------------------------------------ #
if __name__ == "__main__":
    key = jax.random.PRNGKey(0)
    k_x, k_wq, k_bq, k_wk, k_bk, k_wv, k_bv, k_wo, k_bo = jax.random.split(key, 9)

    B, S = 2, 8
    x = jax.random.normal(k_x, (B, S, HIDDEN), dtype=jnp.float32)

    def init_w(k):
        return jax.random.normal(k, (HIDDEN, HIDDEN), dtype=jnp.float32) * 0.02

    def init_b(k):
        return jax.random.normal(k, (HIDDEN,), dtype=jnp.float32) * 0.02

    params = {
        "wq": init_w(k_wq), "bq": init_b(k_bq),
        "wk": init_w(k_wk), "bk": init_b(k_bk),
        "wv": init_w(k_wv), "bv": init_b(k_bv),
        "wo": init_w(k_wo), "bo": init_b(k_bo),
    }

    # vis=True path (returns attention weights).
    out, weights = attention_forward(x, params, vis=True)
    out = jax.block_until_ready(out)
    weights = jax.block_until_ready(weights)

    ref_out, ref_w = attention_reference(x, params)
    assert out.shape == (B, S, HIDDEN)
    assert weights.shape == (B, NUM_HEADS, S, S)
    # Tolerances account for bf16 MXU operands (f32 accumulation) + approx recip.
    assert jnp.allclose(out, ref_out, rtol=2e-2, atol=2e-2)
    assert jnp.allclose(weights, ref_w, rtol=1e-2, atol=1e-2)

    # vis=False path (probs never computed or written).
    out2, w2 = attention_forward(x, params, vis=False)
    out2 = jax.block_until_ready(out2)
    assert w2 is None
    assert jnp.allclose(out2, ref_out, rtol=2e-2, atol=2e-2)

    print("KERNEL_OK")
</pallas_src>

<mosaic_0001>
module attributes {stable_mosaic.version = 11 : i64} {
  func.func @kernel(%arg0: i32, %arg1: memref<1x128x768xf32, #tpu.memory_space<vmem>>, %arg2: memref<768x2304xbf16, #tpu.memory_space<vmem>>, %arg3: memref<1x2304xf32, #tpu.memory_space<vmem>>, %arg4: memref<768x768xbf16, #tpu.memory_space<vmem>>, %arg5: memref<1x768xf32, #tpu.memory_space<vmem>>, %arg6: memref<1x8x768xf32, #tpu.memory_space<vmem>>, %arg7: memref<1x12x8x128xf32, #tpu.memory_space<vmem>>, %arg8: memref<1x8x768xbf16, #tpu.memory_space<vmem>>, %arg9: memref<1x128x1536xbf16, #tpu.memory_space<vmem>>, %arg10: memref<1x8x768xbf16, #tpu.memory_space<vmem>>) attributes {dimension_semantics = [#tpu.dimension_semantics<parallel>], iteration_bounds = array<i64: 2>, scalar_prefetch = 0 : i64, scratch_operands = 3 : i64, tpu.core_type = #tpu.core_type<tc>, window_params = [{transform_indices = @transform_0, window_bounds = array<i64: 1, 128, 768>}, {pipeline_mode = #tpu.pipeline_mode<synchronous>, transform_indices = @transform_1, window_bounds = array<i64: 768, 2304>}, {pipeline_mode = #tpu.pipeline_mode<synchronous>, transform_indices = @transform_2, window_bounds = array<i64: 1, 2304>}, {pipeline_mode = #tpu.pipeline_mode<synchronous>, transform_indices = @transform_3, window_bounds = array<i64: 768, 768>}, {pipeline_mode = #tpu.pipeline_mode<synchronous>, transform_indices = @transform_4, window_bounds = array<i64: 1, 768>}, {transform_indices = @transform_5, window_bounds = array<i64: 1, 8, 768>}, {transform_indices = @transform_6, window_bounds = array<i64: 1, 12, 8, 128>}]} {
    %c0 = arith.constant 0 : index
    %c0_0 = arith.constant 0 : index
    %c0_1 = arith.constant 0 : index
    %0 = vector.load %arg1[%c0, %c0_0, %c0_1] : memref<1x128x768xf32, #tpu.memory_space<vmem>>, vector<1x128x768xf32>
    %1 = arith.truncf %0 : vector<1x128x768xf32> to vector<1x128x768xbf16>
    %2 = vector.extract_strided_slice %1 {offsets = [0, 0, 0], sizes = [1, 8, 768], strides = [1, 1, 1]} : vector<1x128x768xbf16> to vector<1x8x768xbf16>
    %3 = vector.shape_cast %2 : vector<1x8x768xbf16> to vector<8x768xbf16>
    %4 = vector.shape_cast %1 : vector<1x128x768xbf16> to vector<128x768xbf16>
    %c0_2 = arith.constant 0 : index
    %c0_3 = arith.constant 0 : index
    %5 = vector.load %arg2[%c0_2, %c0_3] : memref<768x2304xbf16, #tpu.memory_space<vmem>>, vector<768x768xbf16>
    %cst = arith.constant dense<0.000000e+00> : vector<8x768xf32>
    %6 = tpu.matmul %3, %5, %cst {dimension_numbers = #tpu.dot_dimension_numbers<[1], [0], [0], [1], [0, 0, 1, 1], [], []>} : vector<8x768xbf16>, vector<768x768xbf16>, vector<8x768xf32> -> vector<8x768xf32>
    %c0_4 = arith.constant 0 : index
    %c0_5 = arith.constant 0 : index
    %7 = vector.load %arg3[%c0_4, %c0_5] : memref<1x2304xf32, #tpu.memory_space<vmem>>, vector<1x768xf32>
    %8 = vector.broadcast %7 : vector<1x768xf32> to vector<8x768xf32>
    %9 = arith.addf %6, %8 : vector<8x768xf32>
    %10 = arith.truncf %9 : vector<8x768xf32> to vector<8x768xbf16>
    %11 = vector.shape_cast %10 : vector<8x768xbf16> to vector<1x8x768xbf16>
    %c0_6 = arith.constant 0 : index
    %c0_7 = arith.constant 0 : index
    %c0_8 = arith.constant 0 : index
    %12 = vector.load %arg8[%c0_6, %c0_7, %c0_8] : memref<1x8x768xbf16, #tpu.memory_space<vmem>>, vector<1x8x768xbf16>
    tpu.vector_store %arg8[%c0_6, %c0_7, %c0_8], %11 {strides = array<i32>} : memref<1x8x768xbf16, #tpu.memory_space<vmem>>, vector<1x8x768xbf16>,
    %c0_9 = arith.constant 0 : index
    %c768 = arith.constant 768 : index
    %13 = vector.load %arg2[%c0_9, %c768] : memref<768x2304xbf16, #tpu.memory_space<vmem>>, vector<768x1536xbf16>
    %cst_10 = arith.constant dense<0.000000e+00> : vector<128x1536xf32>
    %14 = tpu.matmul %4, %13, %cst_10 {dimension_numbers = #tpu.dot_dimension_numbers<[1], [0], [0], [1], [0, 0, 1, 1], [], []>} : vector<128x768xbf16>, vector<768x1536xbf16>, vector<128x1536xf32> -> vector<128x1536xf32>
    %c0_11 = arith.constant 0 : index
    %c768_12 = arith.constant 768 : index
    %15 = vector.load %arg3[%c0_11, %c768_12] : memref<1x2304xf32, #tpu.memory_space<vmem>>, vector<1x1536xf32>
    %16 = vector.broadcast %15 : vector<1x1536xf32> to vector<128x1536xf32>
    %17 = arith.addf %14, %16 : vector<128x1536xf32>
    %18 = arith.truncf %17 : vector<128x1536xf32> to vector<128x1536xbf16>
    %19 = vector.shape_cast %18 : vector<128x1536xbf16> to vector<1x128x1536xbf16>
    %c0_13 = arith.constant 0 : index
    %c0_14 = arith.constant 0 : index
    %c0_15 = arith.constant 0 : index
    %20 = vector.load %arg9[%c0_13, %c0_14, %c0_15] : memref<1x128x1536xbf16, #tpu.memory_space<vmem>>, vector<1x128x1536xbf16>
    tpu.vector_store %arg9[%c0_13, %c0_14, %c0_15], %19 {strides = array<i32>} : memref<1x128x1536xbf16, #tpu.memory_space<vmem>>, vector<1x128x1536xbf16>,
    %21 = tpu.iota {dimensions = array<i32: 2>} : vector<1x1x128xi32>
    %c8_i32 = arith.constant 8 : i32
    %22 = vector.broadcast %c8_i32 : i32 to vector<1x1x128xi32>
    %23 = arith.cmpi slt, %21, %22 : vector<1x1x128xi32>
    %cst_16 = arith.constant 0.000000e+00 : f32
    %cst_17 = arith.constant -1.000000e+30 : f32
    %24 = vector.broadcast %cst_16 : f32 to vector<1x1x128xf32>
    %25 = vector.broadcast %cst_17 : f32 to vector<1x1x128xf32>
    %26 = arith.select %23, %24, %25 : vector<1x1x128xi1>, vector<1x1x128xf32>
    %27 = vector.shape_cast %26 : vector<1x1x128xf32> to vector<1x1x128xf32>
    %28 = vector.broadcast %27 : vector<1x1x128xf32> to vector<1x8x128xf32>
    %c0_18 = arith.constant 0 : index
    %c0_19 = arith.constant 0 : index
    %c0_20 = arith.constant 0 : index
    %29 = vector.load %arg8[%c0_18, %c0_19, %c0_20] : memref<1x8x768xbf16, #tpu.memory_space<vmem>>, vector<1x8x64xbf16>
    %c0_21 = arith.constant 0 : index
    %c0_22 = arith.constant 0 : index
    %c0_23 = arith.constant 0 : index
    %30 = vector.load %arg9[%c0_21, %c0_22, %c0_23] : memref<1x128x1536xbf16, #tpu.memory_space<vmem>>, vector<1x128x64xbf16>
    %c0_24 = arith.constant 0 : index
    %c0_25 = arith.constant 0 : index
    %c768_26 = arith.constant 768 : index
    %31 = vector.load %arg9[%c0_24, %c0_25, %c768_26] : memref<1x128x1536xbf16, #tpu.memory_space<vmem>>, vector<1x128x64xbf16>
    "tpu.trace_start"() <{level = 10 : i32, message = "bqd,bkd->bqk"}> : () -> ()
    %cst_27 = arith.constant dense<0.000000e+00> : vector<1x8x128xf32>
    %32 = tpu.matmul %29, %30, %cst_27 {dimension_numbers = #tpu.dot_dimension_numbers<[2], [2], [1], [1], [0, 0, 0, 1, 1, 1], [0], [0]>} : vector<1x8x64xbf16>, vector<1x128x64xbf16>, vector<1x8x128xf32> -> vector<1x8x128xf32>
    "tpu.trace_stop"() : () -> ()
    %33 = arith.addf %32, %28 : vector<1x8x128xf32>
    %cst_28 = arith.constant dense<0xFF800000> : vector<1x8xf32>
    %34 = vector.multi_reduction <maximumf>, %33, %cst_28 [2] : vector<1x8x128xf32> to vector<1x8xf32>
    %35 = vector.shape_cast %34 : vector<1x8xf32> to vector<1x8x1xf32>
    %36 = vector.broadcast %35 : vector<1x8x1xf32> to vector<1x8x128xf32>
    %37 = arith.subf %33, %36 : vector<1x8x128xf32>
    %38 = math.exp %37 : vector<1x8x128xf32>
    %cst_29 = arith.constant dense<0.000000e+00> : vector<1x8xf32>
    %39 = vector.multi_reduction <add>, %38, %cst_29 [2] : vector<1x8x128xf32> to vector<1x8xf32>
    %40 = vector.shape_cast %39 : vector<1x8xf32> to vector<1x8x1xf32>
    %41 = tpu.reciprocal %40 {approx = true} : vector<1x8x1xf32> -> vector<1x8x1xf32>
    %42 = vector.broadcast %41 : vector<1x8x1xf32> to vector<1x8x128xf32>
    %43 = arith.mulf %38, %42 : vector<1x8x128xf32>
    %c0_30 = arith.constant 0 : index
    %c0_31 = arith.constant 0 : index
    %c0_32 = arith.constant 0 : index
    %c0_33 = arith.constant 0 : index
    %44 = vector.load %arg7[%c0_30, %c0_31, %c0_32, %c0_33] : memref<1x12x8x128xf32, #tpu.memory_space<vmem>>, vector<1x1x8x128xf32>
    %45 = vector.shape_cast %44 : vector<1x1x8x128xf32> to vector<1x8x128xf32>
    %46 = vector.shape_cast %43 : vector<1x8x128xf32> to vector<1x1x8x128xf32>
    tpu.vector_store %arg7[%c0_30, %c0_31, %c0_32, %c0_33], %46 {strides = array<i32>} : memref<1x12x8x128xf32, #tpu.memory_space<vmem>>, vector<1x1x8x128xf32>,
    %47 = arith.truncf %43 : vector<1x8x128xf32> to vector<1x8x128xbf16>
    "tpu.trace_start"() <{level = 10 : i32, message = "bqk,bkd->bqd"}> : () -> ()
    %cst_34 = arith.constant dense<0.000000e+00> : vector<1x8x64xf32>
    %48 = tpu.matmul %47, %31, %cst_34 {dimension_numbers = #tpu.dot_dimension_numbers<[2], [1], [1], [2], [0, 0, 0, 1, 1, 2], [0], [0]>} : vector<1x8x128xbf16>, vector<1x128x64xbf16>, vector<1x8x64xf32> -> vector<1x8x64xf32>
    "tpu.trace_stop"() : () -> ()
    %49 = arith.truncf %48 : vector<1x8x64xf32> to vector<1x8x64xbf16>
    %c0_35 = arith.constant 0 : index
    %c0_36 = arith.constant 0 : index
    %c0_37 = arith.constant 0 : index
    %50 = vector.load %arg10[%c0_35, %c0_36, %c0_37] : memref<1x8x768xbf16, #tpu.memory_space<vmem>>, vector<1x8x64xbf16>
    tpu.vector_store %arg10[%c0_35, %c0_36, %c0_37], %49 {strides = array<i32>} : memref<1x8x768xbf16, #tpu.memory_space<vmem>>, vector<1x8x64xbf16>,
    %c0_38 = arith.constant 0 : index
    %c0_39 = arith.constant 0 : index
    %c64 = arith.constant 64 : index
    %51 = vector.load %arg8[%c0_38, %c0_39, %c64] : memref<1x8x768xbf16, #tpu.memory_space<vmem>>, vector<1x8x64xbf16>
    %c0_40 = arith.constant 0 : index
    %c0_41 = arith.constant 0 : index
    %c64_42 = arith.constant 64 : index
    %52 = vector.load %arg9[%c0_40, %c0_41, %c64_42] : memref<1x128x1536xbf16, #tpu.memory_space<vmem>>, vector<1x128x64xbf16>
    %c0_43 = arith.constant 0 : index
    %c0_44 = arith.constant 0 : index
    %c832 = arith.constant 832 : index
    %53 = vector.load %arg9[%c0_43, %c0_44, %c832] : memref<1x128x1536xbf16, #tpu.memory_space<vmem>>, vector<1x128x64xbf16>
    "tpu.trace_start"() <{level = 10 : i32, message = "bqd,bkd->bqk"}> : () -> ()
    %cst_45 = arith.constant dense<0.000000e+00> : vector<1x8x128xf32>
    %54 = tpu.matmul %51, %52, %cst_45 {dimension_numbers = #tpu.dot_dimension_numbers<[2], [2], [1], [1], [0, 0, 0, 1, 1, 1], [0], [0]>} : vector<1x8x64xbf16>, vector<1x128x64xbf16>, vector<1x8x128xf32> -> vector<1x8x128xf32>
    "tpu.trace_stop"() : () -> ()
    %55 = arith.addf %54, %28 : vector<1x8x128xf32>
    %cst_46 = arith.constant dense<0xFF800000> : vector<1x8xf32>
    %56 = vector.multi_reduction <maximumf>, %55, %cst_46 [2] : vector<1x8x128xf32> to vector<1x8xf32>
    %57 = vector.shape_cast %56 : vector<1x8xf32> to vector<1x8x1xf32>
    %58 = vector.broadcast %57 : vector<1x8x1xf32> to vector<1x8x128xf32>
    %59 = arith.subf %55, %58 : vector<1x8x128xf32>
    %60 = math.exp %59 : vector<1x8x128xf32>
    %cst_47 = arith.constant dense<0.000000e+00> : vector<1x8xf32>
    %61 = vector.multi_reduction <add>, %60, %cst_47 [2] : vector<1x8x128xf32> to vector<1x8xf32>
    %62 = vector.shape_cast %61 : vector<1x8xf32> to vector<1x8x1xf32>
    %63 = tpu.reciprocal %62 {approx = true} : vector<1x8x1xf32> -> vector<1x8x1xf32>
    %64 = vector.broadcast %63 : vector<1x8x1xf32> to vector<1x8x128xf32>
    %65 = arith.mulf %60, %64 : vector<1x8x128xf32>
    %c0_48 = arith.constant 0 : index
    %c1 = arith.constant 1 : index
    %c0_49 = arith.constant 0 : index
    %c0_50 = arith.constant 0 : index
    %66 = vector.load %arg7[%c0_48, %c1, %c0_49, %c0_50] : memref<1x12x8x128xf32, #tpu.memory_space<vmem>>, vector<1x1x8x128xf32>
    %67 = vector.shape_cast %66 : vector<1x1x8x128xf32> to vector<1x8x128xf32>
    %68 = vector.shape_cast %65 : vector<1x8x128xf32> to vector<1x1x8x128xf32>
    tpu.vector_store %arg7[%c0_48, %c1, %c0_49, %c0_50], %68 {strides = array<i32>} : memref<1x12x8x128xf32, #tpu.memory_space<vmem>>, vector<1x1x8x128xf32>,
    %69 = arith.truncf %65 : vector<1x8x128xf32> to vector<1x8x128xbf16>
    "tpu.trace_start"() <{level = 10 : i32, message = "bqk,bkd->bqd"}> : () -> ()
    %cst_51 = arith.constant dense<0.000000e+00> : vector<1x8x64xf32>
    %70 = tpu.matmul %69, %53, %cst_51 {dimension_numbers = #tpu.dot_dimension_numbers<[2], [1], [1], [2], [0, 0, 0, 1, 1, 2], [0], [0]>} : vector<1x8x128xbf16>, vector<1x128x64xbf16>, vector<1x8x64xf32> -> vector<1x8x64xf32>
    "tpu.trace_stop"() : () -> ()
    %71 = arith.truncf %70 : vector<1x8x64xf32> to vector<1x8x64xbf16>
    %c0_52 = arith.constant 0 : index
    %c0_53 = arith.constant 0 : index
    %c64_54 = arith.constant 64 : index
    %72 = vector.load %arg10[%c0_52, %c0_53, %c64_54] : memref<1x8x768xbf16, #tpu.memory_space<vmem>>, vector<1x8x64xbf16>
    tpu.vector_store %arg10[%c0_52, %c0_53, %c64_54], %71 {strides = array<i32>} : memref<1x8x768xbf16, #tpu.memory_space<vmem>>, vector<1x8x64xbf16>,
    %c0_55 = arith.constant 0 : index
    %c0_56 = arith.constant 0 : index
    %c128 = arith.constant 128 : index
    %73 = vector.load %arg8[%c0_55, %c0_56, %c128] : memref<1x8x768xbf16, #tpu.memory_space<vmem>>, vector<1x8x64xbf16>
    %c0_57 = arith.constant 0 : index
    %c0_58 = arith.constant 0 : index
    %c128_59 = arith.constant 128 : index
    %74 = vector.load %arg9[%c0_57, %c0_58, %c128_59] : memref<1x128x1536xbf16, #tpu.memory_space<vmem>>, vector<1x128x64xbf16>
    %c0_60 = arith.constant 0 : index
    %c0_61 = arith.constant 0 : index
    %c896 = arith.constant 896 : index
    %75 = vector.load %arg9[%c0_60, %c0_61, %c896] : memref<1x128x1536xbf16, #tpu.memory_space<vmem>>, vector<1x128x64xbf16>
    "tpu.trace_start"() <{level = 10 : i32, message = "bqd,bkd->bqk"}> : () -> ()
    %cst_62 = arith.constant dense<0.000000e+00> : vector<1x8x128xf32>
    %76 = tpu.matmul %73, %74, %cst_62 {dimension_numbers = #tpu.dot_dimension_numbers<[2], [2], [1], [1], [0, 0, 0, 1, 1, 1], [0], [0]>} : vector<1x8x64xbf16>, vector<1x128x64xbf16>, vector<1x8x128xf32> -> vector<1x8x128xf32>
    "tpu.trace_stop"() : () -> ()
    %77 = arith.addf %76, %28 : vector<1x8x128xf32>
    %cst_63 = arith.constant dense<0xFF800000> : vector<1x8xf32>
    %78 = vector.multi_reduction <maximumf>, %77, %cst_63 [2] : vector<1x8x128xf32> to vector<1x8xf32>
    %79 = vector.shape_cast %78 : vector<1x8xf32> to vector<1x8x1xf32>
    %80 = vector.broadcast %79 : vector<1x8x1xf32> to vector<1x8x128xf32>
    %81 = arith.subf %77, %80 : vector<1x8x128xf32>
    %82 = math.exp %81 : vector<1x8x128xf32>
    %cst_64 = arith.constant dense<0.000000e+00> : vector<1x8xf32>
    %83 = vector.multi_reduction <add>, %82, %cst_64 [2] : vector<1x8x128xf32> to vector<1x8xf32>
    %84 = vector.shape_cast %83 : vector<1x8xf32> to vector<1x8x1xf32>
    %85 = tpu.reciprocal %84 {approx = true} : vector<1x8x1xf32> -> vector<1x8x1xf32>
    %86 = vector.broadcast %85 : vector<1x8x1xf32> to vector<1x8x128xf32>
    %87 = arith.mulf %82, %86 : vector<1x8x128xf32>
    %c0_65 = arith.constant 0 : index
    %c2 = arith.constant 2 : index
    %c0_66 = arith.constant 0 : index
    %c0_67 = arith.constant 0 : index
    %88 = vector.load %arg7[%c0_65, %c2, %c0_66, %c0_67] : memref<1x12x8x128xf32, #tpu.memory_space<vmem>>, vector<1x1x8x128xf32>
    %89 = vector.shape_cast %88 : vector<1x1x8x128xf32> to vector<1x8x128xf32>
    %90 = vector.shape_cast %87 : vector<1x8x128xf32> to vector<1x1x8x128xf32>
    tpu.vector_store %arg7[%c0_65, %c2, %c0_66, %c0_67], %90 {strides = array<i32>} : memref<1x12x8x128xf32, #tpu.memory_space<vmem>>, vector<1x1x8x128xf32>,
    %91 = arith.truncf %87 : vector<1x8x128xf32> to vector<1x8x128xbf16>
    "tpu.trace_start"() <{level = 10 : i32, message = "bqk,bkd->bqd"}> : () -> ()
    %cst_68 = arith.constant dense<0.000000e+00> : vector<1x8x64xf32>
    %92 = tpu.matmul %91, %75, %cst_68 {dimension_numbers = #tpu.dot_dimension_numbers<[2], [1], [1], [2], [0, 0, 0, 1, 1, 2], [0], [0]>} : vector<1x8x128xbf16>, vector<1x128x64xbf16>, vector<1x8x64xf32> -> vector<1x8x64xf32>
    "tpu.trace_stop"() : () -> ()
    %93 = arith.truncf %92 : vector<1x8x64xf32> to vector<1x8x64xbf16>
    %c0_69 = arith.constant 0 : index
    %c0_70 = arith.constant 0 : index
    %c128_71 = arith.constant 128 : index
    %94 = vector.load %arg10[%c0_69, %c0_70, %c128_71] : memref<1x8x768xbf16, #tpu.memory_space<vmem>>, vector<1x8x64xbf16>
    tpu.vector_store %arg10[%c0_69, %c0_70, %c128_71], %93 {strides = array<i32>} : memref<1x8x768xbf16, #tpu.memory_space<vmem>>, vector<1x8x64xbf16>,
    %c0_72 = arith.constant 0 : index
    %c0_73 = arith.constant 0 : index
    %c192 = arith.constant 192 : index
    %95 = vector.load %arg8[%c0_72, %c0_73, %c192] : memref<1x8x768xbf16, #tpu.memory_space<vmem>>, vector<1x8x64xbf16>
    %c0_74 = arith.constant 0 : index
    %c0_75 = arith.constant 0 : index
    %c192_76 = arith.constant 192 : index
    %96 = vector.load %arg9[%c0_74, %c0_75, %c192_76] : memref<1x128x1536xbf16, #tpu.memory_space<vmem>>, vector<1x128x64xbf16>
    %c0_77 = arith.constant 0 : index
    %c0_78 = arith.constant 0 : index
    %c960 = arith.constant 960 : index
    %97 = vector.load %arg9[%c0_77, %c0_78, %c960] : memref<1x128x1536xbf16, #tpu.memory_space<vmem>>, vector<1x128x64xbf16>
    "tpu.trace_start"() <{level = 10 : i32, message = "bqd,bkd->bqk"}> : () -> ()
    %cst_79 = arith.constant dense<0.000000e+00> : vector<1x8x128xf32>
    %98 = tpu.matmul %95, %96, %cst_79 {dimension_numbers = #tpu.dot_dimension_numbers<[2], [2], [1], [1], [0, 0, 0, 1, 1, 1], [0], [0]>} : vector<1x8x64xbf16>, vector<1x128x64xbf16>, vector<1x8x128xf32> -> vector<1x8x128xf32>
    "tpu.trace_stop"() : () -> ()
    %99 = arith.addf %98, %28 : vector<1x8x128xf32>
    %cst_80 = arith.constant dense<0xFF800000> : vector<1x8xf32>
    %100 = vector.multi_reduction <maximumf>, %99, %cst_80 [2] : vector<1x8x128xf32> to vector<1x8xf32>
    %101 = vector.shape_cast %100 : vector<1x8xf32> to vector<1x8x1xf32>
    %102 = vector.broadcast %101 : vector<1x8x1xf32> to vector<1x8x128xf32>
    %103 = arith.subf %99, %102 : vector<1x8x128xf32>
    %104 = math.exp %103 : vector<1x8x128xf32>
    %cst_81 = arith.constant dense<0.000000e+00> : vector<1x8xf32>
    %105 = vector.multi_reduction <add>, %104, %cst_81 [2] : vector<1x8x128xf32> to vector<1x8xf32>
    %106 = vector.shape_cast %105 : vector<1x8xf32> to vector<1x8x1xf32>
    %107 = tpu.reciprocal %106 {approx = true} : vector<1x8x1xf32> -> vector<1x8x1xf32>
    %108 = vector.broadcast %107 : vector<1x8x1xf32> to vector<1x8x128xf32>
    %109 = arith.mulf %104, %108 : vector<1x8x128xf32>
    %c0_82 = arith.constant 0 : index
    %c3 = arith.constant 3 : index
    %c0_83 = arith.constant 0 : index
    %c0_84 = arith.constant 0 : index
    %110 = vector.load %arg7[%c0_82, %c3, %c0_83, %c0_84] : memref<1x12x8x128xf32, #tpu.memory_space<vmem>>, vector<1x1x8x128xf32>
    %111 = vector.shape_cast %110 : vector<1x1x8x128xf32> to vector<1x8x128xf32>
    %112 = vector.shape_cast %109 : vector<1x8x128xf32> to vector<1x1x8x128xf32>
    tpu.vector_store %arg7[%c0_82, %c3, %c0_83, %c0_84], %112 {strides = array<i32>} : memref<1x12x8x128xf32, #tpu.memory_space<vmem>>, vector<1x1x8x128xf32>,
    %113 = arith.truncf %109 : vector<1x8x128xf32> to vector<1x8x128xbf16>
    "tpu.trace_start"() <{level = 10 : i32, message = "bqk,bkd->bqd"}> : () -> ()
    %cst_85 = arith.constant dense<0.000000e+00> : vector<1x8x64xf32>
    %114 = tpu.matmul %113, %97, %cst_85 {dimension_numbers = #tpu.dot_dimension_numbers<[2], [1], [1], [2], [0, 0, 0, 1, 1, 2], [0], [0]>} : vector<1x8x128xbf16>, vector<1x128x64xbf16>, vector<1x8x64xf32> -> vector<1x8x64xf32>
    "tpu.trace_stop"() : () -> ()
    %115 = arith.truncf %114 : vector<1x8x64xf32> to vector<1x8x64xbf16>
    %c0_86 = arith.constant 0 : index
    %c0_87 = arith.constant 0 : index
    %c192_88 = arith.constant 192 : index
    %116 = vector.load %arg10[%c0_86, %c0_87, %c192_88] : memref<1x8x768xbf16, #tpu.memory_space<vmem>>, vector<1x8x64xbf16>
    tpu.vector_store %arg10[%c0_86, %c0_87, %c192_88], %115 {strides = array<i32>} : memref<1x8x768xbf16, #tpu.memory_space<vmem>>, vector<1x8x64xbf16>,
    %c0_89 = arith.constant 0 : index
    %c0_90 = arith.constant 0 : index
    %c256 = arith.constant 256 : index
    %117 = vector.load %arg8[%c0_89, %c0_90, %c256] : memref<1x8x768xbf16, #tpu.memory_space<vmem>>, vector<1x8x64xbf16>
    %c0_91 = arith.constant 0 : index
    %c0_92 = arith.constant 0 : index
    %c256_93 = arith.constant 256 : index
    %118 = vector.load %arg9[%c0_91, %c0_92, %c256_93] : memref<1x128x1536xbf16, #tpu.memory_space<vmem>>, vector<1x128x64xbf16>
    %c0_94 = arith.constant 0 : index
    %c0_95 = arith.constant 0 : index
    %c1024 = arith.constant 1024 : index
    %119 = vector.load %arg9[%c0_94, %c0_95, %c1024] : memref<1x128x1536xbf16, #tpu.memory_space<vmem>>, vector<1x128x64xbf16>
    "tpu.trace_start"() <{level = 10 : i32, message = "bqd,bkd->bqk"}> : () -> ()
    %cst_96 = arith.constant dense<0.000000e+00> : vector<1x8x128xf32>
    %120 = tpu.matmul %117, %118, %cst_96 {dimension_numbers = #tpu.dot_dimension_numbers<[2], [2], [1], [1], [0, 0, 0, 1, 1, 1], [0], [0]>} : vector<1x8x64xbf16>, vector<1x128x64xbf16>, vector<1x8x128xf32> -> vector<1x8x128xf32>
    "tpu.trace_stop"() : () -> ()
    %121 = arith.addf %120, %28 : vector<1x8x128xf32>
    %cst_97 = arith.constant dense<0xFF800000> : vector<1x8xf32>
    %122 = vector.multi_reduction <maximumf>, %121, %cst_97 [2] : vector<1x8x128xf32> to vector<1x8xf32>
    %123 = vector.shape_cast %122 : vector<1x8xf32> to vector<1x8x1xf32>
    %124 = vector.broadcast %123 : vector<1x8x1xf32> to vector<1x8x128xf32>
    %125 = arith.subf %121, %124 : vector<1x8x128xf32>
    %126 = math.exp %125 : vector<1x8x128xf32>
    %cst_98 = arith.constant dense<0.000000e+00> : vector<1x8xf32>
    %127 = vector.multi_reduction <add>, %126, %cst_98 [2] : vector<1x8x128xf32> to vector<1x8xf32>
    %128 = vector.shape_cast %127 : vector<1x8xf32> to vector<1x8x1xf32>
    %129 = tpu.reciprocal %128 {approx = true} : vector<1x8x1xf32> -> vector<1x8x1xf32>
    %130 = vector.broadcast %129 : vector<1x8x1xf32> to vector<1x8x128xf32>
    %131 = arith.mulf %126, %130 : vector<1x8x128xf32>
    %c0_99 = arith.constant 0 : index
    %c4 = arith.constant 4 : index
    %c0_100 = arith.constant 0 : index
    %c0_101 = arith.constant 0 : index
    %132 = vector.load %arg7[%c0_99, %c4, %c0_100, %c0_101] : memref<1x12x8x128xf32, #tpu.memory_space<vmem>>, vector<1x1x8x128xf32>
    %133 = vector.shape_cast %132 : vector<1x1x8x128xf32> to vector<1x8x128xf32>
    %134 = vector.shape_cast %131 : vector<1x8x128xf32> to vector<1x1x8x128xf32>
    tpu.vector_store %arg7[%c0_99, %c4, %c0_100, %c0_101], %134 {strides = array<i32>} : memref<1x12x8x128xf32, #tpu.memory_space<vmem>>, vector<1x1x8x128xf32>,
    %135 = arith.truncf %131 : vector<1x8x128xf32> to vector<1x8x128xbf16>
    "tpu.trace_start"() <{level = 10 : i32, message = "bqk,bkd->bqd"}> : () -> ()
    %cst_102 = arith.constant dense<0.000000e+00> : vector<1x8x64xf32>
    %136 = tpu.matmul %135, %119, %cst_102 {dimension_numbers = #tpu.dot_dimension_numbers<[2], [1], [1], [2], [0, 0, 0, 1, 1, 2], [0], [0]>} : vector<1x8x128xbf16>, vector<1x128x64xbf16>, vector<1x8x64xf32> -> vector<1x8x64xf32>
    "tpu.trace_stop"() : () -> ()
    %137 = arith.truncf %136 : vector<1x8x64xf32> to vector<1x8x64xbf16>
    %c0_103 = arith.constant 0 : index
    %c0_104 = arith.constant 0 : index
    %c256_105 = arith.constant 256 : index
    %138 = vector.load %arg10[%c0_103, %c0_104, %c256_105] : memref<1x8x768xbf16, #tpu.memory_space<vmem>>, vector<1x8x64xbf16>
    tpu.vector_store %arg10[%c0_103, %c0_104, %c256_105], %137 {strides = array<i32>} : memref<1x8x768xbf16, #tpu.memory_space<vmem>>, vector<1x8x64xbf16>,
    %c0_106 = arith.constant 0 : index
    %c0_107 = arith.constant 0 : index
    %c320 = arith.constant 320 : index
    %139 = vector.load %arg8[%c0_106, %c0_107, %c320] : memref<1x8x768xbf16, #tpu.memory_space<vmem>>, vector<1x8x64xbf16>
    %c0_108 = arith.constant 0 : index
    %c0_109 = arith.constant 0 : index
    %c320_110 = arith.constant 320 : index
    %140 = vector.load %arg9[%c0_108, %c0_109, %c320_110] : memref<1x128x1536xbf16, #tpu.memory_space<vmem>>, vector<1x128x64xbf16>
    %c0_111 = arith.constant 0 : index
    %c0_112 = arith.constant 0 : index
    %c1088 = arith.constant 1088 : index
    %141 = vector.load %arg9[%c0_111, %c0_112, %c1088] : memref<1x128x1536xbf16, #tpu.memory_space<vmem>>, vector<1x128x64xbf16>
    "tpu.trace_start"() <{level = 10 : i32, message = "bqd,bkd->bqk"}> : () -> ()
    %cst_113 = arith.constant dense<0.000000e+00> : vector<1x8x128xf32>
    %142 = tpu.matmul %139, %140, %cst_113 {dimension_numbers = #tpu.dot_dimension_numbers<[2], [2], [1], [1], [0, 0, 0, 1, 1, 1], [0], [0]>} : vector<1x8x64xbf16>, vector<1x128x64xbf16>, vector<1x8x128xf32> -> vector<1x8x128xf32>
    "tpu.trace_stop"() : () -> ()
    %143 = arith.addf %142, %28 : vector<1x8x128xf32>
    %cst_114 = arith.constant dense<0xFF800000> : vector<1x8xf32>
    %144 = vector.multi_reduction <maximumf>, %143, %cst_114 [2] : vector<1x8x128xf32> to vector<1x8xf32>
    %145 = vector.shape_cast %144 : vector<1x8xf32> to vector<1x8x1xf32>
    %146 = vector.broadcast %145 : vector<1x8x1xf32> to vector<1x8x128xf32>
    %147 = arith.subf %143, %146 : vector<1x8x128xf32>
    %148 = math.exp %147 : vector<1x8x128xf32>
    %cst_115 = arith.constant dense<0.000000e+00> : vector<1x8xf32>
    %149 = vector.multi_reduction <add>, %148, %cst_115 [2] : vector<1x8x128xf32> to vector<1x8xf32>
    %150 = vector.shape_cast %149 : vector<1x8xf32> to vector<1x8x1xf32>
    %151 = tpu.reciprocal %150 {approx = true} : vector<1x8x1xf32> -> vector<1x8x1xf32>
    %152 = vector.broadcast %151 : vector<1x8x1xf32> to vector<1x8x128xf32>
    %153 = arith.mulf %148, %152 : vector<1x8x128xf32>
    %c0_116 = arith.constant 0 : index
    %c5 = arith.constant 5 : index
    %c0_117 = arith.constant 0 : index
    %c0_118 = arith.constant 0 : index
    %154 = vector.load %arg7[%c0_116, %c5, %c0_117, %c0_118] : memref<1x12x8x128xf32, #tpu.memory_space<vmem>>, vector<1x1x8x128xf32>
    %155 = vector.shape_cast %154 : vector<1x1x8x128xf32> to vector<1x8x128xf32>
    %156 = vector.shape_cast %153 : vector<1x8x128xf32> to vector<1x1x8x128xf32>
    tpu.vector_store %arg7[%c0_116, %c5, %c0_117, %c0_118], %156 {strides = array<i32>} : memref<1x12x8x128xf32, #tpu.memory_space<vmem>>, vector<1x1x8x128xf32>,
    %157 = arith.truncf %153 : vector<1x8x128xf32> to vector<1x8x128xbf16>
    "tpu.trace_start"() <{level = 10 : i32, message = "bqk,bkd->bqd"}> : () -> ()
    %cst_119 = arith.constant dense<0.000000e+00> : vector<1x8x64xf32>
    %158 = tpu.matmul %157, %141, %cst_119 {dimension_numbers = #tpu.dot_dimension_numbers<[2], [1], [1], [2], [0, 0, 0, 1, 1, 2], [0], [0]>} : vector<1x8x128xbf16>, vector<1x128x64xbf16>, vector<1x8x64xf32> -> vector<1x8x64xf32>
    "tpu.trace_stop"() : () -> ()
    %159 = arith.truncf %158 : vector<1x8x64xf32> to vector<1x8x64xbf16>
    %c0_120 = arith.constant 0 : index
    %c0_121 = arith.constant 0 : index
    %c320_122 = arith.constant 320 : index
    %160 = vector.load %arg10[%c0_120, %c0_121, %c320_122] : memref<1x8x768xbf16, #tpu.memory_space<vmem>>, vector<1x8x64xbf16>
    tpu.vector_store %arg10[%c0_120, %c0_121, %c320_122], %159 {strides = array<i32>} : memref<1x8x768xbf16, #tpu.memory_space<vmem>>, vector<1x8x64xbf16>,
    %c0_123 = arith.constant 0 : index
    %c0_124 = arith.constant 0 : index
    %c384 = arith.constant 384 : index
    %161 = vector.load %arg8[%c0_123, %c0_124, %c384] : memref<1x8x768xbf16, #tpu.memory_space<vmem>>, vector<1x8x64xbf16>
    %c0_125 = arith.constant 0 : index
    %c0_126 = arith.constant 0 : index
    %c384_127 = arith.constant 384 : index
    %162 = vector.load %arg9[%c0_125, %c0_126, %c384_127] : memref<1x128x1536xbf16, #tpu.memory_space<vmem>>, vector<1x128x64xbf16>
    %c0_128 = arith.constant 0 : index
    %c0_129 = arith.constant 0 : index
    %c1152 = arith.constant 1152 : index
    %163 = vector.load %arg9[%c0_128, %c0_129, %c1152] : memref<1x128x1536xbf16, #tpu.memory_space<vmem>>, vector<1x128x64xbf16>
    "tpu.trace_start"() <{level = 10 : i32, message = "bqd,bkd->bqk"}> : () -> ()
    %cst_130 = arith.constant dense<0.000000e+00> : vector<1x8x128xf32>
    %164 = tpu.matmul %161, %162, %cst_130 {dimension_numbers = #tpu.dot_dimension_numbers<[2], [2], [1], [1], [0, 0, 0, 1, 1, 1], [0], [0]>} : vector<1x8x64xbf16>, vector<1x128x64xbf16>, vector<1x8x128xf32> -> vector<1x8x128xf32>
    "tpu.trace_stop"() : () -> ()
    %165 = arith.addf %164, %28 : vector<1x8x128xf32>
    %cst_131 = arith.constant dense<0xFF800000> : vector<1x8xf32>
    %166 = vector.multi_reduction <maximumf>, %165, %cst_131 [2] : vector<1x8x128xf32> to vector<1x8xf32>
    %167 = vector.shape_cast %166 : vector<1x8xf32> to vector<1x8x1xf32>
    %168 = vector.broadcast %167 : vector<1x8x1xf32> to vector<1x8x128xf32>
    %169 = arith.subf %165, %168 : vector<1x8x128xf32>
    %170 = math.exp %169 : vector<1x8x128xf32>
    %cst_132 = arith.constant dense<0.000000e+00> : vector<1x8xf32>
    %171 = vector.multi_reduction <add>, %170, %cst_132 [2] : vector<1x8x128xf32> to vector<1x8xf32>
    %172 = vector.shape_cast %171 : vector<1x8xf32> to vector<1x8x1xf32>
    %173 = tpu.reciprocal %172 {approx = true} : vector<1x8x1xf32> -> vector<1x8x1xf32>
    %174 = vector.broadcast %173 : vector<1x8x1xf32> to vector<1x8x128xf32>
    %175 = arith.mulf %170, %174 : vector<1x8x128xf32>
    %c0_133 = arith.constant 0 : index
    %c6 = arith.constant 6 : index
    %c0_134 = arith.constant 0 : index
    %c0_135 = arith.constant 0 : index
    %176 = vector.load %arg7[%c0_133, %c6, %c0_134, %c0_135] : memref<1x12x8x128xf32, #tpu.memory_space<vmem>>, vector<1x1x8x128xf32>
    %177 = vector.shape_cast %176 : vector<1x1x8x128xf32> to vector<1x8x128xf32>
    %178 = vector.shape_cast %175 : vector<1x8x128xf32> to vector<1x1x8x128xf32>
    tpu.vector_store %arg7[%c0_133, %c6, %c0_134, %c0_135], %178 {strides = array<i32>} : memref<1x12x8x128xf32, #tpu.memory_space<vmem>>, vector<1x1x8x128xf32>,
    %179 = arith.truncf %175 : vector<1x8x128xf32> to vector<1x8x128xbf16>
    "tpu.trace_start"() <{level = 10 : i32, message = "bqk,bkd->bqd"}> : () -> ()
    %cst_136 = arith.constant dense<0.000000e+00> : vector<1x8x64xf32>
    %180 = tpu.matmul %179, %163, %cst_136 {dimension_numbers = #tpu.dot_dimension_numbers<[2], [1], [1], [2], [0, 0, 0, 1, 1, 2], [0], [0]>} : vector<1x8x128xbf16>, vector<1x128x64xbf16>, vector<1x8x64xf32> -> vector<1x8x64xf32>
    "tpu.trace_stop"() : () -> ()
    %181 = arith.truncf %180 : vector<1x8x64xf32> to vector<1x8x64xbf16>
    %c0_137 = arith.constant 0 : index
    %c0_138 = arith.constant 0 : index
    %c384_139 = arith.constant 384 : index
    %182 = vector.load %arg10[%c0_137, %c0_138, %c384_139] : memref<1x8x768xbf16, #tpu.memory_space<vmem>>, vector<1x8x64xbf16>
    tpu.vector_store %arg10[%c0_137, %c0_138, %c384_139], %181 {strides = array<i32>} : memref<1x8x768xbf16, #tpu.memory_space<vmem>>, vector<1x8x64xbf16>,
    %c0_140 = arith.constant 0 : index
    %c0_141 = arith.constant 0 : index
    %c448 = arith.constant 448 : index
    %183 = vector.load %arg8[%c0_140, %c0_141, %c448] : memref<1x8x768xbf16, #tpu.memory_space<vmem>>, vector<1x8x64xbf16>
    %c0_142 = arith.constant 0 : index
    %c0_143 = arith.constant 0 : index
    %c448_144 = arith.constant 448 : index
    %184 = vector.load %arg9[%c0_142, %c0_143, %c448_144] : memref<1x128x1536xbf16, #tpu.memory_space<vmem>>, vector<1x128x64xbf16>
    %c0_145 = arith.constant 0 : index
    %c0_146 = arith.constant 0 : index
    %c1216 = arith.constant 1216 : index
    %185 = vector.load %arg9[%c0_145, %c0_146, %c1216] : memref<1x128x1536xbf16, #tpu.memory_space<vmem>>, vector<1x128x64xbf16>
    "tpu.trace_start"() <{level = 10 : i32, message = "bqd,bkd->bqk"}> : () -> ()
    %cst_147 = arith.constant dense<0.000000e+00> : vector<1x8x128xf32>
    %186 = tpu.matmul %183, %184, %cst_147 {dimension_numbers = #tpu.dot_dimension_numbers<[2], [2], [1], [1], [0, 0, 0, 1, 1, 1], [0], [0]>} : vector<1x8x64xbf16>, vector<1x128x64xbf16>, vector<1x8x128xf32> -> vector<1x8x128xf32>
    "tpu.trace_stop"() : () -> ()
    %187 = arith.addf %186, %28 : vector<1x8x128xf32>
    %cst_148 = arith.constant dense<0xFF800000> : vector<1x8xf32>
    %188 = vector.multi_reduction <maximumf>, %187, %cst_148 [2] : vector<1x8x128xf32> to vector<1x8xf32>
    %189 = vector.shape_cast %188 : vector<1x8xf32> to vector<1x8x1xf32>
    %190 = vector.broadcast %189 : vector<1x8x1xf32> to vector<1x8x128xf32>
    %191 = arith.subf %187, %190 : vector<1x8x128xf32>
    %192 = math.exp %191 : vector<1x8x128xf32>
    %cst_149 = arith.constant dense<0.000000e+00> : vector<1x8xf32>
    %193 = vector.multi_reduction <add>, %192, %cst_149 [2] : vector<1x8x128xf32> to vector<1x8xf32>
    %194 = vector.shape_cast %193 : vector<1x8xf32> to vector<1x8x1xf32>
    %195 = tpu.reciprocal %194 {approx = true} : vector<1x8x1xf32> -> vector<1x8x1xf32>
    %196 = vector.broadcast %195 : vector<1x8x1xf32> to vector<1x8x128xf32>
    %197 = arith.mulf %192, %196 : vector<1x8x128xf32>
    %c0_150 = arith.constant 0 : index
    %c7 = arith.constant 7 : index
    %c0_151 = arith.constant 0 : index
    %c0_152 = arith.constant 0 : index
    %198 = vector.load %arg7[%c0_150, %c7, %c0_151, %c0_152] : memref<1x12x8x128xf32, #tpu.memory_space<vmem>>, vector<1x1x8x128xf32>
    %199 = vector.shape_cast %198 : vector<1x1x8x128xf32> to vector<1x8x128xf32>
    %200 = vector.shape_cast %197 : vector<1x8x128xf32> to vector<1x1x8x128xf32>
    tpu.vector_store %arg7[%c0_150, %c7, %c0_151, %c0_152], %200 {strides = array<i32>} : memref<1x12x8x128xf32, #tpu.memory_space<vmem>>, vector<1x1x8x128xf32>,
    %201 = arith.truncf %197 : vector<1x8x128xf32> to vector<1x8x128xbf16>
    "tpu.trace_start"() <{level = 10 : i32, message = "bqk,bkd->bqd"}> : () -> ()
    %cst_153 = arith.constant dense<0.000000e+00> : vector<1x8x64xf32>
    %202 = tpu.matmul %201, %185, %cst_153 {dimension_numbers = #tpu.dot_dimension_numbers<[2], [1], [1], [2], [0, 0, 0, 1, 1, 2], [0], [0]>} : vector<1x8x128xbf16>, vector<1x128x64xbf16>, vector<1x8x64xf32> -> vector<1x8x64xf32>
    "tpu.trace_stop"() : () -> ()
    %203 = arith.truncf %202 : vector<1x8x64xf32> to vector<1x8x64xbf16>
    %c0_154 = arith.constant 0 : index
    %c0_155 = arith.constant 0 : index
    %c448_156 = arith.constant 448 : index
    %204 = vector.load %arg10[%c0_154, %c0_155, %c448_156] : memref<1x8x768xbf16, #tpu.memory_space<vmem>>, vector<1x8x64xbf16>
    tpu.vector_store %arg10[%c0_154, %c0_155, %c448_156], %203 {strides = array<i32>} : memref<1x8x768xbf16, #tpu.memory_space<vmem>>, vector<1x8x64xbf16>,
    %c0_157 = arith.constant 0 : index
    %c0_158 = arith.constant 0 : index
    %c512 = arith.constant 512 : index
    %205 = vector.load %arg8[%c0_157, %c0_158, %c512] : memref<1x8x768xbf16, #tpu.memory_space<vmem>>, vector<1x8x64xbf16>
    %c0_159 = arith.constant 0 : index
    %c0_160 = arith.constant 0 : index
    %c512_161 = arith.constant 512 : index
    %206 = vector.load %arg9[%c0_159, %c0_160, %c512_161] : memref<1x128x1536xbf16, #tpu.memory_space<vmem>>, vector<1x128x64xbf16>
    %c0_162 = arith.constant 0 : index
    %c0_163 = arith.constant 0 : index
    %c1280 = arith.constant 1280 : index
    %207 = vector.load %arg9[%c0_162, %c0_163, %c1280] : memref<1x128x1536xbf16, #tpu.memory_space<vmem>>, vector<1x128x64xbf16>
    "tpu.trace_start"() <{level = 10 : i32, message = "bqd,bkd->bqk"}> : () -> ()
    %cst_164 = arith.constant dense<0.000000e+00> : vector<1x8x128xf32>
    %208 = tpu.matmul %205, %206, %cst_164 {dimension_numbers = #tpu.dot_dimension_numbers<[2], [2], [1], [1], [0, 0, 0, 1, 1, 1], [0], [0]>} : vector<1x8x64xbf16>, vector<1x128x64xbf16>, vector<1x8x128xf32> -> vector<1x8x128xf32>
    "tpu.trace_stop"() : () -> ()
    %209 = arith.addf %208, %28 : vector<1x8x128xf32>
    %cst_165 = arith.constant dense<0xFF800000> : vector<1x8xf32>
    %210 = vector.multi_reduction <maximumf>, %209, %cst_165 [2] : vector<1x8x128xf32> to vector<1x8xf32>
    %211 = vector.shape_cast %210 : vector<1x8xf32> to vector<1x8x1xf32>
    %212 = vector.broadcast %211 : vector<1x8x1xf32> to vector<1x8x128xf32>
    %213 = arith.subf %209, %212 : vector<1x8x128xf32>
    %214 = math.exp %213 : vector<1x8x128xf32>
    %cst_166 = arith.constant dense<0.000000e+00> : vector<1x8xf32>
    %215 = vector.multi_reduction <add>, %214, %cst_166 [2] : vector<1x8x128xf32> to vector<1x8xf32>
    %216 = vector.shape_cast %215 : vector<1x8xf32> to vector<1x8x1xf32>
    %217 = tpu.reciprocal %216 {approx = true} : vector<1x8x1xf32> -> vector<1x8x1xf32>
    %218 = vector.broadcast %217 : vector<1x8x1xf32> to vector<1x8x128xf32>
    %219 = arith.mulf %214, %218 : vector<1x8x128xf32>
    %c0_167 = arith.constant 0 : index
    %c8 = arith.constant 8 : index
    %c0_168 = arith.constant 0 : index
    %c0_169 = arith.constant 0 : index
    %220 = vector.load %arg7[%c0_167, %c8, %c0_168, %c0_169] : memref<1x12x8x128xf32, #tpu.memory_space<vmem>>, vector<1x1x8x128xf32>
    %221 = vector.shape_cast %220 : vector<1x1x8x128xf32> to vector<1x8x128xf32>
    %222 = vector.shape_cast %219 : vector<1x8x128xf32> to vector<1x1x8x128xf32>
    tpu.vector_store %arg7[%c0_167, %c8, %c0_168, %c0_169], %222 {strides = array<i32>} : memref<1x12x8x128xf32, #tpu.memory_space<vmem>>, vector<1x1x8x128xf32>,
    %223 = arith.truncf %219 : vector<1x8x128xf32> to vector<1x8x128xbf16>
    "tpu.trace_start"() <{level = 10 : i32, message = "bqk,bkd->bqd"}> : () -> ()
    %cst_170 = arith.constant dense<0.000000e+00> : vector<1x8x64xf32>
    %224 = tpu.matmul %223, %207, %cst_170 {dimension_numbers = #tpu.dot_dimension_numbers<[2], [1], [1], [2], [0, 0, 0, 1, 1, 2], [0], [0]>} : vector<1x8x128xbf16>, vector<1x128x64xbf16>, vector<1x8x64xf32> -> vector<1x8x64xf32>
    "tpu.trace_stop"() : () -> ()
    %225 = arith.truncf %224 : vector<1x8x64xf32> to vector<1x8x64xbf16>
    %c0_171 = arith.constant 0 : index
    %c0_172 = arith.constant 0 : index
    %c512_173 = arith.constant 512 : index
    %226 = vector.load %arg10[%c0_171, %c0_172, %c512_173] : memref<1x8x768xbf16, #tpu.memory_space<vmem>>, vector<1x8x64xbf16>
    tpu.vector_store %arg10[%c0_171, %c0_172, %c512_173], %225 {strides = array<i32>} : memref<1x8x768xbf16, #tpu.memory_space<vmem>>, vector<1x8x64xbf16>,
    %c0_174 = arith.constant 0 : index
    %c0_175 = arith.constant 0 : index
    %c576 = arith.constant 576 : index
    %227 = vector.load %arg8[%c0_174, %c0_175, %c576] : memref<1x8x768xbf16, #tpu.memory_space<vmem>>, vector<1x8x64xbf16>
    %c0_176 = arith.constant 0 : index
    %c0_177 = arith.constant 0 : index
    %c576_178 = arith.constant 576 : index
    %228 = vector.load %arg9[%c0_176, %c0_177, %c576_178] : memref<1x128x1536xbf16, #tpu.memory_space<vmem>>, vector<1x128x64xbf16>
    %c0_179 = arith.constant 0 : index
    %c0_180 = arith.constant 0 : index
    %c1344 = arith.constant 1344 : index
    %229 = vector.load %arg9[%c0_179, %c0_180, %c1344] : memref<1x128x1536xbf16, #tpu.memory_space<vmem>>, vector<1x128x64xbf16>
    "tpu.trace_start"() <{level = 10 : i32, message = "bqd,bkd->bqk"}> : () -> ()
    %cst_181 = arith.constant dense<0.000000e+00> : vector<1x8x128xf32>
    %230 = tpu.matmul %227, %228, %cst_181 {dimension_numbers = #tpu.dot_dimension_numbers<[2], [2], [1], [1], [0, 0, 0, 1, 1, 1], [0], [0]>} : vector<1x8x64xbf16>, vector<1x128x64xbf16>, vector<1x8x128xf32> -> vector<1x8x128xf32>
    "tpu.trace_stop"() : () -> ()
    %231 = arith.addf %230, %28 : vector<1x8x128xf32>
    %cst_182 = arith.constant dense<0xFF800000> : vector<1x8xf32>
    %232 = vector.multi_reduction <maximumf>, %231, %cst_182 [2] : vector<1x8x128xf32> to vector<1x8xf32>
    %233 = vector.shape_cast %232 : vector<1x8xf32> to vector<1x8x1xf32>
    %234 = vector.broadcast %233 : vector<1x8x1xf32> to vector<1x8x128xf32>
    %235 = arith.subf %231, %234 : vector<1x8x128xf32>
    %236 = math.exp %235 : vector<1x8x128xf32>
    %cst_183 = arith.constant dense<0.000000e+00> : vector<1x8xf32>
    %237 = vector.multi_reduction <add>, %236, %cst_183 [2] : vector<1x8x128xf32> to vector<1x8xf32>
    %238 = vector.shape_cast %237 : vector<1x8xf32> to vector<1x8x1xf32>
    %239 = tpu.reciprocal %238 {approx = true} : vector<1x8x1xf32> -> vector<1x8x1xf32>
    %240 = vector.broadcast %239 : vector<1x8x1xf32> to vector<1x8x128xf32>
    %241 = arith.mulf %236, %240 : vector<1x8x128xf32>
    %c0_184 = arith.constant 0 : index
    %c9 = arith.constant 9 : index
    %c0_185 = arith.constant 0 : index
    %c0_186 = arith.constant 0 : index
    %242 = vector.load %arg7[%c0_184, %c9, %c0_185, %c0_186] : memref<1x12x8x128xf32, #tpu.memory_space<vmem>>, vector<1x1x8x128xf32>
    %243 = vector.shape_cast %242 : vector<1x1x8x128xf32> to vector<1x8x128xf32>
    %244 = vector.shape_cast %241 : vector<1x8x128xf32> to vector<1x1x8x128xf32>
    tpu.vector_store %arg7[%c0_184, %c9, %c0_185, %c0_186], %244 {strides = array<i32>} : memref<1x12x8x128xf32, #tpu.memory_space<vmem>>, vector<1x1x8x128xf32>,
    %245 = arith.truncf %241 : vector<1x8x128xf32> to vector<1x8x128xbf16>
    "tpu.trace_start"() <{level = 10 : i32, message = "bqk,bkd->bqd"}> : () -> ()
    %cst_187 = arith.constant dense<0.000000e+00> : vector<1x8x64xf32>
    %246 = tpu.matmul %245, %229, %cst_187 {dimension_numbers = #tpu.dot_dimension_numbers<[2], [1], [1], [2], [0, 0, 0, 1, 1, 2], [0], [0]>} : vector<1x8x128xbf16>, vector<1x128x64xbf16>, vector<1x8x64xf32> -> vector<1x8x64xf32>
    "tpu.trace_stop"() : () -> ()
    %247 = arith.truncf %246 : vector<1x8x64xf32> to vector<1x8x64xbf16>
    %c0_188 = arith.constant 0 : index
    %c0_189 = arith.constant 0 : index
    %c576_190 = arith.constant 576 : index
    %248 = vector.load %arg10[%c0_188, %c0_189, %c576_190] : memref<1x8x768xbf16, #tpu.memory_space<vmem>>, vector<1x8x64xbf16>
    tpu.vector_store %arg10[%c0_188, %c0_189, %c576_190], %247 {strides = array<i32>} : memref<1x8x768xbf16, #tpu.memory_space<vmem>>, vector<1x8x64xbf16>,
    %c0_191 = arith.constant 0 : index
    %c0_192 = arith.constant 0 : index
    %c640 = arith.constant 640 : index
    %249 = vector.load %arg8[%c0_191, %c0_192, %c640] : memref<1x8x768xbf16, #tpu.memory_space<vmem>>, vector<1x8x64xbf16>
    %c0_193 = arith.constant 0 : index
    %c0_194 = arith.constant 0 : index
    %c640_195 = arith.constant 640 : index
    %250 = vector.load %arg9[%c0_193, %c0_194, %c640_195] : memref<1x128x1536xbf16, #tpu.memory_space<vmem>>, vector<1x128x64xbf16>
    %c0_196 = arith.constant 0 : index
    %c0_197 = arith.constant 0 : index
    %c1408 = arith.constant 1408 : index
    %251 = vector.load %arg9[%c0_196, %c0_197, %c1408] : memref<1x128x1536xbf16, #tpu.memory_space<vmem>>, vector<1x128x64xbf16>
    "tpu.trace_start"() <{level = 10 : i32, message = "bqd,bkd->bqk"}> : () -> ()
    %cst_198 = arith.constant dense<0.000000e+00> : vector<1x8x128xf32>
    %252 = tpu.matmul %249, %250, %cst_198 {dimension_numbers = #tpu.dot_dimension_numbers<[2], [2], [1], [1], [0, 0, 0, 1, 1, 1], [0], [0]>} : vector<1x8x64xbf16>, vector<1x128x64xbf16>, vector<1x8x128xf32> -> vector<1x8x128xf32>
    "tpu.trace_stop"() : () -> ()
    %253 = arith.addf %252, %28 : vector<1x8x128xf32>
    %cst_199 = arith.constant dense<0xFF800000> : vector<1x8xf32>
    %254 = vector.multi_reduction <maximumf>, %253, %cst_199 [2] : vector<1x8x128xf32> to vector<1x8xf32>
    %255 = vector.shape_cast %254 : vector<1x8xf32> to vector<1x8x1xf32>
    %256 = vector.broadcast %255 : vector<1x8x1xf32> to vector<1x8x128xf32>
    %257 = arith.subf %253, %256 : vector<1x8x128xf32>
    %258 = math.exp %257 : vector<1x8x128xf32>
    %cst_200 = arith.constant dense<0.000000e+00> : vector<1x8xf32>
    %259 = vector.multi_reduction <add>, %258, %cst_200 [2] : vector<1x8x128xf32> to vector<1x8xf32>
    %260 = vector.shape_cast %259 : vector<1x8xf32> to vector<1x8x1xf32>
    %261 = tpu.reciprocal %260 {approx = true} : vector<1x8x1xf32> -> vector<1x8x1xf32>
    %262 = vector.broadcast %261 : vector<1x8x1xf32> to vector<1x8x128xf32>
    %263 = arith.mulf %258, %262 : vector<1x8x128xf32>
    %c0_201 = arith.constant 0 : index
    %c10 = arith.constant 10 : index
    %c0_202 = arith.constant 0 : index
    %c0_203 = arith.constant 0 : index
    %264 = vector.load %arg7[%c0_201, %c10, %c0_202, %c0_203] : memref<1x12x8x128xf32, #tpu.memory_space<vmem>>, vector<1x1x8x128xf32>
    %265 = vector.shape_cast %264 : vector<1x1x8x128xf32> to vector<1x8x128xf32>
    %266 = vector.shape_cast %263 : vector<1x8x128xf32> to vector<1x1x8x128xf32>
    tpu.vector_store %arg7[%c0_201, %c10, %c0_202, %c0_203], %266 {strides = array<i32>} : memref<1x12x8x128xf32, #tpu.memory_space<vmem>>, vector<1x1x8x128xf32>,
    %267 = arith.truncf %263 : vector<1x8x128xf32> to vector<1x8x128xbf16>
    "tpu.trace_start"() <{level = 10 : i32, message = "bqk,bkd->bqd"}> : () -> ()
    %cst_204 = arith.constant dense<0.000000e+00> : vector<1x8x64xf32>
    %268 = tpu.matmul %267, %251, %cst_204 {dimension_numbers = #tpu.dot_dimension_numbers<[2], [1], [1], [2], [0, 0, 0, 1, 1, 2], [0], [0]>} : vector<1x8x128xbf16>, vector<1x128x64xbf16>, vector<1x8x64xf32> -> vector<1x8x64xf32>
    "tpu.trace_stop"() : () -> ()
    %269 = arith.truncf %268 : vector<1x8x64xf32> to vector<1x8x64xbf16>
    %c0_205 = arith.constant 0 : index
    %c0_206 = arith.constant 0 : index
    %c640_207 = arith.constant 640 : index
    %270 = vector.load %arg10[%c0_205, %c0_206, %c640_207] : memref<1x8x768xbf16, #tpu.memory_space<vmem>>, vector<1x8x64xbf16>
    tpu.vector_store %arg10[%c0_205, %c0_206, %c640_207], %269 {strides = array<i32>} : memref<1x8x768xbf16, #tpu.memory_space<vmem>>, vector<1x8x64xbf16>,
    %c0_208 = arith.constant 0 : index
    %c0_209 = arith.constant 0 : index
    %c704 = arith.constant 704 : index
    %271 = vector.load %arg8[%c0_208, %c0_209, %c704] : memref<1x8x768xbf16, #tpu.memory_space<vmem>>, vector<1x8x64xbf16>
    %c0_210 = arith.constant 0 : index
    %c0_211 = arith.constant 0 : index
    %c704_212 = arith.constant 704 : index
    %272 = vector.load %arg9[%c0_210, %c0_211, %c704_212] : memref<1x128x1536xbf16, #tpu.memory_space<vmem>>, vector<1x128x64xbf16>
    %c0_213 = arith.constant 0 : index
    %c0_214 = arith.constant 0 : index
    %c1472 = arith.constant 1472 : index
    %273 = vector.load %arg9[%c0_213, %c0_214, %c1472] : memref<1x128x1536xbf16, #tpu.memory_space<vmem>>, vector<1x128x64xbf16>
    "tpu.trace_start"() <{level = 10 : i32, message = "bqd,bkd->bqk"}> : () -> ()
    %cst_215 = arith.constant dense<0.000000e+00> : vector<1x8x128xf32>
    %274 = tpu.matmul %271, %272, %cst_215 {dimension_numbers = #tpu.dot_dimension_numbers<[2], [2], [1], [1], [0, 0, 0, 1, 1, 1], [0], [0]>} : vector<1x8x64xbf16>, vector<1x128x64xbf16>, vector<1x8x128xf32> -> vector<1x8x128xf32>
    "tpu.trace_stop"() : () -> ()
    %275 = arith.addf %274, %28 : vector<1x8x128xf32>
    %cst_216 = arith.constant dense<0xFF800000> : vector<1x8xf32>
    %276 = vector.multi_reduction <maximumf>, %275, %cst_216 [2] : vector<1x8x128xf32> to vector<1x8xf32>
    %277 = vector.shape_cast %276 : vector<1x8xf32> to vector<1x8x1xf32>
    %278 = vector.broadcast %277 : vector<1x8x1xf32> to vector<1x8x128xf32>
    %279 = arith.subf %275, %278 : vector<1x8x128xf32>
    %280 = math.exp %279 : vector<1x8x128xf32>
    %cst_217 = arith.constant dense<0.000000e+00> : vector<1x8xf32>
    %281 = vector.multi_reduction <add>, %280, %cst_217 [2] : vector<1x8x128xf32> to vector<1x8xf32>
    %282 = vector.shape_cast %281 : vector<1x8xf32> to vector<1x8x1xf32>
    %283 = tpu.reciprocal %282 {approx = true} : vector<1x8x1xf32> -> vector<1x8x1xf32>
    %284 = vector.broadcast %283 : vector<1x8x1xf32> to vector<1x8x128xf32>
    %285 = arith.mulf %280, %284 : vector<1x8x128xf32>
    %c0_218 = arith.constant 0 : index
    %c11 = arith.constant 11 : index
    %c0_219 = arith.constant 0 : index
    %c0_220 = arith.constant 0 : index
    %286 = vector.load %arg7[%c0_218, %c11, %c0_219, %c0_220] : memref<1x12x8x128xf32, #tpu.memory_space<vmem>>, vector<1x1x8x128xf32>
    %287 = vector.shape_cast %286 : vector<1x1x8x128xf32> to vector<1x8x128xf32>
    %288 = vector.shape_cast %285 : vector<1x8x128xf32> to vector<1x1x8x128xf32>
    tpu.vector_store %arg7[%c0_218, %c11, %c0_219, %c0_220], %288 {strides = array<i32>} : memref<1x12x8x128xf32, #tpu.memory_space<vmem>>, vector<1x1x8x128xf32>,
    %289 = arith.truncf %285 : vector<1x8x128xf32> to vector<1x8x128xbf16>
    "tpu.trace_start"() <{level = 10 : i32, message = "bqk,bkd->bqd"}> : () -> ()
    %cst_221 = arith.constant dense<0.000000e+00> : vector<1x8x64xf32>
    %290 = tpu.matmul %289, %273, %cst_221 {dimension_numbers = #tpu.dot_dimension_numbers<[2], [1], [1], [2], [0, 0, 0, 1, 1, 2], [0], [0]>} : vector<1x8x128xbf16>, vector<1x128x64xbf16>, vector<1x8x64xf32> -> vector<1x8x64xf32>
    "tpu.trace_stop"() : () -> ()
    %291 = arith.truncf %290 : vector<1x8x64xf32> to vector<1x8x64xbf16>
    %c0_222 = arith.constant 0 : index
    %c0_223 = arith.constant 0 : index
    %c704_224 = arith.constant 704 : index
    %292 = vector.load %arg10[%c0_222, %c0_223, %c704_224] : memref<1x8x768xbf16, #tpu.memory_space<vmem>>, vector<1x8x64xbf16>
    tpu.vector_store %arg10[%c0_222, %c0_223, %c704_224], %291 {strides = array<i32>} : memref<1x8x768xbf16, #tpu.memory_space<vmem>>, vector<1x8x64xbf16>,
    %c0_225 = arith.constant 0 : index
    %c0_226 = arith.constant 0 : index
    %c0_227 = arith.constant 0 : index
    %293 = vector.load %arg10[%c0_225, %c0_226, %c0_227] : memref<1x8x768xbf16, #tpu.memory_space<vmem>>, vector<1x8x768xbf16>
    %294 = vector.shape_cast %293 : vector<1x8x768xbf16> to vector<8x768xbf16>
    %c0_228 = arith.constant 0 : index
    %c0_229 = arith.constant 0 : index
    %295 = vector.load %arg4[%c0_228, %c0_229] : memref<768x768xbf16, #tpu.memory_space<vmem>>, vector<768x768xbf16>
    %cst_230 = arith.constant dense<0.000000e+00> : vector<8x768xf32>
    %296 = tpu.matmul %294, %295, %cst_230 {dimension_numbers = #tpu.dot_dimension_numbers<[1], [0], [0], [1], [0, 0, 1, 1], [], []>} : vector<8x768xbf16>, vector<768x768xbf16>, vector<8x768xf32> -> vector<8x768xf32>
    %c0_231 = arith.constant 0 : index
    %c0_232 = arith.constant 0 : index
    %297 = vector.load %arg5[%c0_231, %c0_232] : memref<1x768xf32, #tpu.memory_space<vmem>>, vector<1x768xf32>
    %298 = vector.broadcast %297 : vector<1x768xf32> to vector<8x768xf32>
    %299 = arith.addf %296, %298 : vector<8x768xf32>
    %300 = vector.shape_cast %299 : vector<8x768xf32> to vector<1x8x768xf32>
    %c0_233 = arith.constant 0 : index
    %c0_234 = arith.constant 0 : index
    %c0_235 = arith.constant 0 : index
    %301 = vector.load %arg6[%c0_233, %c0_234, %c0_235] : memref<1x8x768xf32, #tpu.memory_space<vmem>>, vector<1x8x768xf32>
    tpu.vector_store %arg6[%c0_233, %c0_234, %c0_235], %300 {strides = array<i32>} : memref<1x8x768xf32, #tpu.memory_space<vmem>>, vector<1x8x768xf32>,
    return
  }
  func.func @transform_0(%arg0: i32) -> (i32, i32, i32) {
    %c0_i32 = arith.constant 0 : i32
    %c0_i32_0 = arith.constant 0 : i32
    %c0_i32_1 = arith.constant 0 : i32
    return %arg0, %c0_i32, %c0_i32_0 : i32, i32, i32
  }
  func.func @transform_1(%arg0: i32) -> (i32, i32) {
    %c0_i32 = arith.constant 0 : i32
    %c0_i32_0 = arith.constant 0 : i32
    %c0_i32_1 = arith.constant 0 : i32
    return %c0_i32, %c0_i32_0 : i32, i32
  }
  func.func @transform_2(%arg0: i32) -> (i32, i32) {
    %c0_i32 = arith.constant 0 : i32
    %c0_i32_0 = arith.constant 0 : i32
    %c0_i32_1 = arith.constant 0 : i32
    return %c0_i32, %c0_i32_0 : i32, i32
  }
  func.func @transform_3(%arg0: i32) -> (i32, i32) {
    %c0_i32 = arith.constant 0 : i32
    %c0_i32_0 = arith.constant 0 : i32
    %c0_i32_1 = arith.constant 0 : i32
    return %c0_i32, %c0_i32_0 : i32, i32
  }
  func.func @transform_4(%arg0: i32) -> (i32, i32) {
    %c0_i32 = arith.constant 0 : i32
    %c0_i32_0 = arith.constant 0 : i32
    %c0_i32_1 = arith.constant 0 : i32
    return %c0_i32, %c0_i32_0 : i32, i32
  }
  func.func @transform_5(%arg0: i32) -> (i32, i32, i32) {
    %c0_i32 = arith.constant 0 : i32
    %c0_i32_0 = arith.constant 0 : i32
    %c0_i32_1 = arith.constant 0 : i32
    return %arg0, %c0_i32, %c0_i32_0 : i32, i32, i32
  }
  func.func @transform_6(%arg0: i32) -> (i32, i32, i32, i32) {
    %c0_i32 = arith.constant 0 : i32
    %c0_i32_0 = arith.constant 0 : i32
    %c0_i32_1 = arith.constant 0 : i32
    %c0_i32_2 = arith.constant 0 : i32
    return %arg0, %c0_i32, %c0_i32_0, %c0_i32_1 : i32, i32, i32, i32
  }
}

</mosaic_0001>

<bundles_post_ra>
// kernel: attention_forward.1
= control target key start
LH: loop header
LB: loop body
LE: loop exit
PB: predicated region body
PF: predicated region fallthrough
CT: control target
= control target key end

     0   :  { %12 = vsyncpa [#allocation6], 0  ;;  %s22529_s0 = inlined_call_operand.vmem [shape: f32[2,128,768], index: 0, kind: input, shape index: {}]   ;;  %s22530_s1 = inlined_call_operand.vmem [shape: bf16[768,2304], index: 1, kind: input, shape index: {}]   ;;  %s22531_s2 = inlined_call_operand.vmem [shape: f32[1,2304], index: 2, kind: input, shape index: {}]   ;;  %s22532_s3 = inlined_call_operand.vmem [shape: bf16[768,768], index: 3, kind: input, shape index: {}]   ;;  %s22533_s4 = inlined_call_operand.vmem [shape: f32[1,768], index: 4, kind: input, shape index: {}]   ;;  %s22534_s5 = inlined_call_operand.hbm [shape: f32[2,8,768], index: 5, kind: output, shape index: {0}]   ;;  %s22535_s6 = inlined_call_operand.vmem [shape: f32[2,12,8,128], index: 6, kind: output, shape index: {1}]  }
   0x1   :  { %14 = vsyncpa [#allocation6 + $0x1], 0  ;;  %s17126_s21 = smov 0   ;;  %s17128_s22 = smov 0  }
   0x2   :  { %s17130_s23 = smov 0   ;;  %s17132_s24 = smov 0  }
   0x3 LB: > { %s17147_s25 = sadd.s32 4294967295, %s17084_s24   ;;  %s12640_s26 = sadd.s32 4294967294, %s17084_s24   ;;  %s17084_s24 = sphi %s17132_s24, %s22773_s24   ;;  %s17080_s23 = sphi %s17130_s23, %s22772_s23   ;;  %s17076_s22 = sphi %s17128_s22, %s22771_s22   ;;  %s17072_s21 = sphi %s17126_s21, %s22770_s21  }
   0x4   : > { %s17151_s27 = sadd.s32 1, %s17084_s24   ;;  %s137_s28 = sadd.s32 1, %s17080_s23 }
   0x5   : > { %s134_s29 = ssub.s32 %s17084_s24, %s17151_s27  ;;  %p147_p0 = scmp.ne.s32.totalorder %s17080_s23, %s17076_s22 }
   0x6   : > { %p135_p1 = scmp.eq.s32.totalorder %s134_s29, 0  ;;  %p148_p2 = scmp.eq.s32.totalorder %s17147_s25, 1 }
   0x7   : > { %p153_p3 = scmp.ne.s32.totalorder %s17076_s22, %s17072_s21  ;;  %p154_p4 = scmp.eq.s32.totalorder %s12640_s26, 1 }
   0x8   : > { %s17162_s30 = scalar_select %p135_p1, %s17080_s23, %s137_s28  }
   0x9   : > { %p17164_p5 = por %p148_p2, %p147_p0  ;;  %p17168_p6 = por %p154_p4, %p153_p3 }
   0xa   : > { %p12643_p7 = scmp.ge.s32.totalorder %s17084_s24, 1  ;;  %p218_p8 = scmp.lt.s32.totalorder %s17084_s24, 3 }
   0xc   : > { %p219_p9 = pnand %p12643_p7, %p218_p8 }
   0xe   : > { %222 = sbr.rel (%p219_p9) target bundleno = 7647 (0x1ddf), region = 40 }
  0x15   : > { %v15231_v0 = vld [vmem:[%s22530_s1 + $0x4] ss:$72 sps:$4 sm:$0xff]   ;;  %v15235_v2 = vld [vmem:[%s22530_s1] ss:$72 sps:$4 sm:$0xff]   ;;  %v15237_v4 = vld [vmem:[%s22530_s1 + $0x94] ss:$72 sps:$4 sm:$0xff]  }
  0x16   : > { %v15233_v1 = vld [vmem:[%s22530_s1 + $0x904] ss:$72 sps:$4 sm:$0xff]   ;;  %2168 = vmatprep.subr.bf16.mxu1 %v15231_v0  ;;  %v15236_v3 = vld [vmem:[%s22530_s1 + $0x900] ss:$72 sps:$4 sm:$0xff]   ;;  %v15239_v5 = vld [vmem:[%s22530_s1 + $0x994] ss:$72 sps:$4 sm:$0xff]  }
  0x17   : > { %2209 = vmatprep.subr.bf16.mxu0 %v15233_v1  ;;  %2169 = vmatpush1.bf16.msra.mxu1 %v15235_v2  ;;  %v15241_v6 = vld [vmem:[%s22530_s1 + $0x90] ss:$72 sps:$4 sm:$0xff]   ;;  %v15243_v8 = vld [vmem:[%s22530_s1 + $0x124] ss:$72 sps:$4 sm:$0xff]   ;;  %v15247_v10 = vld [vmem:[%s22530_s1 + $0x120] ss:$72 sps:$4 sm:$0xff]  }
  0x18   : > { %2210 = vmatpush1.bf16.msra.mxu0 %v15236_v3  ;;  %2170 = vmatprep.subr.bf16.mxu1 %v15237_v4  ;;  %v15242_v7 = vld [vmem:[%s22530_s1 + $0x990] ss:$72 sps:$4 sm:$0xff]   ;;  %v15245_v9 = vld [vmem:[%s22530_s1 + $0xa24] ss:$72 sps:$4 sm:$0xff]   ;;  %v15248_v11 = vld [vmem:[%s22530_s1 + $0xa20] ss:$72 sps:$4 sm:$0xff]  }
  0x19   : > { %2211 = vmatprep.subr.bf16.mxu0 %v15239_v5  ;;  %v15249_v12 = vld [vmem:[%s22530_s1 + $0x1b4] ss:$72 sps:$4 sm:$0xff]   ;;  %v15253_v14 = vld [vmem:[%s22530_s1 + $0x1b0] ss:$72 sps:$4 sm:$0xff]   ;;  %v15255_v16 = vld [vmem:[%s22530_s1 + $0x244] ss:$72 sps:$4 sm:$0xff]  }
  0x1a   : > { %v15251_v13 = vld [vmem:[%s22530_s1 + $0xab4] ss:$72 sps:$4 sm:$0xff]   ;;  %v15254_v15 = vld [vmem:[%s22530_s1 + $0xab0] ss:$72 sps:$4 sm:$0xff]   ;;  %v15257_v17 = vld [vmem:[%s22530_s1 + $0xb44] ss:$72 sps:$4 sm:$0xff]  }
  0x1b   : > { %2171 = vmatpush1.bf16.msra.mxu1 %v15241_v6  ;;  %v15259_v18 = vld [vmem:[%s22530_s1 + $0x240] ss:$72 sps:$4 sm:$0xff]   ;;  %v15261_v20 = vld [vmem:[%s22530_s1 + $0x2d4] ss:$72 sps:$4 sm:$0xff]   ;;  %v15265_v22 = vld [vmem:[%s22530_s1 + $0x2d0] ss:$72 sps:$4 sm:$0xff]  }
  0x1c   : > { %2212 = vmatpush1.bf16.msra.mxu0 %v15242_v7  ;;  %2172 = vmatprep.subr.bf16.mxu1 %v15243_v8  ;;  %v15260_v19 = vld [vmem:[%s22530_s1 + $0xb40] ss:$72 sps:$4 sm:$0xff]   ;;  %v15263_v21 = vld [vmem:[%s22530_s1 + $0xbd4] ss:$72 sps:$4 sm:$0xff]   ;;  %v15266_v23 = vld [vmem:[%s22530_s1 + $0xbd0] ss:$72 sps:$4 sm:$0xff]  }
  0x1d   : > { %2213 = vmatprep.subr.bf16.mxu0 %v15245_v9  ;;  %v15267_v24 = vld [vmem:[%s22530_s1 + $0x364] ss:$72 sps:$4 sm:$0xff]   ;;  %v15271_v26 = vld [vmem:[%s22530_s1 + $0x360] ss:$72 sps:$4 sm:$0xff]   ;;  %v15273_v28 = vld [vmem:[%s22530_s1 + $0x3f4] ss:$72 sps:$4 sm:$0xff]  }
  0x1e   : > { %v15269_v25 = vld [vmem:[%s22530_s1 + $0xc64] ss:$72 sps:$4 sm:$0xff]   ;;  %v15272_v27 = vld [vmem:[%s22530_s1 + $0xc60] ss:$72 sps:$4 sm:$0xff]   ;;  %v15275_v29 = vld [vmem:[%s22530_s1 + $0xcf4] ss:$72 sps:$4 sm:$0xff]  }
  0x1f   : > { %2173 = vmatpush1.bf16.msra.mxu1 %v15247_v10  ;;  %v15277_v30 = vld [vmem:[%s22530_s1 + $0x3f0] ss:$72 sps:$4 sm:$0xff]   ;;  %p253_p10 = scmp.lt.s32.totalorder %s17147_s25, 1  ;;  %v15279_v32 = vld [vmem:[%s22530_s1 + $0x484] ss:$72 sps:$4 sm:$0xff]   ;;  %s17086_s17 = smov 64  }
  0x20   : > { %2214 = vmatpush1.bf16.msra.mxu0 %v15248_v11  ;;  %2174 = vmatprep.subr.bf16.mxu1 %v15249_v12  ;;  %v15278_v31 = vld [vmem:[%s22530_s1 + $0xcf0] ss:$72 sps:$4 sm:$0xff]   ;;  %v15281_v33 = vld [vmem:[%s22530_s1 + $0xd84] ss:$72 sps:$4 sm:$0xff]   ;;  %v15283_v34 = vld [vmem:[%s22530_s1 + $0x480] ss:$72 sps:$4 sm:$0xff]  }
  0x21   : > { %2215 = vmatprep.subr.bf16.mxu0 %v15251_v13  ;;  %v15284_v35 = vld [vmem:[%s22530_s1 + $0xd80] ss:$72 sps:$4 sm:$0xff]   ;;  %s17284_s26 = scalar_select %p253_p10, %s17147_s25, 1  ;;  %v15285_v36 = vld [vmem:[%s22530_s1 + $0x514] ss:$72 sps:$4 sm:$0xff]   ;;  %vm8331_vm0 = vcmask 523264  }
  0x22   : > { %v15287_v37 = vld [vmem:[%s22530_s1 + $0xe14] ss:$72 sps:$4 sm:$0xff]   ;;  %v15289_v38 = vld [vmem:[%s22530_s1 + $0x510] ss:$72 sps:$4 sm:$0xff]   ;;  %v15291_v40 = vld [vmem:[%s22530_s1 + $0x5a4] ss:$72 sps:$4 sm:$0xff]  }
  0x23   : > { %2175 = vmatpush1.bf16.msra.mxu1 %v15253_v14  ;;  %s15185_s13 = smul.u32 768, %s17284_s26  ;;  %v15290_v39 = vld [vmem:[%s22530_s1 + $0xe10] ss:$72 sps:$4 sm:$0xff]   ;;  %v15293_v41 = vld [vmem:[%s22530_s1 + $0xea4] ss:$72 sps:$4 sm:$0xff]   ;;  %vm17088_vm1 = vmmov 0  }
  0x24   : > { %2216 = vmatpush1.bf16.msra.mxu0 %v15254_v15  ;;  %2176 = vmatprep.subr.bf16.mxu1 %v15255_v16  ;;  %v15295_v42 = vld [vmem:[%s22530_s1 + $0x5a0] ss:$72 sps:$4 sm:$0xff]   ;;  %v15297_v44 = vld [vmem:[%s22530_s1 + $0x634] ss:$72 sps:$4 sm:$0xff]   ;;  %v15301_v47 = vld [vmem:[%s22530_s1 + $0x630] ss:$72 sps:$4 sm:$0xff]  }
  0x25   : > { %2217 = vmatprep.subr.bf16.mxu0 %v15257_v17  ;;  %v15296_v43 = vld [vmem:[%s22530_s1 + $0xea0] ss:$72 sps:$4 sm:$0xff]   ;;  %s17314_s12 = scalar_lea.vmem %s22529_s0, %s15185_s13  ;;  %v15299_v45 = vld [vmem:[%s22530_s1 + $0xf34] ss:$72 sps:$4 sm:$0xff]   ;;  %v15302_v48 = vld [vmem:[%s22530_s1 + $0xf30] ss:$72 sps:$4 sm:$0xff]  }
  0x26   : > { %v265_v46 = vld [vmem:[%s17314_s12 + $0x8] sm:$0xff]  ;;  %v271_v49 = vld [vmem:[%s17314_s12 + $0x38] sm:$0xff]  ;;  %v264_v6 = vld [vmem:[%s17314_s12] sm:$0xff]  ;;  %s15186_s18 = smul.u32 96, %s17284_s26  ;;  %vm8451_vm3 = vcmask 519168   ;;  %vm8657_vm4 = vcmask 1043968  }
  0x27   : > { %2177 = vmatpush1.bf16.msra.mxu1 %v15259_v18  ;;  %v17330_v50 = vpack.c.bf16 %v271_v49, %v265_v46  ;;  %v267_v51 = vld [vmem:[%s17314_s12 + $0x18] sm:$0xff]  ;;  %v273_v52 = vld [vmem:[%s17314_s12 + $0x48] sm:$0xff]  ;;  %v270_v7 = vld [vmem:[%s17314_s12 + $0x30] sm:$0xff]  ;;  %s243_s15 = sand.u32 1, %s17076_s22   ;;  %s15187_s19 = smul.u32 768, %s17147_s25 }
  0x28   : > { %2218 = vmatpush1.bf16.msra.mxu0 %v15260_v19  ;;  %2178 = vmatprep.subr.bf16.mxu1 %v15261_v20  ;;  %v15303_v53 = vld [vmem:[%s22530_s1 + $0x6c4] ss:$72 sps:$4 sm:$0xff]   ;;  %v17340_v55 = vpack.c.bf16 %v273_v52, %v267_v51  ;;  %v15307_v56 = vld [vmem:[%s22530_s1 + $0x6c0] ss:$72 sps:$4 sm:$0xff]   ;;  %v15309_v58 = vld [vmem:[%s22530_s1 + $0x754] ss:$72 sps:$4 sm:$0xff]   ;;  %v17396_v12 = vpack.c.bf16 %v270_v7, %v264_v6  ;;  %s20904_s20 = scalar_lea.vmem %s22535_s6, %s15186_s18 }
  0x29   : > { %2219 = vmatprep.subr.bf16.mxu0 %v15263_v21  ;;  %v15305_v54 = vld [vmem:[%s22530_s1 + $0xfc4] ss:$72 sps:$4 sm:$0xff]   ;;  %2200 = vmatprep.mubr.bf16.mxu1 %v17330_v50  ;;  %v15308_v57 = vld [vmem:[%s22530_s1 + $0xfc0] ss:$72 sps:$4 sm:$0xff]   ;;  %v15311_v59 = vld [vmem:[%s22530_s1 + $0x1054] ss:$72 sps:$4 sm:$0xff]  }
  0x2a   : > { %2241 = vmatprep.mubr.bf16.mxu0 %v17340_v55  ;;  %v15313_v60 = vld [vmem:[%s22530_s1 + $0x750] ss:$72 sps:$4 sm:$0xff]   ;;  %v15315_v62 = vld [vmem:[%s22530_s1 + $0x7e4] ss:$72 sps:$4 sm:$0xff]   ;;  %v15319_v0 = vld [vmem:[%s22530_s1 + $0x7e0] ss:$72 sps:$4 sm:$0xff]  }
  0x2b   : > { %2179 = vmatpush1.bf16.msra.mxu1 %v15265_v22  ;;  %v15314_v61 = vld [vmem:[%s22530_s1 + $0x1050] ss:$72 sps:$4 sm:$0xff]   ;;  %v15317_v63 = vld [vmem:[%s22530_s1 + $0x10e4] ss:$72 sps:$4 sm:$0xff]   ;;  %v15320_v1 = vld [vmem:[%s22530_s1 + $0x10e0] ss:$72 sps:$4 sm:$0xff]  }
  0x2c   : > { %2220 = vmatpush1.bf16.msra.mxu0 %v15266_v23  ;;  %2180 = vmatprep.subr.bf16.mxu1 %v15267_v24  ;;  %v15321_v2 = vld [vmem:[%s22530_s1 + $0x874] ss:$72 sps:$4 sm:$0xff]   ;;  %v15325_v4 = vld [vmem:[%s22530_s1 + $0x870] ss:$72 sps:$4 sm:$0xff]   ;;  %v15329_v8 = vld [vmem:[%s22530_s1 + $0x1204] ss:$72 sps:$4 sm:$0xff]  }
  0x2d   : > { %2221 = vmatprep.subr.bf16.mxu0 %v15269_v25  ;;  %v15323_v3 = vld [vmem:[%s22530_s1 + $0x1174] ss:$72 sps:$4 sm:$0xff]   ;;  %v15326_v5 = vld [vmem:[%s22530_s1 + $0x1170] ss:$72 sps:$4 sm:$0xff]   ;;  %v272_v10 = vld [vmem:[%s17314_s12 + $0x40] sm:$0xff]  ;;  %s12534_s25 = scalar_lea.sflag [#allocation6], %s243_s15 }
  0x2e   : > { %v266_v9 = vld [vmem:[%s17314_s12 + $0x10] sm:$0xff]  ;;  %v15327_v13 = vld [vmem:[%s22530_s1 + $0x1200] ss:$72 sps:$4 sm:$0xff]   ;;  %v15338_v17 = vld [vmem:[%s22530_s1 + $0x9c] ss:$72 sps:$4 sm:$0xff]   ;;  %s17090_s9 = smov [#allocation5]  }
  0x2f   : > { %2181 = vmatpush1.bf16.msra.mxu1 %v15271_v26  ;;  %v15332_v11 = vld [vmem:[%s22530_s1 + $0xc] ss:$72 sps:$4 sm:$0xff]   ;;  %v15330_v14 = vld [vmem:[%s22530_s1 + $0x8] ss:$72 sps:$4 sm:$0xff]   ;;  %v17404_v15 = vpack.c.bf16 %v272_v10, %v266_v9  ;;  %v15336_v19 = vld [vmem:[%s22530_s1 + $0x98] ss:$72 sps:$4 sm:$0xff]  }
  0x30   : > { %2222 = vmatpush1.bf16.msra.mxu0 %v15272_v27  ;;  %2182 = vmatprep.subr.bf16.mxu1 %v15273_v28  ;;  %v15335_v16 = vld [vmem:[%s22530_s1 + $0x1294] ss:$72 sps:$4 sm:$0xff]   ;;  %v15333_v18 = vld [vmem:[%s22530_s1 + $0x1290] ss:$72 sps:$4 sm:$0xff]   ;;  %v15341_v20 = vld [vmem:[%s22530_s1 + $0x1324] ss:$72 sps:$4 sm:$0xff]  }
  0x31   : > { %2223 = vmatprep.subr.bf16.mxu0 %v15275_v29  ;;  %v15344_v21 = vld [vmem:[%s22530_s1 + $0x12c] ss:$72 sps:$4 sm:$0xff]   ;;  %v15339_v22 = vld [vmem:[%s22530_s1 + $0x1320] ss:$72 sps:$4 sm:$0xff]   ;;  %v15350_v25 = vld [vmem:[%s22530_s1 + $0x1bc] ss:$72 sps:$4 sm:$0xff]  }
  0x32   : > { %v15342_v23 = vld [vmem:[%s22530_s1 + $0x128] ss:$72 sps:$4 sm:$0xff]   ;;  %v15347_v24 = vld [vmem:[%s22530_s1 + $0x13b4] ss:$72 sps:$4 sm:$0xff]   ;;  %v15348_v27 = vld [vmem:[%s22530_s1 + $0x1b8] ss:$72 sps:$4 sm:$0xff]  }
  0x33   : > { %2183 = vmatpush1.bf16.msra.mxu1 %v15277_v30  ;;  %v15345_v26 = vld [vmem:[%s22530_s1 + $0x13b0] ss:$72 sps:$4 sm:$0xff]   ;;  %v15353_v28 = vld [vmem:[%s22530_s1 + $0x1444] ss:$72 sps:$4 sm:$0xff]   ;;  %v15351_v30 = vld [vmem:[%s22530_s1 + $0x1440] ss:$72 sps:$4 sm:$0xff]  }
  0x34   : > { %2224 = vmatpush1.bf16.msra.mxu0 %v15278_v31  ;;  %2184 = vmatprep.subr.bf16.mxu1 %v15279_v32  ;;  %v15356_v29 = vld [vmem:[%s22530_s1 + $0x24c] ss:$72 sps:$4 sm:$0xff]   ;;  %v15354_v31 = vld [vmem:[%s22530_s1 + $0x248] ss:$72 sps:$4 sm:$0xff]   ;;  %v15372_v46 = vld [vmem:[%s22530_s1 + $0x3f8] ss:$72 sps:$4 sm:$0xff]  }
  0x35   : > { %2225 = vmatprep.subr.bf16.mxu0 %v15281_v33  ;;  %v15359_v32 = vld [vmem:[%s22530_s1 + $0x14d4] ss:$72 sps:$4 sm:$0xff]   ;;  %v15375_v49 = vld [vmem:[%s22530_s1 + $0x1680] ss:$72 sps:$4 sm:$0xff]   ;;  %v15405_v7 = vld [vmem:[%s22530_s1 + $0x1950] ss:$72 sps:$4 sm:$0xff]  }
  0x36   : > { %v15362_v33 = vld [vmem:[%s22530_s1 + $0x2dc] ss:$72 sps:$4 sm:$0xff]   ;;  %v15378_v51 = vld [vmem:[%s22530_s1 + $0x488] ss:$72 sps:$4 sm:$0xff]   ;;  %v15416_v10 = vld [vmem:[%s22530_s1 + $0x7ec] ss:$72 sps:$4 sm:$0xff]  }
  0x37   : > { %2185 = vmatpush1.bf16.msra.mxu1 %v15283_v34  ;;  %v15357_v34 = vld [vmem:[%s22530_s1 + $0x14d0] ss:$72 sps:$4 sm:$0xff]   ;;  %v15383_v52 = vld [vmem:[%s22530_s1 + $0x1714] ss:$72 sps:$4 sm:$0xff]   ;;  %v15413_v9 = vld [vmem:[%s22530_s1 + $0x19e4] ss:$72 sps:$4 sm:$0xff]  }
  0x38   : > { %2226 = vmatpush1.bf16.msra.mxu0 %v15284_v35  ;;  %2186 = vmatprep.subr.bf16.mxu1 %v15285_v36  ;;  %v15360_v35 = vld [vmem:[%s22530_s1 + $0x2d8] ss:$72 sps:$4 sm:$0xff]   ;;  %v15365_v36 = vld [vmem:[%s22530_s1 + $0x1564] ss:$72 sps:$4 sm:$0xff]   ;;  %s17026_s10 = sshll.u32 %s17090_s9, 4  ;;  %s17027_s10 = int_to_ptr.vmem [resolvable:$false] %s17026_s10 }
  0x39   : > { %2227 = vmatprep.subr.bf16.mxu0 %v15287_v37  ;;  %v15368_v37 = vld [vmem:[%s22530_s1 + $0x36c] ss:$72 sps:$4 sm:$0xff]   ;;  %v15410_v6 = vld [vmem:[%s22530_s1 + $0x75c] ss:$72 sps:$4 sm:$0xff]   ;;  %s17028_s11 = scalar_lea.vmem %s17027_s10, 1536 }
  0x3b   : > { %2187 = vmatpush1.bf16.msra.mxu1 %v15289_v38  ;;  %v15363_v38 = vld [vmem:[%s22530_s1 + $0x1560] ss:$72 sps:$4 sm:$0xff]  }
  0x3c   : > { %2228 = vmatpush1.bf16.msra.mxu0 %v15290_v39  ;;  %2188 = vmatprep.subr.bf16.mxu1 %v15291_v40  ;;  %v15366_v39 = vld [vmem:[%s22530_s1 + $0x368] ss:$72 sps:$4 sm:$0xff]   ;;  %v15371_v40 = vld [vmem:[%s22530_s1 + $0x15f4] ss:$72 sps:$4 sm:$0xff]  }
  0x3d   : > { %2229 = vmatprep.subr.bf16.mxu0 %v15293_v41  ;;  %v269_v41 = vld [vmem:[%s17314_s12 + $0x28] sm:$0xff] }
  0x3f   : > { %2189 = vmatpush1.bf16.msra.mxu1 %v15295_v42  ;;  %v275_v42 = vld [vmem:[%s17314_s12 + $0x58] sm:$0xff] }
  0x40   : > { %2230 = vmatpush1.bf16.msra.mxu0 %v15296_v43  ;;  %2190 = vmatprep.subr.bf16.mxu1 %v15297_v44  ;;  %v15374_v43 = vld [vmem:[%s22530_s1 + $0x3fc] ss:$72 sps:$4 sm:$0xff]   ;;  %v17489_v44 = vpack.c.bf16 %v275_v42, %v269_v41  ;;  %v15450_v41 = vld [vmem:[%s22530_s1 + $0x250] ss:$72 sps:$4 sm:$0xff]  }
  0x41   : > { %2231 = vmatprep.subr.bf16.mxu0 %v15299_v45  ;;  %v15369_v45 = vld [vmem:[%s22530_s1 + $0x15f0] ss:$72 sps:$4 sm:$0xff]   ;;  %v15455_v42 = vld [vmem:[%s22530_s1 + $0xbdc] ss:$72 sps:$4 sm:$0xff]  }
  0x43   : > { %2191 = vmatpush1.bf16.msra.mxu1 %v15301_v47  ;;  %v15377_v47 = vld [vmem:[%s22530_s1 + $0x1684] ss:$72 sps:$4 sm:$0xff]  }
  0x44   : > { %2232 = vmatpush1.bf16.msra.mxu0 %v15302_v48  ;;  %2192 = vmatprep.subr.bf16.mxu1 %v15303_v53  ;;  %v15380_v48 = vld [vmem:[%s22530_s1 + $0x48c] ss:$72 sps:$4 sm:$0xff]   ;;  %v15386_v53 = vld [vmem:[%s22530_s1 + $0x51c] ss:$72 sps:$4 sm:$0xff]  }
  0x45   : > { %2233 = vmatprep.subr.bf16.mxu0 %v15305_v54  ;;  %v15381_v54 = vld [vmem:[%s22530_s1 + $0x1710] ss:$72 sps:$4 sm:$0xff]  }
  0x47   : > { %2193 = vmatpush1.bf16.msra.mxu1 %v15307_v56  ;;  %v15384_v56 = vld [vmem:[%s22530_s1 + $0x518] ss:$72 sps:$4 sm:$0xff]  }
  0x48   : > { %2234 = vmatpush1.bf16.msra.mxu0 %v15308_v57  ;;  %2194 = vmatprep.subr.bf16.mxu1 %v15309_v58  ;;  %v15389_v57 = vld [vmem:[%s22530_s1 + $0x17a4] ss:$72 sps:$4 sm:$0xff]  }
  0x49   : > { %2235 = vmatprep.subr.bf16.mxu0 %v15311_v59  ;;  %v15392_v58 = vld [vmem:[%s22530_s1 + $0x5ac] ss:$72 sps:$4 sm:$0xff]   ;;  %v15387_v59 = vld [vmem:[%s22530_s1 + $0x17a0] ss:$72 sps:$4 sm:$0xff]  }
  0x4b   : > { %2195 = vmatpush1.bf16.msra.mxu1 %v15313_v60  ;;  %v15390_v60 = vld [vmem:[%s22530_s1 + $0x5a8] ss:$72 sps:$4 sm:$0xff]  }
  0x4c   : > { %2236 = vmatpush1.bf16.msra.mxu0 %v15314_v61  ;;  %2196 = vmatprep.subr.bf16.mxu1 %v15315_v62  ;;  %v15395_v61 = vld [vmem:[%s22530_s1 + $0x1834] ss:$72 sps:$4 sm:$0xff]  }
  0x4d   : > { %2237 = vmatprep.subr.bf16.mxu0 %v15317_v63  ;;  %v15398_v62 = vld [vmem:[%s22530_s1 + $0x63c] ss:$72 sps:$4 sm:$0xff]   ;;  %v15393_v63 = vld [vmem:[%s22530_s1 + $0x1830] ss:$72 sps:$4 sm:$0xff]  }
  0x4f   : > { %2197 = vmatpush1.bf16.msra.mxu1 %v15319_v0  ;;  %v15396_v0 = vld [vmem:[%s22530_s1 + $0x638] ss:$72 sps:$4 sm:$0xff]  }
  0x50   : > { %2238 = vmatpush1.bf16.msra.mxu0 %v15320_v1  ;;  %2198 = vmatprep.subr.bf16.mxu1 %v15321_v2  ;;  %v15401_v1 = vld [vmem:[%s22530_s1 + $0x18c4] ss:$72 sps:$4 sm:$0xff]  }
  0x51   : > { %2239 = vmatprep.subr.bf16.mxu0 %v15323_v3  ;;  %v15404_v2 = vld [vmem:[%s22530_s1 + $0x6cc] ss:$72 sps:$4 sm:$0xff]   ;;  %v15399_v3 = vld [vmem:[%s22530_s1 + $0x18c0] ss:$72 sps:$4 sm:$0xff]  }
  0x53   : > { %2199 = vmatpush1.bf16.msra.mxu1 %v15325_v4  ;;  %v15402_v4 = vld [vmem:[%s22530_s1 + $0x6c8] ss:$72 sps:$4 sm:$0xff]  }
  0x54   : > { %2240 = vmatpush1.bf16.msra.mxu0 %v15326_v5  ;;  %2291 = vmatprep.subr.bf16.mxu1 %v15332_v11  ;;  %v15407_v5 = vld [vmem:[%s22530_s1 + $0x1954] ss:$72 sps:$4 sm:$0xff]   ;;  %v15411_v11 = vld [vmem:[%s22530_s1 + $0x19e0] ss:$72 sps:$4 sm:$0xff]  }
  0x55   : > { %2250 = vmatprep.subr.bf16.mxu0 %v15329_v8  ;;  %v15408_v8 = vld [vmem:[%s22530_s1 + $0x758] ss:$72 sps:$4 sm:$0xff]  }
  0x56   : > { %2201 = vmatmul.mubr.bf16.vlgmr.msra.gmra.mrb[0].mxu1 %v17396_v12 }
  0x57   : > { %2242 = vmatmul.mubr.bf16.vlgmr.msra.gmra.mrb[0].mxu0 %v17404_v15  ;;  %2292 = vmatpush1.bf16.msra.mxu1 %v15330_v14  ;;  %v15419_v14 = vld [vmem:[%s22530_s1 + $0x1a74] ss:$72 sps:$4 sm:$0xff]  }
  0x58   : > { %2251 = vmatpush1.bf16.msra.mxu0 %v15327_v13  ;;  %2293 = vmatprep.subr.bf16.mxu1 %v15338_v17  ;;  %v15414_v13 = vld [vmem:[%s22530_s1 + $0x7e8] ss:$72 sps:$4 sm:$0xff]  }
  0x59   : > { %2252 = vmatprep.subr.bf16.mxu0 %v15335_v16  ;;  %2323 = vmatprep.mubr.bf16.mxu1 %v17330_v50  ;;  %v15422_v16 = vld [vmem:[%s22530_s1 + $0x87c] ss:$72 sps:$4 sm:$0xff]   ;;  %v15417_v17 = vld [vmem:[%s22530_s1 + $0x1a70] ss:$72 sps:$4 sm:$0xff]  }
  0x5a   : > { %2282 = vmatprep.mubr.bf16.mxu0 %v17489_v44 }
  0x5b   : > { %2294 = vmatpush1.bf16.msra.mxu1 %v15336_v19  ;;  %v268_v19 = vld [vmem:[%s17314_s12 + $0x20] sm:$0xff] }
  0x5c   : > { %2253 = vmatpush1.bf16.msra.mxu0 %v15333_v18  ;;  %2295 = vmatprep.subr.bf16.mxu1 %v15344_v21  ;;  %v15420_v18 = vld [vmem:[%s22530_s1 + $0x878] ss:$72 sps:$4 sm:$0xff]   ;;  %v15425_v21 = vld [vmem:[%s22530_s1 + $0x90c] ss:$72 sps:$4 sm:$0xff]  }
  0x5d   : > { %2254 = vmatprep.subr.bf16.mxu0 %v15341_v20  ;;  %v274_v20 = vld [vmem:[%s17314_s12 + $0x50] sm:$0xff] }
  0x5f   : > { %2296 = vmatpush1.bf16.msra.mxu1 %v15342_v23  ;;  %v17602_v23 = vpack.c.bf16 %v274_v20, %v268_v19  ;;  %v15509_v19 = vld [vmem:[%s22530_s1 + $0x10ec] ss:$72 sps:$4 sm:$0xff]  }
  0x60   : > { %2255 = vmatpush1.bf16.msra.mxu0 %v15339_v22  ;;  %2297 = vmatprep.subr.bf16.mxu1 %v15350_v25  ;;  %v15428_v22 = vld [vmem:[%s22530_s1 + $0x14] ss:$72 sps:$4 sm:$0xff]   ;;  %v15426_v25 = vld [vmem:[%s22530_s1 + $0x10] ss:$72 sps:$4 sm:$0xff]  }
  0x61   : > { %2256 = vmatprep.subr.bf16.mxu0 %v15347_v24  ;;  %v15423_v24 = vld [vmem:[%s22530_s1 + $0x908] ss:$72 sps:$4 sm:$0xff]   ;;  %v15512_v20 = vld [vmem:[%s22530_s1 + $0x7f4] ss:$72 sps:$4 sm:$0xff]  }
  0x63   : > { %2298 = vmatpush1.bf16.msra.mxu1 %v15348_v27  ;;  %v15434_v27 = vld [vmem:[%s22530_s1 + $0xa4] ss:$72 sps:$4 sm:$0xff]  }
  0x64   : > { %2257 = vmatpush1.bf16.msra.mxu0 %v15345_v26  ;;  %2299 = vmatprep.subr.bf16.mxu1 %v15356_v29  ;;  %v15431_v26 = vld [vmem:[%s22530_s1 + $0x99c] ss:$72 sps:$4 sm:$0xff]   ;;  %v15432_v29 = vld [vmem:[%s22530_s1 + $0xa0] ss:$72 sps:$4 sm:$0xff]  }
  0x65   : > { %2258 = vmatprep.subr.bf16.mxu0 %v15353_v28  ;;  %v15429_v28 = vld [vmem:[%s22530_s1 + $0x998] ss:$72 sps:$4 sm:$0xff]  }
  0x67   : > { %2300 = vmatpush1.bf16.msra.mxu1 %v15354_v31  ;;  %v15440_v31 = vld [vmem:[%s22530_s1 + $0x134] ss:$72 sps:$4 sm:$0xff]  }
  0x68   : > { %2259 = vmatpush1.bf16.msra.mxu0 %v15351_v30  ;;  %2301 = vmatprep.subr.bf16.mxu1 %v15362_v33  ;;  %v15437_v30 = vld [vmem:[%s22530_s1 + $0xa2c] ss:$72 sps:$4 sm:$0xff]   ;;  %v15438_v33 = vld [vmem:[%s22530_s1 + $0x130] ss:$72 sps:$4 sm:$0xff]  }
  0x69   : > { %2260 = vmatprep.subr.bf16.mxu0 %v15359_v32  ;;  %v15435_v32 = vld [vmem:[%s22530_s1 + $0xa28] ss:$72 sps:$4 sm:$0xff]  }
  0x6b   : > { %2302 = vmatpush1.bf16.msra.mxu1 %v15360_v35  ;;  %v15446_v35 = vld [vmem:[%s22530_s1 + $0x1c4] ss:$72 sps:$4 sm:$0xff]  }
  0x6c   : > { %2261 = vmatpush1.bf16.msra.mxu0 %v15357_v34  ;;  %2303 = vmatprep.subr.bf16.mxu1 %v15368_v37  ;;  %v15443_v34 = vld [vmem:[%s22530_s1 + $0xabc] ss:$72 sps:$4 sm:$0xff]   ;;  %v15444_v37 = vld [vmem:[%s22530_s1 + $0x1c0] ss:$72 sps:$4 sm:$0xff]  }
  0x6d   : > { %2262 = vmatprep.subr.bf16.mxu0 %v15365_v36  ;;  %v15441_v36 = vld [vmem:[%s22530_s1 + $0xab8] ss:$72 sps:$4 sm:$0xff]  }
  0x6f   : > { %2304 = vmatpush1.bf16.msra.mxu1 %v15366_v39  ;;  %v15452_v39 = vld [vmem:[%s22530_s1 + $0x254] ss:$72 sps:$4 sm:$0xff]  }
  0x70   : > { %2263 = vmatpush1.bf16.msra.mxu0 %v15363_v38  ;;  %2305 = vmatprep.subr.bf16.mxu1 %v15374_v43  ;;  %v15449_v38 = vld [vmem:[%s22530_s1 + $0xb4c] ss:$72 sps:$4 sm:$0xff]  }
  0x71   : > { %2264 = vmatprep.subr.bf16.mxu0 %v15371_v40  ;;  %v15447_v40 = vld [vmem:[%s22530_s1 + $0xb48] ss:$72 sps:$4 sm:$0xff]   ;;  %v15458_v43 = vld [vmem:[%s22530_s1 + $0x2e4] ss:$72 sps:$4 sm:$0xff]  }
  0x73   : > { %2306 = vmatpush1.bf16.msra.mxu1 %v15372_v46  ;;  %v15456_v46 = vld [vmem:[%s22530_s1 + $0x2e0] ss:$72 sps:$4 sm:$0xff]  }
  0x74   : > { %2265 = vmatpush1.bf16.msra.mxu0 %v15369_v45  ;;  %2307 = vmatprep.subr.bf16.mxu1 %v15380_v48  ;;  %v15453_v45 = vld [vmem:[%s22530_s1 + $0xbd8] ss:$72 sps:$4 sm:$0xff]   ;;  %v15464_v48 = vld [vmem:[%s22530_s1 + $0x374] ss:$72 sps:$4 sm:$0xff]  }
  0x75   : > { %2266 = vmatprep.subr.bf16.mxu0 %v15377_v47  ;;  %v15461_v47 = vld [vmem:[%s22530_s1 + $0xc6c] ss:$72 sps:$4 sm:$0xff]  }
  0x77   : > { %2308 = vmatpush1.bf16.msra.mxu1 %v15378_v51  ;;  %v15462_v51 = vld [vmem:[%s22530_s1 + $0x370] ss:$72 sps:$4 sm:$0xff]  }
  0x78   : > { %2267 = vmatpush1.bf16.msra.mxu0 %v15375_v49  ;;  %2309 = vmatprep.subr.bf16.mxu1 %v15386_v53  ;;  %v15459_v49 = vld [vmem:[%s22530_s1 + $0xc68] ss:$72 sps:$4 sm:$0xff]   ;;  %v15470_v53 = vld [vmem:[%s22530_s1 + $0x404] ss:$72 sps:$4 sm:$0xff]  }
  0x79   : > { %2268 = vmatprep.subr.bf16.mxu0 %v15383_v52  ;;  %v15467_v52 = vld [vmem:[%s22530_s1 + $0xcfc] ss:$72 sps:$4 sm:$0xff]  }
  0x7b   : > { %2310 = vmatpush1.bf16.msra.mxu1 %v15384_v56  ;;  %v15468_v56 = vld [vmem:[%s22530_s1 + $0x400] ss:$72 sps:$4 sm:$0xff]  }
  0x7c   : > { %2269 = vmatpush1.bf16.msra.mxu0 %v15381_v54  ;;  %2311 = vmatprep.subr.bf16.mxu1 %v15392_v58  ;;  %v15465_v54 = vld [vmem:[%s22530_s1 + $0xcf8] ss:$72 sps:$4 sm:$0xff]   ;;  %v15476_v58 = vld [vmem:[%s22530_s1 + $0x494] ss:$72 sps:$4 sm:$0xff]  }
  0x7d   : > { %2270 = vmatprep.subr.bf16.mxu0 %v15389_v57  ;;  %v15473_v57 = vld [vmem:[%s22530_s1 + $0xd8c] ss:$72 sps:$4 sm:$0xff]  }
  0x7f   : > { %2312 = vmatpush1.bf16.msra.mxu1 %v15390_v60  ;;  %v15474_v60 = vld [vmem:[%s22530_s1 + $0x490] ss:$72 sps:$4 sm:$0xff]  }
  0x80   : > { %2271 = vmatpush1.bf16.msra.mxu0 %v15387_v59  ;;  %2313 = vmatprep.subr.bf16.mxu1 %v15398_v62  ;;  %v15471_v59 = vld [vmem:[%s22530_s1 + $0xd88] ss:$72 sps:$4 sm:$0xff]   ;;  %v15482_v62 = vld [vmem:[%s22530_s1 + $0x524] ss:$72 sps:$4 sm:$0xff]  }
  0x81   : > { %2272 = vmatprep.subr.bf16.mxu0 %v15395_v61  ;;  %v15479_v61 = vld [vmem:[%s22530_s1 + $0xe1c] ss:$72 sps:$4 sm:$0xff]  }
  0x83   : > { %2314 = vmatpush1.bf16.msra.mxu1 %v15396_v0  ;;  %v15480_v0 = vld [vmem:[%s22530_s1 + $0x520] ss:$72 sps:$4 sm:$0xff]  }
  0x84   : > { %2273 = vmatpush1.bf16.msra.mxu0 %v15393_v63  ;;  %2315 = vmatprep.subr.bf16.mxu1 %v15404_v2  ;;  %v15477_v63 = vld [vmem:[%s22530_s1 + $0xe18] ss:$72 sps:$4 sm:$0xff]   ;;  %v15488_v2 = vld [vmem:[%s22530_s1 + $0x5b4] ss:$72 sps:$4 sm:$0xff]  }
  0x85   : > { %2274 = vmatprep.subr.bf16.mxu0 %v15401_v1  ;;  %v15485_v1 = vld [vmem:[%s22530_s1 + $0xeac] ss:$72 sps:$4 sm:$0xff]  }
  0x87   : > { %2316 = vmatpush1.bf16.msra.mxu1 %v15402_v4  ;;  %v15486_v4 = vld [vmem:[%s22530_s1 + $0x5b0] ss:$72 sps:$4 sm:$0xff]  }
  0x88   : > { %2275 = vmatpush1.bf16.msra.mxu0 %v15399_v3  ;;  %2317 = vmatprep.subr.bf16.mxu1 %v15410_v6  ;;  %v15483_v3 = vld [vmem:[%s22530_s1 + $0xea8] ss:$72 sps:$4 sm:$0xff]   ;;  %v15494_v6 = vld [vmem:[%s22530_s1 + $0x644] ss:$72 sps:$4 sm:$0xff]  }
  0x89   : > { %2276 = vmatprep.subr.bf16.mxu0 %v15407_v5  ;;  %v15491_v5 = vld [vmem:[%s22530_s1 + $0xf3c] ss:$72 sps:$4 sm:$0xff]  }
  0x8b   : > { %2318 = vmatpush1.bf16.msra.mxu1 %v15408_v8  ;;  %v15492_v8 = vld [vmem:[%s22530_s1 + $0x640] ss:$72 sps:$4 sm:$0xff]  }
  0x8c   : > { %2277 = vmatpush1.bf16.msra.mxu0 %v15405_v7  ;;  %2319 = vmatprep.subr.bf16.mxu1 %v15416_v10  ;;  %v15489_v7 = vld [vmem:[%s22530_s1 + $0xf38] ss:$72 sps:$4 sm:$0xff]   ;;  %v15500_v10 = vld [vmem:[%s22530_s1 + $0x6d4] ss:$72 sps:$4 sm:$0xff]  }
  0x8d   : > { %2278 = vmatprep.subr.bf16.mxu0 %v15413_v9  ;;  %v15497_v9 = vld [vmem:[%s22530_s1 + $0xfcc] ss:$72 sps:$4 sm:$0xff]  }
  0x8f   : > { %2320 = vmatpush1.bf16.msra.mxu1 %v15414_v13  ;;  %v15498_v13 = vld [vmem:[%s22530_s1 + $0x6d0] ss:$72 sps:$4 sm:$0xff]  }
  0x90   : > { %2279 = vmatpush1.bf16.msra.mxu0 %v15411_v11  ;;  %2321 = vmatprep.subr.bf16.mxu1 %v15422_v16  ;;  %v15495_v11 = vld [vmem:[%s22530_s1 + $0xfc8] ss:$72 sps:$4 sm:$0xff]   ;;  %v15506_v16 = vld [vmem:[%s22530_s1 + $0x764] ss:$72 sps:$4 sm:$0xff]  }
  0x91   : > { %2280 = vmatprep.subr.bf16.mxu0 %v15419_v14  ;;  %v15503_v14 = vld [vmem:[%s22530_s1 + $0x105c] ss:$72 sps:$4 sm:$0xff]  }
  0x93   : > { %2322 = vmatpush1.bf16.msra.mxu1 %v15420_v18  ;;  %v15504_v18 = vld [vmem:[%s22530_s1 + $0x760] ss:$72 sps:$4 sm:$0xff]  }
  0x94   : > { %2281 = vmatpush1.bf16.msra.mxu0 %v15417_v17  ;;  %2332 = vmatprep.subr.bf16.mxu1 %v15425_v21  ;;  %v15501_v17 = vld [vmem:[%s22530_s1 + $0x1058] ss:$72 sps:$4 sm:$0xff]   ;;  %v15507_v21 = vld [vmem:[%s22530_s1 + $0x10e8] ss:$72 sps:$4 sm:$0xff]  }
  0x95   : > { %2414 = vmatprep.subr.bf16.mxu0 %v15428_v22  ;;  %v15510_v22 = vld [vmem:[%s22530_s1 + $0x7f0] ss:$72 sps:$4 sm:$0xff]  }
  0x96   : > { %2324 = vmatmul.mubr.bf16.vlgmr.msra.gmra.mrb[4].mxu1 %v17396_v12 }
  0x97   : > { %2283 = vmatmul.mubr.bf16.vlgmr.msra.gmra.mrb[0].mxu0 %v17602_v23  ;;  %2333 = vmatpush1.bf16.msra.mxu1 %v15423_v24  ;;  %v15515_v24 = vld [vmem:[%s22530_s1 + $0x117c] ss:$72 sps:$4 sm:$0xff]  }
  0x98   : > { %2415 = vmatpush1.bf16.msra.mxu0 %v15426_v25  ;;  %2334 = vmatprep.subr.bf16.mxu1 %v15431_v26  ;;  %v15518_v25 = vld [vmem:[%s22530_s1 + $0x884] ss:$72 sps:$4 sm:$0xff]   ;;  %v15513_v26 = vld [vmem:[%s22530_s1 + $0x1178] ss:$72 sps:$4 sm:$0xff]  }
  0x99   : > { %2416 = vmatprep.subr.bf16.mxu0 %v15434_v27  ;;  %2364 = vmatprep.mubr.bf16.mxu1 %v17340_v55  ;;  %v15516_v27 = vld [vmem:[%s22530_s1 + $0x880] ss:$72 sps:$4 sm:$0xff]  }
  0x9a   : > { %2446 = vmatprep.mubr.bf16.mxu0 %v17330_v50 }
  0x9b   : > { %2335 = vmatpush1.bf16.msra.mxu1 %v15429_v28  ;;  %v15521_v28 = vld [vmem:[%s22530_s1 + $0x120c] ss:$72 sps:$4 sm:$0xff]  }
  0x9c   : > { %2417 = vmatpush1.bf16.msra.mxu0 %v15432_v29  ;;  %2336 = vmatprep.subr.bf16.mxu1 %v15437_v30  ;;  %v15524_v29 = vld [vmem:[%s22530_s1 + $0x914] ss:$72 sps:$4 sm:$0xff]   ;;  %v15519_v30 = vld [vmem:[%s22530_s1 + $0x1208] ss:$72 sps:$4 sm:$0xff]  }
  0x9d   : > { %2418 = vmatprep.subr.bf16.mxu0 %v15440_v31  ;;  %v15522_v31 = vld [vmem:[%s22530_s1 + $0x910] ss:$72 sps:$4 sm:$0xff]  }
  0x9f   : > { %2337 = vmatpush1.bf16.msra.mxu1 %v15435_v32  ;;  %v15527_v32 = vld [vmem:[%s22530_s1 + $0x129c] ss:$72 sps:$4 sm:$0xff]  }
  0xa0   : > { %2419 = vmatpush1.bf16.msra.mxu0 %v15438_v33  ;;  %2338 = vmatprep.subr.bf16.mxu1 %v15443_v34  ;;  %v15530_v33 = vld [vmem:[%s22530_s1 + $0x9a4] ss:$72 sps:$4 sm:$0xff]   ;;  %v15525_v34 = vld [vmem:[%s22530_s1 + $0x1298] ss:$72 sps:$4 sm:$0xff]  }
  0xa1   : > { %2420 = vmatprep.subr.bf16.mxu0 %v15446_v35  ;;  %v15528_v35 = vld [vmem:[%s22530_s1 + $0x9a0] ss:$72 sps:$4 sm:$0xff]  }
  0xa3   : > { %2339 = vmatpush1.bf16.msra.mxu1 %v15441_v36  ;;  %v15533_v36 = vld [vmem:[%s22530_s1 + $0x132c] ss:$72 sps:$4 sm:$0xff]  }
  0xa4   : > { %2421 = vmatpush1.bf16.msra.mxu0 %v15444_v37  ;;  %2340 = vmatprep.subr.bf16.mxu1 %v15449_v38  ;;  %v15536_v37 = vld [vmem:[%s22530_s1 + $0xa34] ss:$72 sps:$4 sm:$0xff]   ;;  %v15531_v38 = vld [vmem:[%s22530_s1 + $0x1328] ss:$72 sps:$4 sm:$0xff]  }
  0xa5   : > { %2422 = vmatprep.subr.bf16.mxu0 %v15452_v39  ;;  %v15534_v39 = vld [vmem:[%s22530_s1 + $0xa30] ss:$72 sps:$4 sm:$0xff]  }
  0xa7   : > { %2341 = vmatpush1.bf16.msra.mxu1 %v15447_v40  ;;  %v15539_v40 = vld [vmem:[%s22530_s1 + $0x13bc] ss:$72 sps:$4 sm:$0xff]  }
  0xa8   : > { %2423 = vmatpush1.bf16.msra.mxu0 %v15450_v41  ;;  %2342 = vmatprep.subr.bf16.mxu1 %v15455_v42  ;;  %v15542_v41 = vld [vmem:[%s22530_s1 + $0xac4] ss:$72 sps:$4 sm:$0xff]   ;;  %v15537_v42 = vld [vmem:[%s22530_s1 + $0x13b8] ss:$72 sps:$4 sm:$0xff]  }
  0xa9   : > { %2424 = vmatprep.subr.bf16.mxu0 %v15458_v43  ;;  %v15540_v43 = vld [vmem:[%s22530_s1 + $0xac0] ss:$72 sps:$4 sm:$0xff]  }
  0xab   : > { %2343 = vmatpush1.bf16.msra.mxu1 %v15453_v45  ;;  %v15545_v45 = vld [vmem:[%s22530_s1 + $0x144c] ss:$72 sps:$4 sm:$0xff]  }
  0xac   : > { %2425 = vmatpush1.bf16.msra.mxu0 %v15456_v46  ;;  %2344 = vmatprep.subr.bf16.mxu1 %v15461_v47  ;;  %v15548_v46 = vld [vmem:[%s22530_s1 + $0xb54] ss:$72 sps:$4 sm:$0xff]   ;;  %v15543_v47 = vld [vmem:[%s22530_s1 + $0x1448] ss:$72 sps:$4 sm:$0xff]  }
  0xad   : > { %2426 = vmatprep.subr.bf16.mxu0 %v15464_v48  ;;  %v15546_v48 = vld [vmem:[%s22530_s1 + $0xb50] ss:$72 sps:$4 sm:$0xff]  }
  0xaf   : > { %2345 = vmatpush1.bf16.msra.mxu1 %v15459_v49  ;;  %v15551_v49 = vld [vmem:[%s22530_s1 + $0x14dc] ss:$72 sps:$4 sm:$0xff]  }
  0xb0   : > { %2427 = vmatpush1.bf16.msra.mxu0 %v15462_v51  ;;  %2346 = vmatprep.subr.bf16.mxu1 %v15467_v52  ;;  %v15554_v51 = vld [vmem:[%s22530_s1 + $0xbe4] ss:$72 sps:$4 sm:$0xff]   ;;  %v15549_v52 = vld [vmem:[%s22530_s1 + $0x14d8] ss:$72 sps:$4 sm:$0xff]  }
  0xb1   : > { %2428 = vmatprep.subr.bf16.mxu0 %v15470_v53  ;;  %v15552_v53 = vld [vmem:[%s22530_s1 + $0xbe0] ss:$72 sps:$4 sm:$0xff]  }
  0xb3   : > { %2347 = vmatpush1.bf16.msra.mxu1 %v15465_v54  ;;  %v15557_v54 = vld [vmem:[%s22530_s1 + $0x156c] ss:$72 sps:$4 sm:$0xff]  }
  0xb4   : > { %2429 = vmatpush1.bf16.msra.mxu0 %v15468_v56  ;;  %2348 = vmatprep.subr.bf16.mxu1 %v15473_v57  ;;  %v15560_v56 = vld [vmem:[%s22530_s1 + $0xc74] ss:$72 sps:$4 sm:$0xff]   ;;  %v15555_v57 = vld [vmem:[%s22530_s1 + $0x1568] ss:$72 sps:$4 sm:$0xff]  }
  0xb5   : > { %2430 = vmatprep.subr.bf16.mxu0 %v15476_v58  ;;  %v15558_v58 = vld [vmem:[%s22530_s1 + $0xc70] ss:$72 sps:$4 sm:$0xff]  }
  0xb7   : > { %2349 = vmatpush1.bf16.msra.mxu1 %v15471_v59  ;;  %v15563_v59 = vld [vmem:[%s22530_s1 + $0x15fc] ss:$72 sps:$4 sm:$0xff]  }
  0xb8   : > { %2431 = vmatpush1.bf16.msra.mxu0 %v15474_v60  ;;  %2350 = vmatprep.subr.bf16.mxu1 %v15479_v61  ;;  %v15566_v60 = vld [vmem:[%s22530_s1 + $0xd04] ss:$72 sps:$4 sm:$0xff]   ;;  %v15561_v61 = vld [vmem:[%s22530_s1 + $0x15f8] ss:$72 sps:$4 sm:$0xff]  }
  0xb9   : > { %2432 = vmatprep.subr.bf16.mxu0 %v15482_v62  ;;  %v15564_v62 = vld [vmem:[%s22530_s1 + $0xd00] ss:$72 sps:$4 sm:$0xff]  }
  0xbb   : > { %2351 = vmatpush1.bf16.msra.mxu1 %v15477_v63  ;;  %v15569_v63 = vld [vmem:[%s22530_s1 + $0x168c] ss:$72 sps:$4 sm:$0xff]  }
  0xbc   : > { %2433 = vmatpush1.bf16.msra.mxu0 %v15480_v0  ;;  %2352 = vmatprep.subr.bf16.mxu1 %v15485_v1  ;;  %v15572_v0 = vld [vmem:[%s22530_s1 + $0xd94] ss:$72 sps:$4 sm:$0xff]   ;;  %v15567_v1 = vld [vmem:[%s22530_s1 + $0x1688] ss:$72 sps:$4 sm:$0xff]  }
  0xbd   : > { %2434 = vmatprep.subr.bf16.mxu0 %v15488_v2  ;;  %v15570_v2 = vld [vmem:[%s22530_s1 + $0xd90] ss:$72 sps:$4 sm:$0xff]  }
  0xbf   : > { %2353 = vmatpush1.bf16.msra.mxu1 %v15483_v3  ;;  %v15575_v3 = vld [vmem:[%s22530_s1 + $0x171c] ss:$72 sps:$4 sm:$0xff]  }
  0xc0   : > { %2435 = vmatpush1.bf16.msra.mxu0 %v15486_v4  ;;  %2354 = vmatprep.subr.bf16.mxu1 %v15491_v5  ;;  %v15578_v4 = vld [vmem:[%s22530_s1 + $0xe24] ss:$72 sps:$4 sm:$0xff]   ;;  %v15573_v5 = vld [vmem:[%s22530_s1 + $0x1718] ss:$72 sps:$4 sm:$0xff]  }
  0xc1   : > { %2436 = vmatprep.subr.bf16.mxu0 %v15494_v6  ;;  %v15576_v6 = vld [vmem:[%s22530_s1 + $0xe20] ss:$72 sps:$4 sm:$0xff]  }
  0xc3   : > { %2355 = vmatpush1.bf16.msra.mxu1 %v15489_v7  ;;  %v15581_v7 = vld [vmem:[%s22530_s1 + $0x17ac] ss:$72 sps:$4 sm:$0xff]  }
  0xc4   : > { %2437 = vmatpush1.bf16.msra.mxu0 %v15492_v8  ;;  %2356 = vmatprep.subr.bf16.mxu1 %v15497_v9  ;;  %v15584_v8 = vld [vmem:[%s22530_s1 + $0xeb4] ss:$72 sps:$4 sm:$0xff]   ;;  %v15579_v9 = vld [vmem:[%s22530_s1 + $0x17a8] ss:$72 sps:$4 sm:$0xff]  }
  0xc5   : > { %2438 = vmatprep.subr.bf16.mxu0 %v15500_v10  ;;  %v15582_v10 = vld [vmem:[%s22530_s1 + $0xeb0] ss:$72 sps:$4 sm:$0xff]  }
  0xc7   : > { %2357 = vmatpush1.bf16.msra.mxu1 %v15495_v11  ;;  %v15587_v11 = vld [vmem:[%s22530_s1 + $0x183c] ss:$72 sps:$4 sm:$0xff]  }
  0xc8   : > { %2439 = vmatpush1.bf16.msra.mxu0 %v15498_v13  ;;  %2358 = vmatprep.subr.bf16.mxu1 %v15503_v14  ;;  %v15590_v13 = vld [vmem:[%s22530_s1 + $0xf44] ss:$72 sps:$4 sm:$0xff]   ;;  %v15585_v14 = vld [vmem:[%s22530_s1 + $0x1838] ss:$72 sps:$4 sm:$0xff]  }
  0xc9   : > { %2440 = vmatprep.subr.bf16.mxu0 %v15506_v16  ;;  %v15588_v16 = vld [vmem:[%s22530_s1 + $0xf40] ss:$72 sps:$4 sm:$0xff]  }
  0xcb   : > { %2359 = vmatpush1.bf16.msra.mxu1 %v15501_v17  ;;  %v15593_v17 = vld [vmem:[%s22530_s1 + $0x18cc] ss:$72 sps:$4 sm:$0xff]  }
  0xcc   : > { %2441 = vmatpush1.bf16.msra.mxu0 %v15504_v18  ;;  %2360 = vmatprep.subr.bf16.mxu1 %v15509_v19  ;;  %v15596_v18 = vld [vmem:[%s22530_s1 + $0xfd4] ss:$72 sps:$4 sm:$0xff]   ;;  %v15591_v19 = vld [vmem:[%s22530_s1 + $0x18c8] ss:$72 sps:$4 sm:$0xff]  }
  0xcd   : > { %2442 = vmatprep.subr.bf16.mxu0 %v15512_v20  ;;  %v15594_v20 = vld [vmem:[%s22530_s1 + $0xfd0] ss:$72 sps:$4 sm:$0xff]  }
  0xcf   : > { %2361 = vmatpush1.bf16.msra.mxu1 %v15507_v21  ;;  %v15599_v21 = vld [vmem:[%s22530_s1 + $0x195c] ss:$72 sps:$4 sm:$0xff]  }
  0xd0   : > { %2443 = vmatpush1.bf16.msra.mxu0 %v15510_v22  ;;  %2362 = vmatprep.subr.bf16.mxu1 %v15515_v24  ;;  %v15602_v22 = vld [vmem:[%s22530_s1 + $0x1064] ss:$72 sps:$4 sm:$0xff]   ;;  %v15597_v24 = vld [vmem:[%s22530_s1 + $0x1958] ss:$72 sps:$4 sm:$0xff]  }
  0xd1   : > { %2444 = vmatprep.subr.bf16.mxu0 %v15518_v25  ;;  %v15600_v25 = vld [vmem:[%s22530_s1 + $0x1060] ss:$72 sps:$4 sm:$0xff]  }
  0xd3   : > { %2363 = vmatpush1.bf16.msra.mxu1 %v15513_v26  ;;  %v15605_v26 = vld [vmem:[%s22530_s1 + $0x19ec] ss:$72 sps:$4 sm:$0xff]  }
  0xd4   : > { %2445 = vmatpush1.bf16.msra.mxu0 %v15516_v27  ;;  %2373 = vmatprep.subr.bf16.mxu1 %v15521_v28  ;;  %v15608_v27 = vld [vmem:[%s22530_s1 + $0x10f4] ss:$72 sps:$4 sm:$0xff]   ;;  %v15603_v28 = vld [vmem:[%s22530_s1 + $0x19e8] ss:$72 sps:$4 sm:$0xff]  }
  0xd5   : > { %2455 = vmatprep.subr.bf16.mxu0 %v15524_v29  ;;  %v15606_v29 = vld [vmem:[%s22530_s1 + $0x10f0] ss:$72 sps:$4 sm:$0xff]  }
  0xd6   : > { %2365 = vmatmul.mubr.bf16.vlgmr.msra.gmra.mrb[4].mxu1 %v17404_v15 }
  0xd7   : > { %2447 = vmatmul.mubr.bf16.vlgmr.msra.gmra.mrb[4].mxu0 %v17396_v12  ;;  %2374 = vmatpush1.bf16.msra.mxu1 %v15519_v30  ;;  %v15611_v30 = vld [vmem:[%s22530_s1 + $0x1a7c] ss:$72 sps:$4 sm:$0xff]  }
  0xd8   : > { %2456 = vmatpush1.bf16.msra.mxu0 %v15522_v31  ;;  %2375 = vmatprep.subr.bf16.mxu1 %v15527_v32  ;;  %v15614_v31 = vld [vmem:[%s22530_s1 + $0x1184] ss:$72 sps:$4 sm:$0xff]   ;;  %v15609_v32 = vld [vmem:[%s22530_s1 + $0x1a78] ss:$72 sps:$4 sm:$0xff]  }
  0xd9   : > { %2457 = vmatprep.subr.bf16.mxu0 %v15530_v33  ;;  %2405 = vmatprep.mubr.bf16.mxu1 %v17489_v44  ;;  %v15612_v33 = vld [vmem:[%s22530_s1 + $0x1180] ss:$72 sps:$4 sm:$0xff]  }
  0xda   : > { %2487 = vmatprep.mubr.bf16.mxu0 %v17340_v55 }
  0xdb   : > { %2376 = vmatpush1.bf16.msra.mxu1 %v15525_v34  ;;  %v15617_v34 = vld [vmem:[%s22530_s1 + $0x1214] ss:$72 sps:$4 sm:$0xff]  }
  0xdc   : > { %2458 = vmatpush1.bf16.msra.mxu0 %v15528_v35  ;;  %2377 = vmatprep.subr.bf16.mxu1 %v15533_v36  ;;  %v15620_v35 = vld [vmem:[%s22530_s1 + $0x1c] ss:$72 sps:$4 sm:$0xff]   ;;  %v15615_v36 = vld [vmem:[%s22530_s1 + $0x1210] ss:$72 sps:$4 sm:$0xff]  }
  0xdd   : > { %2459 = vmatprep.subr.bf16.mxu0 %v15536_v37  ;;  %v15618_v37 = vld [vmem:[%s22530_s1 + $0x18] ss:$72 sps:$4 sm:$0xff]  }
  0xdf   : > { %2378 = vmatpush1.bf16.msra.mxu1 %v15531_v38  ;;  %v15623_v38 = vld [vmem:[%s22530_s1 + $0x12a4] ss:$72 sps:$4 sm:$0xff]  }
  0xe0   : > { %2460 = vmatpush1.bf16.msra.mxu0 %v15534_v39  ;;  %2379 = vmatprep.subr.bf16.mxu1 %v15539_v40  ;;  %v15626_v39 = vld [vmem:[%s22530_s1 + $0xac] ss:$72 sps:$4 sm:$0xff]   ;;  %v15621_v40 = vld [vmem:[%s22530_s1 + $0x12a0] ss:$72 sps:$4 sm:$0xff]  }
  0xe1   : > { %2461 = vmatprep.subr.bf16.mxu0 %v15542_v41  ;;  %v15624_v41 = vld [vmem:[%s22530_s1 + $0xa8] ss:$72 sps:$4 sm:$0xff]  }
  0xe3   : > { %2380 = vmatpush1.bf16.msra.mxu1 %v15537_v42  ;;  %v15629_v42 = vld [vmem:[%s22530_s1 + $0x1334] ss:$72 sps:$4 sm:$0xff]  }
  0xe4   : > { %2462 = vmatpush1.bf16.msra.mxu0 %v15540_v43  ;;  %2381 = vmatprep.subr.bf16.mxu1 %v15545_v45  ;;  %v15632_v43 = vld [vmem:[%s22530_s1 + $0x13c] ss:$72 sps:$4 sm:$0xff]   ;;  %v15627_v45 = vld [vmem:[%s22530_s1 + $0x1330] ss:$72 sps:$4 sm:$0xff]  }
  0xe5   : > { %2463 = vmatprep.subr.bf16.mxu0 %v15548_v46  ;;  %v15630_v46 = vld [vmem:[%s22530_s1 + $0x138] ss:$72 sps:$4 sm:$0xff]  }
  0xe7   : > { %2382 = vmatpush1.bf16.msra.mxu1 %v15543_v47  ;;  %v15635_v47 = vld [vmem:[%s22530_s1 + $0x13c4] ss:$72 sps:$4 sm:$0xff]  }
  0xe8   : > { %2464 = vmatpush1.bf16.msra.mxu0 %v15546_v48  ;;  %2383 = vmatprep.subr.bf16.mxu1 %v15551_v49  ;;  %v15638_v48 = vld [vmem:[%s22530_s1 + $0x1cc] ss:$72 sps:$4 sm:$0xff]   ;;  %v15633_v49 = vld [vmem:[%s22530_s1 + $0x13c0] ss:$72 sps:$4 sm:$0xff]  }
  0xe9   : > { %2465 = vmatprep.subr.bf16.mxu0 %v15554_v51  ;;  %v15636_v51 = vld [vmem:[%s22530_s1 + $0x1c8] ss:$72 sps:$4 sm:$0xff]  }
  0xeb   : > { %2384 = vmatpush1.bf16.msra.mxu1 %v15549_v52  ;;  %v15641_v52 = vld [vmem:[%s22530_s1 + $0x1454] ss:$72 sps:$4 sm:$0xff]  }
  0xec   : > { %2466 = vmatpush1.bf16.msra.mxu0 %v15552_v53  ;;  %2385 = vmatprep.subr.bf16.mxu1 %v15557_v54  ;;  %v15644_v53 = vld [vmem:[%s22530_s1 + $0x25c] ss:$72 sps:$4 sm:$0xff]   ;;  %v15639_v54 = vld [vmem:[%s22530_s1 + $0x1450] ss:$72 sps:$4 sm:$0xff]  }
  0xed   : > { %2467 = vmatprep.subr.bf16.mxu0 %v15560_v56  ;;  %v15642_v56 = vld [vmem:[%s22530_s1 + $0x258] ss:$72 sps:$4 sm:$0xff]  }
  0xef   : > { %2386 = vmatpush1.bf16.msra.mxu1 %v15555_v57  ;;  %v15647_v57 = vld [vmem:[%s22530_s1 + $0x14e4] ss:$72 sps:$4 sm:$0xff]  }
  0xf0   : > { %2468 = vmatpush1.bf16.msra.mxu0 %v15558_v58  ;;  %2387 = vmatprep.subr.bf16.mxu1 %v15563_v59  ;;  %v15650_v58 = vld [vmem:[%s22530_s1 + $0x2ec] ss:$72 sps:$4 sm:$0xff]   ;;  %v15645_v59 = vld [vmem:[%s22530_s1 + $0x14e0] ss:$72 sps:$4 sm:$0xff]  }
  0xf1   : > { %2469 = vmatprep.subr.bf16.mxu0 %v15566_v60  ;;  %v15648_v60 = vld [vmem:[%s22530_s1 + $0x2e8] ss:$72 sps:$4 sm:$0xff]  }
  0xf3   : > { %2388 = vmatpush1.bf16.msra.mxu1 %v15561_v61  ;;  %v15653_v61 = vld [vmem:[%s22530_s1 + $0x1574] ss:$72 sps:$4 sm:$0xff]  }
  0xf4   : > { %2470 = vmatpush1.bf16.msra.mxu0 %v15564_v62  ;;  %2389 = vmatprep.subr.bf16.mxu1 %v15569_v63  ;;  %v15656_v62 = vld [vmem:[%s22530_s1 + $0x37c] ss:$72 sps:$4 sm:$0xff]  }
  0xf5   : > { %2471 = vmatprep.subr.bf16.mxu0 %v15572_v0 }
  0xf7   : > { %2390 = vmatpush1.bf16.msra.mxu1 %v15567_v1  ;;  %v15651_v1 = vld [vmem:[%s22530_s1 + $0x1570] ss:$72 sps:$4 sm:$0xff]  }
  0xf8   : > { %2472 = vmatpush1.bf16.msra.mxu0 %v15570_v2  ;;  %2391 = vmatprep.subr.bf16.mxu1 %v15575_v3  ;;  %v15654_v3 = vld [vmem:[%s22530_s1 + $0x378] ss:$72 sps:$4 sm:$0xff]  }
  0xf9   : > { %2473 = vmatprep.subr.bf16.mxu0 %v15578_v4  ;;  %v15659_v4 = vld [vmem:[%s22530_s1 + $0x1604] ss:$72 sps:$4 sm:$0xff]  }
  0xfb   : > { %2392 = vmatpush1.bf16.msra.mxu1 %v15573_v5 }
  0xfc   : > { %2474 = vmatpush1.bf16.msra.mxu0 %v15576_v6  ;;  %2393 = vmatprep.subr.bf16.mxu1 %v15581_v7  ;;  %v15662_v6 = vld [vmem:[%s22530_s1 + $0x40c] ss:$72 sps:$4 sm:$0xff]   ;;  %v15657_v7 = vld [vmem:[%s22530_s1 + $0x1600] ss:$72 sps:$4 sm:$0xff]  }
  0xfd   : > { %2475 = vmatprep.subr.bf16.mxu0 %v15584_v8  ;;  %v15660_v8 = vld [vmem:[%s22530_s1 + $0x408] ss:$72 sps:$4 sm:$0xff]  }
  0xff   : > { %2394 = vmatpush1.bf16.msra.mxu1 %v15579_v9  ;;  %v15665_v9 = vld [vmem:[%s22530_s1 + $0x1694] ss:$72 sps:$4 sm:$0xff]  }
 0x100   : > { %2476 = vmatpush1.bf16.msra.mxu0 %v15582_v10  ;;  %2395 = vmatprep.subr.bf16.mxu1 %v15587_v11  ;;  %v15668_v10 = vld [vmem:[%s22530_s1 + $0x49c] ss:$72 sps:$4 sm:$0xff]   ;;  %v15663_v11 = vld [vmem:[%s22530_s1 + $0x1690] ss:$72 sps:$4 sm:$0xff]  }
 0x101   : > { %2477 = vmatprep.subr.bf16.mxu0 %v15590_v13  ;;  %v15666_v13 = vld [vmem:[%s22530_s1 + $0x498] ss:$72 sps:$4 sm:$0xff]  }
 0x103   : > { %2396 = vmatpush1.bf16.msra.mxu1 %v15585_v14  ;;  %v15671_v14 = vld [vmem:[%s22530_s1 + $0x1724] ss:$72 sps:$4 sm:$0xff]  }
 0x104   : > { %2478 = vmatpush1.bf16.msra.mxu0 %v15588_v16  ;;  %2397 = vmatprep.subr.bf16.mxu1 %v15593_v17  ;;  %v15674_v16 = vld [vmem:[%s22530_s1 + $0x52c] ss:$72 sps:$4 sm:$0xff]   ;;  %v15669_v17 = vld [vmem:[%s22530_s1 + $0x1720] ss:$72 sps:$4 sm:$0xff]  }
 0x105   : > { %2479 = vmatprep.subr.bf16.mxu0 %v15596_v18  ;;  %v15672_v18 = vld [vmem:[%s22530_s1 + $0x528] ss:$72 sps:$4 sm:$0xff]  }
 0x107   : > { %2398 = vmatpush1.bf16.msra.mxu1 %v15591_v19  ;;  %v15677_v19 = vld [vmem:[%s22530_s1 + $0x17b4] ss:$72 sps:$4 sm:$0xff]  }
 0x108   : > { %2480 = vmatpush1.bf16.msra.mxu0 %v15594_v20  ;;  %2399 = vmatprep.subr.bf16.mxu1 %v15599_v21  ;;  %v15680_v20 = vld [vmem:[%s22530_s1 + $0x5bc] ss:$72 sps:$4 sm:$0xff]   ;;  %v15675_v21 = vld [vmem:[%s22530_s1 + $0x17b0] ss:$72 sps:$4 sm:$0xff]  }
 0x109   : > { %2481 = vmatprep.subr.bf16.mxu0 %v15602_v22  ;;  %v15678_v22 = vld [vmem:[%s22530_s1 + $0x5b8] ss:$72 sps:$4 sm:$0xff]  }
 0x10b   : > { %2400 = vmatpush1.bf16.msra.mxu1 %v15597_v24  ;;  %v15683_v24 = vld [vmem:[%s22530_s1 + $0x1844] ss:$72 sps:$4 sm:$0xff]  }
 0x10c   : > { %2482 = vmatpush1.bf16.msra.mxu0 %v15600_v25  ;;  %2401 = vmatprep.subr.bf16.mxu1 %v15605_v26  ;;  %v15686_v25 = vld [vmem:[%s22530_s1 + $0x64c] ss:$72 sps:$4 sm:$0xff]   ;;  %v15681_v26 = vld [vmem:[%s22530_s1 + $0x1840] ss:$72 sps:$4 sm:$0xff]  }
 0x10d   : > { %2483 = vmatprep.subr.bf16.mxu0 %v15608_v27  ;;  %v15684_v27 = vld [vmem:[%s22530_s1 + $0x648] ss:$72 sps:$4 sm:$0xff]  }
 0x10f   : > { %2402 = vmatpush1.bf16.msra.mxu1 %v15603_v28  ;;  %v15689_v28 = vld [vmem:[%s22530_s1 + $0x18d4] ss:$72 sps:$4 sm:$0xff]  }
 0x110   : > { %2484 = vmatpush1.bf16.msra.mxu0 %v15606_v29  ;;  %2403 = vmatprep.subr.bf16.mxu1 %v15611_v30  ;;  %v15692_v29 = vld [vmem:[%s22530_s1 + $0x6dc] ss:$72 sps:$4 sm:$0xff]   ;;  %v15687_v30 = vld [vmem:[%s22530_s1 + $0x18d0] ss:$72 sps:$4 sm:$0xff]  }
 0x111   : > { %2485 = vmatprep.subr.bf16.mxu0 %v15614_v31  ;;  %v15690_v31 = vld [vmem:[%s22530_s1 + $0x6d8] ss:$72 sps:$4 sm:$0xff]  }
 0x113   : > { %2404 = vmatpush1.bf16.msra.mxu1 %v15609_v32  ;;  %v15695_v32 = vld [vmem:[%s22530_s1 + $0x1964] ss:$72 sps:$4 sm:$0xff]  }
 0x114   : > { %2486 = vmatpush1.bf16.msra.mxu0 %v15612_v33  ;;  %6084 = vmatprep.subr.bf16.mxu1 %v15620_v35  ;;  %v15698_v33 = vld [vmem:[%s22530_s1 + $0x76c] ss:$72 sps:$4 sm:$0xff]   ;;  %v15696_v35 = vld [vmem:[%s22530_s1 + $0x768] ss:$72 sps:$4 sm:$0xff]  }
 0x115   : > { %2496 = vmatprep.subr.bf16.mxu0 %v15617_v34  ;;  %v15693_v34 = vld [vmem:[%s22530_s1 + $0x1960] ss:$72 sps:$4 sm:$0xff]  }
 0x116   : > { %2406 = vmatmul.mubr.bf16.vlgmr.msra.gmra.mrb[4].mxu1 %v17602_v23 }
 0x117   : > { %2488 = vmatmul.mubr.bf16.vlgmr.msra.gmra.mrb[4].mxu0 %v17404_v15  ;;  %6085 = vmatpush1.bf16.msra.mxu1 %v15618_v37  ;;  %v15704_v37 = vld [vmem:[%s22530_s1 + $0x7fc] ss:$72 sps:$4 sm:$0xff]  }
 0x118   : > { %2497 = vmatpush1.bf16.msra.mxu0 %v15615_v36  ;;  %6086 = vmatprep.subr.bf16.mxu1 %v15626_v39  ;;  %v15701_v36 = vld [vmem:[%s22530_s1 + $0x19f4] ss:$72 sps:$4 sm:$0xff]   ;;  %v15702_v39 = vld [vmem:[%s22530_s1 + $0x7f8] ss:$72 sps:$4 sm:$0xff]  }
 0x119   : > { %2498 = vmatprep.subr.bf16.mxu0 %v15623_v38  ;;  %6116 = vmatprep.mubr.bf16.mxu1 %v17330_v50  ;;  %v15699_v38 = vld [vmem:[%s22530_s1 + $0x19f0] ss:$72 sps:$4 sm:$0xff]  }
 0x11a   : > { %2528 = vmatprep.mubr.bf16.mxu0 %v17489_v44 }
 0x11b   : > { %6087 = vmatpush1.bf16.msra.mxu1 %v15624_v41  ;;  %v15710_v41 = vld [vmem:[%s22530_s1 + $0x88c] ss:$72 sps:$4 sm:$0xff]  }
 0x11c   : > { %2499 = vmatpush1.bf16.msra.mxu0 %v15621_v40  ;;  %6088 = vmatprep.subr.bf16.mxu1 %v15632_v43  ;;  %v15707_v40 = vld [vmem:[%s22530_s1 + $0x1a84] ss:$72 sps:$4 sm:$0xff]   ;;  %v15708_v43 = vld [vmem:[%s22530_s1 + $0x888] ss:$72 sps:$4 sm:$0xff]  }
 0x11d   : > { %2500 = vmatprep.subr.bf16.mxu0 %v15629_v42  ;;  %v15705_v42 = vld [vmem:[%s22530_s1 + $0x1a80] ss:$72 sps:$4 sm:$0xff]  }
 0x11f   : > { %6089 = vmatpush1.bf16.msra.mxu1 %v15630_v46  ;;  %v15716_v46 = vld [vmem:[%s22530_s1 + $0x24] ss:$72 sps:$4 sm:$0xff]  }
 0x120   : > { %2501 = vmatpush1.bf16.msra.mxu0 %v15627_v45  ;;  %6090 = vmatprep.subr.bf16.mxu1 %v15638_v48  ;;  %v15713_v45 = vld [vmem:[%s22530_s1 + $0x91c] ss:$72 sps:$4 sm:$0xff]   ;;  %v277_v48 = vld [vmem:[%s17314_s12 + $0x68] sm:$0xff] }
 0x121   : > { %2502 = vmatprep.subr.bf16.mxu0 %v15635_v47  ;;  %v15711_v47 = vld [vmem:[%s22530_s1 + $0x918] ss:$72 sps:$4 sm:$0xff]  }
 0x123   : > { %6091 = vmatpush1.bf16.msra.mxu1 %v15636_v51  ;;  %v15714_v51 = vld [vmem:[%s22530_s1 + $0x20] ss:$72 sps:$4 sm:$0xff]  }
 0x124   : > { %2503 = vmatpush1.bf16.msra.mxu0 %v15633_v49  ;;  %6092 = vmatprep.subr.bf16.mxu1 %v15644_v53  ;;  %v283_v49 = vld [vmem:[%s17314_s12 + $0x98] sm:$0xff] }
 0x125   : > { %2504 = vmatprep.subr.bf16.mxu0 %v15641_v52  ;;  %v15719_v52 = vld [vmem:[%s22530_s1 + $0x9ac] ss:$72 sps:$4 sm:$0xff]  }
 0x126   : > { %v15722_v53 = vld [vmem:[%s22530_s1 + $0xb4] ss:$72 sps:$4 sm:$0xff]  }
 0x127   : > { %6093 = vmatpush1.bf16.msra.mxu1 %v15642_v56  ;;  %v18213_v56 = vpack.c.bf16 %v283_v49, %v277_v48  ;;  %v15755_v49 = vld [vmem:[%s22530_s1 + $0xd0c] ss:$72 sps:$4 sm:$0xff]  }
 0x128   : > { %2505 = vmatpush1.bf16.msra.mxu0 %v15639_v54  ;;  %6094 = vmatprep.subr.bf16.mxu1 %v15650_v58  ;;  %v15717_v54 = vld [vmem:[%s22530_s1 + $0x9a8] ss:$72 sps:$4 sm:$0xff]   ;;  %v276_v58 = vld [vmem:[%s17314_s12 + $0x60] sm:$0xff] }
 0x129   : > { %2506 = vmatprep.subr.bf16.mxu0 %v15647_v57  ;;  %v18072_v63 = vpop.f32.mrb[0].mxu1  ;;  %v15720_v57 = vld [vmem:[%s22530_s1 + $0xb0] ss:$72 sps:$4 sm:$0xff]  }
 0x12a   : > { %v18074_v0 = vpop.f32.mrb[1].mxu1 }
 0x12b   : > { %v2206_v2 = vpop.f32.mrb[2].mxu1  ;;  %6095 = vmatpush1.bf16.msra.mxu1 %v15648_v60  ;;  %v15725_v60 = vld [vmem:[%s22530_s1 + $0xa3c] ss:$72 sps:$4 sm:$0xff]  }
 0x12c   : > { %2507 = vmatpush1.bf16.msra.mxu0 %v15645_v59  ;;  %v2207_v5 = vpop.f32.mrb[3].mxu1  ;;  %6096 = vmatprep.subr.bf16.mxu1 %v15656_v62  ;;  %v282_v59 = vld [vmem:[%s17314_s12 + $0x90] sm:$0xff]  ;;  %v15728_v62 = vld [vmem:[%s22530_s1 + $0x144] ss:$72 sps:$4 sm:$0xff]  }
 0x12d   : > { %2508 = vmatprep.subr.bf16.mxu0 %v15653_v61  ;;  %v22536_v61 = vlaneseq  ;;  %v289_v2 = vld [vmem:[%s17314_s12 + $0xc8] sm:$0xff] }
 0x12e   : > { %v15726_v5 = vld [vmem:[%s22530_s1 + $0x140] ss:$72 sps:$4 sm:$0xff]  }
 0x12f   : > { %6097 = vmatpush1.bf16.msra.mxu1 %v15654_v3  ;;  %v295_v3 = vld [vmem:[%s17314_s12 + $0xf8] sm:$0xff] }
 0x130   : > { %2509 = vmatpush1.bf16.msra.mxu0 %v15651_v1  ;;  %6098 = vmatprep.subr.bf16.mxu1 %v15662_v6  ;;  %v18230_v1 = vpack.c.bf16 %v282_v59, %v276_v58  ;;  %v15731_v6 = vld [vmem:[%s22530_s1 + $0xacc] ss:$72 sps:$4 sm:$0xff]   ;;  %v312_v59 = vld [vmem:[%s17314_s12 + $0x180] sm:$0xff] }
 0x131   : > { %2510 = vmatprep.subr.bf16.mxu0 %v15659_v4  ;;  %v15723_v4 = vld [vmem:[%s22530_s1 + $0xa38] ss:$72 sps:$4 sm:$0xff]  }
 0x133   : > { %6099 = vmatpush1.bf16.msra.mxu1 %v15660_v8  ;;  %v15734_v8 = vld [vmem:[%s22530_s1 + $0x1d4] ss:$72 sps:$4 sm:$0xff]  }
 0x134   : > { %2511 = vmatpush1.bf16.msra.mxu0 %v15657_v7  ;;  %6100 = vmatprep.subr.bf16.mxu1 %v15668_v10  ;;  %v18244_v7 = vshrl.u32 %v22536_v61, 7  ;;  %v18252_v10 = vpack.c.bf16 %v295_v3, %v289_v2  ;;  %v15764_v2 = vld [vmem:[%s22530_s1 + $0x4a4] ss:$72 sps:$4 sm:$0xff]   ;;  %v15947_v61 = vld [vmem:[%s22530_s1 + $0x1614] ss:$72 sps:$4 sm:$0xff]  }
 0x135   : > { %2512 = vmatprep.subr.bf16.mxu0 %v15665_v9  ;;  %v15729_v9 = vld [vmem:[%s22530_s1 + $0xac8] ss:$72 sps:$4 sm:$0xff]  }
 0x136   : > { %22624 = vst [vmem:[#allocation8_spill] sm:$0xff] %v18244_v7 }
 0x137   : > { %6101 = vmatpush1.bf16.msra.mxu1 %v15666_v13  ;;  %v288_v13 = vld [vmem:[%s17314_s12 + $0xc0] sm:$0xff] }
 0x138   : > { %2513 = vmatpush1.bf16.msra.mxu0 %v15663_v11  ;;  %6102 = vmatprep.subr.bf16.mxu1 %v15674_v16  ;;  %v15732_v11 = vld [vmem:[%s22530_s1 + $0x1d0] ss:$72 sps:$4 sm:$0xff]   ;;  %v15737_v16 = vld [vmem:[%s22530_s1 + $0xb5c] ss:$72 sps:$4 sm:$0xff]  }
 0x139   : > { %2514 = vmatprep.subr.bf16.mxu0 %v15671_v14  ;;  %v294_v14 = vld [vmem:[%s17314_s12 + $0xf0] sm:$0xff] }
 0x13b   : > { %6103 = vmatpush1.bf16.msra.mxu1 %v15672_v18  ;;  %v15740_v18 = vld [vmem:[%s22530_s1 + $0x264] ss:$72 sps:$4 sm:$0xff]  }
 0x13c   : > { %2515 = vmatpush1.bf16.msra.mxu0 %v15669_v17  ;;  %6104 = vmatprep.subr.bf16.mxu1 %v15680_v20  ;;  %v18264_v17 = vsub.s32 0, %v18244_v7  ;;  %v18273_v20 = vsub.s32 1, %v18244_v7 }
 0x13d   : > { %2516 = vmatprep.subr.bf16.mxu0 %v15677_v19  ;;  %v696_v19 = vld [vmem:[%s22531_s2] sm:$0x3f] }
 0x13e   : > { %22625 = vst [vmem:[#allocation9_spill] sm:$0xff] %v18264_v17  ;;  %22626 = vst [vmem:[#allocation10_spill] sm:$0xff] %v18273_v20 }
 0x13f   : > { %6105 = vmatpush1.bf16.msra.mxu1 %v15678_v22  ;;  %v301_v22 = vld [vmem:[%s17314_s12 + $0x128] sm:$0xff] }
 0x140   : > { %2517 = vmatpush1.bf16.msra.mxu0 %v15675_v21  ;;  %6106 = vmatprep.subr.bf16.mxu1 %v15686_v25  ;;  %v18276_v21 = vpack.c.bf16 %v294_v14, %v288_v13  ;;  %v15735_v25 = vld [vmem:[%s22530_s1 + $0xb58] ss:$72 sps:$4 sm:$0xff]   ;;  %v15765_v13 = vld [vmem:[%s22530_s1 + $0xe28] ss:$72 sps:$4 sm:$0xff]  }
 0x141   : > { %2518 = vmatprep.subr.bf16.mxu0 %v15683_v24  ;;  %v307_v24 = vld [vmem:[%s17314_s12 + $0x158] sm:$0xff] }
 0x142   : > { %v15768_v14 = vld [vmem:[%s22530_s1 + $0x530] ss:$72 sps:$4 sm:$0xff]  }
 0x143   : > { %6107 = vmatpush1.bf16.msra.mxu1 %v15684_v27  ;;  %v701_v27 = vrot.slane %v696_v19, %v18264_v17 }
 0x144   : > { %2519 = vmatpush1.bf16.msra.mxu0 %v15681_v26  ;;  %6108 = vmatprep.subr.bf16.mxu1 %v15692_v29  ;;  %v15738_v26 = vld [vmem:[%s22530_s1 + $0x260] ss:$72 sps:$4 sm:$0xff]   ;;  %v15746_v29 = vld [vmem:[%s22530_s1 + $0x2f4] ss:$72 sps:$4 sm:$0xff]  }
 0x145   : > { %2520 = vmatprep.subr.bf16.mxu0 %v15689_v28  ;;  %v15743_v28 = vld [vmem:[%s22530_s1 + $0xbec] ss:$72 sps:$4 sm:$0xff]  }
 0x147   : > { %6109 = vmatpush1.bf16.msra.mxu1 %v15690_v31  ;;  %v15741_v31 = vld [vmem:[%s22530_s1 + $0xbe8] ss:$72 sps:$4 sm:$0xff]  }
 0x148   : > { %2521 = vmatpush1.bf16.msra.mxu0 %v15687_v30  ;;  %6110 = vmatprep.subr.bf16.mxu1 %v15698_v33  ;;  %v705_v30 = vrot.slane %v696_v19, %v18273_v20  ;;  %v18300_v33 = vpack.c.bf16 %v307_v24, %v301_v22  ;;  %v330_v19 = vld [vmem:[%s17314_s12 + $0x210] sm:$0xff]  ;;  %v15773_v22 = vld [vmem:[%s22530_s1 + $0xebc] ss:$72 sps:$4 sm:$0xff]  }
 0x149   : > { %2522 = vmatprep.subr.bf16.mxu0 %v15695_v32  ;;  %v15744_v32 = vld [vmem:[%s22530_s1 + $0x2f0] ss:$72 sps:$4 sm:$0xff]   ;;  %v15776_v24 = vld [vmem:[%s22530_s1 + $0x5c4] ss:$72 sps:$4 sm:$0xff]  }
 0x14b   : > { %6111 = vmatpush1.bf16.msra.mxu1 %v15696_v35  ;;  %v306_v35 = vld [vmem:[%s17314_s12 + $0x150] sm:$0xff] }
 0x14c   : > { %2523 = vmatpush1.bf16.msra.mxu0 %v15693_v34  ;;  %6112 = vmatprep.subr.bf16.mxu1 %v15704_v37  ;;  %v300_v34 = vld [vmem:[%s17314_s12 + $0x120] sm:$0xff] }
 0x14d   : > { %2524 = vmatprep.subr.bf16.mxu0 %v15701_v36  ;;  %v2203_v36 = vadd.f32 %v18072_v63, %v701_v27  ;;  %v15749_v37 = vld [vmem:[%s22530_s1 + $0xc7c] ss:$72 sps:$4 sm:$0xff]   ;;  %v313_v63 = vld [vmem:[%s17314_s12 + $0x188] sm:$0xff] }
 0x14e   : > { %v343_v27 = vld [vmem:[%s17314_s12 + $0x278] sm:$0xff] }
 0x14f   : > { %6113 = vmatpush1.bf16.msra.mxu1 %v15702_v39  ;;  %v2205_v39 = vadd.f32 %v18074_v0, %v705_v30  ;;  %v15750_v0 = vld [vmem:[%s22530_s1 + $0x380] ss:$72 sps:$4 sm:$0xff]   ;;  %v15779_v30 = vld [vmem:[%s22530_s1 + $0xf4c] ss:$72 sps:$4 sm:$0xff]  }
 0x150   : > { %2525 = vmatpush1.bf16.msra.mxu0 %v15699_v38  ;;  %6114 = vmatprep.subr.bf16.mxu1 %v15710_v41  ;;  %v15752_v38 = vld [vmem:[%s22530_s1 + $0x384] ss:$72 sps:$4 sm:$0xff]  }
 0x151   : > { %2526 = vmatprep.subr.bf16.mxu0 %v15707_v40 }
 0x153   : > { %6115 = vmatpush1.bf16.msra.mxu1 %v15708_v43  ;;  %v18314_v43 = vpack.c.bf16 %v306_v35, %v300_v34  ;;  %v15780_v34 = vld [vmem:[%s22530_s1 + $0x650] ss:$72 sps:$4 sm:$0xff]  }
 0x154   : > { %2527 = vmatpush1.bf16.msra.mxu0 %v15705_v42  ;;  %6197 = vmatprep.subr.bf16.mxu1 %v15713_v45  ;;  %v319_v45 = vld [vmem:[%s17314_s12 + $0x1b8] sm:$0xff] }
 0x155   : > { %6423 = vmatprep.subr.bf16.mxu0 %v15716_v46  ;;  %v18336_v58 = vpack.c.bf16 %v319_v45, %v313_v63  ;;  %v15783_v63 = vld [vmem:[%s22530_s1 + $0xfd8] ss:$72 sps:$4 sm:$0xff]  }
 0x156   : > { %6117 = vmatmul.mubr.bf16.vlgmr.msra.gmra.mrb[8].mxu1 %v17396_v12  ;;  %v15786_v45 = vld [vmem:[%s22530_s1 + $0x6e0] ss:$72 sps:$4 sm:$0xff]  }
 0x157   : > { %2529 = vmatmul.mubr.bf16.vlgmr.msra.gmra.mrb[4].mxu0 %v17602_v23  ;;  %6198 = vmatpush1.bf16.msra.mxu1 %v15711_v47  ;;  %v15747_v47 = vld [vmem:[%s22530_s1 + $0xc78] ss:$72 sps:$4 sm:$0xff]  }
 0x158   : > { %6424 = vmatpush1.bf16.msra.mxu0 %v15714_v51  ;;  %6199 = vmatprep.subr.bf16.mxu1 %v15719_v52  ;;  %v15758_v51 = vld [vmem:[%s22530_s1 + $0x414] ss:$72 sps:$4 sm:$0xff]  }
 0x159   : > { %6425 = vmatprep.subr.bf16.mxu0 %v15722_v53  ;;  %6126 = vmatprep.mubr.bf16.mxu1 %v18213_v56 }
 0x15a   : > { %6455 = vmatprep.mubr.bf16.mxu0 %v17330_v50 }
 0x15b   : > { %6200 = vmatpush1.bf16.msra.mxu1 %v15717_v54  ;;  %v15753_v54 = vld [vmem:[%s22530_s1 + $0xd08] ss:$72 sps:$4 sm:$0xff]  }
 0x15c   : > { %6426 = vmatpush1.bf16.msra.mxu0 %v15720_v57  ;;  %6201 = vmatprep.subr.bf16.mxu1 %v15725_v60  ;;  %v15756_v57 = vld [vmem:[%s22530_s1 + $0x410] ss:$72 sps:$4 sm:$0xff]  }
 0x15d   : > { %6427 = vmatprep.subr.bf16.mxu0 %v15728_v62  ;;  %v318_v60 = vld [vmem:[%s17314_s12 + $0x1b0] sm:$0xff]  ;;  %v15761_v62 = vld [vmem:[%s22530_s1 + $0xd9c] ss:$72 sps:$4 sm:$0xff]  }
 0x15e   : > { %6127 = vmatmul.mubr.bf16.gmra.mrb[12].mxu1 %v18230_v1  ;;  %v18348_v3 = vpack.c.bf16 %v318_v60, %v312_v59  ;;  %v15795_v59 = vld [vmem:[%s22530_s1 + $0x10f8] ss:$72 sps:$4 sm:$0xff]  }
 0x15f   : > { %6202 = vmatpush1.bf16.msra.mxu1 %v15723_v4  ;;  %6136 = vmatprep.mubr.bf16.mxu1 %v18252_v10  ;;  %v325_v4 = vld [vmem:[%s17314_s12 + $0x1e8] sm:$0xff] }
 0x160   : > { %6428 = vmatpush1.bf16.msra.mxu0 %v15726_v5  ;;  %6203 = vmatprep.subr.bf16.mxu1 %v15731_v6  ;;  %v331_v5 = vld [vmem:[%s17314_s12 + $0x218] sm:$0xff]  ;;  %v15798_v60 = vld [vmem:[%s22530_s1 + $0x800] ss:$72 sps:$4 sm:$0xff]  }
 0x161   : > { %6429 = vmatprep.subr.bf16.mxu0 %v15734_v8  ;;  %v15759_v6 = vld [vmem:[%s22530_s1 + $0xd98] ss:$72 sps:$4 sm:$0xff]  }
 0x162   : > { %v15762_v8 = vld [vmem:[%s22530_s1 + $0x4a0] ss:$72 sps:$4 sm:$0xff]  }
 0x163   : > { %6204 = vmatpush1.bf16.msra.mxu1 %v15729_v9  ;;  %v15767_v9 = vld [vmem:[%s22530_s1 + $0xe2c] ss:$72 sps:$4 sm:$0xff]  }
 0x164   : > { %6430 = vmatpush1.bf16.msra.mxu0 %v15732_v11  ;;  %6205 = vmatprep.subr.bf16.mxu1 %v15737_v16  ;;  %v15770_v11 = vld [vmem:[%s22530_s1 + $0x534] ss:$72 sps:$4 sm:$0xff]   ;;  %v18370_v16 = vpack.c.bf16 %v331_v5, %v325_v4  ;;  %v15801_v4 = vld [vmem:[%s22530_s1 + $0x1188] ss:$72 sps:$4 sm:$0xff]  }
 0x165   : > { %6431 = vmatprep.subr.bf16.mxu0 %v15740_v18  ;;  %v324_v18 = vld [vmem:[%s17314_s12 + $0x1e0] sm:$0xff]  ;;  %v15804_v5 = vld [vmem:[%s22530_s1 + $0x890] ss:$72 sps:$4 sm:$0xff]  }
 0x166   : > { %6137 = vmatmul.mubr.bf16.gmra.mrb[16].mxu1 %v18276_v21 }
 0x167   : > { %6206 = vmatpush1.bf16.msra.mxu1 %v15735_v25  ;;  %6146 = vmatprep.mubr.bf16.mxu1 %v18300_v33  ;;  %v18382_v25 = vpack.c.bf16 %v330_v19, %v324_v18  ;;  %v15815_v18 = vld [vmem:[%s22530_s1 + $0x12ac] ss:$72 sps:$4 sm:$0xff]  }
 0x168   : > { %6432 = vmatpush1.bf16.msra.mxu0 %v15738_v26  ;;  %6207 = vmatprep.subr.bf16.mxu1 %v15743_v28  ;;  %v337_v26 = vld [vmem:[%s17314_s12 + $0x248] sm:$0xff]  ;;  %v15771_v28 = vld [vmem:[%s22530_s1 + $0xeb8] ss:$72 sps:$4 sm:$0xff]   ;;  %v15818_v19 = vld [vmem:[%s22530_s1 + $0x9b4] ss:$72 sps:$4 sm:$0xff]  }
 0x169   : > { %6433 = vmatprep.subr.bf16.mxu0 %v15746_v29  ;;  %v15774_v29 = vld [vmem:[%s22530_s1 + $0x5c0] ss:$72 sps:$4 sm:$0xff]   ;;  %v18404_v35 = vpack.c.bf16 %v343_v27, %v337_v26  ;;  %v278_v27 = vld [vmem:[%s17314_s12 + $0x70] sm:$0xff] }
 0x16a   : > { %v2284_v40 = vpop.f32.mrb[0].mxu0 }
 0x16b   : > { %v14551_v41 = vadd.f32 %v2284_v40, %v2203_v36  ;;  %v2286_v42 = vpop.f32.mrb[1].mxu0  ;;  %6208 = vmatpush1.bf16.msra.mxu1 %v15741_v31  ;;  %v15782_v31 = vld [vmem:[%s22530_s1 + $0x654] ss:$72 sps:$4 sm:$0xff]   ;;  %v336_v36 = vld [vmem:[%s17314_s12 + $0x240] sm:$0xff] }
 0x16c   : > { %v14553_v46 = vadd.f32 %v2286_v42, %v2205_v39  ;;  %6434 = vmatpush1.bf16.msra.mxu0 %v15744_v32  ;;  %v2288_v48 = vpop.f32.mrb[2].mxu0  ;;  %6209 = vmatprep.subr.bf16.mxu1 %v15749_v37  ;;  %v15777_v32 = vld [vmem:[%s22530_s1 + $0xf48] ss:$72 sps:$4 sm:$0xff]   ;;  %v15788_v39 = vld [vmem:[%s22530_s1 + $0x6e4] ss:$72 sps:$4 sm:$0xff]   ;;  %v355_v42 = vld [vmem:[%s17314_s12 + $0x2d8] sm:$0xff] }
 0x16d   : > { %6435 = vmatprep.subr.bf16.mxu0 %v15752_v38  ;;  %v2289_v52 = vpop.f32.mrb[3].mxu0  ;;  %v342_v37 = vld [vmem:[%s17314_s12 + $0x270] sm:$0xff]  ;;  %v15785_v38 = vld [vmem:[%s22530_s1 + $0xfdc] ss:$72 sps:$4 sm:$0xff]  }
 0x16e   : > { %v13845_v53 = vpack.c.bf16 %v14553_v46, %v14551_v41  ;;  %6147 = vmatmul.mubr.bf16.gmra.mrb[20].mxu1 %v18314_v43  ;;  %v18416_v40 = vpack.c.bf16 %v342_v37, %v336_v36  ;;  %v349_v41 = vld [vmem:[%s17314_s12 + $0x2a8] sm:$0xff]  ;;  %v15792_v48 = vld [vmem:[%s22530_s1 + $0x770] ss:$72 sps:$4 sm:$0xff]  }
 0x16f   : > { %6210 = vmatpush1.bf16.msra.mxu1 %v15747_v47  ;;  %6156 = vmatprep.mubr.bf16.mxu1 %v18336_v58  ;;  %v15791_v46 = vld [vmem:[%s22530_s1 + $0x106c] ss:$72 sps:$4 sm:$0xff]   ;;  %v15822_v36 = vld [vmem:[%s22530_s1 + $0xa40] ss:$72 sps:$4 sm:$0xff]  }
 0x170   : > { %2561 = vst [vmem:[#allocation2] sm:$0xff] %v13845_v53  ;;  %6436 = vmatpush1.bf16.msra.mxu0 %v15750_v0  ;;  %6211 = vmatprep.subr.bf16.mxu1 %v15755_v49  ;;  %v15794_v47 = vld [vmem:[%s22530_s1 + $0x774] ss:$72 sps:$4 sm:$0xff]   ;;  %v15789_v0 = vld [vmem:[%s22530_s1 + $0x1068] ss:$72 sps:$4 sm:$0xff]   ;;  %v18438_v49 = vpack.c.bf16 %v355_v42, %v349_v41 }
 0x171   : > { %6437 = vmatprep.subr.bf16.mxu0 %v15758_v51  ;;  %v348_v51 = vld [vmem:[%s17314_s12 + $0x2a0] sm:$0xff]  ;;  %v354_v52 = vld [vmem:[%s17314_s12 + $0x2d0] sm:$0xff] }
 0x172   : > { %v15797_v53 = vld [vmem:[%s22530_s1 + $0x10fc] ss:$72 sps:$4 sm:$0xff]   ;;  %v15825_v41 = vld [vmem:[%s22530_s1 + $0x13c8] ss:$72 sps:$4 sm:$0xff]  }
 0x173   : > { %6212 = vmatpush1.bf16.msra.mxu1 %v15753_v54  ;;  %v15800_v54 = vld [vmem:[%s22530_s1 + $0x804] ss:$72 sps:$4 sm:$0xff]   ;;  %v15828_v42 = vld [vmem:[%s22530_s1 + $0xad0] ss:$72 sps:$4 sm:$0xff]  }
 0x174   : > { %6438 = vmatpush1.bf16.msra.mxu0 %v15756_v57  ;;  %6213 = vmatprep.subr.bf16.mxu1 %v15761_v62  ;;  %v18450_v57 = vpack.c.bf16 %v354_v52, %v348_v51  ;;  %v15803_v62 = vld [vmem:[%s22530_s1 + $0x118c] ss:$72 sps:$4 sm:$0xff]   ;;  %v15831_v52 = vld [vmem:[%s22530_s1 + $0x1458] ss:$72 sps:$4 sm:$0xff]  }
 0x175   : > { %6439 = vmatprep.subr.bf16.mxu0 %v15764_v2  ;;  %v15806_v2 = vld [vmem:[%s22530_s1 + $0x894] ss:$72 sps:$4 sm:$0xff]   ;;  %v309_v51 = vld [vmem:[%s17314_s12 + $0x168] sm:$0xff] }
 0x176   : > { %6157 = vmatmul.mubr.bf16.gmra.mrb[24].mxu1 %v18348_v3 }
 0x177   : > { %6214 = vmatpush1.bf16.msra.mxu1 %v15759_v6  ;;  %6166 = vmatprep.mubr.bf16.mxu1 %v18370_v16  ;;  %v15809_v6 = vld [vmem:[%s22530_s1 + $0x121c] ss:$72 sps:$4 sm:$0xff]  }
 0x178   : > { %6440 = vmatpush1.bf16.msra.mxu0 %v15762_v8  ;;  %6215 = vmatprep.subr.bf16.mxu1 %v15767_v9  ;;  %v15812_v8 = vld [vmem:[%s22530_s1 + $0x924] ss:$72 sps:$4 sm:$0xff]   ;;  %v279_v9 = vld [vmem:[%s17314_s12 + $0x78] sm:$0xff] }
 0x179   : > { %6441 = vmatprep.subr.bf16.mxu0 %v15770_v11  ;;  %v285_v11 = vld [vmem:[%s17314_s12 + $0xa8] sm:$0xff] }
 0x17a   : > { %v18498_v26 = vpack.c.bf16 %v285_v11, %v279_v9  ;;  %v15848_v9 = vld [vmem:[%s22530_s1 + $0xc84] ss:$72 sps:$4 sm:$0xff]   ;;  %v315_v11 = vld [vmem:[%s17314_s12 + $0x198] sm:$0xff] }
 0x17b   : > { %6216 = vmatpush1.bf16.msra.mxu1 %v15765_v13  ;;  %v15807_v13 = vld [vmem:[%s22530_s1 + $0x1218] ss:$72 sps:$4 sm:$0xff]  }
 0x17c   : > { %6442 = vmatpush1.bf16.msra.mxu0 %v15768_v14  ;;  %6217 = vmatprep.subr.bf16.mxu1 %v15773_v22  ;;  %v15810_v14 = vld [vmem:[%s22530_s1 + $0x920] ss:$72 sps:$4 sm:$0xff]  }
 0x17d   : > { %6443 = vmatprep.subr.bf16.mxu0 %v15776_v24  ;;  %v15813_v22 = vld [vmem:[%s22530_s1 + $0x12a8] ss:$72 sps:$4 sm:$0xff]  }
 0x17e   : > { %6167 = vmatmul.mubr.bf16.gmra.mrb[28].mxu1 %v18382_v25  ;;  %v15816_v24 = vld [vmem:[%s22530_s1 + $0x9b0] ss:$72 sps:$4 sm:$0xff]  }
 0x17f   : > { %6218 = vmatpush1.bf16.msra.mxu1 %v15771_v28  ;;  %6176 = vmatprep.mubr.bf16.mxu1 %v18404_v35  ;;  %v284_v28 = vld [vmem:[%s17314_s12 + $0xa0] sm:$0xff] }
 0x180   : > { %6444 = vmatpush1.bf16.msra.mxu0 %v15774_v29  ;;  %6219 = vmatprep.subr.bf16.mxu1 %v15779_v30  ;;  %v15821_v29 = vld [vmem:[%s22530_s1 + $0x133c] ss:$72 sps:$4 sm:$0xff]   ;;  %v18520_v37 = vpack.c.bf16 %v284_v28, %v278_v27  ;;  %v15849_v27 = vld [vmem:[%s22530_s1 + $0x1608] ss:$72 sps:$4 sm:$0xff]  }
 0x181   : > { %6445 = vmatprep.subr.bf16.mxu0 %v15782_v31  ;;  %v15824_v30 = vld [vmem:[%s22530_s1 + $0xa44] ss:$72 sps:$4 sm:$0xff]   ;;  %v291_v31 = vld [vmem:[%s17314_s12 + $0xd8] sm:$0xff] }
 0x182   : > { %v15852_v28 = vld [vmem:[%s22530_s1 + $0xd10] ss:$72 sps:$4 sm:$0xff]  }
 0x183   : > { %6220 = vmatpush1.bf16.msra.mxu1 %v15777_v32  ;;  %v297_v32 = vld [vmem:[%s17314_s12 + $0x108] sm:$0xff] }
 0x184   : > { %6446 = vmatpush1.bf16.msra.mxu0 %v15780_v34  ;;  %6221 = vmatprep.subr.bf16.mxu1 %v15785_v38  ;;  %v15819_v34 = vld [vmem:[%s22530_s1 + $0x1338] ss:$72 sps:$4 sm:$0xff]   ;;  %v15827_v38 = vld [vmem:[%s22530_s1 + $0x13cc] ss:$72 sps:$4 sm:$0xff]  }
 0x185   : > { %6447 = vmatprep.subr.bf16.mxu0 %v15788_v39  ;;  %v15830_v39 = vld [vmem:[%s22530_s1 + $0xad4] ss:$72 sps:$4 sm:$0xff]  }
 0x186   : > { %6177 = vmatmul.mubr.bf16.gmra.mrb[32].mxu1 %v18416_v40 }
 0x187   : > { %6222 = vmatpush1.bf16.msra.mxu1 %v15783_v63  ;;  %6186 = vmatprep.mubr.bf16.mxu1 %v18438_v49  ;;  %v18534_v63 = vpack.c.bf16 %v297_v32, %v291_v31  ;;  %v320_v31 = vld [vmem:[%s17314_s12 + $0x1c0] sm:$0xff] }
 0x188   : > { %6448 = vmatpush1.bf16.msra.mxu0 %v15786_v45  ;;  %6223 = vmatprep.subr.bf16.mxu1 %v15791_v46  ;;  %v290_v45 = vld [vmem:[%s17314_s12 + $0xd0] sm:$0xff]  ;;  %v296_v46 = vld [vmem:[%s17314_s12 + $0x100] sm:$0xff] }
 0x189   : > { %6449 = vmatprep.subr.bf16.mxu0 %v15794_v47  ;;  %22627 = vst [vmem:[#allocation11_spill] sm:$0xff] %v18534_v63  ;;  %v15833_v47 = vld [vmem:[%s22530_s1 + $0x145c] ss:$72 sps:$4 sm:$0xff]  }
 0x18a   : > { %v15857_v32 = vld [vmem:[%s22530_s1 + $0x169c] ss:$72 sps:$4 sm:$0xff]  }
 0x18b   : > { %6224 = vmatpush1.bf16.msra.mxu1 %v15789_v0  ;;  %v15836_v0 = vld [vmem:[%s22530_s1 + $0xb64] ss:$72 sps:$4 sm:$0xff]  }
 0x18c   : > { %6450 = vmatpush1.bf16.msra.mxu0 %v15792_v48  ;;  %6225 = vmatprep.subr.bf16.mxu1 %v15797_v53  ;;  %v303_v48 = vld [vmem:[%s17314_s12 + $0x138] sm:$0xff]  ;;  %v15834_v53 = vld [vmem:[%s22530_s1 + $0xb60] ss:$72 sps:$4 sm:$0xff]  }
 0x18d   : > { %6451 = vmatprep.subr.bf16.mxu0 %v15800_v54  ;;  %v18556_v54 = vpack.c.bf16 %v296_v46, %v290_v45  ;;  %v15863_v45 = vld [vmem:[%s22530_s1 + $0x172c] ss:$72 sps:$4 sm:$0xff]  }
 0x18e   : > { %6187 = vmatmul.mubr.bf16.gmra.mrb[36].mxu1 %v18450_v57  ;;  %v15866_v46 = vld [vmem:[%s22530_s1 + $0xe34] ss:$72 sps:$4 sm:$0xff]  }
 0x18f   : > { %6226 = vmatpush1.bf16.msra.mxu1 %v15795_v59  ;;  %6229 = vmatprep.mubr.bf16.mxu1 %v17340_v55  ;;  %22628 = vst [vmem:[#allocation12_spill] sm:$0xff] %v18556_v54  ;;  %v15839_v59 = vld [vmem:[%s22530_s1 + $0x14ec] ss:$72 sps:$4 sm:$0xff]  }
 0x190   : > { %6452 = vmatpush1.bf16.msra.mxu0 %v15798_v60  ;;  %6227 = vmatprep.subr.bf16.mxu1 %v15803_v62  ;;  %v15842_v60 = vld [vmem:[%s22530_s1 + $0xbf4] ss:$72 sps:$4 sm:$0xff]   ;;  %v15837_v62 = vld [vmem:[%s22530_s1 + $0x14e8] ss:$72 sps:$4 sm:$0xff]  }
 0x191   : > { %6453 = vmatprep.subr.bf16.mxu0 %v15806_v2  ;;  %v15840_v2 = vld [vmem:[%s22530_s1 + $0xbf0] ss:$72 sps:$4 sm:$0xff]  }
 0x193   : > { %6228 = vmatpush1.bf16.msra.mxu1 %v15801_v4  ;;  %v18570_v4 = vpack.c.bf16 %v309_v51, %v303_v48  ;;  %v326_v51 = vld [vmem:[%s17314_s12 + $0x1f0] sm:$0xff] }
 0x194   : > { %6454 = vmatpush1.bf16.msra.mxu0 %v15804_v5  ;;  %6310 = vmatprep.subr.bf16.mxu1 %v15809_v6  ;;  %v302_v5 = vld [vmem:[%s17314_s12 + $0x130] sm:$0xff]  ;;  %v308_v6 = vld [vmem:[%s17314_s12 + $0x160] sm:$0xff] }
 0x195   : > { %6536 = vmatprep.subr.bf16.mxu0 %v15812_v8  ;;  %22629 = vst [vmem:[#allocation13_spill] sm:$0xff] %v18570_v4  ;;  %v15845_v8 = vld [vmem:[%s22530_s1 + $0x157c] ss:$72 sps:$4 sm:$0xff]  }
 0x196   : > { %6230 = vmatmul.mubr.bf16.vlgmr.msra.gmra.mrb[8].mxu1 %v17404_v15 }
 0x197   : > { %6456 = vmatmul.mubr.bf16.vlgmr.msra.gmra.mrb[8].mxu0 %v17396_v12  ;;  %6311 = vmatpush1.bf16.msra.mxu1 %v15807_v13  ;;  %v321_v13 = vld [vmem:[%s17314_s12 + $0x1c8] sm:$0xff] }
 0x198   : > { %6537 = vmatpush1.bf16.msra.mxu0 %v15810_v14  ;;  %6312 = vmatprep.subr.bf16.mxu1 %v15815_v18  ;;  %v15843_v14 = vld [vmem:[%s22530_s1 + $0x1578] ss:$72 sps:$4 sm:$0xff]  }
 0x199   : > { %6538 = vmatprep.subr.bf16.mxu0 %v15818_v19  ;;  %6239 = vmatprep.mubr.bf16.mxu1 %v18498_v26  ;;  %v15846_v18 = vld [vmem:[%s22530_s1 + $0xc80] ss:$72 sps:$4 sm:$0xff]   ;;  %v18592_v19 = vpack.c.bf16 %v308_v6, %v302_v5 }
 0x19a   : > { %6465 = vmatprep.mubr.bf16.mxu0 %v18213_v56  ;;  %v15870_v5 = vld [vmem:[%s22530_s1 + $0xec0] ss:$72 sps:$4 sm:$0xff]  }
 0x19b   : > { %6313 = vmatpush1.bf16.msra.mxu1 %v15813_v22  ;;  %v15851_v22 = vld [vmem:[%s22530_s1 + $0x160c] ss:$72 sps:$4 sm:$0xff]  }
 0x19c   : > { %6539 = vmatpush1.bf16.msra.mxu0 %v15816_v24  ;;  %6314 = vmatprep.subr.bf16.mxu1 %v15821_v29  ;;  %v15854_v24 = vld [vmem:[%s22530_s1 + $0xd14] ss:$72 sps:$4 sm:$0xff]   ;;  %v18606_v29 = vpack.c.bf16 %v321_v13, %v315_v11  ;;  %v15873_v11 = vld [vmem:[%s22530_s1 + $0x1848] ss:$72 sps:$4 sm:$0xff]  }
 0x19d   : > { %6540 = vmatprep.subr.bf16.mxu0 %v15824_v30  ;;  %v314_v30 = vld [vmem:[%s17314_s12 + $0x190] sm:$0xff] }
 0x19e   : > { %6240 = vmatmul.mubr.bf16.gmra.mrb[12].mxu1 %v18520_v37  ;;  %22630 = vst [vmem:[#allocation14_spill] sm:$0xff] %v18606_v29  ;;  %v15876_v13 = vld [vmem:[%s22530_s1 + $0xf50] ss:$72 sps:$4 sm:$0xff]  }
 0x19f   : > { %6466 = vmatmul.mubr.bf16.gmra.mrb[12].mxu0 %v18230_v1  ;;  %6315 = vmatpush1.bf16.msra.mxu1 %v15819_v34  ;;  %v15860_v34 = vld [vmem:[%s22530_s1 + $0xda4] ss:$72 sps:$4 sm:$0xff]  }
 0x1a0   : > { %6541 = vmatpush1.bf16.msra.mxu0 %v15822_v36  ;;  %6316 = vmatprep.subr.bf16.mxu1 %v15827_v38  ;;  %v327_v36 = vld [vmem:[%s17314_s12 + $0x1f8] sm:$0xff]  ;;  %v333_v38 = vld [vmem:[%s17314_s12 + $0x228] sm:$0xff] }
 0x1a1   : > { %6542 = vmatprep.subr.bf16.mxu0 %v15830_v39  ;;  %6249 = vmatprep.mubr.bf16.mxu1 %v18534_v63  ;;  %v15855_v39 = vld [vmem:[%s22530_s1 + $0x1698] ss:$72 sps:$4 sm:$0xff]   ;;  %v18642_v48 = vpack.c.bf16 %v333_v38, %v327_v36  ;;  %v15887_v36 = vld [vmem:[%s22530_s1 + $0x196c] ss:$72 sps:$4 sm:$0xff]  }
 0x1a2   : > { %6475 = vmatprep.mubr.bf16.mxu0 %v18252_v10  ;;  %v15890_v38 = vld [vmem:[%s22530_s1 + $0x1074] ss:$72 sps:$4 sm:$0xff]  }
 0x1a3   : > { %6317 = vmatpush1.bf16.msra.mxu1 %v15825_v41  ;;  %v15858_v41 = vld [vmem:[%s22530_s1 + $0xda0] ss:$72 sps:$4 sm:$0xff]  }
 0x1a4   : > { %6543 = vmatpush1.bf16.msra.mxu0 %v15828_v42  ;;  %6318 = vmatprep.subr.bf16.mxu1 %v15833_v47  ;;  %v18628_v42 = vpack.c.bf16 %v320_v31, %v314_v30  ;;  %v15861_v47 = vld [vmem:[%s22530_s1 + $0x1728] ss:$72 sps:$4 sm:$0xff]   ;;  %v15879_v31 = vld [vmem:[%s22530_s1 + $0x18d8] ss:$72 sps:$4 sm:$0xff]  }
 0x1a5   : > { %6544 = vmatprep.subr.bf16.mxu0 %v15836_v0  ;;  %v15864_v0 = vld [vmem:[%s22530_s1 + $0xe30] ss:$72 sps:$4 sm:$0xff]   ;;  %v357_v30 = vld [vmem:[%s17314_s12 + $0x2e8] sm:$0xff] }
 0x1a6   : > { %6250 = vmatmul.mubr.bf16.gmra.mrb[16].mxu1 %v18556_v54 }
 0x1a7   : > { %6476 = vmatmul.mubr.bf16.gmra.mrb[16].mxu0 %v18276_v21  ;;  %6319 = vmatpush1.bf16.msra.mxu1 %v15831_v52  ;;  %v332_v52 = vld [vmem:[%s17314_s12 + $0x220] sm:$0xff] }
 0x1a8   : > { %6545 = vmatpush1.bf16.msra.mxu0 %v15834_v53  ;;  %6320 = vmatprep.subr.bf16.mxu1 %v15839_v59  ;;  %v15869_v53 = vld [vmem:[%s22530_s1 + $0x17bc] ss:$72 sps:$4 sm:$0xff]   ;;  %v18664_v6 = vpack.c.bf16 %v332_v52, %v326_v51  ;;  %v15891_v52 = vld [vmem:[%s22530_s1 + $0x19f8] ss:$72 sps:$4 sm:$0xff]  }
 0x1a9   : > { %6546 = vmatprep.subr.bf16.mxu0 %v15842_v60  ;;  %6259 = vmatprep.mubr.bf16.mxu1 %v18570_v4  ;;  %v15872_v59 = vld [vmem:[%s22530_s1 + $0xec4] ss:$72 sps:$4 sm:$0xff]   ;;  %v339_v60 = vld [vmem:[%s17314_s12 + $0x258] sm:$0xff] }
 0x1aa   : > { %6485 = vmatprep.mubr.bf16.mxu0 %v18300_v33  ;;  %v15896_v51 = vld [vmem:[%s22530_s1 + $0x1104] ss:$72 sps:$4 sm:$0xff]  }
 0x1ab   : > { %6321 = vmatpush1.bf16.msra.mxu1 %v15837_v62  ;;  %v345_v62 = vld [vmem:[%s17314_s12 + $0x288] sm:$0xff] }
 0x1ac   : > { %6547 = vmatpush1.bf16.msra.mxu0 %v15840_v2  ;;  %6322 = vmatprep.subr.bf16.mxu1 %v15845_v8  ;;  %v15867_v2 = vld [vmem:[%s22530_s1 + $0x17b8] ss:$72 sps:$4 sm:$0xff]   ;;  %v15875_v8 = vld [vmem:[%s22530_s1 + $0x184c] ss:$72 sps:$4 sm:$0xff]  }
 0x1ad   : > { %6548 = vmatprep.subr.bf16.mxu0 %v15848_v9  ;;  %v15878_v9 = vld [vmem:[%s22530_s1 + $0xf54] ss:$72 sps:$4 sm:$0xff]  }
 0x1ae   : > { %6260 = vmatmul.mubr.bf16.gmra.mrb[20].mxu1 %v18592_v19 }
 0x1af   : > { %6486 = vmatmul.mubr.bf16.gmra.mrb[20].mxu0 %v18314_v43  ;;  %6323 = vmatpush1.bf16.msra.mxu1 %v15843_v14  ;;  %v18678_v14 = vpack.c.bf16 %v345_v62, %v339_v60  ;;  %v15899_v60 = vld [vmem:[%s22530_s1 + $0x1a8c] ss:$72 sps:$4 sm:$0xff]  }
 0x1b0   : > { %6549 = vmatpush1.bf16.msra.mxu0 %v15846_v18  ;;  %6324 = vmatprep.subr.bf16.mxu1 %v15851_v22  ;;  %v338_v18 = vld [vmem:[%s17314_s12 + $0x250] sm:$0xff]  ;;  %v344_v22 = vld [vmem:[%s17314_s12 + $0x280] sm:$0xff] }
 0x1b1   : > { %6550 = vmatprep.subr.bf16.mxu0 %v15854_v24  ;;  %6269 = vmatprep.mubr.bf16.mxu1 %v18606_v29  ;;  %v15881_v24 = vld [vmem:[%s22530_s1 + $0x18dc] ss:$72 sps:$4 sm:$0xff]  }
 0x1b2   : > { %6495 = vmatprep.mubr.bf16.mxu0 %v18336_v58  ;;  %v15902_v62 = vld [vmem:[%s22530_s1 + $0x1194] ss:$72 sps:$4 sm:$0xff]  }
 0x1b3   : > { %6325 = vmatpush1.bf16.msra.mxu1 %v15849_v27  ;;  %v15884_v27 = vld [vmem:[%s22530_s1 + $0xfe4] ss:$72 sps:$4 sm:$0xff]  }
 0x1b4   : > { %6551 = vmatpush1.bf16.msra.mxu0 %v15852_v28  ;;  %6326 = vmatprep.subr.bf16.mxu1 %v15857_v32  ;;  %v351_v28 = vld [vmem:[%s17314_s12 + $0x2b8] sm:$0xff]  ;;  %v15882_v32 = vld [vmem:[%s22530_s1 + $0xfe0] ss:$72 sps:$4 sm:$0xff]  }
 0x1b5   : > { %6552 = vmatprep.subr.bf16.mxu0 %v15860_v34  ;;  %v18700_v34 = vpack.c.bf16 %v344_v22, %v338_v18  ;;  %v15903_v18 = vld [vmem:[%s22530_s1 + $0x1220] ss:$72 sps:$4 sm:$0xff]  }
 0x1b6   : > { %6270 = vmatmul.mubr.bf16.gmra.mrb[24].mxu1 %v18628_v42  ;;  %v15906_v22 = vld [vmem:[%s22530_s1 + $0x28] ss:$72 sps:$4 sm:$0xff]  }
 0x1b7   : > { %6496 = vmatmul.mubr.bf16.gmra.mrb[24].mxu0 %v18348_v3  ;;  %6327 = vmatpush1.bf16.msra.mxu1 %v15855_v39  ;;  %v15885_v39 = vld [vmem:[%s22530_s1 + $0x1968] ss:$72 sps:$4 sm:$0xff]  }
 0x1b8   : > { %6553 = vmatpush1.bf16.msra.mxu0 %v15858_v41  ;;  %6328 = vmatprep.subr.bf16.mxu1 %v15863_v45  ;;  %v15888_v41 = vld [vmem:[%s22530_s1 + $0x1070] ss:$72 sps:$4 sm:$0xff]   ;;  %v18714_v45 = vpack.c.bf16 %v357_v30, %v351_v28 }
 0x1b9   : > { %6554 = vmatprep.subr.bf16.mxu0 %v15866_v46  ;;  %6279 = vmatprep.mubr.bf16.mxu1 %v18642_v48  ;;  %v350_v46 = vld [vmem:[%s17314_s12 + $0x2b0] sm:$0xff]  ;;  %v15912_v30 = vld [vmem:[%s22530_s1 + $0xb8] ss:$72 sps:$4 sm:$0xff]  }
 0x1ba   : > { %6505 = vmatprep.mubr.bf16.mxu0 %v18370_v16  ;;  %v15909_v28 = vld [vmem:[%s22530_s1 + $0x12b0] ss:$72 sps:$4 sm:$0xff]  }
 0x1bb   : > { %6329 = vmatpush1.bf16.msra.mxu1 %v15861_v47  ;;  %v356_v47 = vld [vmem:[%s17314_s12 + $0x2e0] sm:$0xff] }
 0x1bc   : > { %6555 = vmatpush1.bf16.msra.mxu0 %v15864_v0  ;;  %6330 = vmatprep.subr.bf16.mxu1 %v15869_v53  ;;  %v15893_v0 = vld [vmem:[%s22530_s1 + $0x19fc] ss:$72 sps:$4 sm:$0xff]   ;;  %v15894_v53 = vld [vmem:[%s22530_s1 + $0x1100] ss:$72 sps:$4 sm:$0xff]  }
 0x1bd   : > { %6556 = vmatprep.subr.bf16.mxu0 %v15872_v59  ;;  %v18734_v59 = vpack.c.bf16 %v356_v47, %v350_v46  ;;  %v299_v46 = vld [vmem:[%s17314_s12 + $0x118] sm:$0xff]  ;;  %v15915_v47 = vld [vmem:[%s22530_s1 + $0x1340] ss:$72 sps:$4 sm:$0xff]  }
 0x1be   : > { %6280 = vmatmul.mubr.bf16.gmra.mrb[28].mxu1 %v18664_v6 }
 0x1bf   : > { %6506 = vmatmul.mubr.bf16.gmra.mrb[28].mxu0 %v18382_v25  ;;  %6331 = vmatpush1.bf16.msra.mxu1 %v15867_v2  ;;  %v15897_v2 = vld [vmem:[%s22530_s1 + $0x1a88] ss:$72 sps:$4 sm:$0xff]  }
 0x1c0   : > { %6557 = vmatpush1.bf16.msra.mxu0 %v15870_v5  ;;  %6332 = vmatprep.subr.bf16.mxu1 %v15875_v8  ;;  %v15900_v5 = vld [vmem:[%s22530_s1 + $0x1190] ss:$72 sps:$4 sm:$0xff]   ;;  %v15905_v8 = vld [vmem:[%s22530_s1 + $0x1224] ss:$72 sps:$4 sm:$0xff]  }
 0x1c1   : > { %6558 = vmatprep.subr.bf16.mxu0 %v15878_v9  ;;  %6289 = vmatprep.mubr.bf16.mxu1 %v18678_v14  ;;  %v15908_v9 = vld [vmem:[%s22530_s1 + $0x2c] ss:$72 sps:$4 sm:$0xff]  }
 0x1c2   : > { %6515 = vmatprep.mubr.bf16.mxu0 %v18404_v35 }
 0x1c3   : > { %6333 = vmatpush1.bf16.msra.mxu1 %v15873_v11  ;;  %v281_v11 = vld [vmem:[%s17314_s12 + $0x88] sm:$0xff] }
 0x1c4   : > { %6559 = vmatpush1.bf16.msra.mxu0 %v15876_v13  ;;  %6334 = vmatprep.subr.bf16.mxu1 %v15881_v24  ;;  %v287_v13 = vld [vmem:[%s17314_s12 + $0xb8] sm:$0xff] }
 0x1c5   : > { %6560 = vmatprep.subr.bf16.mxu0 %v15884_v27  ;;  %v15911_v24 = vld [vmem:[%s22530_s1 + $0x12b4] ss:$72 sps:$4 sm:$0xff]  }
 0x1c6   : > { %6290 = vmatmul.mubr.bf16.gmra.mrb[32].mxu1 %v18700_v34  ;;  %v15914_v27 = vld [vmem:[%s22530_s1 + $0xbc] ss:$72 sps:$4 sm:$0xff]  }
 0x1c7   : > { %6516 = vmatmul.mubr.bf16.gmra.mrb[32].mxu0 %v18416_v40  ;;  %6335 = vmatpush1.bf16.msra.mxu1 %v15879_v31  ;;  %v18778_v31 = vpack.c.bf16 %v287_v13, %v281_v11  ;;  %v15932_v11 = vld [vmem:[%s22530_s1 + $0x26c] ss:$72 sps:$4 sm:$0xff]  }
 0x1c8   : > { %6561 = vmatpush1.bf16.msra.mxu0 %v15882_v32  ;;  %6336 = vmatprep.subr.bf16.mxu1 %v15887_v36  ;;  %v280_v32 = vld [vmem:[%s17314_s12 + $0x80] sm:$0xff]  ;;  %v286_v36 = vld [vmem:[%s17314_s12 + $0xb0] sm:$0xff]  ;;  %v305_v13 = vld [vmem:[%s17314_s12 + $0x148] sm:$0xff] }
 0x1c9   : > { %6562 = vmatprep.subr.bf16.mxu0 %v15890_v38  ;;  %6299 = vmatprep.mubr.bf16.mxu1 %v18714_v45  ;;  %v15917_v38 = vld [vmem:[%s22530_s1 + $0x1344] ss:$72 sps:$4 sm:$0xff]  }
 0x1ca   : > { %6525 = vmatprep.mubr.bf16.mxu0 %v18438_v49 }
 0x1cb   : > { %6337 = vmatpush1.bf16.msra.mxu1 %v15885_v39  ;;  %v15920_v39 = vld [vmem:[%s22530_s1 + $0x14c] ss:$72 sps:$4 sm:$0xff]  }
 0x1cc   : > { %6563 = vmatpush1.bf16.msra.mxu0 %v15888_v41  ;;  %6338 = vmatprep.subr.bf16.mxu1 %v15893_v0  ;;  %v293_v41 = vld [vmem:[%s17314_s12 + $0xe8] sm:$0xff] }
 0x1cd   : > { %6564 = vmatprep.subr.bf16.mxu0 %v15896_v51  ;;  %v15918_v0 = vld [vmem:[%s22530_s1 + $0x148] ss:$72 sps:$4 sm:$0xff]   ;;  %v18800_v51 = vpack.c.bf16 %v286_v36, %v280_v32  ;;  %v15935_v32 = vld [vmem:[%s22530_s1 + $0x14f4] ss:$72 sps:$4 sm:$0xff]  }
 0x1ce   : > { %6300 = vmatmul.mubr.bf16.gmra.mrb[36].mxu1 %v18734_v59  ;;  %v15938_v36 = vld [vmem:[%s22530_s1 + $0x2fc] ss:$72 sps:$4 sm:$0xff]  }
 0x1cf   : > { %6526 = vmatmul.mubr.bf16.gmra.mrb[36].mxu0 %v18450_v57  ;;  %6339 = vmatpush1.bf16.msra.mxu1 %v15891_v52  ;;  %22631 = vst [vmem:[#allocation15_spill] sm:$0xff] %v18800_v51  ;;  %v15923_v52 = vld [vmem:[%s22530_s1 + $0x13d4] ss:$72 sps:$4 sm:$0xff]  }
 0x1d0   : > { %6565 = vmatpush1.bf16.msra.mxu0 %v15894_v53  ;;  %6340 = vmatprep.subr.bf16.mxu1 %v15899_v60  ;;  %v15926_v53 = vld [vmem:[%s22530_s1 + $0x1dc] ss:$72 sps:$4 sm:$0xff]   ;;  %v15921_v60 = vld [vmem:[%s22530_s1 + $0x13d0] ss:$72 sps:$4 sm:$0xff]  }
 0x1d1   : > { %6566 = vmatprep.subr.bf16.mxu0 %v15902_v62  ;;  %6342 = vmatprep.mubr.bf16.mxu1 %v17489_v44  ;;  %v15924_v62 = vld [vmem:[%s22530_s1 + $0x1d8] ss:$72 sps:$4 sm:$0xff]  }
 0x1d2   : > { %6568 = vmatprep.mubr.bf16.mxu0 %v17340_v55 }
 0x1d3   : > { %6341 = vmatpush1.bf16.msra.mxu1 %v15897_v2  ;;  %v18814_v2 = vpack.c.bf16 %v299_v46, %v293_v41  ;;  %v304_v46 = vld [vmem:[%s17314_s12 + $0x140] sm:$0xff] }
 0x1d4   : > { %6567 = vmatpush1.bf16.msra.mxu0 %v15900_v5  ;;  %6762 = vmatprep.subr.bf16.mxu1 %v15908_v9  ;;  %v292_v5 = vld [vmem:[%s17314_s12 + $0xe0] sm:$0xff] }
 0x1d5   : > { %6649 = vmatprep.subr.bf16.mxu0 %v15905_v8  ;;  %v298_v8 = vld [vmem:[%s17314_s12 + $0x110] sm:$0xff]  ;;  %v15929_v9 = vld [vmem:[%s22530_s1 + $0x1464] ss:$72 sps:$4 sm:$0xff]  }
 0x1d6   : > { %6343 = vmatmul.mubr.bf16.vlgmr.msra.gmra.mrb[8].mxu1 %v17602_v23 }
 0x1d7   : > { %6569 = vmatmul.mubr.bf16.vlgmr.msra.gmra.mrb[8].mxu0 %v17404_v15  ;;  %6763 = vmatpush1.bf16.msra.mxu1 %v15906_v22  ;;  %v15927_v22 = vld [vmem:[%s22530_s1 + $0x1460] ss:$72 sps:$4 sm:$0xff]  }
 0x1d8   : > { %6650 = vmatpush1.bf16.msra.mxu0 %v15903_v18  ;;  %6764 = vmatprep.subr.bf16.mxu1 %v15914_v27  ;;  %v311_v18 = vld [vmem:[%s17314_s12 + $0x178] sm:$0xff]  ;;  %v18836_v27 = vpack.c.bf16 %v298_v8, %v292_v5  ;;  %v317_v5 = vld [vmem:[%s17314_s12 + $0x1a8] sm:$0xff] }
 0x1d9   : > { %6651 = vmatprep.subr.bf16.mxu0 %v15911_v24  ;;  %6352 = vmatprep.mubr.bf16.mxu1 %v18778_v31  ;;  %v15930_v24 = vld [vmem:[%s22530_s1 + $0x268] ss:$72 sps:$4 sm:$0xff]   ;;  %v18856_v41 = vpack.c.bf16 %v311_v18, %v305_v13  ;;  %v323_v8 = vld [vmem:[%s17314_s12 + $0x1d8] sm:$0xff] }
 0x1da   : > { %6578 = vmatprep.mubr.bf16.mxu0 %v18498_v26  ;;  %v15942_v13 = vld [vmem:[%s22530_s1 + $0x388] ss:$72 sps:$4 sm:$0xff]  }
 0x1db   : > { %6765 = vmatpush1.bf16.msra.mxu1 %v15912_v30  ;;  %v18842_v30 = vsub.s32 3, %v18244_v7 }
 0x1dc   : > { %6652 = vmatpush1.bf16.msra.mxu0 %v15909_v28  ;;  %6766 = vmatprep.subr.bf16.mxu1 %v15920_v39  ;;  %v18839_v28 = vsub.s32 2, %v18244_v7  ;;  %v15936_v39 = vld [vmem:[%s22530_s1 + $0x2f8] ss:$72 sps:$4 sm:$0xff]  }
 0x1dd   : > { %6653 = vmatprep.subr.bf16.mxu0 %v15917_v38  ;;  %22633 = vst [vmem:[#allocation17_spill] sm:$0xff] %v18842_v30  ;;  %v15933_v38 = vld [vmem:[%s22530_s1 + $0x14f0] ss:$72 sps:$4 sm:$0xff]  }
 0x1de   : > { %6353 = vmatmul.mubr.bf16.gmra.mrb[12].mxu1 %v18800_v51  ;;  %22632 = vst [vmem:[#allocation16_spill] sm:$0xff] %v18839_v28 }
 0x1df   : > { %6579 = vmatmul.mubr.bf16.gmra.mrb[12].mxu0 %v18520_v37  ;;  %6767 = vmatpush1.bf16.msra.mxu1 %v15918_v0  ;;  %v17019_v0 = vld [vmem:[%s22531_s2] sm:$0x3f] }
 0x1e0   : > { %6654 = vmatpush1.bf16.msra.mxu0 %v15915_v47  ;;  %6768 = vmatprep.subr.bf16.mxu1 %v15926_v53  ;;  %v310_v47 = vld [vmem:[%s17314_s12 + $0x170] sm:$0xff]  ;;  %v713_v53 = vrot.slane %v17019_v0, %v18842_v30 }
 0x1e1   : > { %6655 = vmatprep.subr.bf16.mxu0 %v15923_v52  ;;  %6362 = vmatprep.mubr.bf16.mxu1 %v18814_v2  ;;  %v709_v52 = vrot.slane %v17019_v0, %v18839_v28 }
 0x1e2   : > { %6588 = vmatprep.mubr.bf16.mxu0 %v18534_v63 }
 0x1e3   : > { %6769 = vmatpush1.bf16.msra.mxu1 %v15924_v62  ;;  %v15944_v62 = vld [vmem:[%s22530_s1 + $0x38c] ss:$72 sps:$4 sm:$0xff]  }
 0x1e4   : > { %6656 = vmatpush1.bf16.msra.mxu0 %v15921_v60  ;;  %6770 = vmatprep.subr.bf16.mxu1 %v15932_v11  ;;  %v15941_v60 = vld [vmem:[%s22530_s1 + $0x1584] ss:$72 sps:$4 sm:$0xff]   ;;  %v15939_v11 = vld [vmem:[%s22530_s1 + $0x1580] ss:$72 sps:$4 sm:$0xff]  }
 0x1e5   : > { %6657 = vmatprep.subr.bf16.mxu0 %v15929_v9 }
 0x1e6   : > { %6363 = vmatmul.mubr.bf16.gmra.mrb[16].mxu1 %v18836_v27 }
 0x1e7   : > { %6589 = vmatmul.mubr.bf16.gmra.mrb[16].mxu0 %v18556_v54  ;;  %6771 = vmatpush1.bf16.msra.mxu1 %v15930_v24  ;;  %v18883_v24 = vpack.c.bf16 %v310_v47, %v304_v46  ;;  %v15945_v46 = vld [vmem:[%s22530_s1 + $0x1610] ss:$72 sps:$4 sm:$0xff]   ;;  %v316_v47 = vld [vmem:[%s17314_s12 + $0x1a0] sm:$0xff] }
 0x1e8   : > { %6658 = vmatpush1.bf16.msra.mxu0 %v15927_v22  ;;  %6772 = vmatprep.subr.bf16.mxu1 %v15938_v36 }
 0x1e9   : > { %6659 = vmatprep.subr.bf16.mxu0 %v15935_v32  ;;  %v2407_v9 = vpop.f32.mrb[4].mxu1  ;;  %6372 = vmatprep.mubr.bf16.mxu1 %v18856_v41 }
 0x1ea   : > { %6598 = vmatprep.mubr.bf16.mxu0 %v18570_v4  ;;  %v14554_v18 = vadd.f32 %v2407_v9, %v709_v52  ;;  %v2409_v22 = vpop.f32.mrb[5].mxu1  ;;  %v15950_v52 = vld [vmem:[%s22530_s1 + $0x41c] ss:$72 sps:$4 sm:$0xff]  }
 0x1eb   : > { %v14555_v32 = vadd.f32 %v2409_v22, %v713_v53  ;;  %v2411_v36 = vpop.f32.mrb[6].mxu1  ;;  %6773 = vmatpush1.bf16.msra.mxu1 %v15936_v39  ;;  %v18897_v39 = vpack.c.bf16 %v323_v8, %v317_v5  ;;  %v322_v53 = vld [vmem:[%s17314_s12 + $0x1d0] sm:$0xff]  ;;  %v329_v5 = vld [vmem:[%s17314_s12 + $0x208] sm:$0xff]  ;;  %v15962_v22 = vld [vmem:[%s22530_s1 + $0x53c] ss:$72 sps:$4 sm:$0xff]  }
 0x1ec   : > { %6660 = vmatpush1.bf16.msra.mxu0 %v15933_v38  ;;  %v2412_v0 = vpop.f32.mrb[7].mxu1  ;;  %6774 = vmatprep.subr.bf16.mxu1 %v15944_v62  ;;  %v15948_v38 = vld [vmem:[%s22530_s1 + $0x418] ss:$72 sps:$4 sm:$0xff]   ;;  %v15956_v62 = vld [vmem:[%s22530_s1 + $0x4ac] ss:$72 sps:$4 sm:$0xff]  }
 0x1ed   : > { %6661 = vmatprep.subr.bf16.mxu0 %v15941_v60  ;;  %v13846_v9 = vpack.c.bf16 %v14555_v32, %v14554_v18  ;;  %v15953_v60 = vld [vmem:[%s22530_s1 + $0x16a4] ss:$72 sps:$4 sm:$0xff]   ;;  %v15951_v8 = vld [vmem:[%s22530_s1 + $0x16a0] ss:$72 sps:$4 sm:$0xff]   ;;  %v15959_v18 = vld [vmem:[%s22530_s1 + $0x1734] ss:$72 sps:$4 sm:$0xff]  }
 0x1ee   : > { %6373 = vmatmul.mubr.bf16.gmra.mrb[20].mxu1 %v18883_v24  ;;  %v15957_v32 = vld [vmem:[%s22530_s1 + $0x1730] ss:$72 sps:$4 sm:$0xff]  }
 0x1ef   : > { %6599 = vmatmul.mubr.bf16.gmra.mrb[20].mxu0 %v18592_v19  ;;  %2562 = vst [vmem:[#allocation2 + $0x8] sm:$0xff] %v13846_v9  ;;  %6775 = vmatpush1.bf16.msra.mxu1 %v15942_v13  ;;  %v18919_v13 = vpack.c.bf16 %v322_v53, %v316_v47  ;;  %v15960_v36 = vld [vmem:[%s22530_s1 + $0x538] ss:$72 sps:$4 sm:$0xff]   ;;  %v334_v9 = vld [vmem:[%s17314_s12 + $0x230] sm:$0xff]  ;;  %v341_v47 = vld [vmem:[%s17314_s12 + $0x268] sm:$0xff] }
 0x1f0   : > { %6662 = vmatpush1.bf16.msra.mxu0 %v15939_v11  ;;  %6776 = vmatprep.subr.bf16.mxu1 %v15950_v52  ;;  %v335_v11 = vld [vmem:[%s17314_s12 + $0x238] sm:$0xff]  ;;  %v328_v52 = vld [vmem:[%s17314_s12 + $0x200] sm:$0xff] }
 0x1f1   : > { %6663 = vmatprep.subr.bf16.mxu0 %v15947_v61  ;;  %6382 = vmatprep.mubr.bf16.mxu1 %v18897_v39  ;;  %v15954_v61 = vld [vmem:[%s22530_s1 + $0x4a8] ss:$72 sps:$4 sm:$0xff]   ;;  %v18933_v0 = vpack.c.bf16 %v335_v11, %v329_v5  ;;  %v347_v53 = vld [vmem:[%s17314_s12 + $0x298] sm:$0xff]  ;;  %v18955_v5 = vpack.c.bf16 %v334_v9, %v328_v52  ;;  %v15977_v52 = vld [vmem:[%s22530_s1 + $0x18e4] ss:$72 sps:$4 sm:$0xff]  }
 0x1f2   : > { %6608 = vmatprep.mubr.bf16.mxu0 %v18606_v29  ;;  %v15969_v11 = vld [vmem:[%s22530_s1 + $0x1850] ss:$72 sps:$4 sm:$0xff]   ;;  %v15980_v9 = vld [vmem:[%s22530_s1 + $0x6ec] ss:$72 sps:$4 sm:$0xff]  }
 0x1f3   : > { %6777 = vmatpush1.bf16.msra.mxu1 %v15948_v38  ;;  %v15968_v38 = vld [vmem:[%s22530_s1 + $0x5cc] ss:$72 sps:$4 sm:$0xff]  }
 0x1f4   : > { %6664 = vmatpush1.bf16.msra.mxu0 %v15945_v46  ;;  %6778 = vmatprep.subr.bf16.mxu1 %v15956_v62  ;;  %v15965_v46 = vld [vmem:[%s22530_s1 + $0x17c4] ss:$72 sps:$4 sm:$0xff]   ;;  %v15966_v62 = vld [vmem:[%s22530_s1 + $0x5c8] ss:$72 sps:$4 sm:$0xff]  }
 0x1f5   : > { %6665 = vmatprep.subr.bf16.mxu0 %v15953_v60  ;;  %v15963_v60 = vld [vmem:[%s22530_s1 + $0x17c0] ss:$72 sps:$4 sm:$0xff]  }
 0x1f6   : > { %6383 = vmatmul.mubr.bf16.gmra.mrb[24].mxu1 %v18919_v13 }
 0x1f7   : > { %6609 = vmatmul.mubr.bf16.gmra.mrb[24].mxu0 %v18628_v42  ;;  %6779 = vmatpush1.bf16.msra.mxu1 %v15954_v61  ;;  %v15974_v61 = vld [vmem:[%s22530_s1 + $0x65c] ss:$72 sps:$4 sm:$0xff]  }
 0x1f8   : > { %6666 = vmatpush1.bf16.msra.mxu0 %v15951_v8  ;;  %6780 = vmatprep.subr.bf16.mxu1 %v15962_v22  ;;  %v15971_v8 = vld [vmem:[%s22530_s1 + $0x1854] ss:$72 sps:$4 sm:$0xff]   ;;  %v18969_v22 = vpack.c.bf16 %v347_v53, %v341_v47  ;;  %v15975_v47 = vld [vmem:[%s22530_s1 + $0x18e0] ss:$72 sps:$4 sm:$0xff]  }
 0x1f9   : > { %6667 = vmatprep.subr.bf16.mxu0 %v15959_v18  ;;  %6392 = vmatprep.mubr.bf16.mxu1 %v18933_v0  ;;  %v15972_v18 = vld [vmem:[%s22530_s1 + $0x658] ss:$72 sps:$4 sm:$0xff]   ;;  %v15978_v53 = vld [vmem:[%s22530_s1 + $0x6e8] ss:$72 sps:$4 sm:$0xff]  }
 0x1fa   : > { %6618 = vmatprep.mubr.bf16.mxu0 %v18642_v48 }
 0x1fb   : > { %6781 = vmatpush1.bf16.msra.mxu1 %v15960_v36  ;;  %v346_v36 = vld [vmem:[%s17314_s12 + $0x290] sm:$0xff] }
 0x1fc   : > { %6668 = vmatpush1.bf16.msra.mxu0 %v15957_v32  ;;  %6782 = vmatprep.subr.bf16.mxu1 %v15968_v38  ;;  %v340_v32 = vld [vmem:[%s17314_s12 + $0x260] sm:$0xff]  ;;  %v359_v38 = vld [vmem:[%s17314_s12 + $0x2f8] sm:$0xff] }
 0x1fd   : > { %6669 = vmatprep.subr.bf16.mxu0 %v15965_v46  ;;  %v353_v46 = vld [vmem:[%s17314_s12 + $0x2c8] sm:$0xff] }
 0x1fe   : > { %6393 = vmatmul.mubr.bf16.gmra.mrb[28].mxu1 %v18955_v5 }
 0x1ff   : > { %6619 = vmatmul.mubr.bf16.gmra.mrb[28].mxu0 %v18664_v6  ;;  %6783 = vmatpush1.bf16.msra.mxu1 %v15966_v62  ;;  %v15983_v62 = vld [vmem:[%s22530_s1 + $0x1974] ss:$72 sps:$4 sm:$0xff]  }
 0x200   : > { %6670 = vmatpush1.bf16.msra.mxu0 %v15963_v60  ;;  %6784 = vmatprep.subr.bf16.mxu1 %v15974_v61  ;;  %v18991_v60 = vpack.c.bf16 %v346_v36, %v340_v32  ;;  %v15981_v61 = vld [vmem:[%s22530_s1 + $0x1970] ss:$72 sps:$4 sm:$0xff]  }
 0x201   : > { %6671 = vmatprep.subr.bf16.mxu0 %v15971_v8  ;;  %6402 = vmatprep.mubr.bf16.mxu1 %v18969_v22  ;;  %v15986_v8 = vld [vmem:[%s22530_s1 + $0x77c] ss:$72 sps:$4 sm:$0xff]   ;;  %v15984_v32 = vld [vmem:[%s22530_s1 + $0x778] ss:$72 sps:$4 sm:$0xff]   ;;  %v358_v36 = vld [vmem:[%s17314_s12 + $0x2f0] sm:$0xff] }
 0x202   : > { %6628 = vmatprep.mubr.bf16.mxu0 %v18678_v14 }
 0x203   : > { %6785 = vmatpush1.bf16.msra.mxu1 %v15972_v18  ;;  %v352_v18 = vld [vmem:[%s17314_s12 + $0x2c0] sm:$0xff] }
 0x204   : > { %6672 = vmatpush1.bf16.msra.mxu0 %v15969_v11  ;;  %6786 = vmatprep.subr.bf16.mxu1 %v15980_v9  ;;  %v19005_v11 = vpack.c.bf16 %v359_v38, %v353_v46  ;;  %v15992_v9 = vld [vmem:[%s22530_s1 + $0x80c] ss:$72 sps:$4 sm:$0xff]   ;;  %v15987_v46 = vld [vmem:[%s22530_s1 + $0x1a00] ss:$72 sps:$4 sm:$0xff]  }
 0x205   : > { %6673 = vmatprep.subr.bf16.mxu0 %v15977_v52  ;;  %v15989_v52 = vld [vmem:[%s22530_s1 + $0x1a04] ss:$72 sps:$4 sm:$0xff]   ;;  %v15990_v38 = vld [vmem:[%s22530_s1 + $0x808] ss:$72 sps:$4 sm:$0xff]  }
 0x206   : > { %6403 = vmatmul.mubr.bf16.gmra.mrb[32].mxu1 %v18991_v60 }
 0x207   : > { %6629 = vmatmul.mubr.bf16.gmra.mrb[32].mxu0 %v18700_v34  ;;  %6787 = vmatpush1.bf16.msra.mxu1 %v15978_v53  ;;  %v15995_v53 = vld [vmem:[%s22530_s1 + $0x1a94] ss:$72 sps:$4 sm:$0xff]  }
 0x208   : > { %6674 = vmatpush1.bf16.msra.mxu0 %v15975_v47  ;;  %6788 = vmatprep.subr.bf16.mxu1 %v15986_v8  ;;  %v19025_v47 = vpack.c.bf16 %v358_v36, %v352_v18  ;;  %v15993_v8 = vld [vmem:[%s22530_s1 + $0x1a90] ss:$72 sps:$4 sm:$0xff]   ;;  %v16004_v18 = vld [vmem:[%s22530_s1 + $0x34] ss:$72 sps:$4 sm:$0xff]  }
 0x209   : > { %6675 = vmatprep.subr.bf16.mxu0 %v15983_v62  ;;  %6412 = vmatprep.mubr.bf16.mxu1 %v19005_v11  ;;  %v15998_v62 = vld [vmem:[%s22530_s1 + $0x89c] ss:$72 sps:$4 sm:$0xff]   ;;  %v15999_v36 = vld [vmem:[%s22530_s1 + $0x928] ss:$72 sps:$4 sm:$0xff]  }
 0x20a   : > { %6638 = vmatprep.mubr.bf16.mxu0 %v18714_v45 }
 0x20b   : > { %6789 = vmatpush1.bf16.msra.mxu1 %v15984_v32  ;;  %v16001_v32 = vld [vmem:[%s22530_s1 + $0x92c] ss:$72 sps:$4 sm:$0xff]  }
 0x20c   : > { %6676 = vmatpush1.bf16.msra.mxu0 %v15981_v61  ;;  %6790 = vmatprep.subr.bf16.mxu1 %v15992_v9  ;;  %v15996_v61 = vld [vmem:[%s22530_s1 + $0x898] ss:$72 sps:$4 sm:$0xff]   ;;  %v16007_v9 = vld [vmem:[%s22530_s1 + $0x9bc] ss:$72 sps:$4 sm:$0xff]  }
 0x20d   : > { %6677 = vmatprep.subr.bf16.mxu0 %v15989_v52  ;;  %v16002_v52 = vld [vmem:[%s22530_s1 + $0x30] ss:$72 sps:$4 sm:$0xff]  }
 0x20e   : > { %6413 = vmatmul.mubr.bf16.gmra.mrb[36].mxu1 %v19025_v47 }
 0x20f   : > { %6639 = vmatmul.mubr.bf16.gmra.mrb[36].mxu0 %v18734_v59  ;;  %6791 = vmatpush1.bf16.msra.mxu1 %v15990_v38  ;;  %v16005_v38 = vld [vmem:[%s22530_s1 + $0x9b8] ss:$72 sps:$4 sm:$0xff]  }
 0x210   : > { %6678 = vmatpush1.bf16.msra.mxu0 %v15987_v46  ;;  %6792 = vmatprep.subr.bf16.mxu1 %v15998_v62  ;;  %v16010_v46 = vld [vmem:[%s22530_s1 + $0xc4] ss:$72 sps:$4 sm:$0xff]  }
 0x211   : > { %6679 = vmatprep.subr.bf16.mxu0 %v15995_v53  ;;  %6794 = vmatprep.mubr.bf16.mxu1 %v17330_v50  ;;  %v16008_v53 = vld [vmem:[%s22530_s1 + $0xc0] ss:$72 sps:$4 sm:$0xff]   ;;  %v16013_v62 = vld [vmem:[%s22530_s1 + $0xa4c] ss:$72 sps:$4 sm:$0xff]  }
 0x212   : > { %6681 = vmatprep.mubr.bf16.mxu0 %v17489_v44 }
 0x213   : > { %6793 = vmatpush1.bf16.msra.mxu1 %v15996_v61  ;;  %v16011_v61 = vld [vmem:[%s22530_s1 + $0xa48] ss:$72 sps:$4 sm:$0xff]  }
 0x214   : > { %6680 = vmatpush1.bf16.msra.mxu0 %v15993_v8  ;;  %6875 = vmatprep.subr.bf16.mxu1 %v16001_v32  ;;  %v16016_v8 = vld [vmem:[%s22530_s1 + $0x154] ss:$72 sps:$4 sm:$0xff]   ;;  %v16014_v32 = vld [vmem:[%s22530_s1 + $0x150] ss:$72 sps:$4 sm:$0xff]  }
 0x215   : > { %7101 = vmatprep.subr.bf16.mxu0 %v16004_v18  ;;  %v16019_v18 = vld [vmem:[%s22530_s1 + $0xadc] ss:$72 sps:$4 sm:$0xff]  }
 0x216   : > { %6795 = vmatmul.mubr.bf16.vlgmr.msra.gmra.mrb[40].mxu1 %v17396_v12 }
 0x217   : > { %6682 = vmatmul.mubr.bf16.vlgmr.msra.gmra.mrb[8].mxu0 %v17602_v23  ;;  %6876 = vmatpush1.bf16.msra.mxu1 %v15999_v36  ;;  %v16022_v36 = vld [vmem:[%s22530_s1 + $0x1e4] ss:$72 sps:$4 sm:$0xff]  }
 0x218   : > { %7102 = vmatpush1.bf16.msra.mxu0 %v16002_v52  ;;  %6877 = vmatprep.subr.bf16.mxu1 %v16007_v9  ;;  %v16017_v52 = vld [vmem:[%s22530_s1 + $0xad8] ss:$72 sps:$4 sm:$0xff]  }
 0x219   : > { %7103 = vmatprep.subr.bf16.mxu0 %v16010_v46  ;;  %6804 = vmatprep.mubr.bf16.mxu1 %v18213_v56  ;;  %v16020_v9 = vld [vmem:[%s22530_s1 + $0x1e0] ss:$72 sps:$4 sm:$0xff]   ;;  %v16025_v46 = vld [vmem:[%s22530_s1 + $0xb6c] ss:$72 sps:$4 sm:$0xff]  }
 0x21a   : > { %6691 = vmatprep.mubr.bf16.mxu0 %v18778_v31 }
 0x21b   : > { %6878 = vmatpush1.bf16.msra.mxu1 %v16005_v38  ;;  %v16028_v38 = vld [vmem:[%s22530_s1 + $0x274] ss:$72 sps:$4 sm:$0xff]  }
 0x21c   : > { %7104 = vmatpush1.bf16.msra.mxu0 %v16008_v53  ;;  %6879 = vmatprep.subr.bf16.mxu1 %v16013_v62  ;;  %v16023_v53 = vld [vmem:[%s22530_s1 + $0xb68] ss:$72 sps:$4 sm:$0xff]  }
 0x21d   : > { %7105 = vmatprep.subr.bf16.mxu0 %v16016_v8  ;;  %v16026_v62 = vld [vmem:[%s22530_s1 + $0x270] ss:$72 sps:$4 sm:$0xff]   ;;  %v16031_v8 = vld [vmem:[%s22530_s1 + $0xbfc] ss:$72 sps:$4 sm:$0xff]  }
 0x21e   : > { %6805 = vmatmul.mubr.bf16.gmra.mrb[44].mxu1 %v18230_v1 }
 0x21f   : > { %6692 = vmatmul.mubr.bf16.gmra.mrb[12].mxu0 %v18800_v51  ;;  %6880 = vmatpush1.bf16.msra.mxu1 %v16011_v61  ;;  %v16034_v61 = vld [vmem:[%s22530_s1 + $0x304] ss:$72 sps:$4 sm:$0xff]  }
 0x220   : > { %7106 = vmatpush1.bf16.msra.mxu0 %v16014_v32  ;;  %6881 = vmatprep.subr.bf16.mxu1 %v16019_v18  ;;  %v16029_v32 = vld [vmem:[%s22530_s1 + $0xbf8] ss:$72 sps:$4 sm:$0xff]  }
 0x221   : > { %7107 = vmatprep.subr.bf16.mxu0 %v16022_v36  ;;  %6814 = vmatprep.mubr.bf16.mxu1 %v18252_v10  ;;  %v16032_v18 = vld [vmem:[%s22530_s1 + $0x300] ss:$72 sps:$4 sm:$0xff]   ;;  %v16037_v36 = vld [vmem:[%s22530_s1 + $0xc8c] ss:$72 sps:$4 sm:$0xff]  }
 0x222   : > { %6701 = vmatprep.mubr.bf16.mxu0 %v18814_v2 }
 0x223   : > { %6882 = vmatpush1.bf16.msra.mxu1 %v16017_v52  ;;  %v16040_v52 = vld [vmem:[%s22530_s1 + $0x394] ss:$72 sps:$4 sm:$0xff]  }
 0x224   : > { %7108 = vmatpush1.bf16.msra.mxu0 %v16020_v9  ;;  %6883 = vmatprep.subr.bf16.mxu1 %v16025_v46  ;;  %v16035_v9 = vld [vmem:[%s22530_s1 + $0xc88] ss:$72 sps:$4 sm:$0xff]  }
 0x225   : > { %7109 = vmatprep.subr.bf16.mxu0 %v16028_v38  ;;  %v16038_v46 = vld [vmem:[%s22530_s1 + $0x390] ss:$72 sps:$4 sm:$0xff]   ;;  %v16043_v38 = vld [vmem:[%s22530_s1 + $0xd1c] ss:$72 sps:$4 sm:$0xff]  }
 0x226   : > { %6815 = vmatmul.mubr.bf16.gmra.mrb[48].mxu1 %v18276_v21 }
 0x227   : > { %6702 = vmatmul.mubr.bf16.gmra.mrb[16].mxu0 %v18836_v27  ;;  %6884 = vmatpush1.bf16.msra.mxu1 %v16023_v53  ;;  %v16046_v53 = vld [vmem:[%s22530_s1 + $0x424] ss:$72 sps:$4 sm:$0xff]  }
 0x228   : > { %7110 = vmatpush1.bf16.msra.mxu0 %v16026_v62  ;;  %6885 = vmatprep.subr.bf16.mxu1 %v16031_v8  ;;  %v16041_v62 = vld [vmem:[%s22530_s1 + $0xd18] ss:$72 sps:$4 sm:$0xff]  }
 0x229   : > { %7111 = vmatprep.subr.bf16.mxu0 %v16034_v61  ;;  %6824 = vmatprep.mubr.bf16.mxu1 %v18300_v33  ;;  %v16044_v8 = vld [vmem:[%s22530_s1 + $0x420] ss:$72 sps:$4 sm:$0xff]   ;;  %v16049_v61 = vld [vmem:[%s22530_s1 + $0xdac] ss:$72 sps:$4 sm:$0xff]  }
 0x22a   : > { %6711 = vmatprep.mubr.bf16.mxu0 %v18856_v41 }
 0x22b   : > { %6886 = vmatpush1.bf16.msra.mxu1 %v16029_v32  ;;  %v16052_v32 = vld [vmem:[%s22530_s1 + $0x4b4] ss:$72 sps:$4 sm:$0xff]  }
 0x22c   : > { %7112 = vmatpush1.bf16.msra.mxu0 %v16032_v18  ;;  %6887 = vmatprep.subr.bf16.mxu1 %v16037_v36  ;;  %v16047_v18 = vld [vmem:[%s22530_s1 + $0xda8] ss:$72 sps:$4 sm:$0xff]  }
 0x22d   : > { %7113 = vmatprep.subr.bf16.mxu0 %v16040_v52  ;;  %v16050_v36 = vld [vmem:[%s22530_s1 + $0x4b0] ss:$72 sps:$4 sm:$0xff]   ;;  %v16055_v52 = vld [vmem:[%s22530_s1 + $0xe3c] ss:$72 sps:$4 sm:$0xff]  }
 0x22e   : > { %6825 = vmatmul.mubr.bf16.gmra.mrb[52].mxu1 %v18314_v43 }
 0x22f   : > { %6712 = vmatmul.mubr.bf16.gmra.mrb[20].mxu0 %v18883_v24  ;;  %6888 = vmatpush1.bf16.msra.mxu1 %v16035_v9  ;;  %v16058_v9 = vld [vmem:[%s22530_s1 + $0x544] ss:$72 sps:$4 sm:$0xff]  }
 0x230   : > { %7114 = vmatpush1.bf16.msra.mxu0 %v16038_v46  ;;  %6889 = vmatprep.subr.bf16.mxu1 %v16043_v38  ;;  %v16053_v46 = vld [vmem:[%s22530_s1 + $0xe38] ss:$72 sps:$4 sm:$0xff]  }
 0x231   : > { %7115 = vmatprep.subr.bf16.mxu0 %v16046_v53  ;;  %6834 = vmatprep.mubr.bf16.mxu1 %v18336_v58  ;;  %v16056_v38 = vld [vmem:[%s22530_s1 + $0x540] ss:$72 sps:$4 sm:$0xff]   ;;  %v16061_v53 = vld [vmem:[%s22530_s1 + $0xecc] ss:$72 sps:$4 sm:$0xff]  }
 0x232   : > { %6721 = vmatprep.mubr.bf16.mxu0 %v18897_v39 }
 0x233   : > { %6890 = vmatpush1.bf16.msra.mxu1 %v16041_v62  ;;  %v16064_v62 = vld [vmem:[%s22530_s1 + $0x5d4] ss:$72 sps:$4 sm:$0xff]  }
 0x234   : > { %7116 = vmatpush1.bf16.msra.mxu0 %v16044_v8  ;;  %6891 = vmatprep.subr.bf16.mxu1 %v16049_v61  ;;  %v16059_v8 = vld [vmem:[%s22530_s1 + $0xec8] ss:$72 sps:$4 sm:$0xff]  }
 0x235   : > { %7117 = vmatprep.subr.bf16.mxu0 %v16052_v32  ;;  %v16062_v61 = vld [vmem:[%s22530_s1 + $0x5d0] ss:$72 sps:$4 sm:$0xff]   ;;  %v16067_v32 = vld [vmem:[%s22530_s1 + $0xf5c] ss:$72 sps:$4 sm:$0xff]  }
 0x236   : > { %6835 = vmatmul.mubr.bf16.gmra.mrb[56].mxu1 %v18348_v3 }
 0x237   : > { %6722 = vmatmul.mubr.bf16.gmra.mrb[24].mxu0 %v18919_v13  ;;  %6892 = vmatpush1.bf16.msra.mxu1 %v16047_v18  ;;  %v16070_v18 = vld [vmem:[%s22530_s1 + $0x664] ss:$72 sps:$4 sm:$0xff]  }
 0x238   : > { %7118 = vmatpush1.bf16.msra.mxu0 %v16050_v36  ;;  %6893 = vmatprep.subr.bf16.mxu1 %v16055_v52  ;;  %v16065_v36 = vld [vmem:[%s22530_s1 + $0xf58] ss:$72 sps:$4 sm:$0xff]  }
 0x239   : > { %7119 = vmatprep.subr.bf16.mxu0 %v16058_v9  ;;  %6844 = vmatprep.mubr.bf16.mxu1 %v18370_v16  ;;  %v16068_v52 = vld [vmem:[%s22530_s1 + $0x660] ss:$72 sps:$4 sm:$0xff]   ;;  %v16073_v9 = vld [vmem:[%s22530_s1 + $0xfec] ss:$72 sps:$4 sm:$0xff]  }
 0x23a   : > { %6731 = vmatprep.mubr.bf16.mxu0 %v18933_v0 }
 0x23b   : > { %6894 = vmatpush1.bf16.msra.mxu1 %v16053_v46  ;;  %v16076_v46 = vld [vmem:[%s22530_s1 + $0x6f4] ss:$72 sps:$4 sm:$0xff]  }
 0x23c   : > { %7120 = vmatpush1.bf16.msra.mxu0 %v16056_v38  ;;  %6895 = vmatprep.subr.bf16.mxu1 %v16061_v53  ;;  %v16071_v38 = vld [vmem:[%s22530_s1 + $0xfe8] ss:$72 sps:$4 sm:$0xff]  }
 0x23d   : > { %7121 = vmatprep.subr.bf16.mxu0 %v16064_v62  ;;  %v16074_v53 = vld [vmem:[%s22530_s1 + $0x6f0] ss:$72 sps:$4 sm:$0xff]   ;;  %v16079_v62 = vld [vmem:[%s22530_s1 + $0x107c] ss:$72 sps:$4 sm:$0xff]  }
 0x23e   : > { %6845 = vmatmul.mubr.bf16.gmra.mrb[60].mxu1 %v18382_v25 }
 0x23f   : > { %6732 = vmatmul.mubr.bf16.gmra.mrb[28].mxu0 %v18955_v5  ;;  %6896 = vmatpush1.bf16.msra.mxu1 %v16059_v8  ;;  %v16082_v8 = vld [vmem:[%s22530_s1 + $0x784] ss:$72 sps:$4 sm:$0xff]  }
 0x240   : > { %7122 = vmatpush1.bf16.msra.mxu0 %v16062_v61  ;;  %6897 = vmatprep.subr.bf16.mxu1 %v16067_v32  ;;  %v16077_v61 = vld [vmem:[%s22530_s1 + $0x1078] ss:$72 sps:$4 sm:$0xff]  }
 0x241   : > { %7123 = vmatprep.subr.bf16.mxu0 %v16070_v18  ;;  %6854 = vmatprep.mubr.bf16.mxu1 %v18404_v35  ;;  %v16080_v32 = vld [vmem:[%s22530_s1 + $0x780] ss:$72 sps:$4 sm:$0xff]   ;;  %v16085_v18 = vld [vmem:[%s22530_s1 + $0x110c] ss:$72 sps:$4 sm:$0xff]  }
 0x242   : > { %6741 = vmatprep.mubr.bf16.mxu0 %v18969_v22 }
 0x243   : > { %6898 = vmatpush1.bf16.msra.mxu1 %v16065_v36  ;;  %v16088_v36 = vld [vmem:[%s22530_s1 + $0x814] ss:$72 sps:$4 sm:$0xff]  }
 0x244   : > { %7124 = vmatpush1.bf16.msra.mxu0 %v16068_v52  ;;  %6899 = vmatprep.subr.bf16.mxu1 %v16073_v9  ;;  %v16083_v52 = vld [vmem:[%s22530_s1 + $0x1108] ss:$72 sps:$4 sm:$0xff]  }
 0x245   : > { %7125 = vmatprep.subr.bf16.mxu0 %v16076_v46  ;;  %v16086_v9 = vld [vmem:[%s22530_s1 + $0x810] ss:$72 sps:$4 sm:$0xff]   ;;  %v16091_v46 = vld [vmem:[%s22530_s1 + $0x119c] ss:$72 sps:$4 sm:$0xff]  }
 0x246   : > { %6855 = vmatmul.mubr.bf16.gmra.mrb[64].mxu1 %v18416_v40 }
 0x247   : > { %6742 = vmatmul.mubr.bf16.gmra.mrb[32].mxu0 %v18991_v60  ;;  %6900 = vmatpush1.bf16.msra.mxu1 %v16071_v38  ;;  %v16094_v38 = vld [vmem:[%s22530_s1 + $0x8a4] ss:$72 sps:$4 sm:$0xff]  }
 0x248   : > { %7126 = vmatpush1.bf16.msra.mxu0 %v16074_v53  ;;  %6901 = vmatprep.subr.bf16.mxu1 %v16079_v62  ;;  %v16089_v53 = vld [vmem:[%s22530_s1 + $0x1198] ss:$72 sps:$4 sm:$0xff]  }
 0x249   : > { %7127 = vmatprep.subr.bf16.mxu0 %v16082_v8  ;;  %6864 = vmatprep.mubr.bf16.mxu1 %v18438_v49  ;;  %v16092_v62 = vld [vmem:[%s22530_s1 + $0x8a0] ss:$72 sps:$4 sm:$0xff]   ;;  %v16097_v8 = vld [vmem:[%s22530_s1 + $0x122c] ss:$72 sps:$4 sm:$0xff]  }
 0x24a   : > { %6751 = vmatprep.mubr.bf16.mxu0 %v19005_v11 }
 0x24b   : > { %6902 = vmatpush1.bf16.msra.mxu1 %v16077_v61  ;;  %v16100_v61 = vld [vmem:[%s22530_s1 + $0x934] ss:$72 sps:$4 sm:$0xff]  }
 0x24c   : > { %7128 = vmatpush1.bf16.msra.mxu0 %v16080_v32  ;;  %6903 = vmatprep.subr.bf16.mxu1 %v16085_v18  ;;  %v16095_v32 = vld [vmem:[%s22530_s1 + $0x1228] ss:$72 sps:$4 sm:$0xff]  }
 0x24d   : > { %7129 = vmatprep.subr.bf16.mxu0 %v16088_v36  ;;  %v16098_v18 = vld [vmem:[%s22530_s1 + $0x930] ss:$72 sps:$4 sm:$0xff]   ;;  %v16103_v36 = vld [vmem:[%s22530_s1 + $0x12bc] ss:$72 sps:$4 sm:$0xff]  }
 0x24e   : > { %6865 = vmatmul.mubr.bf16.gmra.mrb[68].mxu1 %v18450_v57 }
 0x24f   : > { %6752 = vmatmul.mubr.bf16.gmra.mrb[36].mxu0 %v19025_v47  ;;  %6904 = vmatpush1.bf16.msra.mxu1 %v16083_v52  ;;  %v16106_v52 = vld [vmem:[%s22530_s1 + $0x9c4] ss:$72 sps:$4 sm:$0xff]  }
 0x250   : > { %7130 = vmatpush1.bf16.msra.mxu0 %v16086_v9  ;;  %6905 = vmatprep.subr.bf16.mxu1 %v16091_v46  ;;  %v16101_v9 = vld [vmem:[%s22530_s1 + $0x12b8] ss:$72 sps:$4 sm:$0xff]  }
 0x251   : > { %7131 = vmatprep.subr.bf16.mxu0 %v16094_v38  ;;  %6907 = vmatprep.mubr.bf16.mxu1 %v17340_v55  ;;  %v16104_v46 = vld [vmem:[%s22530_s1 + $0x9c0] ss:$72 sps:$4 sm:$0xff]   ;;  %v16109_v38 = vld [vmem:[%s22530_s1 + $0x134c] ss:$72 sps:$4 sm:$0xff]  }
 0x252   : > { %7133 = vmatprep.mubr.bf16.mxu0 %v17330_v50 }
 0x253   : > { %6906 = vmatpush1.bf16.msra.mxu1 %v16089_v53  ;;  %v16112_v53 = vld [vmem:[%s22530_s1 + $0xa54] ss:$72 sps:$4 sm:$0xff]  }
 0x254   : > { %7132 = vmatpush1.bf16.msra.mxu0 %v16092_v62  ;;  %6988 = vmatprep.subr.bf16.mxu1 %v16097_v8  ;;  %v16107_v62 = vld [vmem:[%s22530_s1 + $0x1348] ss:$72 sps:$4 sm:$0xff]  }
 0x255   : > { %7214 = vmatprep.subr.bf16.mxu0 %v16100_v61  ;;  %v16110_v8 = vld [vmem:[%s22530_s1 + $0xa50] ss:$72 sps:$4 sm:$0xff]   ;;  %v16115_v61 = vld [vmem:[%s22530_s1 + $0x13dc] ss:$72 sps:$4 sm:$0xff]  }
 0x256   : > { %6908 = vmatmul.mubr.bf16.vlgmr.msra.gmra.mrb[40].mxu1 %v17404_v15 }
 0x257   : > { %7134 = vmatmul.mubr.bf16.vlgmr.msra.gmra.mrb[40].mxu0 %v17396_v12  ;;  %6989 = vmatpush1.bf16.msra.mxu1 %v16095_v32  ;;  %v16118_v32 = vld [vmem:[%s22530_s1 + $0xae4] ss:$72 sps:$4 sm:$0xff]  }
 0x258   : > { %7215 = vmatpush1.bf16.msra.mxu0 %v16098_v18  ;;  %6990 = vmatprep.subr.bf16.mxu1 %v16103_v36  ;;  %v16113_v18 = vld [vmem:[%s22530_s1 + $0x13d8] ss:$72 sps:$4 sm:$0xff]  }
 0x259   : > { %7216 = vmatprep.subr.bf16.mxu0 %v16106_v52  ;;  %6917 = vmatprep.mubr.bf16.mxu1 %v18498_v26  ;;  %v16116_v36 = vld [vmem:[%s22530_s1 + $0xae0] ss:$72 sps:$4 sm:$0xff]   ;;  %v16121_v52 = vld [vmem:[%s22530_s1 + $0x146c] ss:$72 sps:$4 sm:$0xff]  }
 0x25a   : > { %7143 = vmatprep.mubr.bf16.mxu0 %v18213_v56 }
 0x25b   : > { %6991 = vmatpush1.bf16.msra.mxu1 %v16101_v9  ;;  %v16124_v9 = vld [vmem:[%s22530_s1 + $0xb74] ss:$72 sps:$4 sm:$0xff]  }
 0x25c   : > { %7217 = vmatpush1.bf16.msra.mxu0 %v16104_v46  ;;  %6992 = vmatprep.subr.bf16.mxu1 %v16109_v38  ;;  %v16119_v46 = vld [vmem:[%s22530_s1 + $0x1468] ss:$72 sps:$4 sm:$0xff]  }
 0x25d   : > { %7218 = vmatprep.subr.bf16.mxu0 %v16112_v53  ;;  %v16122_v38 = vld [vmem:[%s22530_s1 + $0xb70] ss:$72 sps:$4 sm:$0xff]   ;;  %v16127_v53 = vld [vmem:[%s22530_s1 + $0x14fc] ss:$72 sps:$4 sm:$0xff]  }
 0x25e   : > { %6918 = vmatmul.mubr.bf16.gmra.mrb[44].mxu1 %v18520_v37 }
 0x25f   : > { %7144 = vmatmul.mubr.bf16.gmra.mrb[44].mxu0 %v18230_v1  ;;  %6993 = vmatpush1.bf16.msra.mxu1 %v16107_v62  ;;  %v16130_v62 = vld [vmem:[%s22530_s1 + $0xc04] ss:$72 sps:$4 sm:$0xff]  }
 0x260   : > { %7219 = vmatpush1.bf16.msra.mxu0 %v16110_v8  ;;  %6994 = vmatprep.subr.bf16.mxu1 %v16115_v61  ;;  %v16125_v8 = vld [vmem:[%s22530_s1 + $0x14f8] ss:$72 sps:$4 sm:$0xff]  }
 0x261   : > { %7220 = vmatprep.subr.bf16.mxu0 %v16118_v32  ;;  %6927 = vmatprep.mubr.bf16.mxu1 %v18534_v63  ;;  %v16128_v61 = vld [vmem:[%s22530_s1 + $0xc00] ss:$72 sps:$4 sm:$0xff]   ;;  %v16133_v32 = vld [vmem:[%s22530_s1 + $0x158c] ss:$72 sps:$4 sm:$0xff]  }
 0x262   : > { %7153 = vmatprep.mubr.bf16.mxu0 %v18252_v10 }
 0x263   : > { %6995 = vmatpush1.bf16.msra.mxu1 %v16113_v18  ;;  %v16136_v18 = vld [vmem:[%s22530_s1 + $0xc94] ss:$72 sps:$4 sm:$0xff]  }
 0x264   : > { %7221 = vmatpush1.bf16.msra.mxu0 %v16116_v36  ;;  %6996 = vmatprep.subr.bf16.mxu1 %v16121_v52  ;;  %v16131_v36 = vld [vmem:[%s22530_s1 + $0x1588] ss:$72 sps:$4 sm:$0xff]  }
 0x265   : > { %7222 = vmatprep.subr.bf16.mxu0 %v16124_v9  ;;  %v16134_v52 = vld [vmem:[%s22530_s1 + $0xc90] ss:$72 sps:$4 sm:$0xff]   ;;  %v16139_v9 = vld [vmem:[%s22530_s1 + $0x161c] ss:$72 sps:$4 sm:$0xff]  }
 0x266   : > { %6928 = vmatmul.mubr.bf16.gmra.mrb[48].mxu1 %v18556_v54 }
 0x267   : > { %7154 = vmatmul.mubr.bf16.gmra.mrb[48].mxu0 %v18276_v21  ;;  %6997 = vmatpush1.bf16.msra.mxu1 %v16119_v46  ;;  %v16142_v46 = vld [vmem:[%s22530_s1 + $0xd24] ss:$72 sps:$4 sm:$0xff]  }
 0x268   : > { %7223 = vmatpush1.bf16.msra.mxu0 %v16122_v38  ;;  %6998 = vmatprep.subr.bf16.mxu1 %v16127_v53  ;;  %v16137_v38 = vld [vmem:[%s22530_s1 + $0x1618] ss:$72 sps:$4 sm:$0xff]  }
 0x269   : > { %7224 = vmatprep.subr.bf16.mxu0 %v16130_v62  ;;  %6937 = vmatprep.mubr.bf16.mxu1 %v18570_v4  ;;  %v16140_v53 = vld [vmem:[%s22530_s1 + $0xd20] ss:$72 sps:$4 sm:$0xff]   ;;  %v16145_v62 = vld [vmem:[%s22530_s1 + $0x16ac] ss:$72 sps:$4 sm:$0xff]  }
 0x26a   : > { %7163 = vmatprep.mubr.bf16.mxu0 %v18300_v33 }
 0x26b   : > { %6999 = vmatpush1.bf16.msra.mxu1 %v16125_v8  ;;  %v16148_v8 = vld [vmem:[%s22530_s1 + $0xdb4] ss:$72 sps:$4 sm:$0xff]  }
 0x26c   : > { %7225 = vmatpush1.bf16.msra.mxu0 %v16128_v61  ;;  %7000 = vmatprep.subr.bf16.mxu1 %v16133_v32  ;;  %v16143_v61 = vld [vmem:[%s22530_s1 + $0x16a8] ss:$72 sps:$4 sm:$0xff]  }
 0x26d   : > { %7226 = vmatprep.subr.bf16.mxu0 %v16136_v18  ;;  %v16146_v32 = vld [vmem:[%s22530_s1 + $0xdb0] ss:$72 sps:$4 sm:$0xff]   ;;  %v16151_v18 = vld [vmem:[%s22530_s1 + $0x173c] ss:$72 sps:$4 sm:$0xff]  }
 0x26e   : > { %6938 = vmatmul.mubr.bf16.gmra.mrb[52].mxu1 %v18592_v19 }
 0x26f   : > { %7164 = vmatmul.mubr.bf16.gmra.mrb[52].mxu0 %v18314_v43  ;;  %7001 = vmatpush1.bf16.msra.mxu1 %v16131_v36  ;;  %v16154_v36 = vld [vmem:[%s22530_s1 + $0xe44] ss:$72 sps:$4 sm:$0xff]  }
 0x270   : > { %7227 = vmatpush1.bf16.msra.mxu0 %v16134_v52  ;;  %7002 = vmatprep.subr.bf16.mxu1 %v16139_v9  ;;  %v16149_v52 = vld [vmem:[%s22530_s1 + $0x1738] ss:$72 sps:$4 sm:$0xff]  }
 0x271   : > { %7228 = vmatprep.subr.bf16.mxu0 %v16142_v46  ;;  %6947 = vmatprep.mubr.bf16.mxu1 %v18606_v29  ;;  %v16152_v9 = vld [vmem:[%s22530_s1 + $0xe40] ss:$72 sps:$4 sm:$0xff]   ;;  %v16157_v46 = vld [vmem:[%s22530_s1 + $0x17cc] ss:$72 sps:$4 sm:$0xff]  }
 0x272   : > { %7173 = vmatprep.mubr.bf16.mxu0 %v18336_v58 }
 0x273   : > { %7003 = vmatpush1.bf16.msra.mxu1 %v16137_v38  ;;  %v16160_v38 = vld [vmem:[%s22530_s1 + $0xed4] ss:$72 sps:$4 sm:$0xff]  }
 0x274   : > { %7229 = vmatpush1.bf16.msra.mxu0 %v16140_v53  ;;  %7004 = vmatprep.subr.bf16.mxu1 %v16145_v62  ;;  %v16155_v53 = vld [vmem:[%s22530_s1 + $0x17c8] ss:$72 sps:$4 sm:$0xff]  }
 0x275   : > { %7230 = vmatprep.subr.bf16.mxu0 %v16148_v8  ;;  %v16158_v62 = vld [vmem:[%s22530_s1 + $0xed0] ss:$72 sps:$4 sm:$0xff]   ;;  %v16163_v8 = vld [vmem:[%s22530_s1 + $0x185c] ss:$72 sps:$4 sm:$0xff]  }
 0x276   : > { %6948 = vmatmul.mubr.bf16.gmra.mrb[56].mxu1 %v18628_v42 }
 0x277   : > { %7174 = vmatmul.mubr.bf16.gmra.mrb[56].mxu0 %v18348_v3  ;;  %7005 = vmatpush1.bf16.msra.mxu1 %v16143_v61  ;;  %v16166_v61 = vld [vmem:[%s22530_s1 + $0xf64] ss:$72 sps:$4 sm:$0xff]  }
 0x278   : > { %7231 = vmatpush1.bf16.msra.mxu0 %v16146_v32  ;;  %7006 = vmatprep.subr.bf16.mxu1 %v16151_v18  ;;  %v16161_v32 = vld [vmem:[%s22530_s1 + $0x1858] ss:$72 sps:$4 sm:$0xff]  }
 0x279   : > { %7232 = vmatprep.subr.bf16.mxu0 %v16154_v36  ;;  %6957 = vmatprep.mubr.bf16.mxu1 %v18642_v48  ;;  %v16164_v18 = vld [vmem:[%s22530_s1 + $0xf60] ss:$72 sps:$4 sm:$0xff]   ;;  %v16169_v36 = vld [vmem:[%s22530_s1 + $0x18ec] ss:$72 sps:$4 sm:$0xff]  }
 0x27a   : > { %7183 = vmatprep.mubr.bf16.mxu0 %v18370_v16 }
 0x27b   : > { %7007 = vmatpush1.bf16.msra.mxu1 %v16149_v52  ;;  %v16172_v52 = vld [vmem:[%s22530_s1 + $0xff4] ss:$72 sps:$4 sm:$0xff]  }
 0x27c   : > { %7233 = vmatpush1.bf16.msra.mxu0 %v16152_v9  ;;  %7008 = vmatprep.subr.bf16.mxu1 %v16157_v46  ;;  %v16167_v9 = vld [vmem:[%s22530_s1 + $0x18e8] ss:$72 sps:$4 sm:$0xff]  }
 0x27d   : > { %7234 = vmatprep.subr.bf16.mxu0 %v16160_v38  ;;  %v16170_v46 = vld [vmem:[%s22530_s1 + $0xff0] ss:$72 sps:$4 sm:$0xff]   ;;  %v16175_v38 = vld [vmem:[%s22530_s1 + $0x197c] ss:$72 sps:$4 sm:$0xff]  }
 0x27e   : > { %6958 = vmatmul.mubr.bf16.gmra.mrb[60].mxu1 %v18664_v6 }
 0x27f   : > { %7184 = vmatmul.mubr.bf16.gmra.mrb[60].mxu0 %v18382_v25  ;;  %7009 = vmatpush1.bf16.msra.mxu1 %v16155_v53  ;;  %v16178_v53 = vld [vmem:[%s22530_s1 + $0x1084] ss:$72 sps:$4 sm:$0xff]  }
 0x280   : > { %7235 = vmatpush1.bf16.msra.mxu0 %v16158_v62  ;;  %7010 = vmatprep.subr.bf16.mxu1 %v16163_v8  ;;  %v16173_v62 = vld [vmem:[%s22530_s1 + $0x1978] ss:$72 sps:$4 sm:$0xff]  }
 0x281   : > { %7236 = vmatprep.subr.bf16.mxu0 %v16166_v61  ;;  %6967 = vmatprep.mubr.bf16.mxu1 %v18678_v14  ;;  %v16176_v8 = vld [vmem:[%s22530_s1 + $0x1080] ss:$72 sps:$4 sm:$0xff]   ;;  %v16181_v61 = vld [vmem:[%s22530_s1 + $0x1a0c] ss:$72 sps:$4 sm:$0xff]  }
 0x282   : > { %7193 = vmatprep.mubr.bf16.mxu0 %v18404_v35 }
 0x283   : > { %7011 = vmatpush1.bf16.msra.mxu1 %v16161_v32  ;;  %v16184_v32 = vld [vmem:[%s22530_s1 + $0x1114] ss:$72 sps:$4 sm:$0xff]  }
 0x284   : > { %7237 = vmatpush1.bf16.msra.mxu0 %v16164_v18  ;;  %7012 = vmatprep.subr.bf16.mxu1 %v16169_v36  ;;  %v16179_v18 = vld [vmem:[%s22530_s1 + $0x1a08] ss:$72 sps:$4 sm:$0xff]  }
 0x285   : > { %7238 = vmatprep.subr.bf16.mxu0 %v16172_v52  ;;  %v16182_v36 = vld [vmem:[%s22530_s1 + $0x1110] ss:$72 sps:$4 sm:$0xff]   ;;  %v16187_v52 = vld [vmem:[%s22530_s1 + $0x1a9c] ss:$72 sps:$4 sm:$0xff]  }
 0x286   : > { %6968 = vmatmul.mubr.bf16.gmra.mrb[64].mxu1 %v18700_v34 }
 0x287   : > { %7194 = vmatmul.mubr.bf16.gmra.mrb[64].mxu0 %v18416_v40  ;;  %7013 = vmatpush1.bf16.msra.mxu1 %v16167_v9  ;;  %v16190_v9 = vld [vmem:[%s22530_s1 + $0x11a4] ss:$72 sps:$4 sm:$0xff]  }
 0x288   : > { %7239 = vmatpush1.bf16.msra.mxu0 %v16170_v46  ;;  %7014 = vmatprep.subr.bf16.mxu1 %v16175_v38  ;;  %v16185_v46 = vld [vmem:[%s22530_s1 + $0x1a98] ss:$72 sps:$4 sm:$0xff]  }
 0x289   : > { %7240 = vmatprep.subr.bf16.mxu0 %v16178_v53  ;;  %6977 = vmatprep.mubr.bf16.mxu1 %v18714_v45  ;;  %v16188_v38 = vld [vmem:[%s22530_s1 + $0x11a0] ss:$72 sps:$4 sm:$0xff]   ;;  %v16193_v53 = vld [vmem:[%s22530_s1 + $0x1234] ss:$72 sps:$4 sm:$0xff]  }
 0x28a   : > { %7203 = vmatprep.mubr.bf16.mxu0 %v18438_v49 }
 0x28b   : > { %7015 = vmatpush1.bf16.msra.mxu1 %v16173_v62  ;;  %v16196_v62 = vld [vmem:[%s22530_s1 + $0x3c] ss:$72 sps:$4 sm:$0xff]  }
 0x28c   : > { %7241 = vmatpush1.bf16.msra.mxu0 %v16176_v8  ;;  %7016 = vmatprep.subr.bf16.mxu1 %v16181_v61  ;;  %v16191_v8 = vld [vmem:[%s22530_s1 + $0x1230] ss:$72 sps:$4 sm:$0xff]  }
 0x28d   : > { %7242 = vmatprep.subr.bf16.mxu0 %v16184_v32  ;;  %v16194_v61 = vld [vmem:[%s22530_s1 + $0x38] ss:$72 sps:$4 sm:$0xff]   ;;  %v16199_v32 = vld [vmem:[%s22530_s1 + $0x12c4] ss:$72 sps:$4 sm:$0xff]  }
 0x28e   : > { %6978 = vmatmul.mubr.bf16.gmra.mrb[68].mxu1 %v18734_v59 }
 0x28f   : > { %7204 = vmatmul.mubr.bf16.gmra.mrb[68].mxu0 %v18450_v57  ;;  %7017 = vmatpush1.bf16.msra.mxu1 %v16179_v18  ;;  %v16202_v18 = vld [vmem:[%s22530_s1 + $0xcc] ss:$72 sps:$4 sm:$0xff]  }
 0x290   : > { %7243 = vmatpush1.bf16.msra.mxu0 %v16182_v36  ;;  %7018 = vmatprep.subr.bf16.mxu1 %v16187_v52  ;;  %v16197_v36 = vld [vmem:[%s22530_s1 + $0x12c0] ss:$72 sps:$4 sm:$0xff]  }
 0x291   : > { %7244 = vmatprep.subr.bf16.mxu0 %v16190_v9  ;;  %7020 = vmatprep.mubr.bf16.mxu1 %v17489_v44  ;;  %v16200_v52 = vld [vmem:[%s22530_s1 + $0xc8] ss:$72 sps:$4 sm:$0xff]   ;;  %v16205_v9 = vld [vmem:[%s22530_s1 + $0x1354] ss:$72 sps:$4 sm:$0xff]  }
 0x292   : > { %7246 = vmatprep.mubr.bf16.mxu0 %v17340_v55 }
 0x293   : > { %7019 = vmatpush1.bf16.msra.mxu1 %v16185_v46  ;;  %v16208_v46 = vld [vmem:[%s22530_s1 + $0x15c] ss:$72 sps:$4 sm:$0xff]  }
 0x294   : > { %7245 = vmatpush1.bf16.msra.mxu0 %v16188_v38  ;;  %7440 = vmatprep.subr.bf16.mxu1 %v16196_v62  ;;  %v16203_v38 = vld [vmem:[%s22530_s1 + $0x1350] ss:$72 sps:$4 sm:$0xff]   ;;  %v16211_v62 = vld [vmem:[%s22530_s1 + $0x13e4] ss:$72 sps:$4 sm:$0xff]  }
 0x295   : > { %7327 = vmatprep.subr.bf16.mxu0 %v16193_v53  ;;  %v16206_v53 = vld [vmem:[%s22530_s1 + $0x158] ss:$72 sps:$4 sm:$0xff]  }
 0x296   : > { %7021 = vmatmul.mubr.bf16.vlgmr.msra.gmra.mrb[40].mxu1 %v17602_v23 }
 0x297   : > { %7247 = vmatmul.mubr.bf16.vlgmr.msra.gmra.mrb[40].mxu0 %v17404_v15  ;;  %7441 = vmatpush1.bf16.msra.mxu1 %v16194_v61  ;;  %v16209_v61 = vld [vmem:[%s22530_s1 + $0x13e0] ss:$72 sps:$4 sm:$0xff]  }
 0x298   : > { %7328 = vmatpush1.bf16.msra.mxu0 %v16191_v8  ;;  %7442 = vmatprep.subr.bf16.mxu1 %v16202_v18  ;;  %v16214_v8 = vld [vmem:[%s22530_s1 + $0x1ec] ss:$72 sps:$4 sm:$0xff]  }
 0x299   : > { %7329 = vmatprep.subr.bf16.mxu0 %v16199_v32  ;;  %7030 = vmatprep.mubr.bf16.mxu1 %v18778_v31  ;;  %v16212_v32 = vld [vmem:[%s22530_s1 + $0x1e8] ss:$72 sps:$4 sm:$0xff]   ;;  %v16217_v18 = vld [vmem:[%s22530_s1 + $0x1474] ss:$72 sps:$4 sm:$0xff]  }
 0x29a   : > { %7256 = vmatprep.mubr.bf16.mxu0 %v18498_v26 }
 0x29b   : > { %7443 = vmatpush1.bf16.msra.mxu1 %v16200_v52  ;;  %v16215_v52 = vld [vmem:[%s22530_s1 + $0x1470] ss:$72 sps:$4 sm:$0xff]  }
 0x29c   : > { %7330 = vmatpush1.bf16.msra.mxu0 %v16197_v36  ;;  %7444 = vmatprep.subr.bf16.mxu1 %v16208_v46  ;;  %v16220_v36 = vld [vmem:[%s22530_s1 + $0x27c] ss:$72 sps:$4 sm:$0xff]  }
 0x29d   : > { %7331 = vmatprep.subr.bf16.mxu0 %v16205_v9  ;;  %v16218_v9 = vld [vmem:[%s22530_s1 + $0x278] ss:$72 sps:$4 sm:$0xff]   ;;  %v16223_v46 = vld [vmem:[%s22530_s1 + $0x1504] ss:$72 sps:$4 sm:$0xff]  }
 0x29e   : > { %7031 = vmatmul.mubr.bf16.gmra.mrb[44].mxu1 %v18800_v51 }
 0x29f   : > { %7257 = vmatmul.mubr.bf16.gmra.mrb[44].mxu0 %v18520_v37  ;;  %7445 = vmatpush1.bf16.msra.mxu1 %v16206_v53  ;;  %v3140_v53 = vld [vmem:[%s22531_s2 + $0x6] sm:$0xff] }
 0x2a0   : > { %7332 = vmatpush1.bf16.msra.mxu0 %v16203_v38  ;;  %7446 = vmatprep.subr.bf16.mxu1 %v16214_v8  ;;  %v16226_v38 = vld [vmem:[%s22530_s1 + $0x30c] ss:$72 sps:$4 sm:$0xff]   ;;  %v16224_v8 = vld [vmem:[%s22530_s1 + $0x308] ss:$72 sps:$4 sm:$0xff]   ;;  %v19577_v30 = vrot.slane %v3140_v53, %v18264_v17 }
 0x2a1   : > { %7333 = vmatprep.subr.bf16.mxu0 %v16211_v62  ;;  %7040 = vmatprep.mubr.bf16.mxu1 %v18814_v2  ;;  %v16221_v62 = vld [vmem:[%s22530_s1 + $0x1500] ss:$72 sps:$4 sm:$0xff]  }
 0x2a2   : > { %7266 = vmatprep.mubr.bf16.mxu0 %v18534_v63 }
 0x2a3   : > { %7447 = vmatpush1.bf16.msra.mxu1 %v16212_v32  ;;  %v16232_v32 = vld [vmem:[%s22530_s1 + $0x39c] ss:$72 sps:$4 sm:$0xff]  }
 0x2a4   : > { %7334 = vmatpush1.bf16.msra.mxu0 %v16209_v61  ;;  %7448 = vmatprep.subr.bf16.mxu1 %v16220_v36  ;;  %v16229_v61 = vld [vmem:[%s22530_s1 + $0x1594] ss:$72 sps:$4 sm:$0xff]   ;;  %v19586_v36 = vrot.slane %v3140_v53, %v18273_v20 }
 0x2a5   : > { %7335 = vmatprep.subr.bf16.mxu0 %v16217_v18  ;;  %v16238_v53 = vld [vmem:[%s22530_s1 + $0x42c] ss:$72 sps:$4 sm:$0xff]  }
 0x2a6   : > { %7041 = vmatmul.mubr.bf16.gmra.mrb[48].mxu1 %v18836_v27 }
 0x2a7   : > { %7267 = vmatmul.mubr.bf16.gmra.mrb[48].mxu0 %v18556_v54  ;;  %7449 = vmatpush1.bf16.msra.mxu1 %v16218_v9  ;;  %v16230_v9 = vld [vmem:[%s22530_s1 + $0x398] ss:$72 sps:$4 sm:$0xff]  }
 0x2a8   : > { %7336 = vmatpush1.bf16.msra.mxu0 %v16215_v52  ;;  %7450 = vmatprep.subr.bf16.mxu1 %v16226_v38  ;;  %v16227_v52 = vld [vmem:[%s22530_s1 + $0x1590] ss:$72 sps:$4 sm:$0xff]   ;;  %v16235_v38 = vld [vmem:[%s22530_s1 + $0x1624] ss:$72 sps:$4 sm:$0xff]  }
 0x2a9   : > { %7337 = vmatprep.subr.bf16.mxu0 %v16223_v46  ;;  %v6344_v18 = vpop.f32.mrb[8].mxu1  ;;  %7050 = vmatprep.mubr.bf16.mxu1 %v18856_v41 }
 0x2aa   : > { %7276 = vmatprep.mubr.bf16.mxu0 %v18570_v4  ;;  %v6346_v46 = vpop.f32.mrb[9].mxu1  ;;  %v14558_v20 = vadd.f32 %v6344_v18, %v19577_v30  ;;  %v16247_v18 = vld [vmem:[%s22530_s1 + $0x1744] ss:$72 sps:$4 sm:$0xff]  }
 0x2ab   : > { %v6348_v17 = vpop.f32.mrb[10].mxu1  ;;  %7451 = vmatpush1.bf16.msra.mxu1 %v16224_v8  ;;  %v14559_v54 = vadd.f32 %v6346_v46, %v19586_v36 }
 0x2ac   : > { %7338 = vmatpush1.bf16.msra.mxu0 %v16221_v62  ;;  %v14560_v28 = vadd.f32 %v6348_v17, %v19577_v30  ;;  %v6350_v4 = vpop.f32.mrb[11].mxu1  ;;  %7452 = vmatprep.subr.bf16.mxu1 %v16232_v32  ;;  %v16233_v17 = vld [vmem:[%s22530_s1 + $0x1620] ss:$72 sps:$4 sm:$0xff]  }
 0x2ad   : > { %7339 = vmatprep.subr.bf16.mxu0 %v16229_v61  ;;  %v14561_v63 = vadd.f32 %v6350_v4, %v19586_v36  ;;  %v16236_v61 = vld [vmem:[%s22530_s1 + $0x428] ss:$72 sps:$4 sm:$0xff]  }
 0x2ae   : > { %7051 = vmatmul.mubr.bf16.gmra.mrb[52].mxu1 %v18883_v24  ;;  %v19608_v62 = vpack.c.bf16 %v14560_v28, %v14558_v20  ;;  %v16241_v20 = vld [vmem:[%s22530_s1 + $0x16b4] ss:$72 sps:$4 sm:$0xff]   ;;  %v16239_v4 = vld [vmem:[%s22530_s1 + $0x16b0] ss:$72 sps:$4 sm:$0xff]  }
 0x2af   : > { %7277 = vmatmul.mubr.bf16.gmra.mrb[52].mxu0 %v18592_v19  ;;  %v19610_v8 = vpack.c.bf16 %v14561_v63, %v14559_v54  ;;  %7453 = vmatpush1.bf16.msra.mxu1 %v16230_v9  ;;  %v16244_v63 = vld [vmem:[%s22530_s1 + $0x4bc] ss:$72 sps:$4 sm:$0xff]   ;;  %v16242_v28 = vld [vmem:[%s22530_s1 + $0x4b8] ss:$72 sps:$4 sm:$0xff]   ;;  %v16250_v9 = vld [vmem:[%s22530_s1 + $0x54c] ss:$72 sps:$4 sm:$0xff]  }
 0x2b0   : > { %22634 = vst [vmem:[#allocation18_spill] sm:$0xff] %v19608_v62  ;;  %7340 = vmatpush1.bf16.msra.mxu0 %v16227_v52  ;;  %8483 = vrot.lane.b32.xlu1 %v19608_v62, %s17086_s17 }
 0x2b1   : > { %22635 = vst [vmem:[#allocation19_spill] sm:$0xff] %v19610_v8  ;;  %7341 = vmatprep.subr.bf16.mxu0 %v16235_v38  ;;  %v6354_v54 = vpop.f32.mrb[12].mxu1  ;;  %7454 = vmatprep.subr.bf16.mxu1 %v16238_v53 }
 0x2b2   : > { %7060 = vmatprep.mubr.bf16.mxu1 %v18897_v39  ;;  %v6356_v32 = vpop.f32.mrb[13].mxu1  ;;  %7286 = vmatprep.mubr.bf16.mxu0 %v18606_v29  ;;  %v14562_v46 = vadd.f32 %v6354_v54, %v19577_v30  ;;  %v16251_v54 = vld [vmem:[%s22530_s1 + $0x17d0] ss:$72 sps:$4 sm:$0xff]  }
 0x2b3   : > { %v6358_v52 = vpop.f32.mrb[14].mxu1  ;;  %7455 = vmatpush1.bf16.msra.mxu1 %v16236_v61  ;;  %v14563_v8 = vadd.f32 %v6356_v32, %v19586_v36  ;;  %v16245_v61 = vld [vmem:[%s22530_s1 + $0x1740] ss:$72 sps:$4 sm:$0xff]  }
 0x2b4   : > { %7342 = vmatpush1.bf16.msra.mxu0 %v16233_v17  ;;  %v14564_v38 = vadd.f32 %v6358_v52, %v19577_v30  ;;  %v6360_v53 = vpop.f32.mrb[15].mxu1  ;;  %7456 = vmatprep.subr.bf16.mxu1 %v16244_v63  ;;  %v16253_v63 = vld [vmem:[%s22530_s1 + $0x17d4] ss:$72 sps:$4 sm:$0xff]  }
 0x2b5   : > { %7343 = vmatprep.subr.bf16.mxu0 %v16241_v20  ;;  %v14565_v62 = vadd.f32 %v6360_v53, %v19586_v36  ;;  %v16248_v20 = vld [vmem:[%s22530_s1 + $0x548] ss:$72 sps:$4 sm:$0xff]   ;;  %v16262_v52 = vld [vmem:[%s22530_s1 + $0x66c] ss:$72 sps:$4 sm:$0xff]  }
 0x2b6   : > { %v19644_v29 = vpack.c.bf16 %v14564_v38, %v14562_v46  ;;  %7061 = vmatmul.mubr.bf16.gmra.mrb[56].mxu1 %v18919_v13 }
 0x2b7   : > { %7287 = vmatmul.mubr.bf16.gmra.mrb[56].mxu0 %v18628_v42  ;;  %v19648_v17 = vpack.c.bf16 %v14565_v62, %v14563_v8  ;;  %7457 = vmatpush1.bf16.msra.mxu1 %v16242_v28  ;;  %v16256_v62 = vld [vmem:[%s22530_s1 + $0x5dc] ss:$72 sps:$4 sm:$0xff]  }
 0x2b8   : > { %22636 = vst [vmem:[#allocation20_spill] sm:$0xff] %v19644_v29  ;;  %7344 = vmatpush1.bf16.msra.mxu0 %v16239_v4  ;;  %8485 = vrot.lane.b32.xlu1 %v19644_v29, %s17086_s17  ;;  %v16254_v4 = vld [vmem:[%s22530_s1 + $0x5d8] ss:$72 sps:$4 sm:$0xff]  }
 0x2b9   : > { %22637 = vst [vmem:[#allocation21_spill] sm:$0xff] %v19648_v17  ;;  %7345 = vmatprep.subr.bf16.mxu0 %v16247_v18  ;;  %v6364_v8 = vpop.f32.mrb[16].mxu1  ;;  %7458 = vmatprep.subr.bf16.mxu1 %v16250_v9  ;;  %v16259_v18 = vld [vmem:[%s22530_s1 + $0x1864] ss:$72 sps:$4 sm:$0xff]  }
 0x2ba   : > { %7070 = vmatprep.mubr.bf16.mxu1 %v18933_v0  ;;  %v14566_v28 = vadd.f32 %v6364_v8, %v19577_v30  ;;  %v6366_v32 = vpop.f32.mrb[17].mxu1  ;;  %7296 = vmatprep.mubr.bf16.mxu0 %v18642_v48 }
 0x2bb   : > { %v6368_v9 = vpop.f32.mrb[18].mxu1  ;;  %7459 = vmatpush1.bf16.msra.mxu1 %v16248_v20  ;;  %v14567_v53 = vadd.f32 %v6366_v32, %v19586_v36  ;;  %v16260_v20 = vld [vmem:[%s22530_s1 + $0x668] ss:$72 sps:$4 sm:$0xff]  }
 0x2bc   : > { %7346 = vmatpush1.bf16.msra.mxu0 %v16245_v61  ;;  %v14568_v46 = vadd.f32 %v6368_v9, %v19577_v30  ;;  %v6370_v38 = vpop.f32.mrb[19].mxu1  ;;  %7460 = vmatprep.subr.bf16.mxu1 %v16256_v62  ;;  %v16257_v61 = vld [vmem:[%s22530_s1 + $0x1860] ss:$72 sps:$4 sm:$0xff]   ;;  %v16268_v62 = vld [vmem:[%s22530_s1 + $0x6fc] ss:$72 sps:$4 sm:$0xff]  }
 0x2bd   : > { %7347 = vmatprep.subr.bf16.mxu0 %v16253_v63  ;;  %v14569_v8 = vadd.f32 %v6370_v38, %v19586_v36  ;;  %v16265_v63 = vld [vmem:[%s22530_s1 + $0x18f4] ss:$72 sps:$4 sm:$0xff]  }
 0x2be   : > { %v19682_v17 = vpack.c.bf16 %v14568_v46, %v14566_v28  ;;  %7071 = vmatmul.mubr.bf16.gmra.mrb[60].mxu1 %v18955_v5  ;;  %v16266_v28 = vld [vmem:[%s22530_s1 + $0x6f8] ss:$72 sps:$4 sm:$0xff]   ;;  %v16274_v9 = vld [vmem:[%s22530_s1 + $0x78c] ss:$72 sps:$4 sm:$0xff]  }
 0x2bf   : > { %7297 = vmatmul.mubr.bf16.gmra.mrb[60].mxu0 %v18664_v6  ;;  %v19686_v29 = vpack.c.bf16 %v14569_v8, %v14567_v53  ;;  %7461 = vmatpush1.bf16.msra.mxu1 %v16254_v4  ;;  %v16263_v4 = vld [vmem:[%s22530_s1 + $0x18f0] ss:$72 sps:$4 sm:$0xff]  }
 0x2c0   : > { %22638 = vst [vmem:[#allocation22_spill] sm:$0xff] %v19682_v17  ;;  %7348 = vmatpush1.bf16.msra.mxu0 %v16251_v54  ;;  %7462 = vmatprep.subr.bf16.mxu1 %v16262_v52 }
 0x2c1   : > { %22639 = vst [vmem:[#allocation23_spill] sm:$0xff] %v19686_v29  ;;  %7349 = vmatprep.subr.bf16.mxu0 %v16259_v18  ;;  %v6374_v54 = vpop.f32.mrb[20].mxu1  ;;  %7080 = vmatprep.mubr.bf16.mxu1 %v18969_v22  ;;  %v16271_v18 = vld [vmem:[%s22530_s1 + $0x1984] ss:$72 sps:$4 sm:$0xff]  }
 0x2c2   : > { %7306 = vmatprep.mubr.bf16.mxu0 %v18678_v14  ;;  %v6376_v32 = vpop.f32.mrb[21].mxu1  ;;  %v14570_v46 = vadd.f32 %v6374_v54, %v19577_v30 }
 0x2c3   : > { %v6378_v52 = vpop.f32.mrb[22].mxu1  ;;  %7463 = vmatpush1.bf16.msra.mxu1 %v16260_v20  ;;  %v14571_v8 = vadd.f32 %v6376_v32, %v19586_v36  ;;  %v16269_v20 = vld [vmem:[%s22530_s1 + $0x1980] ss:$72 sps:$4 sm:$0xff]   ;;  %v16275_v32 = vld [vmem:[%s22530_s1 + $0x1a10] ss:$72 sps:$4 sm:$0xff]  }
 0x2c4   : > { %7350 = vmatpush1.bf16.msra.mxu0 %v16257_v61  ;;  %v14572_v38 = vadd.f32 %v6378_v52, %v19577_v30  ;;  %v6380_v53 = vpop.f32.mrb[23].mxu1  ;;  %7464 = vmatprep.subr.bf16.mxu1 %v16268_v62  ;;  %v16277_v62 = vld [vmem:[%s22530_s1 + $0x1a14] ss:$72 sps:$4 sm:$0xff]  }
 0x2c5   : > { %7351 = vmatprep.subr.bf16.mxu0 %v16265_v63  ;;  %v14573_v29 = vadd.f32 %v6380_v53, %v19586_v36  ;;  %v16272_v63 = vld [vmem:[%s22530_s1 + $0x788] ss:$72 sps:$4 sm:$0xff]  }
 0x2c6   : > { %v19718_v17 = vpack.c.bf16 %v14572_v38, %v14570_v46  ;;  %7081 = vmatmul.mubr.bf16.gmra.mrb[64].mxu1 %v18991_v60  ;;  %v16283_v38 = vld [vmem:[%s22530_s1 + $0x1aa4] ss:$72 sps:$4 sm:$0xff]  }
 0x2c7   : > { %7307 = vmatmul.mubr.bf16.gmra.mrb[64].mxu0 %v18700_v34  ;;  %v19722_v61 = vpack.c.bf16 %v14573_v29, %v14571_v8  ;;  %7465 = vmatpush1.bf16.msra.mxu1 %v16266_v28  ;;  %v16280_v29 = vld [vmem:[%s22530_s1 + $0x81c] ss:$72 sps:$4 sm:$0xff]  }
 0x2c8   : > { %22640 = vst [vmem:[#allocation24_spill] sm:$0xff] %v19718_v17  ;;  %7352 = vmatpush1.bf16.msra.mxu0 %v16263_v4  ;;  %8489 = vrot.lane.b32.xlu1 %v19718_v17, %s17086_s17  ;;  %v16314_v17 = vld [vmem:[%s22530_s1 + $0x280] ss:$72 sps:$4 sm:$0xff]  }
 0x2c9   : > { %22641 = vst [vmem:[#allocation25_spill] sm:$0xff] %v19722_v61  ;;  %7353 = vmatprep.subr.bf16.mxu0 %v16271_v18  ;;  %v6384_v54 = vpop.f32.mrb[24].mxu1  ;;  %7466 = vmatprep.subr.bf16.mxu1 %v16274_v9  ;;  %v16278_v18 = vld [vmem:[%s22530_s1 + $0x818] ss:$72 sps:$4 sm:$0xff]  }
 0x2ca   : > { %7090 = vmatprep.mubr.bf16.mxu1 %v19005_v11  ;;  %v6386_v4 = vpop.f32.mrb[25].mxu1  ;;  %7316 = vmatprep.mubr.bf16.mxu0 %v18714_v45  ;;  %v14574_v52 = vadd.f32 %v6384_v54, %v19577_v30  ;;  %v16284_v54 = vld [vmem:[%s22530_s1 + $0x8a8] ss:$72 sps:$4 sm:$0xff]  }
 0x2cb   : > { %v6388_v28 = vpop.f32.mrb[26].mxu1  ;;  %7467 = vmatpush1.bf16.msra.mxu1 %v16272_v63  ;;  %v14575_v53 = vadd.f32 %v6386_v4, %v19586_v36  ;;  %v16289_v4 = vld [vmem:[%s22530_s1 + $0x93c] ss:$72 sps:$4 sm:$0xff]  }
 0x2cc   : > { %7354 = vmatpush1.bf16.msra.mxu0 %v16269_v20  ;;  %v14576_v9 = vadd.f32 %v6388_v28, %v19577_v30  ;;  %v6390_v46 = vpop.f32.mrb[27].mxu1  ;;  %7468 = vmatprep.subr.bf16.mxu1 %v16280_v29  ;;  %v16286_v20 = vld [vmem:[%s22530_s1 + $0x8ac] ss:$72 sps:$4 sm:$0xff]   ;;  %v16281_v29 = vld [vmem:[%s22530_s1 + $0x1aa0] ss:$72 sps:$4 sm:$0xff]  }
 0x2cd   : > { %7355 = vmatprep.subr.bf16.mxu0 %v16277_v62  ;;  %v14577_v8 = vadd.f32 %v6390_v46, %v19586_v36  ;;  %v16292_v28 = vld [vmem:[%s22530_s1 + $0x44] ss:$72 sps:$4 sm:$0xff]   ;;  %v16290_v46 = vld [vmem:[%s22530_s1 + $0x40] ss:$72 sps:$4 sm:$0xff]  }
 0x2ce   : > { %v19756_v63 = vpack.c.bf16 %v14576_v9, %v14574_v52  ;;  %7091 = vmatmul.mubr.bf16.gmra.mrb[68].mxu1 %v19025_v47  ;;  %v16287_v9 = vld [vmem:[%s22530_s1 + $0x938] ss:$72 sps:$4 sm:$0xff]  }
 0x2cf   : > { %7317 = vmatmul.mubr.bf16.gmra.mrb[68].mxu0 %v18734_v59  ;;  %v19760_v62 = vpack.c.bf16 %v14577_v8, %v14575_v53  ;;  %7469 = vmatpush1.bf16.msra.mxu1 %v16278_v18 }
 0x2d0   : > { %22642 = vst [vmem:[#allocation26_spill] sm:$0xff] %v19756_v63  ;;  %7356 = vmatpush1.bf16.msra.mxu0 %v16275_v32  ;;  %8491 = vrot.lane.b32.xlu1 %v19756_v63, %s17086_s17 }
 0x2d1   : > { %22643 = vst [vmem:[#allocation27_spill] sm:$0xff] %v19760_v62  ;;  %7357 = vmatprep.subr.bf16.mxu0 %v16283_v38  ;;  %v6394_v32 = vpop.f32.mrb[28].mxu1  ;;  %7470 = vmatprep.subr.bf16.mxu1 %v16286_v20  ;;  %v16295_v20 = vld [vmem:[%s22530_s1 + $0x9cc] ss:$72 sps:$4 sm:$0xff]  }
 0x2d2   : > { %7472 = vmatprep.mubr.bf16.mxu1 %v17330_v50  ;;  %v6396_v18 = vpop.f32.mrb[29].mxu1  ;;  %7359 = vmatprep.mubr.bf16.mxu0 %v17489_v44  ;;  %v14578_v38 = vadd.f32 %v6394_v32, %v19577_v30  ;;  %v16298_v62 = vld [vmem:[%s22530_s1 + $0xd4] ss:$72 sps:$4 sm:$0xff]   ;;  %v16296_v32 = vld [vmem:[%s22530_s1 + $0xd0] ss:$72 sps:$4 sm:$0xff]  }
 0x2d3   : > { %v6398_v52 = vpop.f32.mrb[30].mxu1  ;;  %7471 = vmatpush1.bf16.msra.mxu1 %v16284_v54 }
 0x2d4   : > { %7358 = vmatpush1.bf16.msra.mxu0 %v16281_v29  ;;  %v14580_v53 = vadd.f32 %v6398_v52, %v19577_v30  ;;  %v6400_v8 = vpop.f32.mrb[31].mxu1  ;;  %7553 = vmatprep.subr.bf16.mxu1 %v16289_v4  ;;  %v14579_v29 = vadd.f32 %v6396_v18, %v19586_v36  ;;  %v16301_v18 = vld [vmem:[%s22530_s1 + $0xa5c] ss:$72 sps:$4 sm:$0xff]  }
 0x2d5   : > { %7779 = vmatprep.subr.bf16.mxu0 %v16292_v28  ;;  %v14581_v54 = vadd.f32 %v6400_v8, %v19586_v36  ;;  %v16293_v28 = vld [vmem:[%s22530_s1 + $0x9c8] ss:$72 sps:$4 sm:$0xff]   ;;  %v16304_v52 = vld [vmem:[%s22530_s1 + $0x164] ss:$72 sps:$4 sm:$0xff]  }
 0x2d6   : > { %v19794_v61 = vpack.c.bf16 %v14580_v53, %v14578_v38  ;;  %7473 = vmatmul.mubr.bf16.vlgmr.msra.gmra.mrb[72].mxu1 %v17396_v12  ;;  %v16299_v53 = vld [vmem:[%s22530_s1 + $0xa58] ss:$72 sps:$4 sm:$0xff]  }
 0x2d7   : > { %7360 = vmatmul.mubr.bf16.vlgmr.msra.gmra.mrb[40].mxu0 %v17602_v23  ;;  %v19798_v4 = vpack.c.bf16 %v14581_v54, %v14579_v29  ;;  %7554 = vmatpush1.bf16.msra.mxu1 %v16287_v9  ;;  %v16302_v8 = vld [vmem:[%s22530_s1 + $0x160] ss:$72 sps:$4 sm:$0xff]   ;;  %v16307_v54 = vld [vmem:[%s22530_s1 + $0xaec] ss:$72 sps:$4 sm:$0xff]  }
 0x2d8   : > { %22644 = vst [vmem:[#allocation28_spill] sm:$0xff] %v19794_v61  ;;  %7780 = vmatpush1.bf16.msra.mxu0 %v16290_v46  ;;  %8493 = vrot.lane.b32.xlu1 %v19794_v61, %s17086_s17 }
 0x2d9   : > { %22645 = vst [vmem:[#allocation29_spill] sm:$0xff] %v19798_v4  ;;  %7555 = vmatprep.subr.bf16.mxu1 %v16295_v20  ;;  %v6404_v9 = vpop.f32.mrb[32].mxu1  ;;  %7781 = vmatprep.subr.bf16.mxu0 %v16298_v62  ;;  %v16310_v4 = vld [vmem:[%s22530_s1 + $0x1f4] ss:$72 sps:$4 sm:$0xff]  }
 0x2da   : > { %7482 = vmatprep.mubr.bf16.mxu1 %v18213_v56  ;;  %v6406_v46 = vpop.f32.mrb[33].mxu1  ;;  %7369 = vmatprep.mubr.bf16.mxu0 %v18778_v31  ;;  %v14582_v20 = vadd.f32 %v6404_v9, %v19577_v30  ;;  %v16308_v9 = vld [vmem:[%s22530_s1 + $0x1f0] ss:$72 sps:$4 sm:$0xff]  }
 0x2db   : > { %v6408_v38 = vpop.f32.mrb[34].mxu1  ;;  %7556 = vmatpush1.bf16.msra.mxu1 %v16293_v28  ;;  %v14583_v28 = vadd.f32 %v6406_v46, %v19586_v36  ;;  %v19845_v46 = vsub.s32 4, %v18244_v7 }
 0x2dc   : > { %7782 = vmatpush1.bf16.msra.mxu0 %v16296_v32  ;;  %v14584_v62 = vadd.f32 %v6408_v38, %v19577_v30  ;;  %v6410_v29 = vpop.f32.mrb[35].mxu1  ;;  %7557 = vmatprep.subr.bf16.mxu1 %v16301_v18  ;;  %v16305_v18 = vld [vmem:[%s22530_s1 + $0xae8] ss:$72 sps:$4 sm:$0xff]   ;;  %v2530_v38 = vpop.f32.mrb[4].mxu0 }
 0x2dd   : > { %7783 = vmatprep.subr.bf16.mxu0 %v16304_v52  ;;  %v14585_v32 = vadd.f32 %v6410_v29, %v19586_v36  ;;  %22648 = vst [vmem:[#allocation32_spill] sm:$0xff] %v19845_v46 }
 0x2de   : > { %v19832_v61 = vpack.c.bf16 %v14584_v62, %v14582_v20  ;;  %7483 = vmatmul.mubr.bf16.gmra.mrb[76].mxu1 %v18230_v1  ;;  %v19848_v20 = vsub.s32 5, %v18244_v7  ;;  %v2532_v62 = vpop.f32.mrb[5].mxu0 }
 0x2df   : > { %7370 = vmatmul.mubr.bf16.gmra.mrb[44].mxu0 %v18800_v51  ;;  %v19839_v52 = vpack.c.bf16 %v14585_v32, %v14583_v28  ;;  %7558 = vmatpush1.bf16.msra.mxu1 %v16299_v53  ;;  %v16313_v53 = vld [vmem:[%s22530_s1 + $0xb7c] ss:$72 sps:$4 sm:$0xff]   ;;  %v2534_v7 = vpop.f32.mrb[6].mxu0 }
 0x2e0   : > { %22646 = vst [vmem:[#allocation30_spill] sm:$0xff] %v19832_v61  ;;  %7784 = vmatpush1.bf16.msra.mxu0 %v16302_v8  ;;  %22649 = vst [vmem:[#allocation33_spill] sm:$0xff] %v19848_v20  ;;  %8495 = vrot.lane.b32.xlu1 %v19832_v61, %s17086_s17  ;;  %v16316_v8 = vld [vmem:[%s22530_s1 + $0x284] ss:$72 sps:$4 sm:$0xff]   ;;  %v2535_v61 = vpop.f32.mrb[7].mxu0 }
 0x2e1   : > { %22647 = vst [vmem:[#allocation31_spill] sm:$0xff] %v19839_v52  ;;  %7559 = vmatprep.subr.bf16.mxu1 %v16307_v54  ;;  %v6414_v29 = vpop.f32.mrb[36].mxu1  ;;  %7785 = vmatprep.subr.bf16.mxu0 %v16310_v4  ;;  %v17020_v28 = vld [vmem:[%s22531_s2] sm:$0x3f]  ;;  %v16319_v61 = vld [vmem:[%s22530_s1 + $0xc0c] ss:$72 sps:$4 sm:$0xff]  }
 0x2e2   : > { %7492 = vmatprep.mubr.bf16.mxu1 %v18252_v10  ;;  %v717_v32 = vrot.slane %v17020_v28, %v19845_v46  ;;  %v721_v54 = vrot.slane %v17020_v28, %v19848_v20  ;;  %v6416_v52 = vpop.f32.mrb[37].mxu1  ;;  %7379 = vmatprep.mubr.bf16.mxu0 %v18814_v2  ;;  %v16311_v4 = vld [vmem:[%s22530_s1 + $0xb78] ss:$72 sps:$4 sm:$0xff]   ;;  %v14586_v28 = vadd.f32 %v6414_v29, %v19577_v30  ;;  %v16330_v29 = vld [vmem:[%s22530_s1 + $0xd28] ss:$72 sps:$4 sm:$0xff]  }
 0x2e3   : > { %v6418_v63 = vpop.f32.mrb[38].mxu1  ;;  %7560 = vmatpush1.bf16.msra.mxu1 %v16305_v18  ;;  %v14587_v18 = vadd.f32 %v6416_v52, %v19586_v36  ;;  %v16323_v52 = vld [vmem:[#allocation2] ss:$0 sps:$4 sm:$0xff]  }
 0x2e4   : > { %7786 = vmatpush1.bf16.msra.mxu0 %v16308_v9  ;;  %v14556_v51 = vadd.f32 %v2530_v38, %v717_v32  ;;  %v14557_v46 = vadd.f32 %v2532_v62, %v721_v54  ;;  %v14588_v7 = vadd.f32 %v6418_v63, %v19577_v30  ;;  %v6420_v20 = vpop.f32.mrb[39].mxu1  ;;  %7561 = vmatprep.subr.bf16.mxu1 %v16313_v53  ;;  %v16322_v38 = vld [vmem:[%s22530_s1 + $0x314] ss:$72 sps:$4 sm:$0xff]   ;;  %v16317_v63 = vld [vmem:[%s22530_s1 + $0xc08] ss:$72 sps:$4 sm:$0xff]  }
 0x2e5   : > { %7787 = vmatprep.subr.bf16.mxu0 %v16316_v8  ;;  %v14589_v9 = vadd.f32 %v6420_v20, %v19586_v36  ;;  %v16320_v36 = vld [vmem:[%s22530_s1 + $0x310] ss:$72 sps:$4 sm:$0xff]   ;;  %v16327_v20 = vld [vmem:[%s22530_s1 + $0x3a0] ss:$72 sps:$4 sm:$0xff]   ;;  %v16332_v53 = vld [vmem:[%s22530_s1 + $0xd2c] ss:$72 sps:$4 sm:$0xff]  }
 0x2e6   : > { %v13847_v62 = vpack.c.bf16 %v14557_v46, %v14556_v51  ;;  %v19881_v32 = vpack.c.bf16 %v14588_v7, %v14586_v28  ;;  %7493 = vmatmul.mubr.bf16.gmra.mrb[80].mxu1 %v18276_v21  ;;  %v16326_v51 = vld [vmem:[%s22530_s1 + $0xc9c] ss:$72 sps:$4 sm:$0xff]   ;;  %v16324_v46 = vld [vmem:[%s22530_s1 + $0xc98] ss:$72 sps:$4 sm:$0xff]  }
 0x2e7   : > { %7380 = vmatmul.mubr.bf16.gmra.mrb[48].mxu0 %v18836_v27  ;;  %v19885_v30 = vpack.c.bf16 %v14589_v9, %v14587_v18  ;;  %7562 = vmatpush1.bf16.msra.mxu1 %v16311_v4  ;;  %v16335_v8 = vld [vmem:[%s22530_s1 + $0x434] ss:$72 sps:$4 sm:$0xff]   ;;  %v16333_v54 = vld [vmem:[%s22530_s1 + $0x430] ss:$72 sps:$4 sm:$0xff]   ;;  %v16341_v28 = vld [vmem:[%s22530_s1 + $0x4c4] ss:$72 sps:$4 sm:$0xff]  }
 0x2e8   : > { %7788 = vmatpush1.bf16.msra.mxu0 %v16314_v17  ;;  %2563 = vst [vmem:[#allocation2 + $0x10] sm:$0xff] %v13847_v62  ;;  %8497 = vrot.lane.b32.xlu1 %v19881_v32, %s17086_s17  ;;  %v16329_v17 = vld [vmem:[%s22530_s1 + $0x3a4] ss:$72 sps:$4 sm:$0xff]   ;;  %v16336_v7 = vld [vmem:[%s22530_s1 + $0xdb8] ss:$72 sps:$4 sm:$0xff]  }
 0x2e9   : > { %7563 = vmatprep.subr.bf16.mxu1 %v16319_v61  ;;  %7789 = vmatprep.subr.bf16.mxu0 %v16322_v38  ;;  %v16338_v4 = vld [vmem:[%s22530_s1 + $0xdbc] ss:$72 sps:$4 sm:$0xff]   ;;  %v16339_v61 = vld [vmem:[%s22530_s1 + $0x4c0] ss:$72 sps:$4 sm:$0xff]   ;;  %v16344_v18 = vld [vmem:[%s22530_s1 + $0xe4c] ss:$72 sps:$4 sm:$0xff]  }
 0x2ea   : > { %7502 = vmatprep.mubr.bf16.mxu1 %v18300_v33  ;;  %7389 = vmatprep.mubr.bf16.mxu0 %v18856_v41  ;;  %v16347_v9 = vld [vmem:[%s22530_s1 + $0x554] ss:$72 sps:$4 sm:$0xff]   ;;  %v16342_v38 = vld [vmem:[%s22530_s1 + $0xe48] ss:$72 sps:$4 sm:$0xff]  }
 0x2eb   : > { %7564 = vmatpush1.bf16.msra.mxu1 %v16317_v63  ;;  %v16345_v62 = vld [vmem:[%s22530_s1 + $0x550] ss:$72 sps:$4 sm:$0xff]   ;;  %v16350_v63 = vld [vmem:[%s22530_s1 + $0xedc] ss:$72 sps:$4 sm:$0xff]  }
 0x2ec   : > { %7790 = vmatpush1.bf16.msra.mxu0 %v16320_v36  ;;  %8473 = vrot.lane.b32.xlu1 %v16323_v52, %s17086_s17  ;;  %v16353_v36 = vld [vmem:[%s22530_s1 + $0x5e4] ss:$72 sps:$4 sm:$0xff]  }
 0x2ed   : > { %7565 = vmatprep.subr.bf16.mxu1 %v16326_v51  ;;  %7791 = vmatprep.subr.bf16.mxu0 %v16329_v17  ;;  %v16348_v51 = vld [vmem:[%s22530_s1 + $0xed8] ss:$72 sps:$4 sm:$0xff]   ;;  %v16356_v52 = vld [vmem:[%s22530_s1 + $0xf6c] ss:$72 sps:$4 sm:$0xff]  }
 0x2ee   : > { %7503 = vmatmul.mubr.bf16.gmra.mrb[84].mxu1 %v18314_v43  ;;  %v16351_v17 = vld [vmem:[%s22530_s1 + $0x5e0] ss:$72 sps:$4 sm:$0xff]  }
 0x2ef   : > { %7390 = vmatmul.mubr.bf16.gmra.mrb[52].mxu0 %v18883_v24  ;;  %7566 = vmatpush1.bf16.msra.mxu1 %v16324_v46  ;;  %v16359_v46 = vld [vmem:[%s22530_s1 + $0x674] ss:$72 sps:$4 sm:$0xff]  }
 0x2f0   : > { %7792 = vmatpush1.bf16.msra.mxu0 %v16327_v20  ;;  %7567 = vmatprep.subr.bf16.mxu1 %v16332_v53  ;;  %v16354_v20 = vld [vmem:[%s22530_s1 + $0xf68] ss:$72 sps:$4 sm:$0xff]  }
 0x2f1   : > { %7793 = vmatprep.subr.bf16.mxu0 %v16335_v8  ;;  %7512 = vmatprep.mubr.bf16.mxu1 %v18336_v58  ;;  %v16357_v53 = vld [vmem:[%s22530_s1 + $0x670] ss:$72 sps:$4 sm:$0xff]   ;;  %v16362_v8 = vld [vmem:[%s22530_s1 + $0xffc] ss:$72 sps:$4 sm:$0xff]  }
 0x2f2   : > { %7399 = vmatprep.mubr.bf16.mxu0 %v18897_v39 }
 0x2f3   : > { %7568 = vmatpush1.bf16.msra.mxu1 %v16330_v29  ;;  %v16365_v29 = vld [vmem:[%s22530_s1 + $0x704] ss:$72 sps:$4 sm:$0xff]  }
 0x2f4   : > { %7794 = vmatpush1.bf16.msra.mxu0 %v16333_v54  ;;  %7569 = vmatprep.subr.bf16.mxu1 %v16338_v4  ;;  %v16360_v54 = vld [vmem:[%s22530_s1 + $0xff8] ss:$72 sps:$4 sm:$0xff]  }
 0x2f5   : > { %7795 = vmatprep.subr.bf16.mxu0 %v16341_v28  ;;  %v16363_v4 = vld [vmem:[%s22530_s1 + $0x700] ss:$72 sps:$4 sm:$0xff]   ;;  %v16368_v28 = vld [vmem:[%s22530_s1 + $0x108c] ss:$72 sps:$4 sm:$0xff]  }
 0x2f6   : > { %7513 = vmatmul.mubr.bf16.gmra.mrb[88].mxu1 %v18348_v3 }
 0x2f7   : > { %7400 = vmatmul.mubr.bf16.gmra.mrb[56].mxu0 %v18919_v13  ;;  %7570 = vmatpush1.bf16.msra.mxu1 %v16336_v7  ;;  %v16371_v7 = vld [vmem:[%s22530_s1 + $0x794] ss:$72 sps:$4 sm:$0xff]  }
 0x2f8   : > { %7796 = vmatpush1.bf16.msra.mxu0 %v16339_v61  ;;  %7571 = vmatprep.subr.bf16.mxu1 %v16344_v18  ;;  %v16366_v61 = vld [vmem:[%s22530_s1 + $0x1088] ss:$72 sps:$4 sm:$0xff]  }
 0x2f9   : > { %7797 = vmatprep.subr.bf16.mxu0 %v16347_v9  ;;  %7522 = vmatprep.mubr.bf16.mxu1 %v18370_v16  ;;  %v16369_v18 = vld [vmem:[%s22530_s1 + $0x790] ss:$72 sps:$4 sm:$0xff]   ;;  %v16374_v9 = vld [vmem:[%s22530_s1 + $0x111c] ss:$72 sps:$4 sm:$0xff]  }
 0x2fa   : > { %7409 = vmatprep.mubr.bf16.mxu0 %v18933_v0 }
 0x2fb   : > { %7572 = vmatpush1.bf16.msra.mxu1 %v16342_v38  ;;  %v16377_v38 = vld [vmem:[%s22530_s1 + $0x824] ss:$72 sps:$4 sm:$0xff]  }
 0x2fc   : > { %7798 = vmatpush1.bf16.msra.mxu0 %v16345_v62  ;;  %7573 = vmatprep.subr.bf16.mxu1 %v16350_v63  ;;  %v16372_v62 = vld [vmem:[%s22530_s1 + $0x1118] ss:$72 sps:$4 sm:$0xff]  }
 0x2fd   : > { %7799 = vmatprep.subr.bf16.mxu0 %v16353_v36  ;;  %v16375_v63 = vld [vmem:[%s22530_s1 + $0x820] ss:$72 sps:$4 sm:$0xff]   ;;  %v16380_v36 = vld [vmem:[%s22530_s1 + $0x11ac] ss:$72 sps:$4 sm:$0xff]  }
 0x2fe   : > { %7523 = vmatmul.mubr.bf16.gmra.mrb[92].mxu1 %v18382_v25 }
 0x2ff   : > { %7410 = vmatmul.mubr.bf16.gmra.mrb[60].mxu0 %v18955_v5  ;;  %7574 = vmatpush1.bf16.msra.mxu1 %v16348_v51  ;;  %v16383_v51 = vld [vmem:[%s22530_s1 + $0x8b4] ss:$72 sps:$4 sm:$0xff]  }
 0x300   : > { %7800 = vmatpush1.bf16.msra.mxu0 %v16351_v17  ;;  %7575 = vmatprep.subr.bf16.mxu1 %v16356_v52  ;;  %v16378_v17 = vld [vmem:[%s22530_s1 + $0x11a8] ss:$72 sps:$4 sm:$0xff]  }
 0x301   : > { %7801 = vmatprep.subr.bf16.mxu0 %v16359_v46  ;;  %7532 = vmatprep.mubr.bf16.mxu1 %v18404_v35  ;;  %v16381_v52 = vld [vmem:[%s22530_s1 + $0x8b0] ss:$72 sps:$4 sm:$0xff]   ;;  %v16386_v46 = vld [vmem:[%s22530_s1 + $0x123c] ss:$72 sps:$4 sm:$0xff]  }
 0x302   : > { %7419 = vmatprep.mubr.bf16.mxu0 %v18969_v22 }
 0x303   : > { %7576 = vmatpush1.bf16.msra.mxu1 %v16354_v20  ;;  %v16389_v20 = vld [vmem:[%s22530_s1 + $0x944] ss:$72 sps:$4 sm:$0xff]  }
 0x304   : > { %7802 = vmatpush1.bf16.msra.mxu0 %v16357_v53  ;;  %7577 = vmatprep.subr.bf16.mxu1 %v16362_v8  ;;  %v16384_v53 = vld [vmem:[%s22530_s1 + $0x1238] ss:$72 sps:$4 sm:$0xff]  }
 0x305   : > { %7803 = vmatprep.subr.bf16.mxu0 %v16365_v29  ;;  %v16387_v8 = vld [vmem:[%s22530_s1 + $0x940] ss:$72 sps:$4 sm:$0xff]   ;;  %v16392_v29 = vld [vmem:[%s22530_s1 + $0x12cc] ss:$72 sps:$4 sm:$0xff]  }
 0x306   : > { %7533 = vmatmul.mubr.bf16.gmra.mrb[96].mxu1 %v18416_v40 }
 0x307   : > { %7420 = vmatmul.mubr.bf16.gmra.mrb[64].mxu0 %v18991_v60  ;;  %7578 = vmatpush1.bf16.msra.mxu1 %v16360_v54  ;;  %v16390_v54 = vld [vmem:[%s22530_s1 + $0x12c8] ss:$72 sps:$4 sm:$0xff]  }
 0x308   : > { %7804 = vmatpush1.bf16.msra.mxu0 %v16363_v4  ;;  %7579 = vmatprep.subr.bf16.mxu1 %v16368_v28  ;;  %v16393_v4 = vld [vmem:[%s22530_s1 + $0x9d0] ss:$72 sps:$4 sm:$0xff]   ;;  %v16398_v28 = vld [vmem:[%s22530_s1 + $0x135c] ss:$72 sps:$4 sm:$0xff]  }
 0x309   : > { %7805 = vmatprep.subr.bf16.mxu0 %v16371_v7  ;;  %7542 = vmatprep.mubr.bf16.mxu1 %v18438_v49  ;;  %v16396_v7 = vld [vmem:[%s22530_s1 + $0x1358] ss:$72 sps:$4 sm:$0xff]  }
 0x30a   : > { %7429 = vmatprep.mubr.bf16.mxu0 %v19005_v11 }
 0x30b   : > { %7580 = vmatpush1.bf16.msra.mxu1 %v16366_v61  ;;  %v16399_v61 = vld [vmem:[%s22530_s1 + $0xa60] ss:$72 sps:$4 sm:$0xff]  }
 0x30c   : > { %7806 = vmatpush1.bf16.msra.mxu0 %v16369_v18  ;;  %7581 = vmatprep.subr.bf16.mxu1 %v16374_v9  ;;  %v16404_v18 = vld [vmem:[%s22530_s1 + $0x13ec] ss:$72 sps:$4 sm:$0xff]   ;;  %v16402_v9 = vld [vmem:[%s22530_s1 + $0x13e8] ss:$72 sps:$4 sm:$0xff]  }
 0x30d   : > { %7807 = vmatprep.subr.bf16.mxu0 %v16377_v38  ;;  %v16405_v38 = vld [vmem:[%s22530_s1 + $0xaf0] ss:$72 sps:$4 sm:$0xff]  }
 0x30e   : > { %7543 = vmatmul.mubr.bf16.gmra.mrb[100].mxu1 %v18450_v57 }
 0x30f   : > { %7430 = vmatmul.mubr.bf16.gmra.mrb[68].mxu0 %v19025_v47  ;;  %7582 = vmatpush1.bf16.msra.mxu1 %v16372_v62  ;;  %v16410_v62 = vld [vmem:[%s22530_s1 + $0x147c] ss:$72 sps:$4 sm:$0xff]  }
 0x310   : > { %7808 = vmatpush1.bf16.msra.mxu0 %v16375_v63  ;;  %7583 = vmatprep.subr.bf16.mxu1 %v16380_v36  ;;  %v22650_v63 = vld [vmem:[#allocation11_spill] sm:$0xff]  ;;  %v16408_v36 = vld [vmem:[%s22530_s1 + $0x1478] ss:$72 sps:$4 sm:$0xff]  }
 0x311   : > { %7809 = vmatprep.subr.bf16.mxu0 %v16383_v51  ;;  %7585 = vmatprep.mubr.bf16.mxu1 %v17340_v55  ;;  %v16411_v51 = vld [vmem:[%s22530_s1 + $0xb80] ss:$72 sps:$4 sm:$0xff]  }
 0x312   : > { %7811 = vmatprep.mubr.bf16.mxu0 %v17330_v50  ;;  %v16395_v50 = vld [vmem:[%s22530_s1 + $0x9d4] ss:$72 sps:$4 sm:$0xff]  }
 0x313   : > { %7584 = vmatpush1.bf16.msra.mxu1 %v16378_v17  ;;  %v16416_v17 = vld [vmem:[%s22530_s1 + $0x150c] ss:$72 sps:$4 sm:$0xff]  }
 0x314   : > { %7810 = vmatpush1.bf16.msra.mxu0 %v16381_v52  ;;  %7666 = vmatprep.subr.bf16.mxu1 %v16386_v46  ;;  %v22651_v52 = vld [vmem:[#allocation12_spill] sm:$0xff] }
 0x315   : > { %7892 = vmatprep.subr.bf16.mxu0 %v16389_v20  ;;  %v16414_v46 = vld [vmem:[%s22530_s1 + $0x1508] ss:$72 sps:$4 sm:$0xff]  }
 0x316   : > { %7586 = vmatmul.mubr.bf16.vlgmr.msra.gmra.mrb[72].mxu1 %v17404_v15  ;;  %v16417_v20 = vld [vmem:[%s22530_s1 + $0xc10] ss:$72 sps:$4 sm:$0xff]  }
 0x317   : > { %7812 = vmatmul.mubr.bf16.vlgmr.msra.gmra.mrb[72].mxu0 %v17396_v12  ;;  %7667 = vmatpush1.bf16.msra.mxu1 %v16384_v53  ;;  %v16401_v12 = vld [vmem:[%s22530_s1 + $0xa64] ss:$72 sps:$4 sm:$0xff]  }
 0x318   : > { %7893 = vmatpush1.bf16.msra.mxu0 %v16387_v8  ;;  %7668 = vmatprep.subr.bf16.mxu1 %v16392_v29  ;;  %v16422_v53 = vld [vmem:[%s22530_s1 + $0x159c] ss:$72 sps:$4 sm:$0xff]   ;;  %v16420_v29 = vld [vmem:[%s22530_s1 + $0x1598] ss:$72 sps:$4 sm:$0xff]  }
 0x319   : > { %7894 = vmatprep.subr.bf16.mxu0 %v16395_v50  ;;  %7595 = vmatprep.mubr.bf16.mxu1 %v18498_v26  ;;  %v22652_v8 = vld [vmem:[#allocation13_spill] sm:$0xff]  ;;  %v16423_v50 = vld [vmem:[%s22530_s1 + $0xca0] ss:$72 sps:$4 sm:$0xff]  }
 0x31a   : > { %7821 = vmatprep.mubr.bf16.mxu0 %v18213_v56  ;;  %v16407_v56 = vld [vmem:[%s22530_s1 + $0xaf4] ss:$72 sps:$4 sm:$0xff]  }
 0x31b   : > { %7669 = vmatpush1.bf16.msra.mxu1 %v16390_v54  ;;  %v16428_v54 = vld [vmem:[%s22530_s1 + $0x162c] ss:$72 sps:$4 sm:$0xff]  }
 0x31c   : > { %7895 = vmatpush1.bf16.msra.mxu0 %v16393_v4  ;;  %7670 = vmatprep.subr.bf16.mxu1 %v16398_v28  ;;  %v16426_v4 = vld [vmem:[%s22530_s1 + $0x1628] ss:$72 sps:$4 sm:$0xff]  }
 0x31d   : > { %7896 = vmatprep.subr.bf16.mxu0 %v16401_v12  ;;  %v16429_v28 = vld [vmem:[%s22530_s1 + $0xd30] ss:$72 sps:$4 sm:$0xff]   ;;  %v16434_v12 = vld [vmem:[%s22530_s1 + $0x16bc] ss:$72 sps:$4 sm:$0xff]  }
 0x31e   : > { %7596 = vmatmul.mubr.bf16.gmra.mrb[76].mxu1 %v18520_v37 }
 0x31f   : > { %7822 = vmatmul.mubr.bf16.gmra.mrb[76].mxu0 %v18230_v1  ;;  %7671 = vmatpush1.bf16.msra.mxu1 %v16396_v7  ;;  %v16413_v1 = vld [vmem:[%s22530_s1 + $0xb84] ss:$72 sps:$4 sm:$0xff]  }
 0x320   : > { %7897 = vmatpush1.bf16.msra.mxu0 %v16399_v61  ;;  %7672 = vmatprep.subr.bf16.mxu1 %v16404_v18  ;;  %v22653_v7 = vld [vmem:[#allocation14_spill] sm:$0xff] }
 0x321   : > { %7898 = vmatprep.subr.bf16.mxu0 %v16407_v56  ;;  %7605 = vmatprep.mubr.bf16.mxu1 %v22650_v63  ;;  %v16432_v61 = vld [vmem:[%s22530_s1 + $0x16b8] ss:$72 sps:$4 sm:$0xff]   ;;  %v16440_v56 = vld [vmem:[%s22530_s1 + $0x174c] ss:$72 sps:$4 sm:$0xff]  }
 0x322   : > { %7831 = vmatprep.mubr.bf16.mxu0 %v18252_v10  ;;  %v16419_v10 = vld [vmem:[%s22530_s1 + $0xc14] ss:$72 sps:$4 sm:$0xff]   ;;  %v16435_v18 = vld [vmem:[%s22530_s1 + $0xdc0] ss:$72 sps:$4 sm:$0xff]  }
 0x323   : > { %7673 = vmatpush1.bf16.msra.mxu1 %v16402_v9  ;;  %v16438_v9 = vld [vmem:[%s22530_s1 + $0x1748] ss:$72 sps:$4 sm:$0xff]  }
 0x324   : > { %7899 = vmatpush1.bf16.msra.mxu0 %v16405_v38  ;;  %7674 = vmatprep.subr.bf16.mxu1 %v16410_v62  ;;  %v16441_v38 = vld [vmem:[%s22530_s1 + $0xe50] ss:$72 sps:$4 sm:$0xff]   ;;  %v16446_v62 = vld [vmem:[%s22530_s1 + $0x17dc] ss:$72 sps:$4 sm:$0xff]  }
 0x325   : > { %7900 = vmatprep.subr.bf16.mxu0 %v16413_v1  ;;  %v16444_v1 = vld [vmem:[%s22530_s1 + $0x17d8] ss:$72 sps:$4 sm:$0xff]  }
 0x326   : > { %7606 = vmatmul.mubr.bf16.gmra.mrb[80].mxu1 %v22651_v52 }
 0x327   : > { %7832 = vmatmul.mubr.bf16.gmra.mrb[80].mxu0 %v18276_v21  ;;  %7675 = vmatpush1.bf16.msra.mxu1 %v16408_v36  ;;  %v16425_v21 = vld [vmem:[%s22530_s1 + $0xca4] ss:$72 sps:$4 sm:$0xff]   ;;  %v16447_v36 = vld [vmem:[%s22530_s1 + $0xee0] ss:$72 sps:$4 sm:$0xff]  }
 0x328   : > { %7901 = vmatpush1.bf16.msra.mxu0 %v16411_v51  ;;  %7676 = vmatprep.subr.bf16.mxu1 %v16416_v17  ;;  %v16452_v51 = vld [vmem:[%s22530_s1 + $0x186c] ss:$72 sps:$4 sm:$0xff]   ;;  %v16450_v17 = vld [vmem:[%s22530_s1 + $0x1868] ss:$72 sps:$4 sm:$0xff]  }
 0x329   : > { %7902 = vmatprep.subr.bf16.mxu0 %v16419_v10  ;;  %7615 = vmatprep.mubr.bf16.mxu1 %v22652_v8  ;;  %v16453_v10 = vld [vmem:[%s22530_s1 + $0xf70] ss:$72 sps:$4 sm:$0xff]  }
 0x32a   : > { %7841 = vmatprep.mubr.bf16.mxu0 %v18300_v33  ;;  %v16431_v33 = vld [vmem:[%s22530_s1 + $0xd34] ss:$72 sps:$4 sm:$0xff]  }
 0x32b   : > { %7677 = vmatpush1.bf16.msra.mxu1 %v16414_v46  ;;  %v16458_v46 = vld [vmem:[%s22530_s1 + $0x18fc] ss:$72 sps:$4 sm:$0xff]  }
 0x32c   : > { %7903 = vmatpush1.bf16.msra.mxu0 %v16417_v20  ;;  %7678 = vmatprep.subr.bf16.mxu1 %v16422_v53  ;;  %v16456_v20 = vld [vmem:[%s22530_s1 + $0x18f8] ss:$72 sps:$4 sm:$0xff]  }
 0x32d   : > { %7904 = vmatprep.subr.bf16.mxu0 %v16425_v21  ;;  %v16459_v53 = vld [vmem:[%s22530_s1 + $0x1000] ss:$72 sps:$4 sm:$0xff]   ;;  %v16464_v21 = vld [vmem:[%s22530_s1 + $0x198c] ss:$72 sps:$4 sm:$0xff]  }
 0x32e   : > { %7616 = vmatmul.mubr.bf16.gmra.mrb[84].mxu1 %v18592_v19 }
 0x32f   : > { %7842 = vmatmul.mubr.bf16.gmra.mrb[84].mxu0 %v18314_v43  ;;  %7679 = vmatpush1.bf16.msra.mxu1 %v16420_v29  ;;  %v16437_v43 = vld [vmem:[%s22530_s1 + $0xdc4] ss:$72 sps:$4 sm:$0xff]   ;;  %v16462_v29 = vld [vmem:[%s22530_s1 + $0x1988] ss:$72 sps:$4 sm:$0xff]  }
 0x330   : > { %7905 = vmatpush1.bf16.msra.mxu0 %v16423_v50  ;;  %7680 = vmatprep.subr.bf16.mxu1 %v16428_v54  ;;  %v16465_v50 = vld [vmem:[%s22530_s1 + $0x1090] ss:$72 sps:$4 sm:$0xff]   ;;  %v16470_v54 = vld [vmem:[%s22530_s1 + $0x1a1c] ss:$72 sps:$4 sm:$0xff]  }
 0x331   : > { %7906 = vmatprep.subr.bf16.mxu0 %v16431_v33  ;;  %7625 = vmatprep.mubr.bf16.mxu1 %v22653_v7  ;;  %v16468_v33 = vld [vmem:[%s22530_s1 + $0x1a18] ss:$72 sps:$4 sm:$0xff]  }
 0x332   : > { %7851 = vmatprep.mubr.bf16.mxu0 %v18336_v58  ;;  %v16443_v58 = vld [vmem:[%s22530_s1 + $0xe54] ss:$72 sps:$4 sm:$0xff]  }
 0x333   : > { %7681 = vmatpush1.bf16.msra.mxu1 %v16426_v4  ;;  %v16471_v4 = vld [vmem:[%s22530_s1 + $0x1120] ss:$72 sps:$4 sm:$0xff]  }
 0x334   : > { %7907 = vmatpush1.bf16.msra.mxu0 %v16429_v28  ;;  %7682 = vmatprep.subr.bf16.mxu1 %v16434_v12  ;;  %v16476_v28 = vld [vmem:[%s22530_s1 + $0x1aac] ss:$72 sps:$4 sm:$0xff]   ;;  %v6683_v12 = vpop.f32.mrb[8].mxu0 }
 0x335   : > { %7908 = vmatprep.subr.bf16.mxu0 %v16437_v43  ;;  %v16474_v43 = vld [vmem:[%s22530_s1 + $0x1aa8] ss:$72 sps:$4 sm:$0xff]  }
 0x336   : > { %7626 = vmatmul.mubr.bf16.gmra.mrb[88].mxu1 %v18628_v42 }
 0x337   : > { %7852 = vmatmul.mubr.bf16.gmra.mrb[88].mxu0 %v18348_v3  ;;  %7683 = vmatpush1.bf16.msra.mxu1 %v16432_v61  ;;  %v16449_v3 = vld [vmem:[%s22530_s1 + $0xee4] ss:$72 sps:$4 sm:$0xff]   ;;  %v16477_v61 = vld [vmem:[%s22530_s1 + $0x11b0] ss:$72 sps:$4 sm:$0xff]  }
 0x338   : > { %7909 = vmatpush1.bf16.msra.mxu0 %v16435_v18  ;;  %7684 = vmatprep.subr.bf16.mxu1 %v16440_v56  ;;  %v20263_v18 = vld [vmem:[%s22531_s2 + $0x6] sm:$0xff]  ;;  %v22654_v56 = vld [vmem:[#allocation16_spill] sm:$0xff] }
 0x339   : > { %7910 = vmatprep.subr.bf16.mxu0 %v16443_v58  ;;  %7635 = vmatprep.mubr.bf16.mxu1 %v18642_v48  ;;  %v20267_v58 = vrot.slane %v20263_v18, %v22654_v56 }
 0x33a   : > { %7861 = vmatprep.mubr.bf16.mxu0 %v18370_v16  ;;  %v16455_v16 = vld [vmem:[%s22530_s1 + $0xf74] ss:$72 sps:$4 sm:$0xff]  }
 0x33b   : > { %7685 = vmatpush1.bf16.msra.mxu1 %v16438_v9  ;;  %v16480_v9 = vld [vmem:[%s22530_s1 + $0x1240] ss:$72 sps:$4 sm:$0xff]  }
 0x33c   : > { %7911 = vmatpush1.bf16.msra.mxu0 %v16441_v38  ;;  %7686 = vmatprep.subr.bf16.mxu1 %v16446_v62  ;;  %v16485_v38 = vld [vmem:[%s22530_s1 + $0x12d4] ss:$72 sps:$4 sm:$0xff]   ;;  %v22575_v62 = vmov 0.0  }
 0x33d   : > { %7912 = vmatprep.subr.bf16.mxu0 %v16449_v3  ;;  %v14590_v3 = vadd.f32 %v6683_v12, %v20267_v58 }
 0x33e   : > { %7636 = vmatmul.mubr.bf16.gmra.mrb[92].mxu1 %v18664_v6 }
 0x33f   : > { %7862 = vmatmul.mubr.bf16.gmra.mrb[92].mxu0 %v18382_v25  ;;  %7687 = vmatpush1.bf16.msra.mxu1 %v16444_v1  ;;  %v16461_v25 = vld [vmem:[%s22530_s1 + $0x1004] ss:$72 sps:$4 sm:$0xff]   ;;  %v22655_v1 = vld [vmem:[#allocation17_spill] sm:$0xff] }
 0x340   : > { %7913 = vmatpush1.bf16.msra.mxu0 %v16447_v36  ;;  %7688 = vmatprep.subr.bf16.mxu1 %v16452_v51  ;;  %v20284_v36 = vrot.slane %v20263_v18, %v22655_v1 }
 0x341   : > { %7914 = vmatprep.subr.bf16.mxu0 %v16455_v16  ;;  %7645 = vmatprep.mubr.bf16.mxu1 %v18678_v14 }
 0x342   : > { %7871 = vmatprep.mubr.bf16.mxu0 %v18404_v35  ;;  %v16467_v35 = vld [vmem:[%s22530_s1 + $0x1094] ss:$72 sps:$4 sm:$0xff]  }
 0x343   : > { %7689 = vmatpush1.bf16.msra.mxu1 %v16450_v17 }
 0x344   : > { %7915 = vmatpush1.bf16.msra.mxu0 %v16453_v10  ;;  %7690 = vmatprep.subr.bf16.mxu1 %v16458_v46  ;;  %v16483_v46 = vld [vmem:[%s22530_s1 + $0x12d0] ss:$72 sps:$4 sm:$0xff]  }
 0x345   : > { %7916 = vmatprep.subr.bf16.mxu0 %v16461_v25 }
 0x346   : > { %7646 = vmatmul.mubr.bf16.gmra.mrb[96].mxu1 %v18700_v34 }
 0x347   : > { %7872 = vmatmul.mubr.bf16.gmra.mrb[96].mxu0 %v18416_v40  ;;  %7691 = vmatpush1.bf16.msra.mxu1 %v16456_v20  ;;  %v16473_v40 = vld [vmem:[%s22530_s1 + $0x1124] ss:$72 sps:$4 sm:$0xff]  }
 0x348   : > { %7917 = vmatpush1.bf16.msra.mxu0 %v16459_v53  ;;  %7692 = vmatprep.subr.bf16.mxu1 %v16464_v21  ;;  %v22657_v21 = vld [vmem:[#allocation18_spill] sm:$0xff] }
 0x349   : > { %7918 = vmatprep.subr.bf16.mxu0 %v16467_v35  ;;  %7655 = vmatprep.mubr.bf16.mxu1 %v18714_v45  ;;  %v8336_v35 = vsel %vm8331_vm0, %v22657_v21, 0  ;;  %v16495_v21 = vld [vmem:[%s22530_s1 + $0x1510] ss:$72 sps:$4 sm:$0xff]  }
 0x34a   : > { %7881 = vmatprep.mubr.bf16.mxu0 %v18438_v49  ;;  %v16479_v49 = vld [vmem:[%s22530_s1 + $0x11b4] ss:$72 sps:$4 sm:$0xff]  }
 0x34b   : > { %7693 = vmatpush1.bf16.msra.mxu1 %v16462_v29  ;;  %v16486_v29 = vld [vmem:[%s22530_s1 + $0x1360] ss:$72 sps:$4 sm:$0xff]  }
 0x34c   : > { %7919 = vmatpush1.bf16.msra.mxu0 %v16465_v50  ;;  %7694 = vmatprep.subr.bf16.mxu1 %v16470_v54  ;;  %v16491_v54 = vld [vmem:[%s22530_s1 + $0x13f4] ss:$72 sps:$4 sm:$0xff]  }
 0x34d   : > { %7920 = vmatprep.subr.bf16.mxu0 %v16473_v40 }
 0x34e   : > { %7656 = vmatmul.mubr.bf16.gmra.mrb[100].mxu1 %v18734_v59 }
 0x34f   : > { %7882 = vmatmul.mubr.bf16.gmra.mrb[100].mxu0 %v18450_v57  ;;  %7695 = vmatpush1.bf16.msra.mxu1 %v16468_v33  ;;  %v16482_v57 = vld [vmem:[%s22530_s1 + $0x1244] ss:$72 sps:$4 sm:$0xff]  }
 0x350   : > { %7921 = vmatpush1.bf16.msra.mxu0 %v16471_v4  ;;  %7696 = vmatprep.subr.bf16.mxu1 %v16476_v28  ;;  %v22658_v28 = vld [vmem:[#allocation15_spill] sm:$0xff] }
 0x351   : > { %7922 = vmatprep.subr.bf16.mxu0 %v16479_v49  ;;  %7698 = vmatprep.mubr.bf16.mxu1 %v17489_v44 }
 0x352   : > { %7924 = vmatprep.mubr.bf16.mxu0 %v17340_v55  ;;  %v6685_v55 = vpop.f32.mrb[9].mxu0 }
 0x353   : > { %7697 = vmatpush1.bf16.msra.mxu1 %v16474_v43  ;;  %v6687_v51 = vpop.f32.mrb[10].mxu0  ;;  %v14591_v16 = vadd.f32 %v6685_v55, %v20284_v36  ;;  %v16489_v43 = vld [vmem:[%s22530_s1 + $0x13f0] ss:$72 sps:$4 sm:$0xff]  }
 0x354   : > { %7923 = vmatpush1.bf16.msra.mxu0 %v16477_v61  ;;  %14070 = vmatprep.subr.bf16.mxu1 %v22575_v62  ;;  %v14592_v17 = vadd.f32 %v6687_v51, %v20267_v58  ;;  %v6689_v10 = vpop.f32.mrb[11].mxu0  ;;  %v16492_v51 = vld [vmem:[%s22530_s1 + $0x1480] ss:$72 sps:$4 sm:$0xff]  }
 0x355   : > { %8005 = vmatprep.subr.bf16.mxu0 %v16482_v57  ;;  %v14593_v25 = vadd.f32 %v6689_v10, %v20284_v36  ;;  %v6693_v50 = vpop.f32.mrb[12].mxu0 }
 0x356   : > { %7699 = vmatmul.mubr.bf16.vlgmr.msra.gmra.mrb[72].mxu1 %v17602_v23  ;;  %v20299_v20 = vpack.c.bf16 %v14592_v17, %v14590_v3  ;;  %v6695_v40 = vpop.f32.mrb[13].mxu0  ;;  %v22660_v3 = vld [vmem:[#allocation20_spill] sm:$0xff] }
 0x357   : > { %7925 = vmatmul.mubr.bf16.vlgmr.msra.gmra.mrb[72].mxu0 %v17404_v15  ;;  %7708 = vmatprep.mubr.bf16.mxu1 %v18778_v31  ;;  %v16488_v15 = vld [vmem:[%s22530_s1 + $0x1364] ss:$72 sps:$4 sm:$0xff]   ;;  %v20301_v53 = vpack.c.bf16 %v14593_v25, %v14591_v16  ;;  %v14595_v33 = vadd.f32 %v6695_v40, %v20284_v36  ;;  %v6697_v4 = vpop.f32.mrb[14].mxu0  ;;  %v8339_v55 = vsel %vm8331_vm0, %v22660_v3, 0  ;;  %v16497_v16 = vld [vmem:[%s22530_s1 + $0x1514] ss:$72 sps:$4 sm:$0xff]  }
 0x358   : > { %8006 = vmatpush1.bf16.msra.mxu0 %v16480_v9  ;;  %7934 = vmatprep.mubr.bf16.mxu0 %v18498_v26  ;;  %v14594_v26 = vadd.f32 %v6693_v50, %v20267_v58  ;;  %v14596_v49 = vadd.f32 %v6697_v4, %v20267_v58  ;;  %v6699_v12 = vpop.f32.mrb[15].mxu0  ;;  %v16494_v9 = vld [vmem:[%s22530_s1 + $0x1484] ss:$72 sps:$4 sm:$0xff]   ;;  %v22661_v50 = vld [vmem:[#allocation32_spill] sm:$0xff]  ;;  %v22662_v40 = vld [vmem:[#allocation33_spill] sm:$0xff] }
 0x359   : > { %8007 = vmatprep.subr.bf16.mxu0 %v16485_v38  ;;  %22656 = vst [vmem:[#allocation11_spill] sm:$0xff] %v20301_v53  ;;  %v14597_v61 = vadd.f32 %v6699_v12, %v20284_v36  ;;  %v6703_v57 = vpop.f32.mrb[16].mxu0 }
 0x35a   : > { %v6705_v17 = vpop.f32.mrb[17].mxu0 }
 0x35b   : > { %v20328_v38 = vpack.c.bf16 %v14597_v61, %v14595_v33  ;;  %v14599_v10 = vadd.f32 %v6705_v17, %v20284_v36  ;;  %v20361_v33 = vrot.slane %v20263_v18, %v22662_v40  ;;  %v22664_v61 = vld [vmem:[#allocation22_spill] sm:$0xff] }
 0x35c   : > { %8008 = vmatpush1.bf16.msra.mxu0 %v16483_v46  ;;  %14071 = vmatpush3.bf16.xpose.msra.mxu1 %v8336_v35  ;;  %v6707_v46 = vpop.f32.mrb[18].mxu0 }
 0x35d   : > { %8009 = vmatprep.subr.bf16.mxu0 %v16488_v15  ;;  %14072 = vmatprep.subr.bf16.mxu1 %v22575_v62  ;;  %22659 = vst [vmem:[#allocation12_spill] sm:$0xff] %v20328_v38  ;;  %v14600_v25 = vadd.f32 %v6707_v46, %v20267_v58  ;;  %v6709_v15 = vpop.f32.mrb[19].mxu0 }
 0x35e   : > { %7709 = vmatmul.mubr.bf16.gmra.mrb[76].mxu1 %v22658_v28  ;;  %v14601_v35 = vadd.f32 %v6709_v15, %v20284_v36 }
 0x35f   : > { %7935 = vmatmul.mubr.bf16.gmra.mrb[76].mxu0 %v18520_v37  ;;  %7718 = vmatprep.mubr.bf16.mxu1 %v18814_v2  ;;  %v20326_v37 = vpack.c.bf16 %v14596_v49, %v14594_v26 }
 0x360   : > { %8010 = vmatpush1.bf16.msra.mxu0 %v16486_v29  ;;  %7944 = vmatprep.mubr.bf16.mxu0 %v22650_v63  ;;  %v14598_v63 = vadd.f32 %v6703_v57, %v20267_v58  ;;  %v6713_v29 = vpop.f32.mrb[20].mxu0  ;;  %v20363_v49 = vpack.c.bf16 %v14601_v35, %v14599_v10  ;;  %v8342_v57 = vsel %vm8331_vm0, %v22664_v61, 0 }
 0x361   : > { %8011 = vmatprep.subr.bf16.mxu0 %v16491_v54  ;;  %v20351_v54 = vrot.slane %v20263_v18, %v22661_v50 }
 0x362   : > { %v20357_v26 = vpack.c.bf16 %v14600_v25, %v14598_v63  ;;  %22663 = vst [vmem:[#allocation13_spill] sm:$0xff] %v20363_v49  ;;  %v6715_v63 = vpop.f32.mrb[21].mxu0 }
 0x363   : > { %v14603_v46 = vadd.f32 %v6715_v63, %v20284_v36  ;;  %v6717_v25 = vpop.f32.mrb[22].mxu0 }
 0x364   : > { %8012 = vmatpush1.bf16.msra.mxu0 %v16489_v43  ;;  %14073 = vmatpush3.bf16.xpose.msra.mxu1 %v8339_v55  ;;  %v6719_v35 = vpop.f32.mrb[23].mxu0 }
 0x365   : > { %8013 = vmatprep.subr.bf16.mxu0 %v16494_v9  ;;  %14074 = vmatprep.subr.bf16.mxu1 %v22575_v62  ;;  %v16498_v9 = vld [vmem:[%s22530_s1 + $0x15a0] ss:$72 sps:$4 sm:$0xff]  }
 0x366   : > { %7719 = vmatmul.mubr.bf16.gmra.mrb[80].mxu1 %v18836_v27 }
 0x367   : > { %7945 = vmatmul.mubr.bf16.gmra.mrb[80].mxu0 %v22651_v52  ;;  %7728 = vmatprep.mubr.bf16.mxu1 %v18856_v41  ;;  %v16500_v52 = vld [vmem:[%s22530_s1 + $0x15a4] ss:$72 sps:$4 sm:$0xff]  }
 0x368   : > { %8014 = vmatpush1.bf16.msra.mxu0 %v16492_v51  ;;  %7954 = vmatprep.mubr.bf16.mxu0 %v22652_v8  ;;  %v16503_v51 = vld [vmem:[%s22530_s1 + $0x1634] ss:$72 sps:$4 sm:$0xff]  }
 0x369   : > { %8015 = vmatprep.subr.bf16.mxu0 %v16497_v16  ;;  %v7022_v4 = vpop.f32.mrb[40].mxu1  ;;  %v14602_v16 = vadd.f32 %v6713_v29, %v20267_v58 }
 0x36a   : > { %v7024_v12 = vpop.f32.mrb[41].mxu1  ;;  %v14622_v8 = vadd.f32 %v7022_v4, %v20351_v54  ;;  %v14605_v4 = vadd.f32 %v6719_v35, %v20284_v36 }
 0x36b   : > { %v7026_v43 = vpop.f32.mrb[42].mxu1  ;;  %v14623_v17 = vadd.f32 %v7024_v12, %v20361_v33  ;;  %v6723_v12 = vpop.f32.mrb[24].mxu0 }
 0x36c   : > { %8016 = vmatpush1.bf16.msra.mxu0 %v16495_v21  ;;  %v14624_v3 = vadd.f32 %v7026_v43, %v20351_v54  ;;  %v7028_v55 = vpop.f32.mrb[43].mxu1  ;;  %14075 = vmatpush3.bf16.xpose.msra.mxu1 %v8342_v57  ;;  %v14604_v21 = vadd.f32 %v6717_v25, %v20267_v58  ;;  %v6725_v25 = vpop.f32.mrb[25].mxu0 }
 0x36d   : > { %8017 = vmatprep.subr.bf16.mxu0 %v16500_v52  ;;  %v14625_v10 = vadd.f32 %v7028_v55, %v20361_v33  ;;  %14076 = vmatprep.subr.bf16.mxu1 %v22575_v62  ;;  %v16501_v52 = vld [vmem:[%s22530_s1 + $0x1630] ss:$72 sps:$4 sm:$0xff]  }
 0x36e   : > { %v20380_v15 = vpack.c.bf16 %v14624_v3, %v14622_v8  ;;  %7729 = vmatmul.mubr.bf16.gmra.mrb[84].mxu1 %v18883_v24  ;;  %v20396_v43 = vpack.c.bf16 %v14604_v21, %v14602_v16  ;;  %v22668_v55 = vld [vmem:[#allocation24_spill] sm:$0xff] }
 0x36f   : > { %7955 = vmatmul.mubr.bf16.gmra.mrb[84].mxu0 %v18592_v19  ;;  %v20385_v29 = vpack.c.bf16 %v14625_v10, %v14623_v17  ;;  %7738 = vmatprep.mubr.bf16.mxu1 %v18897_v39  ;;  %v16506_v19 = vld [vmem:[%s22530_s1 + $0x16c4] ss:$72 sps:$4 sm:$0xff]   ;;  %v8345_v63 = vsel %vm8331_vm0, %v22668_v55, 0  ;;  %v16509_v16 = vld [vmem:[%s22530_s1 + $0x1754] ss:$72 sps:$4 sm:$0xff]  }
 0x370   : > { %22665 = vst [vmem:[#allocation14_spill] sm:$0xff] %v20380_v15  ;;  %8018 = vmatpush1.bf16.msra.mxu0 %v16498_v9  ;;  %7964 = vmatprep.mubr.bf16.mxu0 %v22653_v7  ;;  %v20398_v9 = vpack.c.bf16 %v14605_v4, %v14603_v46  ;;  %v14606_v46 = vadd.f32 %v6723_v12, %v20267_v58  ;;  %v6727_v4 = vpop.f32.mrb[26].mxu0 }
 0x371   : > { %22666 = vst [vmem:[#allocation18_spill] sm:$0xff] %v20385_v29  ;;  %8019 = vmatprep.subr.bf16.mxu0 %v16503_v51  ;;  %v7032_v57 = vpop.f32.mrb[44].mxu1  ;;  %v16504_v51 = vld [vmem:[%s22530_s1 + $0x16c0] ss:$72 sps:$4 sm:$0xff]  }
 0x372   : > { %22667 = vst [vmem:[#allocation15_spill] sm:$0xff] %v20398_v9  ;;  %v7034_v8 = vpop.f32.mrb[45].mxu1  ;;  %v14626_v17 = vadd.f32 %v7032_v57, %v20351_v54 }
 0x373   : > { %v7036_v3 = vpop.f32.mrb[46].mxu1  ;;  %v14627_v21 = vadd.f32 %v7034_v8, %v20361_v33  ;;  %v16507_v8 = vld [vmem:[%s22530_s1 + $0x1750] ss:$72 sps:$4 sm:$0xff]  }
 0x374   : > { %8020 = vmatpush1.bf16.msra.mxu0 %v16501_v52  ;;  %v14628_v10 = vadd.f32 %v7036_v3, %v20351_v54  ;;  %v7038_v7 = vpop.f32.mrb[47].mxu1  ;;  %14077 = vmatpush3.bf16.xpose.msra.mxu1 %v8345_v63  ;;  %v14607_v52 = vadd.f32 %v6725_v25, %v20284_v36  ;;  %v6729_v3 = vpop.f32.mrb[27].mxu0 }
 0x375   : > { %8021 = vmatprep.subr.bf16.mxu0 %v16506_v19  ;;  %v14629_v35 = vadd.f32 %v7038_v7, %v20361_v33  ;;  %14078 = vmatprep.subr.bf16.mxu1 %v22575_v62  ;;  %v14608_v19 = vadd.f32 %v6727_v4, %v20267_v58  ;;  %v14609_v55 = vadd.f32 %v6729_v3, %v20284_v36  ;;  %v6733_v63 = vpop.f32.mrb[28].mxu0 }
 0x376   : > { %v20415_v57 = vpack.c.bf16 %v14628_v10, %v14626_v17  ;;  %7739 = vmatmul.mubr.bf16.gmra.mrb[88].mxu1 %v18919_v13 }
 0x377   : > { %7965 = vmatmul.mubr.bf16.gmra.mrb[88].mxu0 %v18628_v42  ;;  %v20420_v12 = vpack.c.bf16 %v14629_v35, %v14627_v21  ;;  %7748 = vmatprep.mubr.bf16.mxu1 %v18933_v0  ;;  %v16512_v42 = vld [vmem:[%s22530_s1 + $0x17e4] ss:$72 sps:$4 sm:$0xff]   ;;  %v20431_v17 = vpack.c.bf16 %v14608_v19, %v14606_v46  ;;  %v16515_v46 = vld [vmem:[%s22530_s1 + $0x1874] ss:$72 sps:$4 sm:$0xff]   ;;  %v6735_v19 = vpop.f32.mrb[29].mxu0 }
 0x378   : > { %22669 = vst [vmem:[#allocation20_spill] sm:$0xff] %v20415_v57  ;;  %8022 = vmatpush1.bf16.msra.mxu0 %v16504_v51  ;;  %7974 = vmatprep.mubr.bf16.mxu0 %v18642_v48  ;;  %v20433_v51 = vpack.c.bf16 %v14609_v55, %v14607_v52  ;;  %v22672_v21 = vld [vmem:[#allocation26_spill] sm:$0xff]  ;;  %v14610_v52 = vadd.f32 %v6733_v63, %v20267_v58 }
 0x379   : > { %22670 = vst [vmem:[#allocation22_spill] sm:$0xff] %v20420_v12  ;;  %8023 = vmatprep.subr.bf16.mxu0 %v16509_v16  ;;  %v7042_v10 = vpop.f32.mrb[48].mxu1  ;;  %v8348_v35 = vsel %vm8331_vm0, %v22672_v21, 0  ;;  %v16510_v16 = vld [vmem:[%s22530_s1 + $0x17e0] ss:$72 sps:$4 sm:$0xff]   ;;  %v6737_v21 = vpop.f32.mrb[30].mxu0 }
 0x37a   : > { %22671 = vst [vmem:[#allocation24_spill] sm:$0xff] %v20433_v51  ;;  %v7044_v7 = vpop.f32.mrb[49].mxu1  ;;  %v14630_v4 = vadd.f32 %v7042_v10, %v20351_v54  ;;  %v14611_v10 = vadd.f32 %v6735_v19, %v20284_v36 }
 0x37b   : > { %v7046_v25 = vpop.f32.mrb[50].mxu1 }
 0x37c   : > { %8024 = vmatpush1.bf16.msra.mxu0 %v16507_v8  ;;  %v14632_v3 = vadd.f32 %v7046_v25, %v20351_v54  ;;  %v7048_v48 = vpop.f32.mrb[51].mxu1  ;;  %14079 = vmatpush3.bf16.xpose.msra.mxu1 %v8348_v35  ;;  %v14631_v8 = vadd.f32 %v7044_v7, %v20361_v33  ;;  %v6739_v35 = vpop.f32.mrb[31].mxu0  ;;  %v16513_v7 = vld [vmem:[%s22530_s1 + $0x1870] ss:$72 sps:$4 sm:$0xff]  }
 0x37d   : > { %8025 = vmatprep.subr.bf16.mxu0 %v16512_v42  ;;  %v14633_v55 = vadd.f32 %v7048_v48, %v20361_v33  ;;  %14080 = vmatprep.subr.bf16.mxu1 %v22575_v62  ;;  %v14612_v42 = vadd.f32 %v6737_v21, %v20267_v58  ;;  %v14613_v48 = vadd.f32 %v6739_v35, %v20284_v36  ;;  %v22676_v21 = vld [vmem:[#allocation28_spill] sm:$0xff] }
 0x37e   : > { %v20450_v25 = vpack.c.bf16 %v14632_v3, %v14630_v4  ;;  %7749 = vmatmul.mubr.bf16.gmra.mrb[92].mxu1 %v18955_v5  ;;  %v6743_v4 = vpop.f32.mrb[32].mxu0  ;;  %v8351_v62 = vsel %vm8331_vm0, %v22676_v21, 0  ;;  %v22677_v21 = vmov 0.0  }
 0x37f   : > { %7975 = vmatmul.mubr.bf16.gmra.mrb[92].mxu0 %v18664_v6  ;;  %v20455_v63 = vpack.c.bf16 %v14633_v55, %v14631_v8  ;;  %7758 = vmatprep.mubr.bf16.mxu1 %v18969_v22  ;;  %v16518_v6 = vld [vmem:[%s22530_s1 + $0x1904] ss:$72 sps:$4 sm:$0xff]   ;;  %v20466_v3 = vpack.c.bf16 %v14612_v42, %v14610_v52  ;;  %v16521_v52 = vld [vmem:[%s22530_s1 + $0x1994] ss:$72 sps:$4 sm:$0xff]   ;;  %v6745_v42 = vpop.f32.mrb[33].mxu0 }
 0x380   : > { %22673 = vst [vmem:[#allocation26_spill] sm:$0xff] %v20450_v25  ;;  %8026 = vmatpush1.bf16.msra.mxu0 %v16510_v16  ;;  %7984 = vmatprep.mubr.bf16.mxu0 %v18678_v14  ;;  %v20468_v16 = vpack.c.bf16 %v14613_v48, %v14611_v10  ;;  %v14614_v10 = vadd.f32 %v6743_v4, %v20267_v58  ;;  %v6747_v50 = vpop.f32.mrb[34].mxu0 }
 0x381   : > { %22674 = vst [vmem:[#allocation34_spill] sm:$0xff] %v20455_v63  ;;  %8027 = vmatprep.subr.bf16.mxu0 %v16515_v46  ;;  %v7052_v19 = vpop.f32.mrb[52].mxu1  ;;  %v16516_v46 = vld [vmem:[%s22530_s1 + $0x1900] ss:$72 sps:$4 sm:$0xff]  }
 0x382   : > { %22675 = vst [vmem:[#allocation35_spill] sm:$0xff] %v20468_v16  ;;  %v7054_v8 = vpop.f32.mrb[53].mxu1  ;;  %v14634_v35 = vadd.f32 %v7052_v19, %v20351_v54  ;;  %v14615_v19 = vadd.f32 %v6745_v42, %v20284_v36 }
 0x383   : > { %v7056_v55 = vpop.f32.mrb[54].mxu1 }
 0x384   : > { %8028 = vmatpush1.bf16.msra.mxu0 %v16513_v7  ;;  %v14636_v40 = vadd.f32 %v7056_v55, %v20351_v54  ;;  %v7058_v14 = vpop.f32.mrb[55].mxu1  ;;  %14081 = vmatpush3.bf16.xpose.msra.mxu1 %v8351_v62  ;;  %v14635_v7 = vadd.f32 %v7054_v8, %v20361_v33  ;;  %v14616_v62 = vadd.f32 %v6747_v50, %v20267_v58  ;;  %v16519_v8 = vld [vmem:[%s22530_s1 + $0x1990] ss:$72 sps:$4 sm:$0xff]  }
 0x385   : > { %8029 = vmatprep.subr.bf16.mxu0 %v16518_v6  ;;  %v14637_v48 = vadd.f32 %v7058_v14, %v20361_v33  ;;  %14082 = vmatprep.subr.bf16.mxu1 %v22677_v21  ;;  %v6749_v6 = vpop.f32.mrb[35].mxu0 }
 0x386   : > { %v20485_v55 = vpack.c.bf16 %v14636_v40, %v14634_v35  ;;  %7759 = vmatmul.mubr.bf16.gmra.mrb[96].mxu1 %v18991_v60  ;;  %v14617_v14 = vadd.f32 %v6749_v6, %v20284_v36  ;;  %v6753_v40 = vpop.f32.mrb[36].mxu0  ;;  %v20501_v50 = vpack.c.bf16 %v14616_v62, %v14614_v10  ;;  %v16527_v10 = vld [vmem:[%s22530_s1 + $0x1ab4] ss:$72 sps:$4 sm:$0xff]  }
 0x387   : > { %7985 = vmatmul.mubr.bf16.gmra.mrb[96].mxu0 %v18700_v34  ;;  %v20490_v4 = vpack.c.bf16 %v14637_v48, %v14635_v7  ;;  %7768 = vmatprep.mubr.bf16.mxu1 %v19005_v11  ;;  %v16524_v34 = vld [vmem:[%s22530_s1 + $0x1a24] ss:$72 sps:$4 sm:$0xff]   ;;  %v20516_v62 = vpop.f32.mrb[37].mxu0 }
 0x388   : > { %22678 = vst [vmem:[#allocation28_spill] sm:$0xff] %v20485_v55  ;;  %8030 = vmatpush1.bf16.msra.mxu0 %v16516_v46  ;;  %7994 = vmatprep.mubr.bf16.mxu0 %v18714_v45  ;;  %v20503_v46 = vpack.c.bf16 %v14617_v14, %v14615_v19  ;;  %v22681_v48 = vld [vmem:[#allocation30_spill] sm:$0xff]  ;;  %v14618_v19 = vadd.f32 %v6753_v40, %v20267_v58  ;;  %v16525_v40 = vld [vmem:[%s22530_s1 + $0x1ab0] ss:$72 sps:$4 sm:$0xff]  }
 0x389   : > { %22679 = vst [vmem:[#allocation36_spill] sm:$0xff] %v20490_v4  ;;  %8031 = vmatprep.subr.bf16.mxu0 %v16521_v52  ;;  %v7062_v35 = vpop.f32.mrb[56].mxu1  ;;  %v8354_v4 = vsel %vm8331_vm0, %v22681_v48, 0  ;;  %v16522_v52 = vld [vmem:[%s22530_s1 + $0x1a20] ss:$72 sps:$4 sm:$0xff]  }
 0x38a   : > { %22680 = vst [vmem:[#allocation37_spill] sm:$0xff] %v20503_v46  ;;  %v7064_v42 = vpop.f32.mrb[57].mxu1  ;;  %v14638_v6 = vadd.f32 %v7062_v35, %v20351_v54  ;;  %v6757_v35 = vpop.f32.mrb[38].mxu0 }
 0x38b   : > { %v7066_v7 = vpop.f32.mrb[58].mxu1 }
 0x38c   : > { %8032 = vmatpush1.bf16.msra.mxu0 %v16519_v8  ;;  %v14640_v63 = vadd.f32 %v7066_v7, %v20351_v54  ;;  %v7068_v45 = vpop.f32.mrb[59].mxu1  ;;  %14083 = vmatpush3.bf16.xpose.msra.mxu1 %v8354_v4  ;;  %v14639_v8 = vadd.f32 %v7064_v42, %v20361_v33  ;;  %v14620_v4 = vadd.f32 %v6757_v35, %v20267_v58  ;;  %v8357_v58 = vsel %vm8331_vm0, %v19881_v32, 0  ;;  %v8314_v35 = vld [vmem:[#allocation2] sm:$0xf] }
 0x38d   : > { %8033 = vmatprep.subr.bf16.mxu0 %v16524_v34  ;;  %v14641_v14 = vadd.f32 %v7068_v45, %v20361_v33  ;;  %14084 = vmatprep.subr.bf16.mxu1 %v22677_v21 }
 0x38e   : > { %v20521_v48 = vpack.c.bf16 %v14640_v63, %v14638_v6  ;;  %7769 = vmatmul.mubr.bf16.gmra.mrb[100].mxu1 %v19025_v47  ;;  %v20534_v63 = vpack.c.bf16 %v14620_v4, %v14618_v19 }
 0x38f   : > { %7995 = vmatmul.mubr.bf16.gmra.mrb[100].mxu0 %v18734_v59  ;;  %v20526_v34 = vpack.c.bf16 %v14641_v14, %v14639_v8  ;;  %14086 = vmatprep.mubr.msk.bf16.mxu1 %vm17088_vm1, %v22677_v21 }
 0x390   : > { %22682 = vst [vmem:[#allocation30_spill] sm:$0xff] %v20521_v48  ;;  %8034 = vmatpush1.bf16.msra.mxu0 %v16522_v52  ;;  %8037 = vmatprep.mubr.bf16.mxu0 %v17489_v44 }
 0x391   : > { %22683 = vst [vmem:[#allocation38_spill] sm:$0xff] %v20526_v34  ;;  %8035 = vmatprep.subr.bf16.mxu0 %v16527_v10  ;;  %v7072_v42 = vpop.f32.mrb[60].mxu1 }
 0x392   : > { %v7074_v59 = vpop.f32.mrb[61].mxu1  ;;  %v14642_v52 = vadd.f32 %v7072_v42, %v20351_v54 }
 0x393   : > { %v7076_v7 = vpop.f32.mrb[62].mxu1  ;;  %v14643_v44 = vadd.f32 %v7074_v59, %v20361_v33 }
 0x394   : > { %8036 = vmatpush1.bf16.msra.mxu0 %v16525_v40  ;;  %v14644_v6 = vadd.f32 %v7076_v7, %v20351_v54  ;;  %v7078_v45 = vpop.f32.mrb[63].mxu1  ;;  %14085 = vmatpush3.bf16.xpose.msra.mxu1 %v8357_v58  ;;  %v22686_v40 = vld [vmem:[#allocation19_spill] sm:$0xff] }
 0x395   : > { %14150 = vmatprep.subr.bf16.mxu0 %v22677_v21  ;;  %v14645_v10 = vadd.f32 %v7078_v45, %v20361_v33  ;;  %14090 = vmatprep.subr.bf16.mxu1 %v22677_v21  ;;  %v8680_v42 = vsel %vm8331_vm0, %v22686_v40, 0 }
 0x396   : > { %v20544_v19 = vpack.c.bf16 %v14644_v6, %v14642_v52 }
 0x397   : > { %8038 = vmatmul.mubr.bf16.vlgmr.msra.gmra.mrb[72].mxu0 %v17602_v23  ;;  %v20547_v8 = vpack.c.bf16 %v14645_v10, %v14643_v44 }
 0x398   : > { %22684 = vst [vmem:[#allocation39_spill] sm:$0xff] %v20544_v19  ;;  %8047 = vmatprep.mubr.bf16.mxu0 %v18778_v31 }
 0x399   : > { %22685 = vst [vmem:[#allocation40_spill] sm:$0xff] %v20547_v8  ;;  %v7082_v32 = vpop.f32.mrb[64].mxu1 }
 0x39a   : > { %v7084_v14 = vpop.f32.mrb[65].mxu1  ;;  %v14646_v59 = vadd.f32 %v7082_v32, %v20351_v54  ;;  %v22689_v32 = vld [vmem:[#allocation21_spill] sm:$0xff] }
 0x39b   : > { %v7086_v4 = vpop.f32.mrb[66].mxu1  ;;  %14087 = vmatmul.mubr.msk.bf16.vlgmr.msra.gmra.mrb[104].mxu1 %vm8331_vm0, %v8314_v35  ;;  %v14647_v23 = vadd.f32 %v7084_v14, %v20361_v33  ;;  %v8683_v35 = vsel %vm8331_vm0, %v22689_v32, 0 }
 0x39c   : > { %v14648_v7 = vadd.f32 %v7086_v4, %v20351_v54  ;;  %v7088_v58 = vpop.f32.mrb[67].mxu1  ;;  %14106 = vmatprep.mubr.msk.bf16.mxu1 %vm17088_vm1, %v22677_v21 }
 0x39d   : > { %14151 = vmatpush3.bf16.xpose.msra.mxu0 %v8680_v42  ;;  %v14649_v31 = vadd.f32 %v7088_v58, %v20361_v33  ;;  %v22692_v58 = vld [vmem:[#allocation23_spill] sm:$0xff] }
 0x39e   : > { %14152 = vmatprep.subr.bf16.mxu0 %v22677_v21  ;;  %v20560_v52 = vpack.c.bf16 %v14648_v7, %v14646_v59 }
 0x39f   : > { %8048 = vmatmul.mubr.bf16.gmra.mrb[76].mxu0 %v22658_v28  ;;  %v20563_v6 = vpack.c.bf16 %v14649_v31, %v14647_v23  ;;  %v8686_v23 = vsel %vm8331_vm0, %v22692_v58, 0 }
 0x3a0   : > { %22687 = vst [vmem:[#allocation19_spill] sm:$0xff] %v20560_v52  ;;  %8057 = vmatprep.mubr.bf16.mxu0 %v18814_v2 }
 0x3a1   : > { %22688 = vst [vmem:[#allocation41_spill] sm:$0xff] %v20563_v6  ;;  %v7092_v45 = vpop.f32.mrb[68].mxu1 }
 0x3a2   : > { %v7094_v44 = vpop.f32.mrb[69].mxu1  ;;  %v14650_v14 = vadd.f32 %v7092_v45, %v20351_v54  ;;  %v9026_v45 = vsel %vm8331_vm0, %v20326_v37, 0 }
 0x3a3   : > { %v7096_v10 = vpop.f32.mrb[70].mxu1  ;;  %v14651_v59 = vadd.f32 %v7094_v44, %v20361_v33 }
 0x3a4   : > { %v14652_v4 = vadd.f32 %v7096_v10, %v20351_v54  ;;  %v7098_v42 = vpop.f32.mrb[71].mxu1  ;;  %v22693_v54 = vld [vmem:[#allocation25_spill] sm:$0xff]  ;;  %v22698_v10 = vld [vmem:[#allocation8_spill] sm:$0xff] }
 0x3a5   : > { %14153 = vmatpush3.bf16.xpose.msra.mxu0 %v8683_v35  ;;  %v14653_v28 = vadd.f32 %v7098_v42, %v20361_v33  ;;  %v8689_v33 = vsel %vm8331_vm0, %v22693_v54, 0  ;;  %v3170_v35 = vsub.s32 6, %v22698_v10 }
 0x3a6   : > { %14154 = vmatprep.subr.bf16.mxu0 %v22677_v21  ;;  %v20573_v7 = vpack.c.bf16 %v14652_v4, %v14650_v14  ;;  %v9029_v4 = vsel %vm8331_vm0, %v20357_v26, 0 }
 0x3a7   : > { %8058 = vmatmul.mubr.bf16.gmra.mrb[80].mxu0 %v18836_v27  ;;  %v20576_v2 = vpack.c.bf16 %v14653_v28, %v14651_v59  ;;  %v22694_v27 = vld [vmem:[#allocation27_spill] sm:$0xff]  ;;  %v20626_v42 = vrot.slane %v20263_v18, %v3170_v35 }
 0x3a8   : > { %22690 = vst [vmem:[#allocation21_spill] sm:$0xff] %v20573_v7  ;;  %8067 = vmatprep.mubr.bf16.mxu0 %v18856_v41  ;;  %v8692_v41 = vsel %vm8331_vm0, %v22694_v27, 0 }
 0x3a9   : > { %22691 = vst [vmem:[#allocation42_spill] sm:$0xff] %v20576_v2 }
 0x3ad   : > { %14155 = vmatpush3.bf16.xpose.msra.mxu0 %v8686_v23  ;;  %v9032_v23 = vsel %vm8331_vm0, %v20396_v43, 0 }
 0x3ae   : > { %14156 = vmatprep.subr.bf16.mxu0 %v22677_v21 }
 0x3af   : > { %8068 = vmatmul.mubr.bf16.gmra.mrb[84].mxu0 %v18883_v24  ;;  %v22695_v24 = vld [vmem:[#allocation29_spill] sm:$0xff] }
 0x3b0   : > { %8077 = vmatprep.mubr.bf16.mxu0 %v18897_v39  ;;  %v8695_v39 = vsel %vm8331_vm0, %v22695_v24, 0 }
 0x3b5   : > { %14157 = vmatpush3.bf16.xpose.msra.mxu0 %v8689_v33 }
 0x3b6   : > { %14158 = vmatprep.subr.bf16.mxu0 %v22677_v21 }
 0x3b7   : > { %8078 = vmatmul.mubr.bf16.gmra.mrb[88].mxu0 %v18919_v13  ;;  %v22696_v13 = vld [vmem:[#allocation31_spill] sm:$0xff] }
 0x3b8   : > { %8087 = vmatprep.mubr.bf16.mxu0 %v18933_v0  ;;  %v8698_v0 = vsel %vm8331_vm0, %v22696_v13, 0 }
 0x3bd   : > { %14159 = vmatpush3.bf16.xpose.msra.mxu0 %v8692_v41 }
 0x3be   : > { %14160 = vmatprep.subr.bf16.mxu0 %v22677_v21 }
 0x3bf   : > { %8088 = vmatmul.mubr.bf16.gmra.mrb[92].mxu0 %v18955_v5  ;;  %v8701_v5 = vsel %vm8331_vm0, %v19885_v30, 0 }
 0x3c0   : > { %8097 = vmatprep.mubr.bf16.mxu0 %v18969_v22  ;;  %v9023_v22 = vsel %vm8331_vm0, %v20299_v20, 0 }
 0x3c5   : > { %14161 = vmatpush3.bf16.xpose.msra.mxu0 %v8695_v39 }
 0x3c6   : > { %14162 = vmatprep.subr.bf16.mxu0 %v22677_v21 }
 0x3c7   : > { %8098 = vmatmul.mubr.bf16.gmra.mrb[96].mxu0 %v18991_v60  ;;  %v8659_v60 = vld [vmem:[#allocation2 + $0x4] sm:$0xf] }
 0x3c8   : > { %8107 = vmatprep.mubr.bf16.mxu0 %v19005_v11  ;;  %v14619_v11 = vadd.f32 %v20516_v62, %v20284_v36  ;;  %v3174_v62 = vsub.s32 7, %v22698_v10 }
 0x3ca   : > { %v20634_v33 = vrot.slane %v20263_v18, %v3174_v62 }
 0x3cd   : > { %14163 = vmatpush3.bf16.xpose.msra.mxu0 %v8698_v0 }
 0x3ce   : > { %14164 = vmatprep.subr.bf16.mxu0 %v22677_v21 }
 0x3cf   : > { %8108 = vmatmul.mubr.bf16.gmra.mrb[100].mxu0 %v19025_v47  ;;  %v6759_v47 = vpop.f32.mrb[39].mxu0 }
 0x3d0   : > { %14166 = vmatprep.mubr.msk.bf16.mxu0 %vm17088_vm1, %v22677_v21  ;;  %v14621_v31 = vadd.f32 %v6759_v47, %v20284_v36  ;;  %v7361_v14 = vpop.f32.mrb[40].mxu0 }
 0x3d1   : > { %v14654_v36 = vadd.f32 %v7361_v14, %v20626_v42  ;;  %v7363_v59 = vpop.f32.mrb[41].mxu0 }
 0x3d2   : > { %v20619_v44 = vpack.c.bf16 %v14621_v31, %v14619_v11  ;;  %v7365_v28 = vpop.f32.mrb[42].mxu0 }
 0x3d3   : > { %v14656_v41 = vadd.f32 %v7365_v28, %v20626_v42  ;;  %v7367_v39 = vpop.f32.mrb[43].mxu0 }
 0x3d4   : > { %22697 = vst [vmem:[#allocation23_spill] sm:$0xff] %v20619_v44  ;;  %v7371_v0 = vpop.f32.mrb[44].mxu0 }
 0x3d5   : > { %14165 = vmatpush3.bf16.xpose.msra.mxu0 %v8701_v5  ;;  %v14655_v5 = vadd.f32 %v7363_v59, %v20634_v33  ;;  %v14658_v11 = vadd.f32 %v7371_v0, %v20626_v42  ;;  %v7373_v47 = vpop.f32.mrb[45].mxu0 }
 0x3d6   : > { %14230 = vmatprep.subr.bf16.mxu0 %v22677_v21  ;;  %v14659_v31 = vadd.f32 %v7373_v47, %v20634_v33 }
 0x3dc   : > { %14167 = vmatmul.mubr.msk.bf16.vlgmr.msra.gmra.mrb[104].mxu0 %vm8331_vm0, %v8659_v60  ;;  %v14657_v60 = vadd.f32 %v7367_v39, %v20634_v33  ;;  %v9035_v39 = vsel %vm8331_vm0, %v20431_v17, 0 }
 0x3dd   : > { %14231 = vmatpush3.bf16.xpose.msra.mxu0 %v9023_v22  ;;  %14246 = vmatprep.mubr.msk.bf16.mxu0 %vm17088_vm1, %v22677_v21  ;;  %v20638_v22 = vpack.c.bf16 %v14656_v41, %v14654_v36 }
 0x3de   : > { %14232 = vmatprep.subr.bf16.mxu0 %v22677_v21  ;;  %v20644_v18 = vpack.c.bf16 %v14657_v60, %v14655_v5 }
 0x3df   : > { %14091 = vmatpush3.bf16.msra.mxu1 %v20638_v22 }
 0x3e0   : > { %14092 = vmatprep.subr.bf16.mxu1 %v22677_v21 }
 0x3e5   : > { %14233 = vmatpush3.bf16.xpose.msra.mxu0 %v9026_v45  ;;  %v7375_v45 = vpop.f32.mrb[46].mxu0 }
 0x3e6   : > { %14234 = vmatprep.subr.bf16.mxu0 %v22677_v21  ;;  %v14660_v10 = vadd.f32 %v7375_v45, %v20626_v42  ;;  %v7377_v35 = vpop.f32.mrb[47].mxu0 }
 0x3e7   : > { %v14661_v14 = vadd.f32 %v7377_v35, %v20634_v33 }
 0x3e8   : > { %v20650_v36 = vpack.c.bf16 %v14660_v10, %v14658_v11 }
 0x3e9   : > { %v20653_v28 = vpack.c.bf16 %v14661_v14, %v14659_v31 }
 0x3ea   : > { %14093 = vmatpush3.bf16.msra.mxu1 %v20650_v36 }
 0x3eb   : > { %14094 = vmatprep.subr.bf16.mxu1 %v22677_v21 }
 0x3ed   : > { %14235 = vmatpush3.bf16.xpose.msra.mxu0 %v9029_v4  ;;  %v7381_v4 = vpop.f32.mrb[48].mxu0 }
 0x3ee   : > { %14236 = vmatprep.subr.bf16.mxu0 %v22677_v21  ;;  %v14662_v62 = vadd.f32 %v7381_v4, %v20626_v42  ;;  %v7383_v59 = vpop.f32.mrb[49].mxu0 }
 0x3ef   : > { %v7385_v41 = vpop.f32.mrb[50].mxu0 }
 0x3f0   : > { %v14664_v0 = vadd.f32 %v7385_v41, %v20626_v42  ;;  %v7387_v5 = vpop.f32.mrb[51].mxu0 }
 0x3f1   : > { %v14665_v60 = vadd.f32 %v7387_v5, %v20634_v33  ;;  %v7391_v11 = vpop.f32.mrb[52].mxu0 }
 0x3f2   : > { %v20662_v47 = vpack.c.bf16 %v14664_v0, %v14662_v62  ;;  %v14666_v31 = vadd.f32 %v7391_v11, %v20626_v42  ;;  %v7393_v45 = vpop.f32.mrb[53].mxu0 }
 0x3f3   : > { %v14667_v35 = vadd.f32 %v7393_v45, %v20634_v33  ;;  %v7395_v14 = vpop.f32.mrb[54].mxu0  ;;  %v9038_v45 = vsel %vm8331_vm0, %v20466_v3, 0 }
 0x3f4   : > { %v14668_v4 = vadd.f32 %v7395_v14, %v20626_v42  ;;  %14095 = vmatpush3.bf16.msra.mxu1 %v20662_v47 }
 0x3f5   : > { %14237 = vmatpush3.bf16.xpose.msra.mxu0 %v9032_v23  ;;  %v14663_v23 = vadd.f32 %v7383_v59, %v20634_v33  ;;  %v7397_v59 = vpop.f32.mrb[55].mxu0  ;;  %14096 = vmatprep.subr.bf16.mxu1 %v22677_v21 }
 0x3f6   : > { %14238 = vmatprep.subr.bf16.mxu0 %v22677_v21  ;;  %v14669_v41 = vadd.f32 %v7397_v59, %v20634_v33  ;;  %v7401_v62 = vpop.f32.mrb[56].mxu0  ;;  %v20673_v0 = vpack.c.bf16 %v14668_v4, %v14666_v31 }
 0x3f7   : > { %v20665_v10 = vpack.c.bf16 %v14665_v60, %v14663_v23  ;;  %v14670_v23 = vadd.f32 %v7401_v62, %v20626_v42 }
 0x3f8   : > { %v20676_v5 = vpack.c.bf16 %v14669_v41, %v14667_v35  ;;  %14097 = vmatpush3.bf16.msra.mxu1 %v20673_v0 }
 0x3f9   : > { %14098 = vmatprep.subr.bf16.mxu1 %v22677_v21 }
 0x3fd   : > { %14239 = vmatpush3.bf16.xpose.msra.mxu0 %v9035_v39  ;;  %v7403_v39 = vpop.f32.mrb[57].mxu0 }
 0x3fe   : > { %14240 = vmatprep.subr.bf16.mxu0 %v22677_v21  ;;  %v14671_v60 = vadd.f32 %v7403_v39, %v20634_v33  ;;  %v7405_v11 = vpop.f32.mrb[58].mxu0 }
 0x3ff   : > { %v14672_v14 = vadd.f32 %v7405_v11, %v20626_v42  ;;  %v7407_v2 = vpop.f32.mrb[59].mxu0 }
 0x400   : > { %v14673_v59 = vadd.f32 %v7407_v2, %v20634_v33  ;;  %v7411_v31 = vpop.f32.mrb[60].mxu0 }
 0x401   : > { %v20685_v4 = vpack.c.bf16 %v14672_v14, %v14670_v23  ;;  %v14674_v35 = vadd.f32 %v7411_v31, %v20626_v42  ;;  %v7413_v41 = vpop.f32.mrb[61].mxu0 }
 0x402   : > { %v20688_v62 = vpack.c.bf16 %v14673_v59, %v14671_v60  ;;  %v14675_v39 = vadd.f32 %v7413_v41, %v20634_v33  ;;  %v7415_v6 = vpop.f32.mrb[62].mxu0 }
 0x403   : > { %v14676_v11 = vadd.f32 %v7415_v6, %v20626_v42  ;;  %v7417_v8 = vpop.f32.mrb[63].mxu0  ;;  %14099 = vmatpush3.bf16.msra.mxu1 %v20685_v4  ;;  %v9041_v6 = vsel %vm8331_vm0, %v20501_v50, 0 }
 0x404   : > { %v14677_v2 = vadd.f32 %v7417_v8, %v20634_v33  ;;  %v7421_v23 = vpop.f32.mrb[64].mxu0  ;;  %14100 = vmatprep.subr.bf16.mxu1 %v22677_v21 }
 0x405   : > { %14241 = vmatpush3.bf16.xpose.msra.mxu0 %v9038_v45  ;;  %v20696_v14 = vpack.c.bf16 %v14676_v11, %v14674_v35  ;;  %v14678_v60 = vadd.f32 %v7421_v23, %v20626_v42  ;;  %v7423_v45 = vpop.f32.mrb[65].mxu0 }
 0x406   : > { %14242 = vmatprep.subr.bf16.mxu0 %v22677_v21  ;;  %v20699_v59 = vpack.c.bf16 %v14677_v2, %v14675_v39  ;;  %v14679_v31 = vadd.f32 %v7423_v45, %v20634_v33  ;;  %v7425_v41 = vpop.f32.mrb[66].mxu0 }
 0x407   : > { %v14680_v34 = vadd.f32 %v7425_v41, %v20626_v42  ;;  %v7427_v12 = vpop.f32.mrb[67].mxu0  ;;  %14101 = vmatpush3.bf16.msra.mxu1 %v20696_v14 }
 0x408   : > { %v14681_v8 = vadd.f32 %v7427_v12, %v20634_v33  ;;  %v7431_v35 = vpop.f32.mrb[68].mxu0  ;;  %14102 = vmatprep.subr.bf16.mxu1 %v22677_v21 }
 0x409   : > { %v20708_v11 = vpack.c.bf16 %v14680_v34, %v14678_v60  ;;  %v14682_v39 = vadd.f32 %v7431_v35, %v20626_v42  ;;  %v7433_v2 = vpop.f32.mrb[69].mxu0 }
 0x40a   : > { %v20711_v23 = vpack.c.bf16 %v14681_v8, %v14679_v31  ;;  %v14683_v45 = vadd.f32 %v7433_v2, %v20634_v33  ;;  %v7435_v29 = vpop.f32.mrb[70].mxu0  ;;  %v9044_v31 = vsel %vm8331_vm0, %v20534_v63, 0  ;;  %v22700_v8 = vld [vmem:[#allocation10_spill] sm:$0xff] }
 0x40b   : > { %v14684_v41 = vadd.f32 %v7435_v29, %v20626_v42  ;;  %v7437_v7 = vpop.f32.mrb[71].mxu0  ;;  %14103 = vmatpush3.bf16.msra.mxu1 %v20708_v11  ;;  %v9002_v29 = vld [vmem:[#allocation2 + $0x8] sm:$0xf]  ;;  %v22699_v42 = vld [vmem:[#allocation9_spill] sm:$0xff] }
 0x40c   : > { %v14685_v12 = vadd.f32 %v7437_v7, %v20634_v33  ;;  %14104 = vmatprep.subr.bf16.mxu1 %v22677_v21  ;;  %v20734_v7 = vld [vmem:[%s22531_s2 + $0xe] sm:$0xf] }
 0x40d   : > { %14243 = vmatpush3.bf16.xpose.msra.mxu0 %v9041_v6  ;;  %v20719_v34 = vpack.c.bf16 %v14684_v41, %v14682_v39  ;;  %v20738_v33 = vrot.slane %v20734_v7, %v22699_v42  ;;  %v20742_v35 = vrot.slane %v20734_v7, %v22700_v8 }
 0x40e   : > { %14244 = vmatprep.subr.bf16.mxu0 %v22677_v21  ;;  %v20721_v60 = vpack.c.bf16 %v14685_v12, %v14683_v45 }
 0x40f   : > { %14105 = vmatpush3.bf16.msra.mxu1 %v20719_v34 }
 0x410   : > { %14110 = vmatprep.subr.bf16.mxu1 %v22677_v21 }
 0x415   : > { %14245 = vmatpush3.bf16.xpose.msra.mxu0 %v9044_v31 }
 0x416   : > { %14290 = vmatprep.subr.bf16.mxu0 %v22677_v21 }
 0x41c   : > { %14247 = vmatmul.mubr.msk.bf16.vlgmr.msra.gmra.mrb[108].mxu0 %vm8331_vm0, %v9002_v29 }
 0x41d   : > { %14306 = vmatprep.mubr.msk.bf16.mxu0 %vm17088_vm1, %v22677_v21 }
 0x429   : > { %v7700_v6 = vpop.f32.mrb[72].mxu1 }
 0x42a   : > { %v7702_v39 = vpop.f32.mrb[73].mxu1  ;;  %v14686_v45 = vadd.f32 %v7700_v6, %v20738_v33 }
 0x42b   : > { %v7704_v2 = vpop.f32.mrb[74].mxu1  ;;  %v14687_v31 = vadd.f32 %v7702_v39, %v20742_v35 }
 0x42c   : > { %v14688_v41 = vadd.f32 %v7704_v2, %v20738_v33  ;;  %v7706_v12 = vpop.f32.mrb[75].mxu1 }
 0x42d   : > { %v14689_v29 = vadd.f32 %v7706_v12, %v20742_v35 }
 0x42e   : > { %v20748_v52 = vpack.c.bf16 %v14688_v41, %v14686_v45 }
 0x42f   : > { %v20750_v42 = vpack.c.bf16 %v14689_v29, %v14687_v31 }
 0x431   : > { %v7710_v19 = vpop.f32.mrb[76].mxu1 }
 0x432   : > { %v14690_v48 = vadd.f32 %v7710_v19, %v20738_v33  ;;  %v7712_v8 = vpop.f32.mrb[77].mxu1 }
 0x433   : > { %v7714_v55 = vpop.f32.mrb[78].mxu1  ;;  %v14691_v6 = vadd.f32 %v7712_v8, %v20742_v35 }
 0x434   : > { %v14692_v25 = vadd.f32 %v7714_v55, %v20738_v33  ;;  %v7716_v57 = vpop.f32.mrb[79].mxu1 }
 0x435   : > { %v14693_v2 = vadd.f32 %v7716_v57, %v20742_v35 }
 0x436   : > { %v20756_v15 = vpack.c.bf16 %v14692_v25, %v14690_v48 }
 0x437   : > { %v20758_v39 = vpack.c.bf16 %v14693_v2, %v14691_v6 }
 0x439   : > { %22701 = vst [vmem:[#allocation25_spill] sm:$0xff] %v20758_v39  ;;  %v7720_v45 = vpop.f32.mrb[80].mxu1 }
 0x43a   : > { %v14694_v41 = vadd.f32 %v7720_v45, %v20738_v33  ;;  %v7722_v12 = vpop.f32.mrb[81].mxu1 }
 0x43b   : > { %v7724_v31 = vpop.f32.mrb[82].mxu1  ;;  %v14695_v44 = vadd.f32 %v7722_v12, %v20742_v35 }
 0x43c   : > { %v14696_v19 = vadd.f32 %v7724_v31, %v20738_v33  ;;  %v7726_v29 = vpop.f32.mrb[83].mxu1 }
 0x43d   : > { %v14697_v55 = vadd.f32 %v7726_v29, %v20742_v35 }
 0x43e   : > { %v20764_v46 = vpack.c.bf16 %v14696_v19, %v14694_v41 }
 0x43f   : > { %v20766_v8 = vpack.c.bf16 %v14697_v55, %v14695_v44 }
 0x441   : > { %22702 = vst [vmem:[#allocation27_spill] sm:$0xff] %v20766_v8  ;;  %v7730_v57 = vpop.f32.mrb[84].mxu1  ;;  %v22707_v8 = vlaneseq }
 0x442   : > { %v14698_v25 = vadd.f32 %v7730_v57, %v20738_v33  ;;  %v7732_v48 = vpop.f32.mrb[85].mxu1 }
 0x443   : > { %v7734_v6 = vpop.f32.mrb[86].mxu1  ;;  %v14699_v16 = vadd.f32 %v7732_v48, %v20742_v35 }
 0x444   : > { %v14700_v2 = vadd.f32 %v7734_v6, %v20738_v33  ;;  %v7736_v45 = vpop.f32.mrb[87].mxu1 }
 0x445   : > { %v14701_v31 = vadd.f32 %v7736_v45, %v20742_v35 }
 0x446   : > { %v20772_v51 = vpack.c.bf16 %v14700_v2, %v14698_v25 }
 0x447   : > { %v20774_v12 = vpack.c.bf16 %v14701_v31, %v14699_v16 }
 0x449   : > { %22703 = vst [vmem:[#allocation29_spill] sm:$0xff] %v20774_v12  ;;  %v7740_v41 = vpop.f32.mrb[88].mxu1 }
 0x44a   : > { %v14702_v44 = vadd.f32 %v7740_v41, %v20738_v33  ;;  %v7742_v19 = vpop.f32.mrb[89].mxu1 }
 0x44b   : > { %v7744_v29 = vpop.f32.mrb[90].mxu1  ;;  %v14703_v9 = vadd.f32 %v7742_v19, %v20742_v35 }
 0x44c   : > { %v14704_v55 = vadd.f32 %v7744_v29, %v20738_v33  ;;  %v7746_v57 = vpop.f32.mrb[91].mxu1 }
 0x44d   : > { %v14705_v6 = vadd.f32 %v7746_v57, %v20742_v35 }
 0x44e   : > { %v20780_v49 = vpack.c.bf16 %v14704_v55, %v14702_v44 }
 0x44f   : > { %v20782_v48 = vpack.c.bf16 %v14705_v6, %v14703_v9 }
 0x451   : > { %22704 = vst [vmem:[#allocation31_spill] sm:$0xff] %v20782_v48  ;;  %v7750_v25 = vpop.f32.mrb[92].mxu1 }
 0x452   : > { %v14706_v16 = vadd.f32 %v7750_v25, %v20738_v33  ;;  %v7752_v2 = vpop.f32.mrb[93].mxu1 }
 0x453   : > { %v7754_v45 = vpop.f32.mrb[94].mxu1  ;;  %v14707_v38 = vadd.f32 %v7752_v2, %v20742_v35 }
 0x454   : > { %v14708_v31 = vadd.f32 %v7754_v45, %v20738_v33  ;;  %v7756_v41 = vpop.f32.mrb[95].mxu1 }
 0x455   : > { %v14709_v29 = vadd.f32 %v7756_v41, %v20742_v35 }
 0x456   : > { %v20788_v53 = vpack.c.bf16 %v14708_v31, %v14706_v16 }
 0x457   : > { %v20790_v19 = vpack.c.bf16 %v14709_v29, %v14707_v38 }
 0x459   : > { %22705 = vst [vmem:[#allocation8_spill] sm:$0xff] %v20790_v19  ;;  %v7760_v44 = vpop.f32.mrb[96].mxu1 }
 0x45a   : > { %v14710_v9 = vadd.f32 %v7760_v44, %v20738_v33  ;;  %v7762_v55 = vpop.f32.mrb[97].mxu1 }
 0x45b   : > { %v7764_v57 = vpop.f32.mrb[98].mxu1  ;;  %v14711_v48 = vadd.f32 %v7762_v55, %v20742_v35  ;;  %v8311_v55 = vand.u32 127, %v22707_v8 }
 0x45c   : > { %v14712_v6 = vadd.f32 %v7764_v57, %v20738_v33  ;;  %v7766_v25 = vpop.f32.mrb[99].mxu1 }
 0x45d   : > { %v14713_v45 = vadd.f32 %v7766_v25, %v20742_v35  ;;  %v20815_v25 = vrot.slane %v20734_v7, %v22655_v1  ;;  %vm8312_vm2 = vcmp.lt.s32.totalorder %v8311_v55, 8 }
 0x45e   : > { %v20796_v12 = vpack.c.bf16 %v14712_v6, %v14710_v9  ;;  %v20807_v9 = vrot.slane %v20734_v7, %v22654_v56 }
 0x45f   : > { %v20798_v2 = vpack.c.bf16 %v14713_v45, %v14711_v48 }
 0x461   : > { %22706 = vst [vmem:[#allocation43_spill] sm:$0xff] %v20798_v2  ;;  %v7770_v16 = vpop.f32.mrb[100].mxu1 }
 0x462   : > { %v14714_v38 = vadd.f32 %v7770_v16, %v20738_v33  ;;  %v7772_v31 = vpop.f32.mrb[101].mxu1 }
 0x463   : > { %v7774_v41 = vpop.f32.mrb[102].mxu1  ;;  %v14715_v19 = vadd.f32 %v7772_v31, %v20742_v35  ;;  %v17089_v31 = vmov -1e+30  }
 0x464   : > { %v14716_v29 = vadd.f32 %v7774_v41, %v20738_v33  ;;  %v7776_v44 = vpop.f32.mrb[103].mxu1  ;;  %v20819_v41 = vsel %vm8312_vm2, 0.0, %v17089_v31 }
 0x465   : > { %v14717_v57 = vadd.f32 %v7776_v44, %v20742_v35 }
 0x466   : > { %v20809_v48 = vpack.c.bf16 %v14716_v29, %v14714_v38 }
 0x467   : > { %v20811_v6 = vpack.c.bf16 %v14717_v57, %v14715_v19 }
 0x469   : > { %22708 = vst [vmem:[#allocation44_spill] sm:$0xff] %v20811_v6 }
 0x46a   : > { %v8039_v33 = vpop.f32.mrb[72].mxu0 }
 0x46b   : > { %v14718_v45 = vadd.f32 %v8039_v33, %v20807_v9  ;;  %v8041_v16 = vpop.f32.mrb[73].mxu0 }
 0x46c   : > { %v14719_v35 = vadd.f32 %v8041_v16, %v20815_v25  ;;  %v8043_v8 = vpop.f32.mrb[74].mxu0 }
 0x46d   : > { %v14720_v38 = vadd.f32 %v8043_v8, %v20807_v9  ;;  %v8045_v29 = vpop.f32.mrb[75].mxu0 }
 0x46e   : > { %v14721_v19 = vadd.f32 %v8045_v29, %v20815_v25  ;;  %v8393_v44 = vpop.f32.mrb[104].mxu1 }
 0x46f   : > { %v20823_v57 = vpack.c.bf16 %v14720_v38, %v14718_v45  ;;  %v20826_v7 = vadd.f32 %v8393_v44, %v20819_v41  ;;  %v14088_v55 = vpop.f32.mrb[105].mxu1 }
 0x470   : > { %v20828_v33 = vpack.c.bf16 %v14721_v19, %v14719_v35  ;;  %v8396_v1 = vpop.f32.mrb[106].mxu1 }
 0x471   : > { %22709 = vst [vmem:[#allocation45_spill] sm:$0xff] %v20823_v57  ;;  %8399 = vmax.xlane.f32.xlu0 %v20826_v7  ;;  %v14089_v16 = vpop.f32.mrb[107].mxu1 }
 0x472   : > { %22710 = vst [vmem:[#allocation46_spill] sm:$0xff] %v20828_v33  ;;  %v8049_v31 = vpop.f32.mrb[76].mxu0 }
 0x473   : > { %v14722_v56 = vadd.f32 %v8049_v31, %v20807_v9  ;;  %v8051_v8 = vpop.f32.mrb[77].mxu0 }
 0x474   : > { %v14723_v6 = vadd.f32 %v8051_v8, %v20815_v25  ;;  %v8053_v29 = vpop.f32.mrb[78].mxu0 }
 0x475   : > { %v14724_v45 = vadd.f32 %v8053_v29, %v20807_v9  ;;  %v8055_v38 = vpop.f32.mrb[79].mxu0 }
 0x476   : > { %v14725_v44 = vadd.f32 %v8055_v38, %v20815_v25 }
 0x477   : > { %v20835_v57 = vpack.c.bf16 %v14724_v45, %v14722_v56 }
 0x478   : > { %v20837_v35 = vpack.c.bf16 %v14725_v44, %v14723_v6 }
 0x479   : > { %22711 = vst [vmem:[#allocation47_spill] sm:$0xff] %v20835_v57 }
 0x47a   : > { %22712 = vst [vmem:[#allocation48_spill] sm:$0xff] %v20837_v35  ;;  %v8059_v1 = vpop.f32.mrb[80].mxu0 }
 0x47b   : > { %v14726_v19 = vadd.f32 %v8059_v1, %v20807_v9  ;;  %v8061_v55 = vpop.f32.mrb[81].mxu0 }
 0x47c   : > { %v14727_v16 = vadd.f32 %v8061_v55, %v20815_v25  ;;  %v8063_v31 = vpop.f32.mrb[82].mxu0 }
 0x47d   : > { %v14728_v33 = vadd.f32 %v8063_v31, %v20807_v9  ;;  %v8065_v8 = vpop.f32.mrb[83].mxu0 }
 0x47e   : > { %v14729_v2 = vadd.f32 %v8065_v8, %v20815_v25 }
 0x47f   : > { %v20843_v29 = vpack.c.bf16 %v14728_v33, %v14726_v19 }
 0x480   : > { %v20845_v39 = vpack.c.bf16 %v14729_v2, %v14727_v16 }
 0x481   : > { %22713 = vst [vmem:[#allocation49_spill] sm:$0xff] %v20843_v29 }
 0x482   : > { %22714 = vst [vmem:[#allocation50_spill] sm:$0xff] %v20845_v39  ;;  %v8069_v56 = vpop.f32.mrb[84].mxu0 }
 0x483   : > { %v14730_v6 = vadd.f32 %v8069_v56, %v20807_v9  ;;  %v8071_v45 = vpop.f32.mrb[85].mxu0 }
 0x484   : > { %v14731_v38 = vadd.f32 %v8071_v45, %v20815_v25  ;;  %v8073_v44 = vpop.f32.mrb[86].mxu0 }
 0x485   : > { %v14732_v1 = vadd.f32 %v8073_v44, %v20807_v9  ;;  %v8075_v55 = vpop.f32.mrb[87].mxu0 }
 0x486   : > { %v14733_v35 = vadd.f32 %v8075_v55, %v20815_v25 }
 0x487   : > { %v20851_v31 = vpack.c.bf16 %v14732_v1, %v14730_v6 }
 0x488   : > { %v20853_v57 = vpack.c.bf16 %v14733_v35, %v14731_v38 }
 0x489   : > { %22715 = vst [vmem:[#allocation51_spill] sm:$0xff] %v20851_v31 }
 0x48a   : > { %22716 = vst [vmem:[#allocation52_spill] sm:$0xff] %v20853_v57  ;;  %v8079_v33 = vpop.f32.mrb[88].mxu0 }
 0x48b   : > { %v14734_v2 = vadd.f32 %v8079_v33, %v20807_v9  ;;  %v8081_v19 = vpop.f32.mrb[89].mxu0 }
 0x48c   : > { %v14735_v16 = vadd.f32 %v8081_v19, %v20815_v25  ;;  %v8083_v8 = vpop.f32.mrb[90].mxu0 }
 0x48d   : > { %v14736_v56 = vadd.f32 %v8083_v8, %v20807_v9  ;;  %v8085_v45 = vpop.f32.mrb[91].mxu0 }
 0x48e   : > { %v14737_v39 = vadd.f32 %v8085_v45, %v20815_v25 }
 0x48f   : > { %v20859_v44 = vpack.c.bf16 %v14736_v56, %v14734_v2 }
 0x490   : > { %v20861_v29 = vpack.c.bf16 %v14737_v39, %v14735_v16 }
 0x491   : > { %22717 = vst [vmem:[#allocation53_spill] sm:$0xff] %v20859_v44 }
 0x492   : > { %22718 = vst [vmem:[#allocation54_spill] sm:$0xff] %v20861_v29  ;;  %v8089_v6 = vpop.f32.mrb[92].mxu0 }
 0x493   : > { %v14738_v35 = vadd.f32 %v8089_v6, %v20807_v9  ;;  %v8091_v38 = vpop.f32.mrb[93].mxu0 }
 0x494   : > { %v14739_v1 = vadd.f32 %v8091_v38, %v20815_v25  ;;  %v8093_v55 = vpop.f32.mrb[94].mxu0 }
 0x495   : > { %v14740_v33 = vadd.f32 %v8093_v55, %v20807_v9  ;;  %v8095_v19 = vpop.f32.mrb[95].mxu0 }
 0x496   : > { %v14741_v57 = vadd.f32 %v8095_v19, %v20815_v25 }
 0x497   : > { %v20867_v8 = vpack.c.bf16 %v14740_v33, %v14738_v35 }
 0x498   : > { %v20869_v31 = vpack.c.bf16 %v14741_v57, %v14739_v1 }
 0x499   : > { %22719 = vst [vmem:[#allocation55_spill] sm:$0xff] %v20867_v8 }
 0x49a   : > { %22720 = vst [vmem:[#allocation56_spill] sm:$0xff] %v20869_v31  ;;  %v8099_v2 = vpop.f32.mrb[96].mxu0 }
 0x49b   : > { %v14742_v39 = vadd.f32 %v8099_v2, %v20807_v9  ;;  %v8101_v16 = vpop.f32.mrb[97].mxu0 }
 0x49c   : > { %v14743_v56 = vadd.f32 %v8101_v16, %v20815_v25  ;;  %v8103_v45 = vpop.f32.mrb[98].mxu0 }
 0x49d   : > { %v14744_v6 = vadd.f32 %v8103_v45, %v20807_v9  ;;  %v8105_v38 = vpop.f32.mrb[99].mxu0 }
 0x49e   : > { %v14745_v29 = vadd.f32 %v8105_v38, %v20815_v25 }
 0x49f   : > { %v20875_v55 = vpack.c.bf16 %v14744_v6, %v14742_v39 }
 0x4a0   : > { %v20877_v44 = vpack.c.bf16 %v14745_v29, %v14743_v56 }
 0x4a2   : > { %v8109_v35 = vpop.f32.mrb[100].mxu0 }
 0x4a3   : > { %v14746_v57 = vadd.f32 %v8109_v35, %v20807_v9  ;;  %v8111_v1 = vpop.f32.mrb[101].mxu0 }
 0x4a4   : > { %v14747_v33 = vadd.f32 %v8111_v1, %v20815_v25  ;;  %v8113_v19 = vpop.f32.mrb[102].mxu0 }
 0x4a5   : > { %v14748_v2 = vadd.f32 %v8113_v19, %v20807_v9  ;;  %v8115_v16 = vpop.f32.mrb[103].mxu0 }
 0x4a6   : > { %v14749_v31 = vadd.f32 %v8115_v16, %v20815_v25  ;;  %v8484_v16 = vpop.permute.xlu1 %8483 }
 0x4a7   : > { %v20883_v45 = vpack.c.bf16 %v14748_v2, %v14746_v57 }
 0x4a8   : > { %v20885_v8 = vpack.c.bf16 %v14749_v31, %v14747_v33 }
 0x4af   : > { %v8737_v39 = vpop.f32.mrb[104].mxu0 }
 0x4b0   : > { %v20888_v29 = vadd.f32 %v8737_v39, %v20819_v41  ;;  %v14168_v56 = vpop.f32.mrb[105].mxu0  ;;  %v8503_v39 = vsel %vm8331_vm0, %v8484_v16, 0 }
 0x4b1   : > { %v8740_v6 = vpop.f32.mrb[106].mxu0 }
 0x4b2   : > { %v14169_v38 = vpop.f32.mrb[107].mxu0  ;;  %8743 = vmax.xlane.f32.xlu1 %v20888_v29 }
 0x4c3   : > { %8588 = vrot.lane.b32.xlu1 %v20650_v36, %s17086_s17 }
 0x4c7   : > { %8594 = vrot.lane.b32.xlu1 %v20685_v4, %s17086_s17 }
 0x4ef   : > { %v20895_v9 = vpop.f32.mrb[108].mxu0 }
 0x4f0   : > { %v14248_v25 = vpop.f32.mrb[109].mxu0 }
 0x4f1   : > { %v9083_v31 = vpop.f32.mrb[110].mxu0 }
 0x4f2   : > { %v14249_v35 = vpop.f32.mrb[111].mxu0 }
 0x4fe   : > { %v8400_v57 = vpop.xlane.xlu0 %8399 }
 0x4ff   : > { %v8401_v1 = vsub.f32 %v20826_v7, %v8400_v57 }
 0x501   : > { %v8402_v33 = vmul.f32 1.442695, %v8401_v1 }
 0x503   : > { %16971 = vpow2.f32 %v8402_v33 }
 0x50d   : > { %v16972_v19 = vpop.eup %16971 }
 0x50e   : > { %8404 = vadd.xlane.f32.xlu0 %v16972_v19 }
 0x524   : > { %8487 = vrot.lane.b32.xlu0 %v22664_v61, %s17086_s17  ;;  %v8486_v61 = vpop.permute.xlu1 %8485 }
 0x525   : > { %v8506_v56 = vsel %vm8331_vm0, %v8486_v61, 0 }
 0x528   : > { %v8490_v25 = vpop.permute.xlu1 %8489 }
 0x529   : > { %v8512_v31 = vsel %vm8331_vm0, %v8490_v25, 0 }
 0x52c   : > { %v8492_v35 = vpop.permute.xlu1 %8491 }
 0x52d   : > { %v8515_v57 = vsel %vm8331_vm0, %v8492_v35, 0 }
 0x530   : > { %v8494_v1 = vpop.permute.xlu1 %8493 }
 0x531   : > { %v8518_v33 = vsel %vm8331_vm0, %v8494_v1, 0 }
 0x59b   : > { %v8405_v2 = vpop.xlane.xlu0 %8404 }
 0x59c   : > { %16973 = vrcp.f32 %v8405_v2 }
 0x59f   : > { %v8488_v6 = vpop.permute.xlu0 %8487 }
 0x5a0   : > { %v8509_v38 = vsel %vm8331_vm0, %v8488_v6, 0 }
 0x5a6   : > { %v16974_v36 = vpop.eup %16973 }
 0x5a7   : > { %v8407_v4 = vmul.f32 %v16974_v36, %v16972_v19  ;;  %v8496_v19 = vpop.permute.xlu1 %8495 }
 0x5a8   : > { %v8521_v2 = vsel %vm8331_vm0, %v8496_v19, 0 }
 0x5a9   : > { %8408 = vst [vmem:[%s20904_s20] sm:$0xff] %v8407_v4  ;;  %v8409_v7 = vpack.c.bf16 %v8407_v4, %v8407_v4 }
 0x5ab   : > { %14107 = vmatmul.mubr.bf16.vlgmr.msra.gmra.mrb[108].mxu1 %v8409_v7  ;;  %v8498_v36 = vpop.permute.xlu1 %8497 }
 0x5ac   : > { %14111 = vmatpush3.bf16.xpose.msra.mxu1 %v8503_v39  ;;  %14126 = vmatprep.mubr.msk.bf16.mxu1 %vm17088_vm1, %v22677_v21  ;;  %v8524_v4 = vsel %vm8331_vm0, %v8498_v36, 0 }
 0x5ad   : > { %14112 = vmatprep.subr.bf16.mxu1 %v22677_v21 }
 0x5af   : > { %v8474_v16 = vpop.permute.xlu1 %8473 }
 0x5b4   : > { %14113 = vmatpush3.bf16.xpose.msra.mxu1 %v8506_v56 }
 0x5b5   : > { %14114 = vmatprep.subr.bf16.mxu1 %v22677_v21 }
 0x5bc   : > { %14115 = vmatpush3.bf16.xpose.msra.mxu1 %v8509_v38 }
 0x5bd   : > { %14116 = vmatprep.subr.bf16.mxu1 %v22677_v21 }
 0x5c4   : > { %14117 = vmatpush3.bf16.xpose.msra.mxu1 %v8512_v31 }
 0x5c5   : > { %14118 = vmatprep.subr.bf16.mxu1 %v22677_v21 }
 0x5cc   : > { %14119 = vmatpush3.bf16.xpose.msra.mxu1 %v8515_v57 }
 0x5cd   : > { %14120 = vmatprep.subr.bf16.mxu1 %v22677_v21 }
 0x5d4   : > { %14121 = vmatpush3.bf16.xpose.msra.mxu1 %v8518_v33 }
 0x5d5   : > { %14122 = vmatprep.subr.bf16.mxu1 %v22677_v21 }
 0x5dc   : > { %14123 = vmatpush3.bf16.xpose.msra.mxu1 %v8521_v2 }
 0x5dd   : > { %14124 = vmatprep.subr.bf16.mxu1 %v22677_v21 }
 0x5e4   : > { %14125 = vmatpush3.bf16.xpose.msra.mxu1 %v8524_v4 }
 0x5e5   : > { %14130 = vmatprep.subr.bf16.mxu1 %v22677_v21 }
 0x5eb   : > { %14127 = vmatmul.mubr.msk.bf16.vlgmr.msra.gmra.mrb[112].mxu1 %vm8331_vm0, %v8474_v16 }
 0x5ec   : > { %14146 = vmatprep.mubr.msk.bf16.mxu1 %vm17088_vm1, %v22677_v21 }
 0x67e   : > { %v8444_v7 = vpop.f32.mrb[108].mxu1 }
 0x67f   : > { %v8450_v39 = vpack.c.bf16 %v8444_v7, %v8444_v7  ;;  %v14108_v61 = vpop.f32.mrb[109].mxu1 }
 0x680   : > { %v8447_v56 = vpop.f32.mrb[110].mxu1 }
 0x681   : > { %8452 = vst.msk [vmem:[#allocation4] sm:$0xf] %vm8451_vm3, %v8450_v39  ;;  %v14109_v6 = vpop.f32.mrb[111].mxu1 }
 0x6be   : > { %v8560_v38 = vpop.f32.mrb[112].mxu1 }
 0x6bf   : > { %v8561_v25 = vadd.f32 %v8560_v38, %v20819_v41  ;;  %v14128_v31 = vpop.f32.mrb[113].mxu1 }
 0x6c0   : > { %v8563_v35 = vpop.f32.mrb[114].mxu1 }
 0x6c1   : > { %8566 = vmax.xlane.f32.xlu0 %v8561_v25  ;;  %v14129_v57 = vpop.f32.mrb[115].mxu1 }
 0x6d7   : > { %8586 = vrot.lane.b32.xlu0 %v20638_v22, %s17086_s17 }
 0x6db   : > { %8590 = vrot.lane.b32.xlu0 %v20662_v47, %s17086_s17 }
 0x6df   : > { %8592 = vrot.lane.b32.xlu0 %v20673_v0, %s17086_s17 }
 0x6e3   : > { %8596 = vrot.lane.b32.xlu0 %v20696_v14, %s17086_s17 }
 0x6e7   : > { %8600 = vrot.lane.b32.xlu0 %v20719_v34, %s17086_s17 }
 0x6eb   : > { %8827 = vrot.lane.b32.xlu0 %v22686_v40, %s17086_s17  ;;  %v16528_v40 = vld [vmem:[#allocation2 + $0x4] ss:$0 sps:$4 sm:$0xff]  }
 0x6ef   : > { %8829 = vrot.lane.b32.xlu0 %v22689_v32, %s17086_s17  ;;  %v20959_v32 = vadd.f32 %v20895_v9, %v20819_v41 }
 0x6f3   : > { %8831 = vrot.lane.b32.xlu0 %v22692_v58, %s17086_s17 }
 0x6f7   : > { %8833 = vrot.lane.b32.xlu0 %v22693_v54, %s17086_s17 }
 0x6fb   : > { %8835 = vrot.lane.b32.xlu0 %v22694_v27, %s17086_s17  ;;  %v8744_v27 = vpop.xlane.xlu1 %8743 }
 0x6ff   : > { %8837 = vrot.lane.b32.xlu0 %v22695_v24, %s17086_s17 }
 0x703   : > { %8839 = vrot.lane.b32.xlu0 %v22696_v13, %s17086_s17  ;;  %v8589_v13 = vpop.permute.xlu1 %8588 }
 0x707   : > { %8841 = vrot.lane.b32.xlu0 %v19885_v30, %s17086_s17  ;;  %v8595_v14 = vpop.permute.xlu1 %8594 }
 0x70b   : > { %8817 = vrot.lane.b32.xlu0 %v16528_v40, %s17086_s17 }
 0x72a   : > { %9086 = vmax.xlane.f32.xlu0 %v20959_v32 }
 0x740   : > { %8932 = vrot.lane.b32.xlu0 %v20653_v28, %s17086_s17 }
 0x744   : > { %8934 = vrot.lane.b32.xlu0 %v20665_v10, %s17086_s17 }
 0x748   : > { %8938 = vrot.lane.b32.xlu0 %v20688_v62, %s17086_s17 }
 0x74c   : > { %8940 = vrot.lane.b32.xlu0 %v20699_v59, %s17086_s17 }
 0x74e   : > { %v8567_v30 = vpop.xlane.xlu0 %8566 }
 0x74f   : > { %v8568_v58 = vsub.f32 %v8561_v25, %v8567_v30 }
 0x750   : > { %8942 = vrot.lane.b32.xlu0 %v20711_v23, %s17086_s17 }
 0x751   : > { %v8569_v54 = vmul.f32 1.442695, %v8568_v58 }
 0x752   : > { %v8587_v24 = vpop.permute.xlu0 %8586 }
 0x753   : > { %16975 = vpow2.f32 %v8569_v54  ;;  %14131 = vmatpush3.bf16.msra.mxu1 %v8587_v24 }
 0x754   : > { %8944 = vrot.lane.b32.xlu0 %v20721_v60, %s17086_s17  ;;  %14132 = vmatprep.subr.bf16.mxu1 %v22677_v21 }
 0x756   : > { %v8591_v22 = vpop.permute.xlu0 %8590 }
 0x757   : > { %14133 = vmatpush3.bf16.msra.mxu1 %v8589_v13 }
 0x758   : > { %9170 = vrot.lane.b32.xlu0 %v20299_v20, %s17086_s17  ;;  %14134 = vmatprep.subr.bf16.mxu1 %v22677_v21 }
 0x75a   : > { %v8593_v0 = vpop.permute.xlu0 %8592 }
 0x75b   : > { %14135 = vmatpush3.bf16.msra.mxu1 %v8591_v22 }
 0x75c   : > { %9172 = vrot.lane.b32.xlu0 %v20326_v37, %s17086_s17  ;;  %14136 = vmatprep.subr.bf16.mxu1 %v22677_v21  ;;  %v16529_v37 = vld [vmem:[#allocation2 + $0x8] ss:$0 sps:$4 sm:$0xff]  }
 0x75d   : > { %v16976_v47 = vpop.eup %16975 }
 0x75e   : > { %8571 = vadd.xlane.f32.xlu1 %v16976_v47  ;;  %v8597_v20 = vpop.permute.xlu0 %8596 }
 0x75f   : > { %14137 = vmatpush3.bf16.msra.mxu1 %v8593_v0 }
 0x760   : > { %9174 = vrot.lane.b32.xlu0 %v20357_v26, %s17086_s17  ;;  %14138 = vmatprep.subr.bf16.mxu1 %v22677_v21 }
 0x762   : > { %v8601_v26 = vpop.permute.xlu0 %8600 }
 0x763   : > { %14139 = vmatpush3.bf16.msra.mxu1 %v8595_v14 }
 0x764   : > { %9176 = vrot.lane.b32.xlu0 %v20396_v43, %s17086_s17  ;;  %14140 = vmatprep.subr.bf16.mxu1 %v22677_v21  ;;  %v8745_v43 = vsub.f32 %v20888_v29, %v8744_v27 }
 0x767   : > { %14141 = vmatpush3.bf16.msra.mxu1 %v8597_v20 }
 0x768   : > { %9178 = vrot.lane.b32.xlu0 %v20431_v17, %s17086_s17  ;;  %14142 = vmatprep.subr.bf16.mxu1 %v22677_v21  ;;  %v21002_v17 = vpop.permute.xlu0 %8827 }
 0x769   : > { %v8847_v0 = vsel %vm8331_vm0, %v21002_v17, 0 }
 0x76c   : > { %9180 = vrot.lane.b32.xlu0 %v20466_v3, %s17086_s17  ;;  %v8746_v3 = vmul.f32 1.442695, %v8745_v43 }
 0x76e   : > { %16977 = vpow2.f32 %v8746_v3 }
 0x76f   : > { %8598 = vrot.lane.b32.xlu1 %v20708_v11, %s17086_s17  ;;  %v21004_v11 = vpop.permute.xlu0 %8829 }
 0x770   : > { %9182 = vrot.lane.b32.xlu0 %v20501_v50, %s17086_s17 }
 0x773   : > { %v21006_v34 = vpop.permute.xlu0 %8831 }
 0x774   : > { %9184 = vrot.lane.b32.xlu0 %v20534_v63, %s17086_s17 }
 0x777   : > { %v21008_v63 = vpop.permute.xlu0 %8833 }
 0x778   : > { %9160 = vrot.lane.b32.xlu0 %v16529_v37, %s17086_s17  ;;  %v16978_v50 = vpop.eup %16977 }
 0x77b   : > { %v21010_v9 = vpop.permute.xlu0 %8835 }
 0x77c   : > { %9273 = vrot.lane.b32.xlu0 %v20748_v52, %s17086_s17  ;;  %v8859_v14 = vsel %vm8331_vm0, %v21010_v9, 0 }
 0x77f   : > { %v21012_v1 = vpop.permute.xlu0 %8837 }
 0x780   : > { %v8862_v20 = vsel %vm8331_vm0, %v21012_v1, 0 }
 0x783   : > { %v21014_v33 = vpop.permute.xlu0 %8839 }
 0x784   : > { %v8865_v37 = vsel %vm8331_vm0, %v21014_v33, 0 }
 0x787   : > { %v21016_v19 = vpop.permute.xlu0 %8841 }
 0x78b   : > { %v21018_v29 = vpop.permute.xlu0 %8817 }
 0x793   : > { %8748 = vadd.xlane.f32.xlu1 %v16978_v50 }
 0x7b7   : > { %v21020_v2 = vpop.xlane.xlu0 %9086 }
 0x7bb   : > { %v21022_v36 = vpop.permute.xlu0 %8932 }
 0x7bf   : > { %v21024_v4 = vpop.permute.xlu0 %8934 }
 0x7c3   : > { %v21026_v16 = vpop.permute.xlu0 %8938 }
 0x7c7   : > { %v21028_v7 = vpop.permute.xlu0 %8940 }
 0x7cb   : > { %v21030_v39 = vpop.permute.xlu0 %8942 }
 0x7cf   : > { %v21032_v61 = vpop.permute.xlu0 %8944 }
 0x7d3   : > { %v21034_v56 = vpop.permute.xlu0 %9170 }
 0x7d7   : > { %v21036_v6 = vpop.permute.xlu0 %9172 }
 0x7db   : > { %v21038_v38 = vpop.permute.xlu0 %9174 }
 0x7df   : > { %v21040_v25 = vpop.permute.xlu0 %9176 }
 0x7e3   : > { %v21042_v31 = vpop.permute.xlu0 %9178 }
 0x7e7   : > { %v21044_v35 = vpop.permute.xlu0 %9180 }
 0x7eb   : > { %v8572_v57 = vpop.xlane.xlu1 %8571  ;;  %v21046_v40 = vpop.permute.xlu0 %9182 }
 0x7ec   : > { %16979 = vrcp.f32 %v8572_v57 }
 0x7ef   : > { %v8599_v30 = vpop.permute.xlu1 %8598  ;;  %v21048_v58 = vpop.permute.xlu0 %9184 }
 0x7f0   : > { %14143 = vmatpush3.bf16.msra.mxu1 %v8599_v30 }
 0x7f1   : > { %14144 = vmatprep.subr.bf16.mxu1 %v22677_v21 }
 0x7f3   : > { %v21051_v54 = vpop.permute.xlu0 %9160 }
 0x7f4   : > { %14145 = vmatpush3.bf16.msra.mxu1 %v8601_v26  ;;  %v8868_v26 = vsel %vm8331_vm0, %v21016_v19, 0 }
 0x7f5   : > { %14170 = vmatprep.subr.bf16.mxu1 %v22677_v21 }
 0x7f6   : > { %v16980_v27 = vpop.eup %16979 }
 0x7f7   : > { %v9274_v24 = vpop.permute.xlu0 %9273  ;;  %v8574_v13 = vmul.f32 %v16980_v27, %v16976_v47 }
 0x7f8   : > { %14291 = vmatpush3.bf16.msra.mxu0 %v9274_v24 }
 0x7f9   : > { %13516 = vst [vmem:[%s20904_s20 + $0x8] sm:$0xff] %v8574_v13  ;;  %v8577_v22 = vpack.c.bf16 %v8574_v13, %v8574_v13  ;;  %14292 = vmatprep.subr.bf16.mxu0 %v22677_v21 }
 0x7fb   : > { %14147 = vmatmul.mubr.bf16.vlgmr.msra.gmra.mrb[116].mxu1 %v8577_v22 }
 0x7fc   : > { %14171 = vmatpush3.bf16.msra.mxu1 %v20644_v18  ;;  %14186 = vmatprep.mubr.msk.bf16.mxu1 %vm17088_vm1, %v22677_v21 }
 0x7fd   : > { %14172 = vmatprep.subr.bf16.mxu1 %v22677_v21 }
 0x800   : > { %14173 = vmatpush3.bf16.msra.mxu1 %v20653_v28 }
 0x801   : > { %14174 = vmatprep.subr.bf16.mxu1 %v22677_v21 }
 0x804   : > { %14175 = vmatpush3.bf16.msra.mxu1 %v20665_v10 }
 0x805   : > { %14176 = vmatprep.subr.bf16.mxu1 %v22677_v21 }
 0x808   : > { %14177 = vmatpush3.bf16.msra.mxu1 %v20676_v5 }
 0x809   : > { %14178 = vmatprep.subr.bf16.mxu1 %v22677_v21 }
 0x80c   : > { %14179 = vmatpush3.bf16.msra.mxu1 %v20688_v62 }
 0x80d   : > { %14180 = vmatprep.subr.bf16.mxu1 %v22677_v21 }
 0x810   : > { %14181 = vmatpush3.bf16.msra.mxu1 %v20699_v59  ;;  %v8850_v59 = vsel %vm8331_vm0, %v21004_v11, 0 }
 0x811   : > { %14182 = vmatprep.subr.bf16.mxu1 %v22677_v21 }
 0x814   : > { %14183 = vmatpush3.bf16.msra.mxu1 %v20711_v23  ;;  %v8853_v23 = vsel %vm8331_vm0, %v21006_v34, 0 }
 0x815   : > { %14184 = vmatprep.subr.bf16.mxu1 %v22677_v21 }
 0x818   : > { %14185 = vmatpush3.bf16.msra.mxu1 %v20721_v60  ;;  %v8856_v60 = vsel %vm8331_vm0, %v21008_v63, 0 }
 0x819   : > { %14190 = vmatprep.subr.bf16.mxu1 %v22677_v21 }
 0x820   : > { %v8749_v28 = vpop.xlane.xlu1 %8748 }
 0x821   : > { %16981 = vrcp.f32 %v8749_v28 }
 0x82b   : > { %v16982_v10 = vpop.eup %16981 }
 0x82c   : > { %v8751_v47 = vmul.f32 %v16982_v10, %v16978_v50 }
 0x82e   : > { %13519 = vst [vmem:[%s20904_s20 + $0x10] sm:$0xff] %v8751_v47  ;;  %v8754_v62 = vpack.c.bf16 %v8751_v47, %v8751_v47 }
 0x830   : > { %14187 = vmatmul.mubr.bf16.vlgmr.msra.gmra.mrb[120].mxu1 %v8754_v62 }
 0x831   : > { %14191 = vmatpush3.bf16.xpose.msra.mxu1 %v8847_v0  ;;  %14206 = vmatprep.mubr.msk.bf16.mxu1 %vm17088_vm1, %v22677_v21  ;;  %v9196_v0 = vsel %vm8331_vm0, %v21038_v38, 0  ;;  %v9208_v38 = vsel %vm8331_vm0, %v21046_v40, 0  ;;  %v22723_v40 = vld [vmem:[#allocation29_spill] sm:$0xff] }
 0x832   : > { %14192 = vmatprep.subr.bf16.mxu1 %v22677_v21 }
 0x839   : > { %14193 = vmatpush3.bf16.xpose.msra.mxu1 %v8850_v59  ;;  %v9202_v59 = vsel %vm8331_vm0, %v21042_v31, 0  ;;  %v22721_v31 = vld [vmem:[#allocation25_spill] sm:$0xff] }
 0x83a   : > { %14194 = vmatprep.subr.bf16.mxu1 %v22677_v21 }
 0x841   : > { %14195 = vmatpush3.bf16.xpose.msra.mxu1 %v8853_v23  ;;  %v22726_v23 = vld [vmem:[#allocation43_spill] sm:$0xff] }
 0x842   : > { %14196 = vmatprep.subr.bf16.mxu1 %v22677_v21 }
 0x849   : > { %14197 = vmatpush3.bf16.xpose.msra.mxu1 %v8856_v60  ;;  %v22727_v60 = vld [vmem:[#allocation44_spill] sm:$0xff] }
 0x84a   : > { %14198 = vmatprep.subr.bf16.mxu1 %v22677_v21 }
 0x851   : > { %14199 = vmatpush3.bf16.xpose.msra.mxu1 %v8859_v14 }
 0x852   : > { %14200 = vmatprep.subr.bf16.mxu1 %v22677_v21 }
 0x859   : > { %14201 = vmatpush3.bf16.xpose.msra.mxu1 %v8862_v20 }
 0x85a   : > { %14202 = vmatprep.subr.bf16.mxu1 %v22677_v21 }
 0x861   : > { %14203 = vmatpush3.bf16.xpose.msra.mxu1 %v8865_v37 }
 0x862   : > { %14204 = vmatprep.subr.bf16.mxu1 %v22677_v21 }
 0x869   : > { %14205 = vmatpush3.bf16.xpose.msra.mxu1 %v8868_v26 }
 0x86a   : > { %14210 = vmatprep.subr.bf16.mxu1 %v22677_v21 }
 0x870   : > { %14207 = vmatmul.mubr.msk.bf16.vlgmr.msra.gmra.mrb[124].mxu1 %vm8331_vm0, %v21018_v29 }
 0x871   : > { %14226 = vmatprep.mubr.msk.bf16.mxu1 %vm17088_vm1, %v22677_v21 }
 0x8ce   : > { %v21105_v43 = vpop.f32.mrb[116].mxu1 }
 0x8cf   : > { %v14148_v17 = vpop.f32.mrb[117].mxu1 }
 0x8d0   : > { %v8647_v3 = vpop.f32.mrb[118].mxu1 }
 0x8d1   : > { %v14149_v11 = vpop.f32.mrb[119].mxu1 }
 0x903   : > { %v8789_v34 = vpop.f32.mrb[120].mxu1 }
 0x904   : > { %v8795_v50 = vpack.c.bf16 %v8789_v34, %v8789_v34  ;;  %v14188_v63 = vpop.f32.mrb[121].mxu1 }
 0x905   : > { %v8792_v9 = vpop.f32.mrb[122].mxu1 }
 0x906   : > { %8796 = vst.msk [vmem:[#allocation4 + $0x4] sm:$0xf] %vm8451_vm3, %v8795_v50  ;;  %v14189_v1 = vpop.f32.mrb[123].mxu1 }
 0x943   : > { %v8904_v33 = vpop.f32.mrb[124].mxu1 }
 0x944   : > { %v8905_v19 = vadd.f32 %v8904_v33, %v20819_v41  ;;  %v14208_v57 = vpop.f32.mrb[125].mxu1 }
 0x945   : > { %v8907_v29 = vpop.f32.mrb[126].mxu1 }
 0x946   : > { %8910 = vmax.xlane.f32.xlu1 %v8905_v19  ;;  %v14209_v30 = vpop.f32.mrb[127].mxu1 }
 0x957   : > { %8930 = vrot.lane.b32.xlu1 %v20644_v18, %s17086_s17  ;;  %v9088_v18 = vsub.f32 %v20959_v32, %v21020_v2 }
 0x959   : > { %v9089_v10 = vmul.f32 1.442695, %v9088_v18 }
 0x9d3   : > { %v8911_v27 = vpop.xlane.xlu1 %8910 }
 0x9d4   : > { %v8912_v24 = vsub.f32 %v8905_v19, %v8911_v27 }
 0x9d6   : > { %v8913_v13 = vmul.f32 1.442695, %v8912_v24 }
 0x9d7   : > { %v8931_v22 = vpop.permute.xlu1 %8930 }
 0x9d8   : > { %16983 = vpow2.f32 %v8913_v13  ;;  %14211 = vmatpush3.bf16.msra.mxu1 %v8931_v22 }
 0x9d9   : > { %14212 = vmatprep.subr.bf16.mxu1 %v22677_v21  ;;  %16985 = vpow2.f32 %v9089_v10  ;;  %v22728_v10 = vld [vmem:[#allocation11_spill] sm:$0xff] }
 0x9dc   : > { %14213 = vmatpush3.bf16.msra.mxu1 %v21022_v36 }
 0x9dd   : > { %14214 = vmatprep.subr.bf16.mxu1 %v22677_v21 }
 0x9e0   : > { %14215 = vmatpush3.bf16.msra.mxu1 %v21024_v4 }
 0x9e1   : > { %14216 = vmatprep.subr.bf16.mxu1 %v22677_v21 }
 0x9e2   : > { %v16984_v28 = vpop.eup %16983 }
 0x9e3   : > { %8915 = vadd.xlane.f32.xlu1 %v16984_v28  ;;  %v16986_v47 = vpop.eup %16985 }
 0x9f4   : > { %8936 = vrot.lane.b32.xlu1 %v20676_v5, %s17086_s17 }
 0xa18   : > { %9091 = vadd.xlane.f32.xlu1 %v16986_v47 }
 0xa70   : > { %v8916_v36 = vpop.xlane.xlu1 %8915 }
 0xa71   : > { %16987 = vrcp.f32 %v8916_v36 }
 0xa74   : > { %v8937_v62 = vpop.permute.xlu1 %8936 }
 0xa75   : > { %14217 = vmatpush3.bf16.msra.mxu1 %v8937_v62  ;;  %v22730_v62 = vld [vmem:[#allocation13_spill] sm:$0xff] }
 0xa76   : > { %14218 = vmatprep.subr.bf16.mxu1 %v22677_v21 }
 0xa79   : > { %14219 = vmatpush3.bf16.msra.mxu1 %v21026_v16 }
 0xa7a   : > { %14220 = vmatprep.subr.bf16.mxu1 %v22677_v21 }
 0xa7b   : > { %v16988_v4 = vpop.eup %16987 }
 0xa7c   : > { %v8918_v5 = vmul.f32 %v16988_v4, %v16984_v28  ;;  %v9372_v4 = vsel %vm8331_vm0, %v22730_v62, 0 }
 0xa7d   : > { %14221 = vmatpush3.bf16.msra.mxu1 %v21028_v7 }
 0xa7e   : > { %14222 = vmatprep.subr.bf16.mxu1 %v22677_v21  ;;  %13522 = vst [vmem:[%s20904_s20 + $0x18] sm:$0xff] %v8918_v5  ;;  %v8921_v32 = vpack.c.bf16 %v8918_v5, %v8918_v5  ;;  %v22731_v5 = vld [vmem:[#allocation15_spill] sm:$0xff] }
 0xa81   : > { %14223 = vmatpush3.bf16.msra.mxu1 %v21030_v39  ;;  %v9190_v39 = vsel %vm8331_vm0, %v21034_v56, 0  ;;  %v9199_v56 = vsel %vm8331_vm0, %v21040_v25, 0  ;;  %v9211_v25 = vsel %vm8331_vm0, %v21048_v58, 0  ;;  %v22724_v58 = vld [vmem:[#allocation31_spill] sm:$0xff] }
 0xa82   : > { %14224 = vmatprep.subr.bf16.mxu1 %v22677_v21 }
 0xa85   : > { %14225 = vmatpush3.bf16.msra.mxu1 %v21032_v61  ;;  %v9193_v61 = vsel %vm8331_vm0, %v21036_v6, 0  ;;  %v9205_v6 = vsel %vm8331_vm0, %v21044_v35, 0  ;;  %v22722_v35 = vld [vmem:[#allocation27_spill] sm:$0xff] }
 0xa86   : > { %14250 = vmatprep.subr.bf16.mxu1 %v22677_v21 }
 0xa88   : > { %14227 = vmatmul.mubr.bf16.vlgmr.msra.gmra.mrb[128].mxu1 %v8921_v32  ;;  %v9375_v32 = vsel %vm8331_vm0, %v22731_v5, 0 }
 0xa89   : > { %14251 = vmatpush3.bf16.msra.mxu1 %v20748_v52  ;;  %14266 = vmatprep.mubr.msk.bf16.mxu1 %vm17088_vm1, %v22677_v21 }
 0xa8a   : > { %14252 = vmatprep.subr.bf16.mxu1 %v22677_v21 }
 0xa8d   : > { %14253 = vmatpush3.bf16.msra.mxu1 %v20756_v15 }
 0xa8e   : > { %14254 = vmatprep.subr.bf16.mxu1 %v22677_v21 }
 0xa91   : > { %14255 = vmatpush3.bf16.msra.mxu1 %v20764_v46 }
 0xa92   : > { %14256 = vmatprep.subr.bf16.mxu1 %v22677_v21 }
 0xa95   : > { %14257 = vmatpush3.bf16.msra.mxu1 %v20772_v51 }
 0xa96   : > { %14258 = vmatprep.subr.bf16.mxu1 %v22677_v21 }
 0xa99   : > { %14259 = vmatpush3.bf16.msra.mxu1 %v20780_v49 }
 0xa9a   : > { %14260 = vmatprep.subr.bf16.mxu1 %v22677_v21 }
 0xa9d   : > { %14261 = vmatpush3.bf16.msra.mxu1 %v20788_v53 }
 0xa9e   : > { %14262 = vmatprep.subr.bf16.mxu1 %v22677_v21 }
 0xaa1   : > { %14263 = vmatpush3.bf16.msra.mxu1 %v20796_v12 }
 0xaa2   : > { %14264 = vmatprep.subr.bf16.mxu1 %v22677_v21 }
 0xaa5   : > { %14265 = vmatpush3.bf16.msra.mxu1 %v20809_v48  ;;  %v9092_v52 = vpop.xlane.xlu1 %9091 }
 0xaa6   : > { %16989 = vrcp.f32 %v9092_v52  ;;  %14270 = vmatprep.subr.bf16.mxu1 %v22677_v21  ;;  %v22732_v52 = vld [vmem:[#allocation24_spill] sm:$0xff] }
 0xab0   : > { %v16990_v2 = vpop.eup %16989 }
 0xab1   : > { %v9094_v16 = vmul.f32 %v16990_v2, %v16986_v47  ;;  %v9366_v47 = vsel %vm8331_vm0, %v22728_v10, 0  ;;  %v9378_v2 = vsel %vm8331_vm0, %v22732_v52, 0 }
 0xab3   : > { %13525 = vst [vmem:[%s20904_s20 + $0x20] sm:$0xff] %v9094_v16  ;;  %v9097_v7 = vpack.c.bf16 %v9094_v16, %v9094_v16  ;;  %v22733_v16 = vld [vmem:[#allocation35_spill] sm:$0xff] }
 0xab5   : > { %14267 = vmatmul.mubr.bf16.vlgmr.msra.gmra.mrb[132].mxu1 %v9097_v7  ;;  %v9381_v7 = vsel %vm8331_vm0, %v22733_v16, 0 }
 0xab6   : > { %14271 = vmatpush3.bf16.xpose.msra.mxu1 %v9190_v39  ;;  %14286 = vmatprep.mubr.msk.bf16.mxu1 %vm17088_vm1, %v22677_v21  ;;  %v22734_v39 = vld [vmem:[#allocation37_spill] sm:$0xff] }
 0xab7   : > { %14272 = vmatprep.subr.bf16.mxu1 %v22677_v21 }
 0xabe   : > { %14273 = vmatpush3.bf16.xpose.msra.mxu1 %v9193_v61  ;;  %v9384_v61 = vsel %vm8331_vm0, %v22734_v39, 0 }
 0xabf   : > { %14274 = vmatprep.subr.bf16.mxu1 %v22677_v21 }
 0xac6   : > { %14275 = vmatpush3.bf16.xpose.msra.mxu1 %v9196_v0  ;;  %v22735_v0 = vld [vmem:[#allocation23_spill] sm:$0xff] }
 0xac7   : > { %14276 = vmatprep.subr.bf16.mxu1 %v22677_v21 }
 0xace   : > { %14277 = vmatpush3.bf16.xpose.msra.mxu1 %v9199_v56  ;;  %v9387_v56 = vsel %vm8331_vm0, %v22735_v0, 0 }
 0xacf   : > { %14278 = vmatprep.subr.bf16.mxu1 %v22677_v21 }
 0xad6   : > { %14279 = vmatpush3.bf16.xpose.msra.mxu1 %v9202_v59  ;;  %v9345_v59 = vld [vmem:[#allocation2 + $0xc] sm:$0xf] }
 0xad7   : > { %14280 = vmatprep.subr.bf16.mxu1 %v22677_v21 }
 0xade   : > { %14281 = vmatpush3.bf16.xpose.msra.mxu1 %v9205_v6 }
 0xadf   : > { %14282 = vmatprep.subr.bf16.mxu1 %v22677_v21 }
 0xae6   : > { %14283 = vmatpush3.bf16.xpose.msra.mxu1 %v9208_v38 }
 0xae7   : > { %14284 = vmatprep.subr.bf16.mxu1 %v22677_v21 }
 0xaee   : > { %14285 = vmatpush3.bf16.xpose.msra.mxu1 %v9211_v25 }
 0xaef   : > { %14330 = vmatprep.subr.bf16.mxu1 %v22677_v21 }
 0xaf5   : > { %14287 = vmatmul.mubr.msk.bf16.vlgmr.msra.gmra.mrb[136].mxu1 %vm8331_vm0, %v21051_v54  ;;  %v22725_v54 = vld [vmem:[#allocation8_spill] sm:$0xff] }
 0xaf6   : > { %14331 = vmatpush3.bf16.msra.mxu1 %v20750_v42  ;;  %14346 = vmatprep.mubr.msk.bf16.mxu1 %vm17088_vm1, %v22677_v21 }
 0xaf7   : > { %14332 = vmatprep.subr.bf16.mxu1 %v22677_v21 }
 0xafa   : > { %14333 = vmatpush3.bf16.msra.mxu1 %v22721_v31 }
 0xafb   : > { %14334 = vmatprep.subr.bf16.mxu1 %v22677_v21 }
 0xafe   : > { %14335 = vmatpush3.bf16.msra.mxu1 %v22722_v35 }
 0xaff   : > { %14336 = vmatprep.subr.bf16.mxu1 %v22677_v21 }
 0xb02   : > { %14337 = vmatpush3.bf16.msra.mxu1 %v22723_v40 }
 0xb03   : > { %14338 = vmatprep.subr.bf16.mxu1 %v22677_v21 }
 0xb06   : > { %14339 = vmatpush3.bf16.msra.mxu1 %v22724_v58 }
 0xb07   : > { %14340 = vmatprep.subr.bf16.mxu1 %v22677_v21 }
 0xb0a   : > { %14341 = vmatpush3.bf16.msra.mxu1 %v22725_v54 }
 0xb0b   : > { %14342 = vmatprep.subr.bf16.mxu1 %v22677_v21 }
 0xb0e   : > { %14343 = vmatpush3.bf16.msra.mxu1 %v22726_v23 }
 0xb0f   : > { %14344 = vmatprep.subr.bf16.mxu1 %v22677_v21 }
 0xb12   : > { %14345 = vmatpush3.bf16.msra.mxu1 %v22727_v60 }
 0xb13   : > { %14350 = vmatprep.subr.bf16.mxu1 %v22677_v21 }
 0xb5b   : > { %v21195_v14 = vpop.f32.mrb[128].mxu1 }
 0xb5c   : > { %v14228_v20 = vpop.f32.mrb[129].mxu1 }
 0xb5d   : > { %v8991_v37 = vpop.f32.mrb[130].mxu1 }
 0xb5e   : > { %v14229_v26 = vpop.f32.mrb[131].mxu1 }
 0xb88   : > { %v9132_v17 = vpop.f32.mrb[132].mxu1 }
 0xb89   : > { %v9138_v3 = vpack.c.bf16 %v9132_v17, %v9132_v17  ;;  %v14268_v11 = vpop.f32.mrb[133].mxu1 }
 0xb8a   : > { %v9135_v34 = vpop.f32.mrb[134].mxu1 }
 0xb8b   : > { %9139 = vst.msk [vmem:[#allocation4 + $0x8] sm:$0xf] %vm8451_vm3, %v9138_v3  ;;  %v14269_v50 = vpop.f32.mrb[135].mxu1  ;;  %v16530_v34 = vld [vmem:[#allocation2 + $0xc] ss:$0 sps:$4 sm:$0xff]  }
 0xbc8   : > { %v9247_v63 = vpop.f32.mrb[136].mxu1 }
 0xbc9   : > { %v9248_v9 = vadd.f32 %v9247_v63, %v20819_v41  ;;  %v14288_v1 = vpop.f32.mrb[137].mxu1 }
 0xbca   : > { %v9250_v33 = vpop.f32.mrb[138].mxu1 }
 0xbcb   : > { %9253 = vmax.xlane.f32.xlu1 %v9248_v9  ;;  %v14289_v19 = vpop.f32.mrb[139].mxu1 }
 0xbdc   : > { %9275 = vrot.lane.b32.xlu1 %v20756_v15, %s17086_s17 }
 0xbe0   : > { %9277 = vrot.lane.b32.xlu1 %v20764_v46, %s17086_s17 }
 0xbe4   : > { %9279 = vrot.lane.b32.xlu1 %v20772_v51, %s17086_s17 }
 0xbe8   : > { %9281 = vrot.lane.b32.xlu1 %v20780_v49, %s17086_s17 }
 0xbec   : > { %9283 = vrot.lane.b32.xlu1 %v20788_v53, %s17086_s17 }
 0xbf0   : > { %9287 = vrot.lane.b32.xlu1 %v20809_v48, %s17086_s17 }
 0xc58   : > { %v9254_v57 = vpop.xlane.xlu1 %9253 }
 0xc59   : > { %v9255_v29 = vsub.f32 %v9248_v9, %v9254_v57 }
 0xc5b   : > { %v9256_v30 = vmul.f32 1.442695, %v9255_v29 }
 0xc5c   : > { %v9276_v27 = vpop.permute.xlu1 %9275 }
 0xc5d   : > { %16991 = vpow2.f32 %v9256_v30  ;;  %14293 = vmatpush3.bf16.msra.mxu0 %v9276_v27 }
 0xc5e   : > { %14294 = vmatprep.subr.bf16.mxu0 %v22677_v21 }
 0xc60   : > { %v9278_v15 = vpop.permute.xlu1 %9277 }
 0xc61   : > { %14295 = vmatpush3.bf16.msra.mxu0 %v9278_v15 }
 0xc62   : > { %14296 = vmatprep.subr.bf16.mxu0 %v22677_v21 }
 0xc64   : > { %v9280_v51 = vpop.permute.xlu1 %9279 }
 0xc65   : > { %14297 = vmatpush3.bf16.msra.mxu0 %v9280_v51 }
 0xc66   : > { %14298 = vmatprep.subr.bf16.mxu0 %v22677_v21 }
 0xc67   : > { %v16992_v53 = vpop.eup %16991 }
 0xc68   : > { %9258 = vadd.xlane.f32.xlu0 %v16992_v53  ;;  %v9282_v49 = vpop.permute.xlu1 %9281 }
 0xc69   : > { %14299 = vmatpush3.bf16.msra.mxu0 %v9282_v49 }
 0xc6a   : > { %14300 = vmatprep.subr.bf16.mxu0 %v22677_v21 }
 0xc6c   : > { %v9284_v46 = vpop.permute.xlu1 %9283 }
 0xc6d   : > { %14301 = vmatpush3.bf16.msra.mxu0 %v9284_v46 }
 0xc6e   : > { %14302 = vmatprep.subr.bf16.mxu0 %v22677_v21 }
 0xc70   : > { %v9288_v13 = vpop.permute.xlu1 %9287 }
 0xc7e   : > { %9285 = vrot.lane.b32.xlu0 %v20796_v12, %s17086_s17  ;;  %v22729_v12 = vld [vmem:[#allocation12_spill] sm:$0xff] }
 0xc7f   : > { %v9369_v36 = vsel %vm8331_vm0, %v22729_v12, 0 }
 0xcf5   : > { %v9259_v48 = vpop.xlane.xlu0 %9258 }
 0xcf6   : > { %16993 = vrcp.f32 %v9259_v48 }
 0xcf9   : > { %v9286_v24 = vpop.permute.xlu0 %9285 }
 0xcfa   : > { %14303 = vmatpush3.bf16.msra.mxu0 %v9286_v24 }
 0xcfb   : > { %14304 = vmatprep.subr.bf16.mxu0 %v22677_v21 }
 0xcfe   : > { %14305 = vmatpush3.bf16.msra.mxu0 %v9288_v13 }
 0xcff   : > { %14310 = vmatprep.subr.bf16.mxu0 %v22677_v21 }
 0xd00   : > { %v16994_v22 = vpop.eup %16993 }
 0xd01   : > { %v9261_v28 = vmul.f32 %v16994_v22, %v16992_v53 }
 0xd03   : > { %13528 = vst [vmem:[%s20904_s20 + $0x28] sm:$0xff] %v9261_v28  ;;  %v9264_v18 = vpack.c.bf16 %v9261_v28, %v9261_v28 }
 0xd05   : > { %14307 = vmatmul.mubr.bf16.vlgmr.msra.gmra.mrb[112].mxu0 %v9264_v18 }
 0xd06   : > { %14326 = vmatprep.mubr.msk.bf16.mxu0 %vm17088_vm1, %v22677_v21 }
 0xd07   : > { %14311 = vmatpush3.bf16.xpose.msra.mxu0 %v9366_v47 }
 0xd08   : > { %14312 = vmatprep.subr.bf16.mxu0 %v22677_v21 }
 0xd0f   : > { %14313 = vmatpush3.bf16.xpose.msra.mxu0 %v9369_v36  ;;  %v22736_v36 = vld [vmem:[#allocation45_spill] sm:$0xff] }
 0xd10   : > { %14314 = vmatprep.subr.bf16.mxu0 %v22677_v21 }
 0xd17   : > { %14315 = vmatpush3.bf16.xpose.msra.mxu0 %v9372_v4  ;;  %v22738_v4 = vld [vmem:[#allocation49_spill] sm:$0xff] }
 0xd18   : > { %14316 = vmatprep.subr.bf16.mxu0 %v22677_v21 }
 0xd1f   : > { %14317 = vmatpush3.bf16.xpose.msra.mxu0 %v9375_v32  ;;  %v22740_v32 = vld [vmem:[#allocation53_spill] sm:$0xff] }
 0xd20   : > { %14318 = vmatprep.subr.bf16.mxu0 %v22677_v21 }
 0xd27   : > { %14319 = vmatpush3.bf16.xpose.msra.mxu0 %v9378_v2 }
 0xd28   : > { %14320 = vmatprep.subr.bf16.mxu0 %v22677_v21 }
 0xd2f   : > { %14321 = vmatpush3.bf16.xpose.msra.mxu0 %v9381_v7 }
 0xd30   : > { %14322 = vmatprep.subr.bf16.mxu0 %v22677_v21 }
 0xd37   : > { %14323 = vmatpush3.bf16.xpose.msra.mxu0 %v9384_v61 }
 0xd38   : > { %14324 = vmatprep.subr.bf16.mxu0 %v22677_v21 }
 0xd3f   : > { %14325 = vmatpush3.bf16.xpose.msra.mxu0 %v9387_v56 }
 0xd40   : > { %14370 = vmatprep.subr.bf16.mxu0 %v22677_v21 }
 0xd46   : > { %14327 = vmatmul.mubr.msk.bf16.vlgmr.msra.gmra.mrb[116].mxu0 %vm8331_vm0, %v9345_v59 }
 0xd47   : > { %14386 = vmatprep.mubr.msk.bf16.mxu0 %vm17088_vm1, %v22677_v21 }
 0xdd8   : > { %v21250_v6 = vpop.f32.mrb[112].mxu0 }
 0xdd9   : > { %v14308_v38 = vpop.f32.mrb[113].mxu0 }
 0xdda   : > { %v9334_v25 = vpop.f32.mrb[114].mxu0 }
 0xddb   : > { %v14309_v20 = vpop.f32.mrb[115].mxu0 }
 0xe19   : > { %v9423_v37 = vpop.f32.mrb[116].mxu0 }
 0xe1a   : > { %v9424_v26 = vadd.f32 %v9423_v37, %v20819_v41  ;;  %v14328_v17 = vpop.f32.mrb[117].mxu0 }
 0xe1b   : > { %v9426_v3 = vpop.f32.mrb[118].mxu0 }
 0xe1c   : > { %9429 = vmax.xlane.f32.xlu1 %v9424_v26  ;;  %v14329_v11 = vpop.f32.mrb[119].mxu0 }
 0xe2d   : > { %9513 = vrot.lane.b32.xlu1 %v22728_v10, %s17086_s17 }
 0xe31   : > { %9517 = vrot.lane.b32.xlu1 %v22730_v62, %s17086_s17  ;;  %v22737_v62 = vld [vmem:[#allocation47_spill] sm:$0xff] }
 0xe35   : > { %9519 = vrot.lane.b32.xlu1 %v22731_v5, %s17086_s17  ;;  %v22739_v5 = vld [vmem:[#allocation51_spill] sm:$0xff] }
 0xe39   : > { %9521 = vrot.lane.b32.xlu1 %v22732_v52, %s17086_s17  ;;  %v22741_v52 = vld [vmem:[#allocation55_spill] sm:$0xff] }
 0xe3d   : > { %9523 = vrot.lane.b32.xlu1 %v22733_v16, %s17086_s17 }
 0xe41   : > { %9525 = vrot.lane.b32.xlu1 %v22734_v39, %s17086_s17 }
 0xe45   : > { %9503 = vrot.lane.b32.xlu1 %v16530_v34, %s17086_s17 }
 0xe49   : > { %9616 = vrot.lane.b32.xlu1 %v20750_v42, %s17086_s17 }
 0xe4d   : > { %9618 = vrot.lane.b32.xlu1 %v22721_v31, %s17086_s17 }
 0xe51   : > { %9622 = vrot.lane.b32.xlu1 %v22723_v40, %s17086_s17 }
 0xea9   : > { %v9430_v50 = vpop.xlane.xlu1 %9429 }
 0xeaa   : > { %v9431_v63 = vsub.f32 %v9424_v26, %v9430_v50 }
 0xeac   : > { %v9432_v9 = vmul.f32 1.442695, %v9431_v63 }
 0xead   : > { %v9514_v1 = vpop.permute.xlu1 %9513 }
 0xeae   : > { %16995 = vpow2.f32 %v9432_v9  ;;  %v9533_v46 = vsel %vm8331_vm0, %v9514_v1, 0  ;;  %v22742_v1 = vld [vmem:[#allocation14_spill] sm:$0xff] }
 0xeb1   : > { %v9518_v33 = vpop.permute.xlu1 %9517 }
 0xeb2   : > { %v9539_v13 = vsel %vm8331_vm0, %v9518_v33, 0  ;;  %v9709_v33 = vsel %vm8331_vm0, %v22742_v1, 0 }
 0xeb5   : > { %v9520_v19 = vpop.permute.xlu1 %9519 }
 0xeb6   : > { %v9542_v22 = vsel %vm8331_vm0, %v9520_v19, 0 }
 0xeb8   : > { %v16996_v57 = vpop.eup %16995 }
 0xeb9   : > { %9434 = vadd.xlane.f32.xlu0 %v16996_v57  ;;  %v9522_v29 = vpop.permute.xlu1 %9521 }
 0xeba   : > { %v9545_v28 = vsel %vm8331_vm0, %v9522_v29, 0 }
 0xebd   : > { %v9524_v30 = vpop.permute.xlu1 %9523 }
 0xebe   : > { %v9548_v18 = vsel %vm8331_vm0, %v9524_v30, 0  ;;  %v22745_v30 = vld [vmem:[#allocation28_spill] sm:$0xff] }
 0xec1   : > { %v9526_v27 = vpop.permute.xlu1 %9525 }
 0xec2   : > { %v9551_v10 = vsel %vm8331_vm0, %v9526_v27, 0  ;;  %v9718_v27 = vsel %vm8331_vm0, %v22745_v30, 0 }
 0xec5   : > { %v9504_v42 = vpop.permute.xlu1 %9503 }
 0xec9   : > { %v9617_v15 = vpop.permute.xlu1 %9616 }
 0xeca   : > { %14371 = vmatpush3.bf16.msra.mxu0 %v9617_v15 }
 0xecb   : > { %14372 = vmatprep.subr.bf16.mxu0 %v22677_v21 }
 0xecd   : > { %v9619_v31 = vpop.permute.xlu1 %9618 }
 0xece   : > { %14373 = vmatpush3.bf16.msra.mxu0 %v9619_v31  ;;  %v22747_v31 = vld [vmem:[#allocation39_spill] sm:$0xff] }
 0xecf   : > { %9515 = vrot.lane.b32.xlu0 %v22729_v12, %s17086_s17  ;;  %14374 = vmatprep.subr.bf16.mxu0 %v22677_v21 }
 0xed1   : > { %v9623_v3 = vpop.permute.xlu1 %9622 }
 0xed3   : > { %9527 = vrot.lane.b32.xlu0 %v22735_v0, %s17086_s17 }
 0xf46   : > { %v9435_v40 = vpop.xlane.xlu0 %9434 }
 0xf47   : > { %16997 = vrcp.f32 %v9435_v40  ;;  %v9724_v40 = vsel %vm8331_vm0, %v22747_v31, 0 }
 0xf4a   : > { %v9516_v48 = vpop.permute.xlu0 %9515 }
 0xf4b   : > { %v9536_v24 = vsel %vm8331_vm0, %v9516_v48, 0  ;;  %v9688_v48 = vld [vmem:[#allocation2 + $0x10] sm:$0xf] }
 0xf4e   : > { %v9528_v47 = vpop.permute.xlu0 %9527 }
 0xf4f   : > { %v9554_v12 = vsel %vm8331_vm0, %v9528_v47, 0 }
 0xf51   : > { %v16998_v51 = vpop.eup %16997 }
 0xf52   : > { %v9437_v53 = vmul.f32 %v16998_v51, %v16996_v57  ;;  %v22744_v57 = vld [vmem:[#allocation26_spill] sm:$0xff]  ;;  %v22748_v51 = vld [vmem:[#allocation19_spill] sm:$0xff] }
 0xf53   : > { %v9715_v29 = vsel %vm8331_vm0, %v22744_v57, 0 }
 0xf54   : > { %13531 = vst [vmem:[%s20904_s20 + $0x30] sm:$0xff] %v9437_v53  ;;  %v9440_v49 = vpack.c.bf16 %v9437_v53, %v9437_v53  ;;  %v9727_v53 = vsel %vm8331_vm0, %v22748_v51, 0 }
 0xf56   : > { %14347 = vmatmul.mubr.bf16.vlgmr.msra.gmra.mrb[140].mxu1 %v9440_v49  ;;  %v22749_v49 = vld [vmem:[#allocation21_spill] sm:$0xff] }
 0xf57   : > { %14351 = vmatpush3.bf16.xpose.msra.mxu1 %v9533_v46  ;;  %14366 = vmatprep.mubr.msk.bf16.mxu1 %vm17088_vm1, %v22677_v21  ;;  %v9730_v46 = vsel %vm8331_vm0, %v22749_v49, 0 }
 0xf58   : > { %14352 = vmatprep.subr.bf16.mxu1 %v22677_v21 }
 0xf5f   : > { %14353 = vmatpush3.bf16.xpose.msra.mxu1 %v9536_v24 }
 0xf60   : > { %14354 = vmatprep.subr.bf16.mxu1 %v22677_v21 }
 0xf67   : > { %14355 = vmatpush3.bf16.xpose.msra.mxu1 %v9539_v13 }
 0xf68   : > { %14356 = vmatprep.subr.bf16.mxu1 %v22677_v21 }
 0xf6f   : > { %14357 = vmatpush3.bf16.xpose.msra.mxu1 %v9542_v22 }
 0xf70   : > { %14358 = vmatprep.subr.bf16.mxu1 %v22677_v21 }
 0xf77   : > { %14359 = vmatpush3.bf16.xpose.msra.mxu1 %v9545_v28 }
 0xf78   : > { %14360 = vmatprep.subr.bf16.mxu1 %v22677_v21 }
 0xf7f   : > { %14361 = vmatpush3.bf16.xpose.msra.mxu1 %v9548_v18 }
 0xf80   : > { %14362 = vmatprep.subr.bf16.mxu1 %v22677_v21 }
 0xf87   : > { %14363 = vmatpush3.bf16.xpose.msra.mxu1 %v9551_v10 }
 0xf88   : > { %14364 = vmatprep.subr.bf16.mxu1 %v22677_v21 }
 0xf8f   : > { %14365 = vmatpush3.bf16.xpose.msra.mxu1 %v9554_v12 }
 0xf90   : > { %14410 = vmatprep.subr.bf16.mxu1 %v22677_v21 }
 0xf96   : > { %14367 = vmatmul.mubr.msk.bf16.vlgmr.msra.gmra.mrb[144].mxu1 %vm8331_vm0, %v9504_v42  ;;  %v22746_v42 = vld [vmem:[#allocation30_spill] sm:$0xff] }
 0xf97   : > { %14411 = vmatpush3.bf16.msra.mxu1 %v22736_v36  ;;  %14426 = vmatprep.mubr.msk.bf16.mxu1 %vm17088_vm1, %v22677_v21  ;;  %v9721_v15 = vsel %vm8331_vm0, %v22746_v42, 0 }
 0xf98   : > { %14412 = vmatprep.subr.bf16.mxu1 %v22677_v21 }
 0xf9b   : > { %14413 = vmatpush3.bf16.msra.mxu1 %v22737_v62 }
 0xf9c   : > { %14414 = vmatprep.subr.bf16.mxu1 %v22677_v21 }
 0xf9f   : > { %14415 = vmatpush3.bf16.msra.mxu1 %v22738_v4 }
 0xfa0   : > { %14416 = vmatprep.subr.bf16.mxu1 %v22677_v21 }
 0xfa3   : > { %14417 = vmatpush3.bf16.msra.mxu1 %v22739_v5 }
 0xfa4   : > { %14418 = vmatprep.subr.bf16.mxu1 %v22677_v21 }
 0xfa7   : > { %14419 = vmatpush3.bf16.msra.mxu1 %v22740_v32 }
 0xfa8   : > { %14420 = vmatprep.subr.bf16.mxu1 %v22677_v21 }
 0xfab   : > { %14421 = vmatpush3.bf16.msra.mxu1 %v22741_v52 }
 0xfac   : > { %14422 = vmatprep.subr.bf16.mxu1 %v22677_v21 }
 0xfaf   : > { %14423 = vmatpush3.bf16.msra.mxu1 %v20875_v55 }
 0xfb0   : > { %14424 = vmatprep.subr.bf16.mxu1 %v22677_v21 }
 0xfb3   : > { %14425 = vmatpush3.bf16.msra.mxu1 %v20883_v45 }
 0xfb4   : > { %14430 = vmatprep.subr.bf16.mxu1 %v22677_v21 }
0x1029   : > { %v9475_v2 = vpop.f32.mrb[140].mxu1 }
0x102a   : > { %v9481_v16 = vpack.c.bf16 %v9475_v2, %v9475_v2  ;;  %v14348_v7 = vpop.f32.mrb[141].mxu1 }
0x102b   : > { %v9478_v39 = vpop.f32.mrb[142].mxu1 }
0x102c   : > { %9482 = vst.msk [vmem:[#allocation4 + $0xc] sm:$0xf] %vm8451_vm3, %v9481_v16  ;;  %v14349_v61 = vpop.f32.mrb[143].mxu1  ;;  %v16531_v16 = vld [vmem:[#allocation2 + $0x10] ss:$0 sps:$4 sm:$0xff]  }
0x1069   : > { %v9590_v0 = vpop.f32.mrb[144].mxu1 }
0x106a   : > { %v9591_v56 = vadd.f32 %v9590_v0, %v20819_v41  ;;  %v14368_v59 = vpop.f32.mrb[145].mxu1 }
0x106b   : > { %v9593_v38 = vpop.f32.mrb[146].mxu1 }
0x106c   : > { %9596 = vmax.xlane.f32.xlu0 %v9591_v56  ;;  %v14369_v25 = vpop.f32.mrb[147].mxu1 }
0x1082   : > { %9620 = vrot.lane.b32.xlu0 %v22722_v35, %s17086_s17 }
0x1086   : > { %9624 = vrot.lane.b32.xlu0 %v22724_v58, %s17086_s17 }
0x108a   : > { %9626 = vrot.lane.b32.xlu0 %v22725_v54, %s17086_s17 }
0x108e   : > { %9628 = vrot.lane.b32.xlu0 %v22726_v23, %s17086_s17 }
0x10f9   : > { %v9597_v20 = vpop.xlane.xlu0 %9596 }
0x10fa   : > { %v9598_v37 = vsub.f32 %v9591_v56, %v9597_v20 }
0x10fc   : > { %v9599_v26 = vmul.f32 1.442695, %v9598_v37 }
0x10fd   : > { %v9621_v17 = vpop.permute.xlu0 %9620 }
0x10fe   : > { %16999 = vpow2.f32 %v9599_v26  ;;  %14375 = vmatpush3.bf16.msra.mxu0 %v9621_v17 }
0x10ff   : > { %14376 = vmatprep.subr.bf16.mxu0 %v22677_v21 }
0x1101   : > { %v9625_v11 = vpop.permute.xlu0 %9624 }
0x1102   : > { %14377 = vmatpush3.bf16.msra.mxu0 %v9623_v3 }
0x1103   : > { %14378 = vmatprep.subr.bf16.mxu0 %v22677_v21 }
0x1105   : > { %v9627_v35 = vpop.permute.xlu0 %9626 }
0x1106   : > { %14379 = vmatpush3.bf16.msra.mxu0 %v9625_v11 }
0x1107   : > { %14380 = vmatprep.subr.bf16.mxu0 %v22677_v21 }
0x1108   : > { %v17000_v58 = vpop.eup %16999 }
0x1109   : > { %9601 = vadd.xlane.f32.xlu1 %v17000_v58  ;;  %v9629_v54 = vpop.permute.xlu0 %9628 }
0x110a   : > { %14381 = vmatpush3.bf16.msra.mxu0 %v9627_v35 }
0x110b   : > { %14382 = vmatprep.subr.bf16.mxu0 %v22677_v21 }
0x110e   : > { %14383 = vmatpush3.bf16.msra.mxu0 %v9629_v54 }
0x110f   : > { %14384 = vmatprep.subr.bf16.mxu0 %v22677_v21 }
0x111a   : > { %9630 = vrot.lane.b32.xlu1 %v22727_v60, %s17086_s17  ;;  %v22743_v60 = vld [vmem:[#allocation20_spill] sm:$0xff] }
0x111b   : > { %v9712_v19 = vsel %vm8331_vm0, %v22743_v60, 0 }
0x1196   : > { %v9602_v23 = vpop.xlane.xlu1 %9601 }
0x1197   : > { %17001 = vrcp.f32 %v9602_v23 }
0x119a   : > { %v9631_v34 = vpop.permute.xlu1 %9630 }
0x119b   : > { %14385 = vmatpush3.bf16.msra.mxu0 %v9631_v34 }
0x119c   : > { %14390 = vmatprep.subr.bf16.mxu0 %v22677_v21 }
0x11a1   : > { %v17002_v50 = vpop.eup %17001 }
0x11a2   : > { %v9604_v63 = vmul.f32 %v17002_v50, %v17000_v58 }
0x11a4   : > { %13534 = vst [vmem:[%s20904_s20 + $0x38] sm:$0xff] %v9604_v63  ;;  %v9607_v9 = vpack.c.bf16 %v9604_v63, %v9604_v63 }
0x11a6   : > { %14387 = vmatmul.mubr.bf16.vlgmr.msra.gmra.mrb[120].mxu0 %v9607_v9 }
0x11a7   : > { %14391 = vmatpush3.bf16.xpose.msra.mxu0 %v9709_v33  ;;  %14406 = vmatprep.mubr.msk.bf16.mxu0 %vm17088_vm1, %v22677_v21 }
0x11a8   : > { %14392 = vmatprep.subr.bf16.mxu0 %v22677_v21 }
0x11af   : > { %14393 = vmatpush3.bf16.xpose.msra.mxu0 %v9712_v19  ;;  %v22751_v19 = vld [vmem:[#allocation48_spill] sm:$0xff] }
0x11b0   : > { %14394 = vmatprep.subr.bf16.mxu0 %v22677_v21 }
0x11b7   : > { %14395 = vmatpush3.bf16.xpose.msra.mxu0 %v9715_v29  ;;  %v22753_v29 = vld [vmem:[#allocation52_spill] sm:$0xff] }
0x11b8   : > { %14396 = vmatprep.subr.bf16.mxu0 %v22677_v21 }
0x11bf   : > { %14397 = vmatpush3.bf16.xpose.msra.mxu0 %v9718_v27  ;;  %v22755_v27 = vld [vmem:[#allocation56_spill] sm:$0xff] }
0x11c0   : > { %14398 = vmatprep.subr.bf16.mxu0 %v22677_v21 }
0x11c7   : > { %14399 = vmatpush3.bf16.xpose.msra.mxu0 %v9721_v15 }
0x11c8   : > { %14400 = vmatprep.subr.bf16.mxu0 %v22677_v21 }
0x11cf   : > { %14401 = vmatpush3.bf16.xpose.msra.mxu0 %v9724_v40 }
0x11d0   : > { %14402 = vmatprep.subr.bf16.mxu0 %v22677_v21 }
0x11d7   : > { %14403 = vmatpush3.bf16.xpose.msra.mxu0 %v9727_v53 }
0x11d8   : > { %14404 = vmatprep.subr.bf16.mxu0 %v22677_v21 }
0x11df   : > { %14405 = vmatpush3.bf16.xpose.msra.mxu0 %v9730_v46 }
0x11e0   : > { %14450 = vmatprep.subr.bf16.mxu0 %v22677_v21 }
0x11e6   : > { %14407 = vmatmul.mubr.msk.bf16.vlgmr.msra.gmra.mrb[124].mxu0 %vm8331_vm0, %v9688_v48 }
0x11e7   : > { %14466 = vmatprep.mubr.msk.bf16.mxu0 %vm17088_vm1, %v22677_v21 }
0x1279   : > { %v21364_v24 = vpop.f32.mrb[120].mxu0 }
0x127a   : > { %v14388_v13 = vpop.f32.mrb[121].mxu0 }
0x127b   : > { %v9677_v22 = vpop.f32.mrb[122].mxu0 }
0x127c   : > { %v14389_v28 = vpop.f32.mrb[123].mxu0 }
0x12b9   : > { %v9766_v18 = vpop.f32.mrb[124].mxu0 }
0x12ba   : > { %v9767_v10 = vadd.f32 %v9766_v18, %v20819_v41  ;;  %v14408_v47 = vpop.f32.mrb[125].mxu0 }
0x12bb   : > { %v9769_v12 = vpop.f32.mrb[126].mxu0 }
0x12bc   : > { %9772 = vmax.xlane.f32.xlu0 %v9767_v10  ;;  %v14409_v2 = vpop.f32.mrb[127].mxu0 }
0x12d2   : > { %9856 = vrot.lane.b32.xlu0 %v22742_v1, %s17086_s17 }
0x12d6   : > { %9860 = vrot.lane.b32.xlu0 %v22744_v57, %s17086_s17  ;;  %v22752_v57 = vld [vmem:[#allocation50_spill] sm:$0xff] }
0x12da   : > { %9864 = vrot.lane.b32.xlu0 %v22746_v42, %s17086_s17 }
0x12de   : > { %9868 = vrot.lane.b32.xlu0 %v22748_v51, %s17086_s17 }
0x12e2   : > { %9846 = vrot.lane.b32.xlu0 %v16531_v16, %s17086_s17 }
0x12e6   : > { %9959 = vrot.lane.b32.xlu0 %v22736_v36, %s17086_s17 }
0x12ea   : > { %9961 = vrot.lane.b32.xlu0 %v22737_v62, %s17086_s17 }
0x12ee   : > { %9965 = vrot.lane.b32.xlu0 %v22739_v5, %s17086_s17 }
0x1349   : > { %v9773_v7 = vpop.xlane.xlu0 %9772 }
0x134a   : > { %v9774_v39 = vsub.f32 %v9767_v10, %v9773_v7 }
0x134c   : > { %v9775_v61 = vmul.f32 1.442695, %v9774_v39 }
0x134d   : > { %v9857_v0 = vpop.permute.xlu0 %9856 }
0x134e   : > { %17003 = vpow2.f32 %v9775_v61  ;;  %v9876_v3 = vsel %vm8331_vm0, %v9857_v0, 0  ;;  %v22756_v61 = vld [vmem:[#allocation18_spill] sm:$0xff] }
0x134f   : > { %v10052_v0 = vsel %vm8331_vm0, %v22756_v61, 0 }
0x1351   : > { %v9861_v56 = vpop.permute.xlu0 %9860 }
0x1352   : > { %v9882_v58 = vsel %vm8331_vm0, %v9861_v56, 0 }
0x1355   : > { %v9865_v59 = vpop.permute.xlu0 %9864 }
0x1356   : > { %v9888_v34 = vsel %vm8331_vm0, %v9865_v59, 0  ;;  %v22758_v59 = vld [vmem:[#allocation34_spill] sm:$0xff] }
0x1358   : > { %v17004_v38 = vpop.eup %17003 }
0x1359   : > { %9777 = vadd.xlane.f32.xlu1 %v17004_v38  ;;  %v9869_v25 = vpop.permute.xlu0 %9868 }
0x135a   : > { %v9894_v9 = vsel %vm8331_vm0, %v9869_v25, 0  ;;  %v22759_v25 = vld [vmem:[#allocation36_spill] sm:$0xff] }
0x135d   : > { %v9847_v20 = vpop.permute.xlu0 %9846 }
0x1361   : > { %v9960_v37 = vpop.permute.xlu0 %9959 }
0x1362   : > { %14451 = vmatpush3.bf16.msra.mxu0 %v9960_v37  ;;  %v22760_v37 = vld [vmem:[#allocation38_spill] sm:$0xff] }
0x1363   : > { %14452 = vmatprep.subr.bf16.mxu0 %v22677_v21 }
0x1365   : > { %v9962_v36 = vpop.permute.xlu0 %9961 }
0x1366   : > { %14453 = vmatpush3.bf16.msra.mxu0 %v9962_v36  ;;  %v10064_v36 = vsel %vm8331_vm0, %v22760_v37, 0 }
0x1367   : > { %14454 = vmatprep.subr.bf16.mxu0 %v22677_v21 }
0x1369   : > { %v9966_v47 = vpop.permute.xlu0 %9965 }
0x136a   : > { %9858 = vrot.lane.b32.xlu1 %v22743_v60, %s17086_s17  ;;  %v22750_v60 = vld [vmem:[#allocation46_spill] sm:$0xff] }
0x136e   : > { %9862 = vrot.lane.b32.xlu1 %v22745_v30, %s17086_s17  ;;  %v22754_v30 = vld [vmem:[#allocation54_spill] sm:$0xff] }
0x1372   : > { %9866 = vrot.lane.b32.xlu1 %v22747_v31, %s17086_s17 }
0x1376   : > { %9870 = vrot.lane.b32.xlu1 %v22749_v49, %s17086_s17 }
0x13e6   : > { %v9778_v62 = vpop.xlane.xlu1 %9777 }
0x13e7   : > { %17005 = vrcp.f32 %v9778_v62  ;;  %v22761_v62 = vld [vmem:[#allocation40_spill] sm:$0xff] }
0x13ea   : > { %v9859_v11 = vpop.permute.xlu1 %9858 }
0x13eb   : > { %v9879_v35 = vsel %vm8331_vm0, %v9859_v11, 0 }
0x13ee   : > { %v9863_v54 = vpop.permute.xlu1 %9862 }
0x13ef   : > { %v9885_v23 = vsel %vm8331_vm0, %v9863_v54, 0 }
0x13f1   : > { %v17006_v5 = vpop.eup %17005 }
0x13f2   : > { %v9780_v26 = vmul.f32 %v17006_v5, %v17004_v38  ;;  %v9867_v50 = vpop.permute.xlu1 %9866  ;;  %v10058_v38 = vsel %vm8331_vm0, %v22758_v59, 0  ;;  %v10067_v5 = vsel %vm8331_vm0, %v22761_v62, 0 }
0x13f3   : > { %v9891_v63 = vsel %vm8331_vm0, %v9867_v50, 0 }
0x13f4   : > { %13537 = vst [vmem:[%s20904_s20 + $0x40] sm:$0xff] %v9780_v26  ;;  %v9783_v17 = vpack.c.bf16 %v9780_v26, %v9780_v26  ;;  %v22762_v26 = vld [vmem:[#allocation41_spill] sm:$0xff] }
0x13f6   : > { %14427 = vmatmul.mubr.bf16.vlgmr.msra.gmra.mrb[148].mxu1 %v9783_v17  ;;  %v9871_v1 = vpop.permute.xlu1 %9870  ;;  %v10070_v17 = vsel %vm8331_vm0, %v22762_v26, 0 }
0x13f7   : > { %14431 = vmatpush3.bf16.xpose.msra.mxu1 %v9876_v3  ;;  %14446 = vmatprep.mubr.msk.bf16.mxu1 %vm17088_vm1, %v22677_v21  ;;  %v9897_v33 = vsel %vm8331_vm0, %v9871_v1, 0  ;;  %v22763_v3 = vld [vmem:[#allocation42_spill] sm:$0xff] }
0x13f8   : > { %14432 = vmatprep.subr.bf16.mxu1 %v22677_v21  ;;  %v10073_v11 = vsel %vm8331_vm0, %v22763_v3, 0 }
0x13ff   : > { %14433 = vmatpush3.bf16.xpose.msra.mxu1 %v9879_v35  ;;  %v10031_v35 = vld [vmem:[#allocation2 + $0x14] sm:$0xf] }
0x1400   : > { %14434 = vmatprep.subr.bf16.mxu1 %v22677_v21 }
0x1407   : > { %14435 = vmatpush3.bf16.xpose.msra.mxu1 %v9882_v58 }
0x1408   : > { %14436 = vmatprep.subr.bf16.mxu1 %v22677_v21 }
0x140f   : > { %14437 = vmatpush3.bf16.xpose.msra.mxu1 %v9885_v23 }
0x1410   : > { %14438 = vmatprep.subr.bf16.mxu1 %v22677_v21 }
0x1417   : > { %14439 = vmatpush3.bf16.xpose.msra.mxu1 %v9888_v34 }
0x1418   : > { %14440 = vmatprep.subr.bf16.mxu1 %v22677_v21 }
0x141f   : > { %14441 = vmatpush3.bf16.xpose.msra.mxu1 %v9891_v63 }
0x1420   : > { %14442 = vmatprep.subr.bf16.mxu1 %v22677_v21 }
0x1427   : > { %14443 = vmatpush3.bf16.xpose.msra.mxu1 %v9894_v9 }
0x1428   : > { %14444 = vmatprep.subr.bf16.mxu1 %v22677_v21 }
0x142f   : > { %14445 = vmatpush3.bf16.xpose.msra.mxu1 %v9897_v33 }
0x1430   : > { %14490 = vmatprep.subr.bf16.mxu1 %v22677_v21 }
0x1436   : > { %14447 = vmatmul.mubr.msk.bf16.vlgmr.msra.gmra.mrb[152].mxu1 %vm8331_vm0, %v9847_v20  ;;  %v10061_v20 = vsel %vm8331_vm0, %v22759_v25, 0 }
0x1437   : > { %14491 = vmatpush3.bf16.msra.mxu1 %v22750_v60  ;;  %14506 = vmatprep.mubr.msk.bf16.mxu1 %vm17088_vm1, %v22677_v21 }
0x1438   : > { %14492 = vmatprep.subr.bf16.mxu1 %v22677_v21 }
0x143b   : > { %14493 = vmatpush3.bf16.msra.mxu1 %v22751_v19 }
0x143c   : > { %14494 = vmatprep.subr.bf16.mxu1 %v22677_v21 }
0x143f   : > { %14495 = vmatpush3.bf16.msra.mxu1 %v22752_v57 }
0x1440   : > { %14496 = vmatprep.subr.bf16.mxu1 %v22677_v21 }
0x1443   : > { %14497 = vmatpush3.bf16.msra.mxu1 %v22753_v29 }
0x1444   : > { %14498 = vmatprep.subr.bf16.mxu1 %v22677_v21 }
0x1447   : > { %14499 = vmatpush3.bf16.msra.mxu1 %v22754_v30 }
0x1448   : > { %14500 = vmatprep.subr.bf16.mxu1 %v22677_v21 }
0x144b   : > { %14501 = vmatpush3.bf16.msra.mxu1 %v22755_v27 }
0x144c   : > { %14502 = vmatprep.subr.bf16.mxu1 %v22677_v21 }
0x144f   : > { %14503 = vmatpush3.bf16.msra.mxu1 %v20877_v44 }
0x1450   : > { %14504 = vmatprep.subr.bf16.mxu1 %v22677_v21 }
0x1453   : > { %14505 = vmatpush3.bf16.msra.mxu1 %v20885_v8 }
0x1454   : > { %14510 = vmatprep.subr.bf16.mxu1 %v22677_v21 }
0x14c9   : > { %v9818_v42 = vpop.f32.mrb[148].mxu1 }
0x14ca   : > { %v9824_v15 = vpack.c.bf16 %v9818_v42, %v9818_v42  ;;  %v14428_v31 = vpop.f32.mrb[149].mxu1  ;;  %v16532_v42 = vld [vmem:[#allocation2 + $0x14] ss:$0 sps:$4 sm:$0xff]  }
0x14cb   : > { %v9821_v40 = vpop.f32.mrb[150].mxu1 }
0x14cc   : > { %9825 = vst.msk [vmem:[#allocation4 + $0x10] sm:$0xf] %vm8451_vm3, %v9824_v15  ;;  %v14429_v51 = vpop.f32.mrb[151].mxu1 }
0x1509   : > { %v9933_v53 = vpop.f32.mrb[152].mxu1 }
0x150a   : > { %v9934_v49 = vadd.f32 %v9933_v53, %v20819_v41  ;;  %v14448_v46 = vpop.f32.mrb[153].mxu1 }
0x150b   : > { %v9936_v48 = vpop.f32.mrb[154].mxu1 }
0x150c   : > { %9939 = vmax.xlane.f32.xlu1 %v9934_v49  ;;  %v14449_v13 = vpop.f32.mrb[155].mxu1 }
0x151d   : > { %9963 = vrot.lane.b32.xlu1 %v22738_v4, %s17086_s17 }
0x1521   : > { %9967 = vrot.lane.b32.xlu1 %v22740_v32, %s17086_s17 }
0x1525   : > { %9969 = vrot.lane.b32.xlu1 %v22741_v52, %s17086_s17 }
0x1529   : > { %9971 = vrot.lane.b32.xlu1 %v20875_v55, %s17086_s17 }
0x1599   : > { %v9940_v22 = vpop.xlane.xlu1 %9939 }
0x159a   : > { %v9941_v28 = vsub.f32 %v9934_v49, %v9940_v22 }
0x159c   : > { %v9942_v18 = vmul.f32 1.442695, %v9941_v28 }
0x159d   : > { %v9964_v10 = vpop.permute.xlu1 %9963 }
0x159e   : > { %17007 = vpow2.f32 %v9942_v18  ;;  %14455 = vmatpush3.bf16.msra.mxu0 %v9964_v10 }
0x159f   : > { %14456 = vmatprep.subr.bf16.mxu0 %v22677_v21 }
0x15a1   : > { %v9968_v12 = vpop.permute.xlu1 %9967 }
0x15a2   : > { %14457 = vmatpush3.bf16.msra.mxu0 %v9966_v47 }
0x15a3   : > { %14458 = vmatprep.subr.bf16.mxu0 %v22677_v21 }
0x15a5   : > { %v9970_v4 = vpop.permute.xlu1 %9969 }
0x15a6   : > { %14459 = vmatpush3.bf16.msra.mxu0 %v9968_v12 }
0x15a7   : > { %14460 = vmatprep.subr.bf16.mxu0 %v22677_v21 }
0x15a8   : > { %v17008_v32 = vpop.eup %17007 }
0x15a9   : > { %9944 = vadd.xlane.f32.xlu0 %v17008_v32  ;;  %v9972_v55 = vpop.permute.xlu1 %9971 }
0x15aa   : > { %14461 = vmatpush3.bf16.msra.mxu0 %v9970_v4 }
0x15ab   : > { %14462 = vmatprep.subr.bf16.mxu0 %v22677_v21 }
0x15ae   : > { %14463 = vmatpush3.bf16.msra.mxu0 %v9972_v55 }
0x15af   : > { %14464 = vmatprep.subr.bf16.mxu0 %v22677_v21 }
0x15bf   : > { %9973 = vrot.lane.b32.xlu0 %v20883_v45, %s17086_s17  ;;  %v22757_v45 = vld [vmem:[#allocation22_spill] sm:$0xff] }
0x15c0   : > { %v10055_v56 = vsel %vm8331_vm0, %v22757_v45, 0 }
0x1636   : > { %v9945_v52 = vpop.xlane.xlu0 %9944 }
0x1637   : > { %17009 = vrcp.f32 %v9945_v52 }
0x163a   : > { %v9974_v2 = vpop.permute.xlu0 %9973 }
0x163b   : > { %14465 = vmatpush3.bf16.msra.mxu0 %v9974_v2 }
0x163c   : > { %14470 = vmatprep.subr.bf16.mxu0 %v22677_v21 }
0x1641   : > { %v17010_v16 = vpop.eup %17009 }
0x1642   : > { %v9947_v7 = vmul.f32 %v17010_v16, %v17008_v32 }
0x1644   : > { %13540 = vst [vmem:[%s20904_s20 + $0x48] sm:$0xff] %v9947_v7  ;;  %v9950_v39 = vpack.c.bf16 %v9947_v7, %v9947_v7 }
0x1646   : > { %14467 = vmatmul.mubr.bf16.vlgmr.msra.gmra.mrb[128].mxu0 %v9950_v39 }
0x1647   : > { %14471 = vmatpush3.bf16.xpose.msra.mxu0 %v10052_v0  ;;  %14486 = vmatprep.mubr.msk.bf16.mxu0 %vm17088_vm1, %v22677_v21 }
0x1648   : > { %14472 = vmatprep.subr.bf16.mxu0 %v22677_v21 }
0x164f   : > { %14473 = vmatpush3.bf16.xpose.msra.mxu0 %v10055_v56 }
0x1650   : > { %14474 = vmatprep.subr.bf16.mxu0 %v22677_v21 }
0x1657   : > { %14475 = vmatpush3.bf16.xpose.msra.mxu0 %v10058_v38 }
0x1658   : > { %14476 = vmatprep.subr.bf16.mxu0 %v22677_v21 }
0x165f   : > { %14477 = vmatpush3.bf16.xpose.msra.mxu0 %v10061_v20 }
0x1660   : > { %14478 = vmatprep.subr.bf16.mxu0 %v22677_v21 }
0x1667   : > { %14479 = vmatpush3.bf16.xpose.msra.mxu0 %v10064_v36 }
0x1668   : > { %14480 = vmatprep.subr.bf16.mxu0 %v22677_v21 }
0x166f   : > { %14481 = vmatpush3.bf16.xpose.msra.mxu0 %v10067_v5  ;;  %v16539_v5 = vld [vmem:[%s22532_s3 + $0x68] ss:$24 sps:$4 sm:$0xff]  }
0x1670   : > { %14482 = vmatprep.subr.bf16.mxu0 %v22677_v21 }
0x1677   : > { %14483 = vmatpush3.bf16.xpose.msra.mxu0 %v10070_v17  ;;  %v16542_v17 = vld [vmem:[%s22532_s3 + $0x98] ss:$24 sps:$4 sm:$0xff]  }
0x1678   : > { %14484 = vmatprep.subr.bf16.mxu0 %v22677_v21 }
0x167f   : > { %14485 = vmatpush3.bf16.xpose.msra.mxu0 %v10073_v11  ;;  %v16545_v11 = vld [vmem:[%s22532_s3 + $0xc8] ss:$24 sps:$4 sm:$0xff]  }
0x1680   : > { %14530 = vmatprep.subr.bf16.mxu0 %v22677_v21 }
0x1686   : > { %14487 = vmatmul.mubr.msk.bf16.vlgmr.msra.gmra.mrb[132].mxu0 %vm8331_vm0, %v10031_v35  ;;  %v16550_v35 = vld [vmem:[%s22532_s3 + $0xfc] ss:$24 sps:$4 sm:$0xff]  }
0x1687   : > { %14546 = vmatprep.mubr.msk.bf16.mxu0 %vm17088_vm1, %v22677_v21 }
0x1719   : > { %v21478_v58 = vpop.f32.mrb[128].mxu0 }
0x171a   : > { %v14468_v54 = vpop.f32.mrb[129].mxu0 }
0x171b   : > { %v10020_v23 = vpop.f32.mrb[130].mxu0  ;;  %v16553_v54 = vld [vmem:[%s22532_s3 + $0x12c] ss:$24 sps:$4 sm:$0xff]  }
0x171c   : > { %v14469_v34 = vpop.f32.mrb[131].mxu0  ;;  %v16551_v23 = vld [vmem:[%s22532_s3 + $0x128] ss:$24 sps:$4 sm:$0xff]  }
0x171d   : > { %v16556_v34 = vld [vmem:[%s22532_s3 + $0x15c] ss:$24 sps:$4 sm:$0xff]  }
0x1759   : > { %v10109_v50 = vpop.f32.mrb[132].mxu0 }
0x175a   : > { %v10110_v63 = vadd.f32 %v10109_v50, %v20819_v41  ;;  %v14488_v9 = vpop.f32.mrb[133].mxu0  ;;  %v16554_v50 = vld [vmem:[%s22532_s3 + $0x158] ss:$24 sps:$4 sm:$0xff]  }
0x175b   : > { %v10112_v1 = vpop.f32.mrb[134].mxu0  ;;  %v16557_v9 = vld [vmem:[%s22532_s3 + $0x188] ss:$24 sps:$4 sm:$0xff]  }
0x175c   : > { %10115 = vmax.xlane.f32.xlu1 %v10110_v63  ;;  %v14489_v33 = vpop.f32.mrb[135].mxu0  ;;  %v16562_v1 = vld [vmem:[%s22532_s3 + $0x1bc] ss:$24 sps:$4 sm:$0xff]  }
0x175d   : > { %v16560_v33 = vld [vmem:[%s22532_s3 + $0x1b8] ss:$24 sps:$4 sm:$0xff]  }
0x176d   : > { %10201 = vrot.lane.b32.xlu1 %v22757_v45, %s17086_s17 }
0x1771   : > { %10203 = vrot.lane.b32.xlu1 %v22758_v59, %s17086_s17 }
0x1775   : > { %10207 = vrot.lane.b32.xlu1 %v22760_v37, %s17086_s17 }
0x1779   : > { %10211 = vrot.lane.b32.xlu1 %v22762_v26, %s17086_s17  ;;  %v16544_v26 = vld [vmem:[%s22532_s3 + $0x9c] ss:$24 sps:$4 sm:$0xff]  }
0x177d   : > { %10189 = vrot.lane.b32.xlu1 %v16532_v42, %s17086_s17  ;;  %v16565_v42 = vld [vmem:[%s22532_s3 + $0x1ec] ss:$24 sps:$4 sm:$0xff]  }
0x1781   : > { %10302 = vrot.lane.b32.xlu1 %v22750_v60, %s17086_s17 }
0x1785   : > { %10306 = vrot.lane.b32.xlu1 %v22752_v57, %s17086_s17 }
0x1789   : > { %10312 = vrot.lane.b32.xlu1 %v22755_v27, %s17086_s17 }
0x17e9   : > { %v10116_v15 = vpop.xlane.xlu1 %10115 }
0x17ea   : > { %v10117_v31 = vsub.f32 %v10110_v63, %v10116_v15  ;;  %v16559_v63 = vld [vmem:[%s22532_s3 + $0x18c] ss:$24 sps:$4 sm:$0xff]   ;;  %v16563_v15 = vld [vmem:[%s22532_s3 + $0x1e8] ss:$24 sps:$4 sm:$0xff]  }
0x17ec   : > { %v10118_v40 = vmul.f32 1.442695, %v10117_v31  ;;  %v16568_v31 = vld [vmem:[%s22532_s3 + $0x21c] ss:$24 sps:$4 sm:$0xff]  }
0x17ed   : > { %v10202_v51 = vpop.permute.xlu1 %10201 }
0x17ee   : > { %17011 = vpow2.f32 %v10118_v40  ;;  %v10222_v47 = vsel %vm8331_vm0, %v10202_v51, 0  ;;  %v16566_v40 = vld [vmem:[%s22532_s3 + $0x218] ss:$24 sps:$4 sm:$0xff]  }
0x17f1   : > { %v10204_v53 = vpop.permute.xlu1 %10203 }
0x17f2   : > { %v10225_v12 = vsel %vm8331_vm0, %v10204_v53, 0 }
0x17f5   : > { %v10208_v49 = vpop.permute.xlu1 %10207 }
0x17f6   : > { %v10231_v55 = vsel %vm8331_vm0, %v10208_v49, 0 }
0x17f8   : > { %v17012_v46 = vpop.eup %17011 }
0x17f9   : > { %10120 = vadd.xlane.f32.xlu0 %v17012_v46  ;;  %v10212_v48 = vpop.permute.xlu1 %10211 }
0x17fa   : > { %v10237_v16 = vsel %vm8331_vm0, %v10212_v48, 0 }
0x17fd   : > { %v10190_v13 = vpop.permute.xlu1 %10189 }
0x1801   : > { %v10303_v22 = vpop.permute.xlu1 %10302 }
0x1802   : > { %14531 = vmatpush3.bf16.msra.mxu0 %v10303_v22 }
0x1803   : > { %14532 = vmatprep.subr.bf16.mxu0 %v22677_v21 }
0x1805   : > { %v10307_v48 = vpop.permute.xlu1 %10306 }
0x180f   : > { %10199 = vrot.lane.b32.xlu0 %v22756_v61, %s17086_s17 }
0x1813   : > { %10205 = vrot.lane.b32.xlu0 %v22759_v25, %s17086_s17 }
0x1817   : > { %10209 = vrot.lane.b32.xlu0 %v22761_v62, %s17086_s17  ;;  %v13850_v62 = vpack.c.bf16 %v21250_v6, %v21250_v6  ;;  %v16536_v6 = vld [vmem:[%s22532_s3 + $0x38] ss:$24 sps:$4 sm:$0xff]  }
0x181b   : > { %10213 = vrot.lane.b32.xlu0 %v22763_v3, %s17086_s17  ;;  %v16547_v3 = vld [vmem:[%s22532_s3 + $0xcc] ss:$24 sps:$4 sm:$0xff]  }
0x1886   : > { %v10121_v60 = vpop.xlane.xlu0 %10120 }
0x1887   : > { %17013 = vrcp.f32 %v10121_v60 }
0x188a   : > { %v10200_v28 = vpop.permute.xlu0 %10199 }
0x188b   : > { %v10219_v10 = vsel %vm8331_vm0, %v10200_v28, 0 }
0x188e   : > { %v10206_v4 = vpop.permute.xlu0 %10205 }
0x188f   : > { %v10228_v32 = vsel %vm8331_vm0, %v10206_v4, 0  ;;  %v16574_v4 = vld [vmem:[%s22532_s3 + $0x27c] ss:$24 sps:$4 sm:$0xff]  }
0x1891   : > { %v17014_v57 = vpop.eup %17013 }
0x1892   : > { %v10123_v27 = vmul.f32 %v17014_v57, %v17012_v46  ;;  %v10210_v52 = vpop.permute.xlu0 %10209 }
0x1893   : > { %v10234_v2 = vsel %vm8331_vm0, %v10210_v52, 0  ;;  %v13851_v52 = vpack.c.bf16 %v21364_v24, %v21364_v24 }
0x1894   : > { %13543 = vst [vmem:[%s20904_s20 + $0x50] sm:$0xff] %v10123_v27  ;;  %v10126_v18 = vpack.c.bf16 %v10123_v27, %v10123_v27  ;;  %v10313_v27 = vpop.permute.xlu1 %10312 }
0x1896   : > { %14507 = vmatmul.mubr.bf16.vlgmr.msra.gmra.mrb[156].mxu1 %v10126_v18  ;;  %v10214_v7 = vpop.permute.xlu0 %10213 }
0x1897   : > { %14511 = vmatpush3.bf16.xpose.msra.mxu1 %v10219_v10  ;;  %14526 = vmatprep.mubr.msk.bf16.mxu1 %vm17088_vm1, %v22677_v21  ;;  %v10240_v39 = vsel %vm8331_vm0, %v10214_v7, 0  ;;  %v16580_v7 = vld [vmem:[%s22532_s3 + $0x4] ss:$24 sps:$4 sm:$0xff]  }
0x1898   : > { %14512 = vmatprep.subr.bf16.mxu1 %v22677_v21 }
0x189f   : > { %14513 = vmatpush3.bf16.xpose.msra.mxu1 %v10222_v47  ;;  %v16569_v47 = vld [vmem:[%s22532_s3 + $0x248] ss:$24 sps:$4 sm:$0xff]  }
0x18a0   : > { %14514 = vmatprep.subr.bf16.mxu1 %v22677_v21 }
0x18a7   : > { %14515 = vmatpush3.bf16.xpose.msra.mxu1 %v10225_v12  ;;  %v16571_v12 = vld [vmem:[%s22532_s3 + $0x24c] ss:$24 sps:$4 sm:$0xff]  }
0x18a8   : > { %14516 = vmatprep.subr.bf16.mxu1 %v22677_v21 }
0x18af   : > { %14517 = vmatpush3.bf16.xpose.msra.mxu1 %v10228_v32  ;;  %v13849_v32 = vpack.c.bf16 %v21195_v14, %v21195_v14  ;;  %v16581_v14 = vld [vmem:[%s22532_s3 + $0x2d8] ss:$24 sps:$4 sm:$0xff]  }
0x18b0   : > { %14518 = vmatprep.subr.bf16.mxu1 %v22677_v21 }
0x18b7   : > { %14519 = vmatpush3.bf16.xpose.msra.mxu1 %v10231_v55  ;;  %v16577_v55 = vld [vmem:[%s22532_s3 + $0x2ac] ss:$24 sps:$4 sm:$0xff]  }
0x18b8   : > { %14520 = vmatprep.subr.bf16.mxu1 %v22677_v21 }
0x18bf   : > { %14521 = vmatpush3.bf16.xpose.msra.mxu1 %v10234_v2  ;;  %v16583_v2 = vld [vmem:[%s22532_s3 + $0x2dc] ss:$24 sps:$4 sm:$0xff]  }
0x18c0   : > { %14522 = vmatprep.subr.bf16.mxu1 %v22677_v21 }
0x18c7   : > { %14523 = vmatpush3.bf16.xpose.msra.mxu1 %v10237_v16  ;;  %v16591_v16 = vld [vmem:[%s22532_s3 + $0x30c] ss:$24 sps:$4 sm:$0xff]  }
0x18c8   : > { %14524 = vmatprep.subr.bf16.mxu1 %v22677_v21 }
0x18cf   : > { %14525 = vmatpush3.bf16.xpose.msra.mxu1 %v10240_v39 }
0x18d6   : > { %14527 = vmatmul.mubr.msk.bf16.vlgmr.msra.gmra.mrb[160].mxu1 %vm8331_vm0, %v10190_v13 }
0x1969   : > { %v10161_v61 = vpop.f32.mrb[156].mxu1 }
0x196a   : > { %v10167_v0 = vpack.c.bf16 %v10161_v61, %v10161_v61  ;;  %v14508_v45 = vpop.f32.mrb[157].mxu1 }
0x196b   : > { %v10164_v56 = vpop.f32.mrb[158].mxu1 }
0x196c   : > { %10168 = vst.msk [vmem:[#allocation4 + $0x14] sm:$0xf] %vm8451_vm3, %v10167_v0  ;;  %v14509_v59 = vpop.f32.mrb[159].mxu1 }
0x196d   : > { %v16578_v59 = vld [vmem:[%s22532_s3] ss:$24 sps:$4 sm:$0xff]  }
0x19a9   : > { %v10276_v38 = vpop.f32.mrb[160].mxu1 }
0x19aa   : > { %v21526_v25 = vadd.f32 %v10276_v38, %v20819_v41  ;;  %v14528_v20 = vpop.f32.mrb[161].mxu1  ;;  %v13848_v41 = vpack.c.bf16 %v21105_v43, %v21105_v43  ;;  %v16538_v43 = vld [vmem:[%s22532_s3 + $0x3c] ss:$24 sps:$4 sm:$0xff]  }
0x19ab   : > { %v10279_v37 = vpop.f32.mrb[162].mxu1 }
0x19ac   : > { %10282 = vmax.xlane.f32.xlu0 %v21526_v25  ;;  %v14529_v36 = vpop.f32.mrb[163].mxu1  ;;  %v16584_v37 = vld [vmem:[%s22532_s3 + $0x30] ss:$24 sps:$4 sm:$0xff]  }
0x19c2   : > { %10304 = vrot.lane.b32.xlu0 %v22751_v19, %s17086_s17  ;;  %v13852_v19 = vpack.c.bf16 %v21478_v58, %v21478_v58  ;;  %v16548_v58 = vld [vmem:[%s22532_s3 + $0xf8] ss:$24 sps:$4 sm:$0xff]  }
0x19c6   : > { %10308 = vrot.lane.b32.xlu0 %v22753_v29, %s17086_s17  ;;  %v16533_v29 = vld [vmem:[%s22532_s3 + $0x8] ss:$24 sps:$4 sm:$0xff]  }
0x19ca   : > { %10310 = vrot.lane.b32.xlu0 %v22754_v30, %s17086_s17  ;;  %v16541_v30 = vld [vmem:[%s22532_s3 + $0x6c] ss:$24 sps:$4 sm:$0xff]  }
0x19ce   : > { %10314 = vrot.lane.b32.xlu0 %v20877_v44, %s17086_s17  ;;  %v16535_v44 = vld [vmem:[%s22532_s3 + $0xc] ss:$24 sps:$4 sm:$0xff]  }
0x19cf   : > { %12281 = vmatprep.subr.bf16.mxu1 %v16535_v44 }
0x19d0   : > { %12282 = vmatpush1.bf16.msra.mxu1 %v16533_v29  ;;  %v16597_v29 = vld [vmem:[%s22532_s3 + $0x33c] ss:$24 sps:$4 sm:$0xff]  }
0x19d1   : > { %12283 = vmatprep.subr.bf16.mxu1 %v16538_v43  ;;  %v16592_v43 = vld [vmem:[%s22532_s3 + $0x60] ss:$24 sps:$4 sm:$0xff]  }
0x19d2   : > { %8654 = vrot.lane.b32.xlu0 %v13848_v41, %s17086_s17 }
0x19d4   : > { %12284 = vmatpush1.bf16.msra.mxu1 %v16536_v6  ;;  %v16595_v6 = vld [vmem:[%s22532_s3 + $0x338] ss:$24 sps:$4 sm:$0xff]  }
0x19d5   : > { %12285 = vmatprep.subr.bf16.mxu1 %v16541_v30 }
0x19d6   : > { %9341 = vrot.lane.b32.xlu0 %v13850_v62, %s17086_s17  ;;  %v16589_v62 = vld [vmem:[%s22532_s3 + $0x308] ss:$24 sps:$4 sm:$0xff]  }
0x19d8   : > { %12286 = vmatpush1.bf16.msra.mxu1 %v16539_v5  ;;  %v16602_v5 = vld [vmem:[%s22532_s3 + $0x94] ss:$24 sps:$4 sm:$0xff]  }
0x19d9   : > { %12287 = vmatprep.subr.bf16.mxu1 %v16544_v26  ;;  %v16605_v26 = vld [vmem:[%s22532_s3 + $0x36c] ss:$24 sps:$4 sm:$0xff]  }
0x19da   : > { %10027 = vrot.lane.b32.xlu0 %v13852_v19, %s17086_s17  ;;  %v16594_v19 = vld [vmem:[%s22532_s3 + $0x64] ss:$24 sps:$4 sm:$0xff]  }
0x19dc   : > { %12288 = vmatpush1.bf16.msra.mxu1 %v16542_v17  ;;  %v16600_v17 = vld [vmem:[%s22532_s3 + $0x90] ss:$24 sps:$4 sm:$0xff]  }
0x19dd   : > { %12289 = vmatprep.subr.bf16.mxu1 %v16547_v3  ;;  %v16603_v3 = vld [vmem:[%s22532_s3 + $0x368] ss:$24 sps:$4 sm:$0xff]  }
0x19e0   : > { %12290 = vmatpush1.bf16.msra.mxu1 %v16545_v11  ;;  %v16608_v11 = vld [vmem:[%s22532_s3 + $0xc4] ss:$24 sps:$4 sm:$0xff]  }
0x19e1   : > { %12291 = vmatprep.subr.bf16.mxu1 %v16550_v35  ;;  %v16611_v35 = vld [vmem:[%s22532_s3 + $0x39c] ss:$24 sps:$4 sm:$0xff]  }
0x19e4   : > { %12292 = vmatpush1.bf16.msra.mxu1 %v16548_v58  ;;  %v16606_v58 = vld [vmem:[%s22532_s3 + $0xc0] ss:$24 sps:$4 sm:$0xff]  }
0x19e5   : > { %12293 = vmatprep.subr.bf16.mxu1 %v16553_v54  ;;  %v16609_v54 = vld [vmem:[%s22532_s3 + $0x398] ss:$24 sps:$4 sm:$0xff]  }
0x19e8   : > { %12294 = vmatpush1.bf16.msra.mxu1 %v16551_v23  ;;  %v16614_v23 = vld [vmem:[%s22532_s3 + $0xf4] ss:$24 sps:$4 sm:$0xff]  }
0x19e9   : > { %12295 = vmatprep.subr.bf16.mxu1 %v16556_v34  ;;  %v16617_v34 = vld [vmem:[%s22532_s3 + $0x3cc] ss:$24 sps:$4 sm:$0xff]  }
0x19ec   : > { %12296 = vmatpush1.bf16.msra.mxu1 %v16554_v50  ;;  %v16612_v50 = vld [vmem:[%s22532_s3 + $0xf0] ss:$24 sps:$4 sm:$0xff]  }
0x19ed   : > { %12297 = vmatprep.subr.bf16.mxu1 %v16559_v63  ;;  %v16615_v63 = vld [vmem:[%s22532_s3 + $0x3c8] ss:$24 sps:$4 sm:$0xff]  }
0x19f0   : > { %12298 = vmatpush1.bf16.msra.mxu1 %v16557_v9  ;;  %v16620_v9 = vld [vmem:[%s22532_s3 + $0x124] ss:$24 sps:$4 sm:$0xff]  }
0x19f1   : > { %12299 = vmatprep.subr.bf16.mxu1 %v16562_v1  ;;  %v16623_v1 = vld [vmem:[%s22532_s3 + $0x3fc] ss:$24 sps:$4 sm:$0xff]  }
0x19f4   : > { %12300 = vmatpush1.bf16.msra.mxu1 %v16560_v33  ;;  %v16618_v33 = vld [vmem:[%s22532_s3 + $0x120] ss:$24 sps:$4 sm:$0xff]  }
0x19f5   : > { %12301 = vmatprep.subr.bf16.mxu1 %v16565_v42  ;;  %v16621_v42 = vld [vmem:[%s22532_s3 + $0x3f8] ss:$24 sps:$4 sm:$0xff]  }
0x19f8   : > { %12302 = vmatpush1.bf16.msra.mxu1 %v16563_v15  ;;  %v16626_v15 = vld [vmem:[%s22532_s3 + $0x154] ss:$24 sps:$4 sm:$0xff]  }
0x19f9   : > { %12303 = vmatprep.subr.bf16.mxu1 %v16568_v31  ;;  %v16629_v31 = vld [vmem:[%s22532_s3 + $0x42c] ss:$24 sps:$4 sm:$0xff]  }
0x19fc   : > { %12304 = vmatpush1.bf16.msra.mxu1 %v16566_v40  ;;  %v16624_v40 = vld [vmem:[%s22532_s3 + $0x150] ss:$24 sps:$4 sm:$0xff]  }
0x19fd   : > { %12305 = vmatprep.subr.bf16.mxu1 %v16571_v12  ;;  %v16653_v12 = vld [vmem:[%s22532_s3 + $0x4ec] ss:$24 sps:$4 sm:$0xff]  }
0x1a00   : > { %12306 = vmatpush1.bf16.msra.mxu1 %v16569_v47  ;;  %v16650_v47 = vld [vmem:[%s22532_s3 + $0x214] ss:$24 sps:$4 sm:$0xff]  }
0x1a01   : > { %12307 = vmatprep.subr.bf16.mxu1 %v16574_v4  ;;  %v16651_v4 = vld [vmem:[%s22532_s3 + $0x4e8] ss:$24 sps:$4 sm:$0xff]  }
0x1a39   : > { %v10283_v51 = vpop.xlane.xlu0 %10282 }
0x1a3a   : > { %v10284_v53 = vsub.f32 %v21526_v25, %v10283_v51  ;;  %v16586_v25 = vld [vmem:[%s22532_s3 + $0x34] ss:$24 sps:$4 sm:$0xff]   ;;  %v16627_v51 = vld [vmem:[%s22532_s3 + $0x428] ss:$24 sps:$4 sm:$0xff]  }
0x1a3c   : > { %v10285_v49 = vmul.f32 1.442695, %v10284_v53  ;;  %v16632_v53 = vld [vmem:[%s22532_s3 + $0x184] ss:$24 sps:$4 sm:$0xff]  }
0x1a3d   : > { %v10305_v46 = vpop.permute.xlu0 %10304 }
0x1a3e   : > { %17015 = vpow2.f32 %v10285_v49  ;;  %14533 = vmatpush3.bf16.msra.mxu0 %v10305_v46  ;;  %v16635_v49 = vld [vmem:[%s22532_s3 + $0x45c] ss:$24 sps:$4 sm:$0xff]   ;;  %v16630_v46 = vld [vmem:[%s22532_s3 + $0x180] ss:$24 sps:$4 sm:$0xff]  }
0x1a3f   : > { %14534 = vmatprep.subr.bf16.mxu0 %v22677_v21 }
0x1a41   : > { %v10309_v13 = vpop.permute.xlu0 %10308 }
0x1a42   : > { %14535 = vmatpush3.bf16.msra.mxu0 %v10307_v48  ;;  %v16633_v48 = vld [vmem:[%s22532_s3 + $0x458] ss:$24 sps:$4 sm:$0xff]  }
0x1a43   : > { %14536 = vmatprep.subr.bf16.mxu0 %v22677_v21 }
0x1a45   : > { %v10311_v22 = vpop.permute.xlu0 %10310 }
0x1a46   : > { %14537 = vmatpush3.bf16.msra.mxu0 %v10309_v13  ;;  %v16638_v13 = vld [vmem:[%s22532_s3 + $0x1b4] ss:$24 sps:$4 sm:$0xff]  }
0x1a47   : > { %14538 = vmatprep.subr.bf16.mxu0 %v22677_v21 }
0x1a48   : > { %v17016_v60 = vpop.eup %17015 }
0x1a49   : > { %10287 = vadd.xlane.f32.xlu1 %v17016_v60  ;;  %v10315_v57 = vpop.permute.xlu0 %10314 }
0x1a4a   : > { %14539 = vmatpush3.bf16.msra.mxu0 %v10311_v22  ;;  %v16641_v22 = vld [vmem:[%s22532_s3 + $0x48c] ss:$24 sps:$4 sm:$0xff]  }
0x1a4b   : > { %14540 = vmatprep.subr.bf16.mxu0 %v22677_v21 }
0x1a4d   : > { %v8655_v28 = vpop.permute.xlu0 %8654 }
0x1a4e   : > { %8658 = vst.msk [vmem:[#allocation4] sm:$0xf] %vm8657_vm4, %v8655_v28  ;;  %14541 = vmatpush3.bf16.msra.mxu0 %v10313_v27  ;;  %v16644_v27 = vld [vmem:[%s22532_s3 + $0x1e4] ss:$24 sps:$4 sm:$0xff]  }
0x1a4f   : > { %14542 = vmatprep.subr.bf16.mxu0 %v22677_v21  ;;  %v16647_v28 = vld [vmem:[%s22532_s3 + $0x4bc] ss:$24 sps:$4 sm:$0xff]  }
0x1a51   : > { %v9342_v18 = vpop.permute.xlu0 %9341 }
0x1a52   : > { %9344 = vst.msk [vmem:[#allocation4 + $0x8] sm:$0xf] %vm8657_vm4, %v9342_v18  ;;  %14543 = vmatpush3.bf16.msra.mxu0 %v10315_v57  ;;  %v16639_v57 = vld [vmem:[%s22532_s3 + $0x488] ss:$24 sps:$4 sm:$0xff]  }
0x1a53   : > { %14544 = vmatprep.subr.bf16.mxu0 %v22677_v21  ;;  %v16572_v21 = vld [vmem:[%s22532_s3 + $0x278] ss:$24 sps:$4 sm:$0xff]  }
0x1a54   : > { %12308 = vmatpush1.bf16.msra.mxu1 %v16572_v21  ;;  %v16642_v18 = vld [vmem:[%s22532_s3 + $0x1e0] ss:$24 sps:$4 sm:$0xff]   ;;  %v16648_v21 = vld [vmem:[%s22532_s3 + $0x210] ss:$24 sps:$4 sm:$0xff]  }
0x1a55   : > { %v10028_v10 = vpop.permute.xlu0 %10027  ;;  %12309 = vmatprep.subr.bf16.mxu1 %v16577_v55  ;;  %v16654_v55 = vld [vmem:[%s22532_s3 + $0x240] ss:$24 sps:$4 sm:$0xff]  }
0x1a56   : > { %10030 = vst.msk [vmem:[#allocation4 + $0x10] sm:$0xf] %vm8657_vm4, %v10028_v10  ;;  %v16645_v10 = vld [vmem:[%s22532_s3 + $0x4b8] ss:$24 sps:$4 sm:$0xff]  }
0x1a5a   : > { %10316 = vrot.lane.b32.xlu1 %v20885_v8, %s17086_s17  ;;  %v16575_v8 = vld [vmem:[%s22532_s3 + $0x2a8] ss:$24 sps:$4 sm:$0xff]  }
0x1a5b   : > { %12310 = vmatpush1.bf16.msra.mxu1 %v16575_v8  ;;  %v16659_v8 = vld [vmem:[%s22532_s3 + $0x51c] ss:$24 sps:$4 sm:$0xff]  }
0x1a5c   : > { %12311 = vmatprep.subr.bf16.mxu1 %v16583_v2  ;;  %v16665_v2 = vld [vmem:[%s22532_s3 + $0x54c] ss:$24 sps:$4 sm:$0xff]  }
0x1a5e   : > { %8998 = vrot.lane.b32.xlu1 %v13849_v32, %s17086_s17  ;;  %v16656_v32 = vld [vmem:[%s22532_s3 + $0x244] ss:$24 sps:$4 sm:$0xff]  }
0x1a5f   : > { %12312 = vmatpush1.bf16.msra.mxu1 %v16581_v14  ;;  %v16662_v14 = vld [vmem:[%s22532_s3 + $0x274] ss:$24 sps:$4 sm:$0xff]  }
0x1a60   : > { %12322 = vmatprep.subr.bf16.mxu1 %v16591_v16  ;;  %v16660_v16 = vld [vmem:[%s22532_s3 + $0x270] ss:$24 sps:$4 sm:$0xff]  }
0x1a62   : > { %9684 = vrot.lane.b32.xlu1 %v13851_v52, %s17086_s17  ;;  %v16657_v52 = vld [vmem:[%s22532_s3 + $0x518] ss:$24 sps:$4 sm:$0xff]  }
0x1ad6   : > { %v10288_v24 = vpop.xlane.xlu1 %10287 }
0x1ad7   : > { %17017 = vrcp.f32 %v10288_v24  ;;  %v16663_v24 = vld [vmem:[%s22532_s3 + $0x548] ss:$24 sps:$4 sm:$0xff]  }
0x1ada   : > { %v10317_v39 = vpop.permute.xlu1 %10316 }
0x1adb   : > { %14545 = vmatpush3.bf16.msra.mxu0 %v10317_v39  ;;  %v16671_v39 = vld [vmem:[%s22532_s3 + $0x57c] ss:$24 sps:$4 sm:$0xff]  }
0x1adc   : > { %12158 = vmatprep.subr.bf16.mxu0 %v16580_v7  ;;  %v16668_v7 = vld [vmem:[%s22532_s3 + $0x2a4] ss:$24 sps:$4 sm:$0xff]  }
0x1ade   : > { %v8999_v61 = vpop.permute.xlu1 %8998 }
0x1adf   : > { %9001 = vst.msk [vmem:[#allocation4 + $0x4] sm:$0xf] %vm8657_vm4, %v8999_v61  ;;  %v16666_v61 = vld [vmem:[%s22532_s3 + $0x2a0] ss:$24 sps:$4 sm:$0xff]  }
0x1ae1   : > { %v17018_v0 = vpop.eup %17017 }
0x1ae2   : > { %v9685_v45 = vpop.permute.xlu1 %9684  ;;  %v10290_v56 = vmul.f32 %v17018_v0, %v17016_v60  ;;  %v16636_v60 = vld [vmem:[%s22532_s3 + $0x1b0] ss:$24 sps:$4 sm:$0xff]  }
0x1ae3   : > { %9687 = vst.msk [vmem:[#allocation4 + $0xc] sm:$0xf] %vm8657_vm4, %v9685_v45  ;;  %v16669_v0 = vld [vmem:[%s22532_s3 + $0x578] ss:$24 sps:$4 sm:$0xff]   ;;  %v16674_v45 = vld [vmem:[%s22532_s3 + $0x2d4] ss:$24 sps:$4 sm:$0xff]  }
0x1ae4   : > { %13546 = vst [vmem:[%s20904_s20 + $0x58] sm:$0xff] %v10290_v56  ;;  %v10293_v38 = vpack.c.bf16 %v10290_v56, %v10290_v56  ;;  %v16677_v56 = vld [vmem:[%s22532_s3 + $0x5ac] ss:$24 sps:$4 sm:$0xff]   ;;  %s15184_s20 = smul.u32 48, %s243_s15 }
0x1ae6   : > { %14547 = vmatmul.mubr.bf16.vlgmr.msra.gmra.mrb[136].mxu0 %v10293_v38  ;;  %v10374_v20 = vld [vmem:[#allocation4] sm:$0xff]  ;;  %v16675_v38 = vld [vmem:[%s22532_s3 + $0x5a8] ss:$24 sps:$4 sm:$0xff]   ;;  %s245_s13 = scalar_lea.vmem [#allocation5], %s15184_s20 }
0x1ae7   : > { %12159 = vmatpush1.bf16.msra.mxu0 %v16578_v59  ;;  %v21678_v36 = vcombine.low %v10374_v20, %v10374_v20  ;;  %v21680_v41 = vcombine.high %v10374_v20, %v10374_v20  ;;  %v16672_v59 = vld [vmem:[%s22532_s3 + $0x2d0] ss:$24 sps:$4 sm:$0xff]   ;;  %v16683_v20 = vld [vmem:[%s22532_s3 + $0x5dc] ss:$24 sps:$4 sm:$0xff]   ;;  %s12553_s26 = sshll.u32 %s245_s13, 4  ;;  %s22487_s26 = int_to_ptr.vmem [resolvable:$true] %s12553_s26 }
0x1ae8   : > { %12160 = vmatprep.subr.bf16.mxu0 %v16586_v25  ;;  %v16680_v25 = vld [vmem:[%s22532_s3 + $0x304] ss:$24 sps:$4 sm:$0xff]   ;;  %s17022_s29 = scalar_lea.vmem %s22487_s26, 768  ;;  %p17029_p0 = scmp.lt.s32.totalorder %s22487_s26, %s17027_s10 }
0x1ae9   : > { %12190 = vmatprep.mubr.bf16.mxu0 %v21680_v41  ;;  %12313 = vmatprep.mubr.bf16.mxu1 %v21680_v41  ;;  %p17023_p11 = scmp.ne.s32.totalorder %s22487_s26, %s17022_s29  ;;  %p17030_p1 = scmp.lt.s32.totalorder %s17028_s11, %s17022_s29 }
0x1aea   : > { %12314 = vmatmul.mubr.bf16.vlgmr.msra.gmra.mrb[164].mxu1 %v21678_v36  ;;  %v21694_v44 = vld [vmem:[#allocation4 + $0x8] sm:$0xff] }
0x1aeb   : > { %12161 = vmatpush1.bf16.msra.mxu0 %v16584_v37  ;;  %12323 = vmatpush1.bf16.msra.mxu1 %v16589_v62  ;;  %v21704_v30 = vcombine.high %v21694_v44, %v21694_v44  ;;  %v16678_v37 = vld [vmem:[%s22532_s3 + $0x300] ss:$24 sps:$4 sm:$0xff]   ;;  %p17024_p12 = pnand %p17023_p11, %p17164_p5  ;;  %p17031_p2 = por %p17030_p1, %p17029_p0 }
0x1aec   : > { %12162 = vmatprep.subr.bf16.mxu0 %v16594_v19  ;;  %12324 = vmatprep.subr.bf16.mxu1 %v16597_v29  ;;  %v16681_v62 = vld [vmem:[%s22532_s3 + $0x5d8] ss:$24 sps:$4 sm:$0xff]   ;;  %v16686_v19 = vld [vmem:[%s22532_s3 + $0x334] ss:$24 sps:$4 sm:$0xff]  }
0x1aed   : > { %12354 = vmatprep.mubr.bf16.mxu1 %v21704_v30  ;;  %v16684_v29 = vld [vmem:[%s22532_s3 + $0x330] ss:$24 sps:$4 sm:$0xff]   ;;  %p17025_p13 = pneg %p17024_p12 }
0x1aef   : > { %12163 = vmatpush1.bf16.msra.mxu0 %v16592_v43  ;;  %12325 = vmatpush1.bf16.msra.mxu1 %v16595_v6  ;;  %v16689_v43 = vld [vmem:[%s22532_s3 + $0x364] ss:$24 sps:$4 sm:$0xff]   ;;  %v21888_v6 = vcombine.low %v21694_v44, %v21694_v44  ;;  %p17032_p3 = pnand %p17031_p2, %p17025_p13 }
0x1af0   : > { %12164 = vmatprep.subr.bf16.mxu0 %v16602_v5  ;;  %12326 = vmatprep.subr.bf16.mxu1 %v16605_v26  ;;  %v16687_v5 = vld [vmem:[%s22532_s3 + $0x360] ss:$24 sps:$4 sm:$0xff]   ;;  %v16692_v26 = vld [vmem:[%s22532_s3 + $0x394] ss:$24 sps:$4 sm:$0xff]   ;;  %v16695_v44 = vld [vmem:[%s22532_s3 + $0x3c4] ss:$24 sps:$4 sm:$0xff]  }
0x1af3   : > { %12165 = vmatpush1.bf16.msra.mxu0 %v16600_v17  ;;  %12327 = vmatpush1.bf16.msra.mxu1 %v16603_v3  ;;  %v16690_v17 = vld [vmem:[%s22532_s3 + $0x390] ss:$24 sps:$4 sm:$0xff]   ;;  %v16693_v3 = vld [vmem:[%s22532_s3 + $0x3c0] ss:$24 sps:$4 sm:$0xff]  }
0x1af4   : > { %12166 = vmatprep.subr.bf16.mxu0 %v16608_v11  ;;  %12328 = vmatprep.subr.bf16.mxu1 %v16611_v35  ;;  %v16698_v11 = vld [vmem:[%s22532_s3 + $0x3f4] ss:$24 sps:$4 sm:$0xff]   ;;  %v16696_v35 = vld [vmem:[%s22532_s3 + $0x3f0] ss:$24 sps:$4 sm:$0xff]  }
0x1af7   : > { %12167 = vmatpush1.bf16.msra.mxu0 %v16606_v58  ;;  %12329 = vmatpush1.bf16.msra.mxu1 %v16609_v54  ;;  %v16701_v58 = vld [vmem:[%s22532_s3 + $0x424] ss:$24 sps:$4 sm:$0xff]   ;;  %v16699_v54 = vld [vmem:[%s22532_s3 + $0x420] ss:$24 sps:$4 sm:$0xff]  }
0x1af8   : > { %12168 = vmatprep.subr.bf16.mxu0 %v16614_v23  ;;  %12330 = vmatprep.subr.bf16.mxu1 %v16617_v34  ;;  %v16704_v23 = vld [vmem:[%s22532_s3 + $0x454] ss:$24 sps:$4 sm:$0xff]   ;;  %v16732_v34 = vld [vmem:[%s22532_s3 + $0x608] ss:$24 sps:$4 sm:$0xff]  }
0x1afb   : > { %12169 = vmatpush1.bf16.msra.mxu0 %v16612_v50  ;;  %12331 = vmatpush1.bf16.msra.mxu1 %v16615_v63  ;;  %v16734_v50 = vld [vmem:[%s22532_s3 + $0x60c] ss:$24 sps:$4 sm:$0xff]   ;;  %v16740_v63 = vld [vmem:[%s22532_s3 + $0x63c] ss:$24 sps:$4 sm:$0xff]  }
0x1afc   : > { %12170 = vmatprep.subr.bf16.mxu0 %v16620_v9  ;;  %12332 = vmatprep.subr.bf16.mxu1 %v16623_v1  ;;  %v16702_v9 = vld [vmem:[%s22532_s3 + $0x450] ss:$24 sps:$4 sm:$0xff]   ;;  %v16707_v1 = vld [vmem:[%s22532_s3 + $0x484] ss:$24 sps:$4 sm:$0xff]  }
0x1aff   : > { %12171 = vmatpush1.bf16.msra.mxu0 %v16618_v33  ;;  %12333 = vmatpush1.bf16.msra.mxu1 %v16621_v42  ;;  %v16738_v33 = vld [vmem:[%s22532_s3 + $0x638] ss:$24 sps:$4 sm:$0xff]   ;;  %v16746_v42 = vld [vmem:[%s22532_s3 + $0x66c] ss:$24 sps:$4 sm:$0xff]  }
0x1b00   : > { %12172 = vmatprep.subr.bf16.mxu0 %v16626_v15  ;;  %12334 = vmatprep.subr.bf16.mxu1 %v16629_v31  ;;  %v16705_v15 = vld [vmem:[%s22532_s3 + $0x480] ss:$24 sps:$4 sm:$0xff]   ;;  %v16710_v31 = vld [vmem:[%s22532_s3 + $0x4b4] ss:$24 sps:$4 sm:$0xff]  }
0x1b03   : > { %12173 = vmatpush1.bf16.msra.mxu0 %v16624_v40  ;;  %12335 = vmatpush1.bf16.msra.mxu1 %v16627_v51  ;;  %v16744_v40 = vld [vmem:[%s22532_s3 + $0x668] ss:$24 sps:$4 sm:$0xff]   ;;  %v16752_v51 = vld [vmem:[%s22532_s3 + $0x69c] ss:$24 sps:$4 sm:$0xff]  }
0x1b04   : > { %12174 = vmatprep.subr.bf16.mxu0 %v16632_v53  ;;  %12336 = vmatprep.subr.bf16.mxu1 %v16635_v49  ;;  %v16708_v53 = vld [vmem:[%s22532_s3 + $0x4b0] ss:$24 sps:$4 sm:$0xff]   ;;  %v16713_v49 = vld [vmem:[%s22532_s3 + $0x4e4] ss:$24 sps:$4 sm:$0xff]  }
0x1b07   : > { %12175 = vmatpush1.bf16.msra.mxu0 %v16630_v46  ;;  %12337 = vmatpush1.bf16.msra.mxu1 %v16633_v48  ;;  %v16750_v46 = vld [vmem:[%s22532_s3 + $0x698] ss:$24 sps:$4 sm:$0xff]   ;;  %v16758_v48 = vld [vmem:[%s22532_s3 + $0x6cc] ss:$24 sps:$4 sm:$0xff]  }
0x1b08   : > { %12176 = vmatprep.subr.bf16.mxu0 %v16638_v13  ;;  %12338 = vmatprep.subr.bf16.mxu1 %v16641_v22  ;;  %v16711_v13 = vld [vmem:[%s22532_s3 + $0x4e0] ss:$24 sps:$4 sm:$0xff]   ;;  %v16716_v22 = vld [vmem:[%s22532_s3 + $0x514] ss:$24 sps:$4 sm:$0xff]  }
0x1b0b   : > { %12177 = vmatpush1.bf16.msra.mxu0 %v16636_v60  ;;  %12339 = vmatpush1.bf16.msra.mxu1 %v16639_v57  ;;  %v16756_v60 = vld [vmem:[%s22532_s3 + $0x6c8] ss:$24 sps:$4 sm:$0xff]   ;;  %v16764_v57 = vld [vmem:[%s22532_s3 + $0x6fc] ss:$24 sps:$4 sm:$0xff]  }
0x1b0c   : > { %12178 = vmatprep.subr.bf16.mxu0 %v16644_v27  ;;  %12340 = vmatprep.subr.bf16.mxu1 %v16647_v28  ;;  %v16714_v27 = vld [vmem:[%s22532_s3 + $0x510] ss:$24 sps:$4 sm:$0xff]   ;;  %v16719_v28 = vld [vmem:[%s22532_s3 + $0x544] ss:$24 sps:$4 sm:$0xff]  }
0x1b0f   : > { %12179 = vmatpush1.bf16.msra.mxu0 %v16642_v18  ;;  %12341 = vmatpush1.bf16.msra.mxu1 %v16645_v10  ;;  %v16762_v18 = vld [vmem:[%s22532_s3 + $0x6f8] ss:$24 sps:$4 sm:$0xff]   ;;  %v16770_v10 = vld [vmem:[%s22532_s3 + $0x72c] ss:$24 sps:$4 sm:$0xff]  }
0x1b10   : > { %12180 = vmatprep.subr.bf16.mxu0 %v16650_v47  ;;  %12342 = vmatprep.subr.bf16.mxu1 %v16653_v12  ;;  %v16717_v47 = vld [vmem:[%s22532_s3 + $0x540] ss:$24 sps:$4 sm:$0xff]   ;;  %v16722_v12 = vld [vmem:[%s22532_s3 + $0x574] ss:$24 sps:$4 sm:$0xff]  }
0x1b13   : > { %12181 = vmatpush1.bf16.msra.mxu0 %v16648_v21  ;;  %12343 = vmatpush1.bf16.msra.mxu1 %v16651_v4  ;;  %v16768_v21 = vld [vmem:[%s22532_s3 + $0x728] ss:$24 sps:$4 sm:$0xff]   ;;  %v16776_v4 = vld [vmem:[%s22532_s3 + $0x75c] ss:$24 sps:$4 sm:$0xff]  }
0x1b14   : > { %12182 = vmatprep.subr.bf16.mxu0 %v16656_v32  ;;  %12344 = vmatprep.subr.bf16.mxu1 %v16659_v8  ;;  %v16720_v32 = vld [vmem:[%s22532_s3 + $0x570] ss:$24 sps:$4 sm:$0xff]   ;;  %v16725_v8 = vld [vmem:[%s22532_s3 + $0x5a4] ss:$24 sps:$4 sm:$0xff]  }
0x1b17   : > { %12183 = vmatpush1.bf16.msra.mxu0 %v16654_v55  ;;  %12345 = vmatpush1.bf16.msra.mxu1 %v16657_v52  ;;  %v16774_v55 = vld [vmem:[%s22532_s3 + $0x758] ss:$24 sps:$4 sm:$0xff]   ;;  %v16782_v52 = vld [vmem:[%s22532_s3 + $0x78c] ss:$24 sps:$4 sm:$0xff]  }
0x1b18   : > { %12184 = vmatprep.subr.bf16.mxu0 %v16662_v14  ;;  %12346 = vmatprep.subr.bf16.mxu1 %v16665_v2  ;;  %v16723_v14 = vld [vmem:[%s22532_s3 + $0x5a0] ss:$24 sps:$4 sm:$0xff]   ;;  %v16728_v2 = vld [vmem:[%s22532_s3 + $0x5d4] ss:$24 sps:$4 sm:$0xff]  }
0x1b1b   : > { %12185 = vmatpush1.bf16.msra.mxu0 %v16660_v16  ;;  %12347 = vmatpush1.bf16.msra.mxu1 %v16663_v24  ;;  %v16780_v16 = vld [vmem:[%s22532_s3 + $0x788] ss:$24 sps:$4 sm:$0xff]   ;;  %v16788_v24 = vld [vmem:[%s22532_s3 + $0x7bc] ss:$24 sps:$4 sm:$0xff]  }
0x1b1c   : > { %12186 = vmatprep.subr.bf16.mxu0 %v16668_v7  ;;  %12348 = vmatprep.subr.bf16.mxu1 %v16671_v39  ;;  %v16726_v7 = vld [vmem:[%s22532_s3 + $0x5d0] ss:$24 sps:$4 sm:$0xff]   ;;  %v16731_v39 = vld [vmem:[%s22532_s3 + $0x604] ss:$24 sps:$4 sm:$0xff]  }
0x1b1f   : > { %12187 = vmatpush1.bf16.msra.mxu0 %v16666_v61  ;;  %12349 = vmatpush1.bf16.msra.mxu1 %v16669_v0  ;;  %v16786_v61 = vld [vmem:[%s22532_s3 + $0x7b8] ss:$24 sps:$4 sm:$0xff]   ;;  %v16794_v0 = vld [vmem:[%s22532_s3 + $0x7ec] ss:$24 sps:$4 sm:$0xff]  }
0x1b20   : > { %12188 = vmatprep.subr.bf16.mxu0 %v16674_v45  ;;  %12350 = vmatprep.subr.bf16.mxu1 %v16677_v56  ;;  %v16729_v45 = vld [vmem:[%s22532_s3 + $0x600] ss:$24 sps:$4 sm:$0xff]   ;;  %v16737_v56 = vld [vmem:[%s22532_s3 + $0x634] ss:$24 sps:$4 sm:$0xff]  }
0x1b23   : > { %12189 = vmatpush1.bf16.msra.mxu0 %v16672_v59  ;;  %12351 = vmatpush1.bf16.msra.mxu1 %v16675_v38  ;;  %v16792_v59 = vld [vmem:[%s22532_s3 + $0x7e8] ss:$24 sps:$4 sm:$0xff]   ;;  %v16800_v38 = vld [vmem:[%s22532_s3 + $0x81c] ss:$24 sps:$4 sm:$0xff]  }
0x1b24   : > { %12199 = vmatprep.subr.bf16.mxu0 %v16680_v25  ;;  %12352 = vmatprep.subr.bf16.mxu1 %v16683_v20  ;;  %v16735_v25 = vld [vmem:[%s22532_s3 + $0x630] ss:$24 sps:$4 sm:$0xff]   ;;  %v16743_v20 = vld [vmem:[%s22532_s3 + $0x664] ss:$24 sps:$4 sm:$0xff]  }
0x1b26   : > { %12191 = vmatmul.mubr.bf16.vlgmr.msra.gmra.mrb[140].mxu0 %v21678_v36 }
0x1b27   : > { %12200 = vmatpush1.bf16.msra.mxu0 %v16678_v37  ;;  %12231 = vmatprep.mubr.bf16.mxu0 %v21704_v30  ;;  %v16798_v37 = vld [vmem:[%s22532_s3 + $0x818] ss:$24 sps:$4 sm:$0xff]  }
0x1b28   : > { %12353 = vmatpush1.bf16.msra.mxu1 %v16681_v62  ;;  %12201 = vmatprep.subr.bf16.mxu0 %v16686_v19  ;;  %v16806_v62 = vld [vmem:[%s22532_s3 + $0x84c] ss:$24 sps:$4 sm:$0xff]   ;;  %v16741_v19 = vld [vmem:[%s22532_s3 + $0x660] ss:$24 sps:$4 sm:$0xff]  }
0x1b29   : > { %12363 = vmatprep.subr.bf16.mxu1 %v16734_v50  ;;  %v16785_v50 = vld [vmem:[%s22532_s3 + $0x7b4] ss:$24 sps:$4 sm:$0xff]  }
0x1b2b   : > { %12355 = vmatmul.mubr.bf16.vlgmr.msra.gmra.mrb[164].mxu1 %v21888_v6  ;;  %12202 = vmatpush1.bf16.msra.mxu0 %v16684_v29  ;;  %v16749_v29 = vld [vmem:[%s22532_s3 + $0x694] ss:$24 sps:$4 sm:$0xff]  }
0x1b2c   : > { %12203 = vmatprep.subr.bf16.mxu0 %v16689_v43  ;;  %12364 = vmatpush1.bf16.msra.mxu1 %v16732_v34  ;;  %v16804_v43 = vld [vmem:[%s22532_s3 + $0x848] ss:$24 sps:$4 sm:$0xff]  }
0x1b2d   : > { %12365 = vmatprep.subr.bf16.mxu1 %v16740_v63  ;;  %v16777_v34 = vld [vmem:[%s22532_s3 + $0x780] ss:$24 sps:$4 sm:$0xff]   ;;  %v16783_v63 = vld [vmem:[%s22532_s3 + $0x7b0] ss:$24 sps:$4 sm:$0xff]  }
0x1b2f   : > { %12204 = vmatpush1.bf16.msra.mxu0 %v16687_v5  ;;  %v16747_v5 = vld [vmem:[%s22532_s3 + $0x690] ss:$24 sps:$4 sm:$0xff]  }
0x1b30   : > { %12205 = vmatprep.subr.bf16.mxu0 %v16692_v26  ;;  %12366 = vmatpush1.bf16.msra.mxu1 %v16738_v33  ;;  %v16755_v26 = vld [vmem:[%s22532_s3 + $0x6c4] ss:$24 sps:$4 sm:$0xff]   ;;  %v16797_v33 = vld [vmem:[%s22532_s3 + $0x814] ss:$24 sps:$4 sm:$0xff]  }
0x1b31   : > { %12367 = vmatprep.subr.bf16.mxu1 %v16746_v42  ;;  %v16795_v42 = vld [vmem:[%s22532_s3 + $0x810] ss:$24 sps:$4 sm:$0xff]  }
0x1b33   : > { %12206 = vmatpush1.bf16.msra.mxu0 %v16690_v17  ;;  %v16753_v17 = vld [vmem:[%s22532_s3 + $0x6c0] ss:$24 sps:$4 sm:$0xff]  }
0x1b34   : > { %12207 = vmatprep.subr.bf16.mxu0 %v16695_v44  ;;  %12368 = vmatpush1.bf16.msra.mxu1 %v16744_v40  ;;  %v16761_v44 = vld [vmem:[%s22532_s3 + $0x6f4] ss:$24 sps:$4 sm:$0xff]  }
0x1b35   : > { %12369 = vmatprep.subr.bf16.mxu1 %v16752_v51  ;;  %v16809_v40 = vld [vmem:[%s22532_s3 + $0x874] ss:$24 sps:$4 sm:$0xff]   ;;  %v16807_v51 = vld [vmem:[%s22532_s3 + $0x870] ss:$24 sps:$4 sm:$0xff]  }
0x1b37   : > { %12208 = vmatpush1.bf16.msra.mxu0 %v16693_v3  ;;  %v16759_v3 = vld [vmem:[%s22532_s3 + $0x6f0] ss:$24 sps:$4 sm:$0xff]  }
0x1b38   : > { %12209 = vmatprep.subr.bf16.mxu0 %v16698_v11  ;;  %12370 = vmatpush1.bf16.msra.mxu1 %v16750_v46  ;;  %v16767_v11 = vld [vmem:[%s22532_s3 + $0x724] ss:$24 sps:$4 sm:$0xff]   ;;  %v16813_v46 = vld [vmem:[%s22532_s3 + $0x8a0] ss:$24 sps:$4 sm:$0xff]  }
0x1b39   : > { %12371 = vmatprep.subr.bf16.mxu1 %v16758_v48  ;;  %v16815_v48 = vld [vmem:[%s22532_s3 + $0x8a4] ss:$24 sps:$4 sm:$0xff]  }
0x1b3b   : > { %12210 = vmatpush1.bf16.msra.mxu0 %v16696_v35  ;;  %v16765_v35 = vld [vmem:[%s22532_s3 + $0x720] ss:$24 sps:$4 sm:$0xff]  }
0x1b3c   : > { %12211 = vmatprep.subr.bf16.mxu0 %v16701_v58  ;;  %12372 = vmatpush1.bf16.msra.mxu1 %v16756_v60  ;;  %v16773_v58 = vld [vmem:[%s22532_s3 + $0x754] ss:$24 sps:$4 sm:$0xff]   ;;  %v16816_v60 = vld [vmem:[%s22532_s3 + $0x8a8] ss:$24 sps:$4 sm:$0xff]  }
0x1b3d   : > { %12373 = vmatprep.subr.bf16.mxu1 %v16764_v57  ;;  %v16819_v57 = vld [vmem:[%s22532_s3 + $0x8d0] ss:$24 sps:$4 sm:$0xff]  }
0x1b3f   : > { %12212 = vmatpush1.bf16.msra.mxu0 %v16699_v54  ;;  %v16771_v54 = vld [vmem:[%s22532_s3 + $0x750] ss:$24 sps:$4 sm:$0xff]  }
0x1b40   : > { %12213 = vmatprep.subr.bf16.mxu0 %v16704_v23  ;;  %12374 = vmatpush1.bf16.msra.mxu1 %v16762_v18  ;;  %v16779_v23 = vld [vmem:[%s22532_s3 + $0x784] ss:$24 sps:$4 sm:$0xff]  }
0x1b41   : > { %12375 = vmatprep.subr.bf16.mxu1 %v16770_v10  ;;  %v16829_v10 = vld [vmem:[%s22532_s3 + $0x14] ss:$24 sps:$4 sm:$0xff]  }
0x1b43   : > { %12214 = vmatpush1.bf16.msra.mxu0 %v16702_v9  ;;  %v16791_v9 = vld [vmem:[%s22532_s3 + $0x7e4] ss:$24 sps:$4 sm:$0xff]  }
0x1b44   : > { %12215 = vmatprep.subr.bf16.mxu0 %v16707_v1  ;;  %12376 = vmatpush1.bf16.msra.mxu1 %v16768_v21  ;;  %v16789_v1 = vld [vmem:[%s22532_s3 + $0x7e0] ss:$24 sps:$4 sm:$0xff]  }
0x1b45   : > { %12377 = vmatprep.subr.bf16.mxu1 %v16776_v4 }
0x1b47   : > { %12216 = vmatpush1.bf16.msra.mxu0 %v16705_v15  ;;  %v16803_v15 = vld [vmem:[%s22532_s3 + $0x844] ss:$24 sps:$4 sm:$0xff]  }
0x1b48   : > { %12217 = vmatprep.subr.bf16.mxu0 %v16710_v31  ;;  %12378 = vmatpush1.bf16.msra.mxu1 %v16774_v55  ;;  %v16801_v31 = vld [vmem:[%s22532_s3 + $0x840] ss:$24 sps:$4 sm:$0xff]  }
0x1b49   : > { %12379 = vmatprep.subr.bf16.mxu1 %v16782_v52 }
0x1b4b   : > { %12218 = vmatpush1.bf16.msra.mxu0 %v16708_v53  ;;  %v16810_v53 = vld [vmem:[%s22532_s3 + $0x878] ss:$24 sps:$4 sm:$0xff]  }
0x1b4c   : > { %12219 = vmatprep.subr.bf16.mxu0 %v16713_v49  ;;  %12380 = vmatpush1.bf16.msra.mxu1 %v16780_v16  ;;  %v16812_v49 = vld [vmem:[%s22532_s3 + $0x87c] ss:$24 sps:$4 sm:$0xff]   ;;  %v16830_v16 = vld [vmem:[%s22532_s3 + $0x40] ss:$24 sps:$4 sm:$0xff]  }
0x1b4d   : > { %12381 = vmatprep.subr.bf16.mxu1 %v16788_v24  ;;  %v16835_v24 = vld [vmem:[%s22532_s3 + $0x74] ss:$24 sps:$4 sm:$0xff]  }
0x1b4f   : > { %12220 = vmatpush1.bf16.msra.mxu0 %v16711_v13  ;;  %v16818_v13 = vld [vmem:[%s22532_s3 + $0x8ac] ss:$24 sps:$4 sm:$0xff]  }
0x1b50   : > { %12221 = vmatprep.subr.bf16.mxu0 %v16716_v22  ;;  %12382 = vmatpush1.bf16.msra.mxu1 %v16786_v61  ;;  %v16821_v22 = vld [vmem:[%s22532_s3 + $0x8d4] ss:$24 sps:$4 sm:$0xff]  }
0x1b51   : > { %12383 = vmatprep.subr.bf16.mxu1 %v16794_v0  ;;  %v16841_v61 = vld [vmem:[%s22532_s3 + $0xd4] ss:$24 sps:$4 sm:$0xff]   ;;  %v16839_v0 = vld [vmem:[%s22532_s3 + $0xd0] ss:$24 sps:$4 sm:$0xff]  }
0x1b53   : > { %12222 = vmatpush1.bf16.msra.mxu0 %v16714_v27  ;;  %v16824_v27 = vld [vmem:[%s22532_s3 + $0x8dc] ss:$24 sps:$4 sm:$0xff]  }
0x1b54   : > { %12223 = vmatprep.subr.bf16.mxu0 %v16719_v28  ;;  %12384 = vmatpush1.bf16.msra.mxu1 %v16792_v59  ;;  %v16822_v28 = vld [vmem:[%s22532_s3 + $0x8d8] ss:$24 sps:$4 sm:$0xff]   ;;  %v16847_v59 = vld [vmem:[%s22532_s3 + $0x134] ss:$24 sps:$4 sm:$0xff]  }
0x1b55   : > { %12385 = vmatprep.subr.bf16.mxu1 %v16800_v38  ;;  %v16845_v38 = vld [vmem:[%s22532_s3 + $0x130] ss:$24 sps:$4 sm:$0xff]  }
0x1b57   : > { %12224 = vmatpush1.bf16.msra.mxu0 %v16717_v47 }
0x1b58   : > { %12225 = vmatprep.subr.bf16.mxu0 %v16722_v12  ;;  %12386 = vmatpush1.bf16.msra.mxu1 %v16798_v37  ;;  %v16853_v37 = vld [vmem:[%s22532_s3 + $0x194] ss:$24 sps:$4 sm:$0xff]  }
0x1b59   : > { %12387 = vmatprep.subr.bf16.mxu1 %v16806_v62  ;;  %v16851_v62 = vld [vmem:[%s22532_s3 + $0x190] ss:$24 sps:$4 sm:$0xff]  }
0x1b5b   : > { %12226 = vmatpush1.bf16.msra.mxu0 %v16720_v32 }
0x1b5c   : > { %12227 = vmatprep.subr.bf16.mxu0 %v16725_v8  ;;  %12388 = vmatpush1.bf16.msra.mxu1 %v16804_v43  ;;  %v16859_v43 = vld [vmem:[%s22532_s3 + $0x1f4] ss:$24 sps:$4 sm:$0xff]  }
0x1b5d   : > { %12389 = vmatprep.subr.bf16.mxu1 %v16812_v49  ;;  %v16893_v49 = vld [vmem:[%s22532_s3 + $0x430] ss:$24 sps:$4 sm:$0xff]  }
0x1b5f   : > { %12228 = vmatpush1.bf16.msra.mxu0 %v16723_v14  ;;  %v16827_v14 = vld [vmem:[%s22532_s3 + $0x10] ss:$24 sps:$4 sm:$0xff]  }
0x1b60   : > { %12229 = vmatprep.subr.bf16.mxu0 %v16728_v2  ;;  %12390 = vmatpush1.bf16.msra.mxu1 %v16810_v53  ;;  %v16832_v2 = vld [vmem:[%s22532_s3 + $0x44] ss:$24 sps:$4 sm:$0xff]   ;;  %v16895_v53 = vld [vmem:[%s22532_s3 + $0x434] ss:$24 sps:$4 sm:$0xff]  }
0x1b61   : > { %12391 = vmatprep.subr.bf16.mxu1 %v16818_v13  ;;  %v16901_v13 = vld [vmem:[%s22532_s3 + $0x494] ss:$24 sps:$4 sm:$0xff]  }
0x1b63   : > { %12230 = vmatpush1.bf16.msra.mxu0 %v16726_v7  ;;  %v16833_v7 = vld [vmem:[%s22532_s3 + $0x70] ss:$24 sps:$4 sm:$0xff]  }
0x1b64   : > { %12240 = vmatprep.subr.bf16.mxu0 %v16731_v39  ;;  %12392 = vmatpush1.bf16.msra.mxu1 %v16816_v60  ;;  %v16838_v39 = vld [vmem:[%s22532_s3 + $0xa4] ss:$24 sps:$4 sm:$0xff]  }
0x1b65   : > { %12393 = vmatprep.subr.bf16.mxu1 %v16824_v27  ;;  %v16904_v60 = vld [vmem:[%s22532_s3 + $0x4c4] ss:$24 sps:$4 sm:$0xff]   ;;  %v16907_v27 = vld [vmem:[%s22532_s3 + $0x4f4] ss:$24 sps:$4 sm:$0xff]  }
0x1b66   : > { %12232 = vmatmul.mubr.bf16.vlgmr.msra.gmra.mrb[140].mxu0 %v21888_v6 }
0x1b67   : > { %12241 = vmatpush1.bf16.msra.mxu0 %v16729_v45  ;;  %v16844_v45 = vld [vmem:[%s22532_s3 + $0x104] ss:$24 sps:$4 sm:$0xff]  }
0x1b68   : > { %12242 = vmatprep.subr.bf16.mxu0 %v16737_v56  ;;  %12394 = vmatpush1.bf16.msra.mxu1 %v16822_v28  ;;  %v16842_v56 = vld [vmem:[%s22532_s3 + $0x100] ss:$24 sps:$4 sm:$0xff]   ;;  %v16905_v28 = vld [vmem:[%s22532_s3 + $0x4f0] ss:$24 sps:$4 sm:$0xff]  }
0x1b6b   : > { %12243 = vmatpush1.bf16.msra.mxu0 %v16735_v25  ;;  %v16850_v25 = vld [vmem:[%s22532_s3 + $0x164] ss:$24 sps:$4 sm:$0xff]  }
0x1b6c   : > { %12244 = vmatprep.subr.bf16.mxu0 %v16743_v20  ;;  %v16848_v20 = vld [vmem:[%s22532_s3 + $0x160] ss:$24 sps:$4 sm:$0xff]  }
0x1b6f   : > { %12245 = vmatpush1.bf16.msra.mxu0 %v16741_v19  ;;  %v16856_v19 = vld [vmem:[%s22532_s3 + $0x1c4] ss:$24 sps:$4 sm:$0xff]  }
0x1b70   : > { %12246 = vmatprep.subr.bf16.mxu0 %v16749_v29  ;;  %v16854_v29 = vld [vmem:[%s22532_s3 + $0x1c0] ss:$24 sps:$4 sm:$0xff]  }
0x1b73   : > { %12247 = vmatpush1.bf16.msra.mxu0 %v16747_v5  ;;  %v16857_v5 = vld [vmem:[%s22532_s3 + $0x1f0] ss:$24 sps:$4 sm:$0xff]  }
0x1b74   : > { %12248 = vmatprep.subr.bf16.mxu0 %v16755_v26  ;;  %v16862_v26 = vld [vmem:[%s22532_s3 + $0x224] ss:$24 sps:$4 sm:$0xff]  }
0x1b77   : > { %12249 = vmatpush1.bf16.msra.mxu0 %v16753_v17  ;;  %v16860_v17 = vld [vmem:[%s22532_s3 + $0x220] ss:$24 sps:$4 sm:$0xff]  }
0x1b78   : > { %12250 = vmatprep.subr.bf16.mxu0 %v16761_v44  ;;  %v16865_v44 = vld [vmem:[%s22532_s3 + $0x254] ss:$24 sps:$4 sm:$0xff]  }
0x1b7b   : > { %12251 = vmatpush1.bf16.msra.mxu0 %v16759_v3  ;;  %v16863_v3 = vld [vmem:[%s22532_s3 + $0x250] ss:$24 sps:$4 sm:$0xff]  }
0x1b7c   : > { %12252 = vmatprep.subr.bf16.mxu0 %v16767_v11  ;;  %v16868_v11 = vld [vmem:[%s22532_s3 + $0x284] ss:$24 sps:$4 sm:$0xff]  }
0x1b7f   : > { %12253 = vmatpush1.bf16.msra.mxu0 %v16765_v35  ;;  %v16866_v35 = vld [vmem:[%s22532_s3 + $0x280] ss:$24 sps:$4 sm:$0xff]  }
0x1b80   : > { %12254 = vmatprep.subr.bf16.mxu0 %v16773_v58  ;;  %v16871_v58 = vld [vmem:[%s22532_s3 + $0x2b4] ss:$24 sps:$4 sm:$0xff]  }
0x1b83   : > { %12255 = vmatpush1.bf16.msra.mxu0 %v16771_v54  ;;  %v16869_v54 = vld [vmem:[%s22532_s3 + $0x2b0] ss:$24 sps:$4 sm:$0xff]  }
0x1b84   : > { %12256 = vmatprep.subr.bf16.mxu0 %v16779_v23  ;;  %v16874_v23 = vld [vmem:[%s22532_s3 + $0x2e4] ss:$24 sps:$4 sm:$0xff]  }
0x1b87   : > { %12257 = vmatpush1.bf16.msra.mxu0 %v16777_v34  ;;  %v16872_v34 = vld [vmem:[%s22532_s3 + $0x2e0] ss:$24 sps:$4 sm:$0xff]  }
0x1b88   : > { %12258 = vmatprep.subr.bf16.mxu0 %v16785_v50  ;;  %v16877_v50 = vld [vmem:[%s22532_s3 + $0x314] ss:$24 sps:$4 sm:$0xff]  }
0x1b8b   : > { %12259 = vmatpush1.bf16.msra.mxu0 %v16783_v63  ;;  %v16875_v63 = vld [vmem:[%s22532_s3 + $0x310] ss:$24 sps:$4 sm:$0xff]  }
0x1b8c   : > { %12260 = vmatprep.subr.bf16.mxu0 %v16791_v9  ;;  %v16880_v9 = vld [vmem:[%s22532_s3 + $0x344] ss:$24 sps:$4 sm:$0xff]  }
0x1b8f   : > { %12261 = vmatpush1.bf16.msra.mxu0 %v16789_v1  ;;  %v16878_v1 = vld [vmem:[%s22532_s3 + $0x340] ss:$24 sps:$4 sm:$0xff]  }
0x1b90   : > { %12262 = vmatprep.subr.bf16.mxu0 %v16797_v33  ;;  %v16883_v33 = vld [vmem:[%s22532_s3 + $0x374] ss:$24 sps:$4 sm:$0xff]  }
0x1b93   : > { %12263 = vmatpush1.bf16.msra.mxu0 %v16795_v42  ;;  %v16881_v42 = vld [vmem:[%s22532_s3 + $0x370] ss:$24 sps:$4 sm:$0xff]  }
0x1b94   : > { %12264 = vmatprep.subr.bf16.mxu0 %v16803_v15  ;;  %v16889_v15 = vld [vmem:[%s22532_s3 + $0x3d4] ss:$24 sps:$4 sm:$0xff]  }
0x1b97   : > { %12265 = vmatpush1.bf16.msra.mxu0 %v16801_v31  ;;  %v16887_v31 = vld [vmem:[%s22532_s3 + $0x3d0] ss:$24 sps:$4 sm:$0xff]  }
0x1b98   : > { %12266 = vmatprep.subr.bf16.mxu0 %v16809_v40  ;;  %v16892_v40 = vld [vmem:[%s22532_s3 + $0x404] ss:$24 sps:$4 sm:$0xff]  }
0x1b9b   : > { %12267 = vmatpush1.bf16.msra.mxu0 %v16807_v51  ;;  %v16890_v51 = vld [vmem:[%s22532_s3 + $0x400] ss:$24 sps:$4 sm:$0xff]  }
0x1b9c   : > { %12268 = vmatprep.subr.bf16.mxu0 %v16815_v48  ;;  %v16896_v48 = vld [vmem:[%s22532_s3 + $0x460] ss:$24 sps:$4 sm:$0xff]  }
0x1b9f   : > { %12269 = vmatpush1.bf16.msra.mxu0 %v16813_v46  ;;  %v16898_v46 = vld [vmem:[%s22532_s3 + $0x464] ss:$24 sps:$4 sm:$0xff]  }
0x1ba0   : > { %12270 = vmatprep.subr.bf16.mxu0 %v16821_v22  ;;  %v16899_v22 = vld [vmem:[%s22532_s3 + $0x490] ss:$24 sps:$4 sm:$0xff]  }
0x1ba3   : > { %12271 = vmatpush1.bf16.msra.mxu0 %v16819_v57  ;;  %v16902_v57 = vld [vmem:[%s22532_s3 + $0x4c0] ss:$24 sps:$4 sm:$0xff]  }
0x1ba4   : > { %12404 = vmatprep.subr.bf16.mxu0 %v16829_v10  ;;  %v16908_v10 = vld [vmem:[%s22532_s3 + $0x520] ss:$24 sps:$4 sm:$0xff]  }
0x1bb9   : > { %v10360_v18 = vpop.f32.mrb[136].mxu0 }
0x1bba   : > { %v13853_v47 = vpack.c.bf16 %v10360_v18, %v10360_v18  ;;  %v14548_v12 = vpop.f32.mrb[137].mxu0  ;;  %v16910_v18 = vld [vmem:[%s22532_s3 + $0x524] ss:$24 sps:$4 sm:$0xff]  }
0x1bbb   : > { %v10363_v21 = vpop.f32.mrb[138].mxu0  ;;  %v16911_v12 = vld [vmem:[%s22532_s3 + $0x550] ss:$24 sps:$4 sm:$0xff]  }
0x1bbc   : > { %10370 = vrot.lane.b32.xlu1 %v13853_v47, %s17086_s17  ;;  %v14549_v4 = vpop.f32.mrb[139].mxu0  ;;  %v16913_v47 = vld [vmem:[%s22532_s3 + $0x554] ss:$24 sps:$4 sm:$0xff]   ;;  %v16916_v21 = vld [vmem:[%s22532_s3 + $0x584] ss:$24 sps:$4 sm:$0xff]   ;;  %s22485_s17 = scalar_lea.hbm %s22534_s5, %s15187_s19 }
0x1bbd   : > { %v16914_v4 = vld [vmem:[%s22532_s3 + $0x580] ss:$24 sps:$4 sm:$0xff]  }
0x1c2e   : > { %v10371_v32 = vpop.permute.xlu1 %10370 }
0x1c2f   : > { %10373 = vst.msk [vmem:[#allocation4 + $0x14] sm:$0xf] %vm8657_vm4, %v10371_v32  ;;  %v16919_v32 = vld [vmem:[%s22532_s3 + $0x5b4] ss:$24 sps:$4 sm:$0xff]  }
0x1c36   : > { %v10376_v8 = vld [vmem:[#allocation4 + $0x10] sm:$0xff] }
0x1c37   : > { %v22170_v55 = vcombine.low %v10376_v8, %v10376_v8  ;;  %v22172_v52 = vcombine.high %v10376_v8, %v10376_v8  ;;  %v16917_v8 = vld [vmem:[%s22532_s3 + $0x5b0] ss:$24 sps:$4 sm:$0xff]  }
0x1c39   : > { %12272 = vmatprep.mubr.bf16.mxu0 %v22172_v52  ;;  %12395 = vmatprep.mubr.bf16.mxu1 %v22172_v52 }
0x1c3a   : > { %12273 = vmatmul.mubr.bf16.vlgmr.msra.gmra.mrb[140].mxu0 %v22170_v55  ;;  %12396 = vmatmul.mubr.bf16.vlgmr.msra.gmra.mrb[164].mxu1 %v22170_v55 }
0x1c3b   : > { %12405 = vmatpush1.bf16.msra.mxu0 %v16827_v14  ;;  %12436 = vmatprep.mubr.bf16.mxu0 %v21680_v41  ;;  %v16836_v41 = vld [vmem:[%s22532_s3 + $0xa0] ss:$24 sps:$4 sm:$0xff]   ;;  %v16922_v14 = vld [vmem:[%s22532_s3 + $0x5e4] ss:$24 sps:$4 sm:$0xff]  }
0x1c3c   : > { %12406 = vmatprep.subr.bf16.mxu0 %v16832_v2  ;;  %v16920_v2 = vld [vmem:[%s22532_s3 + $0x5e0] ss:$24 sps:$4 sm:$0xff]  }
0x1c3f   : > { %12407 = vmatpush1.bf16.msra.mxu0 %v16830_v16  ;;  %v16925_v16 = vld [vmem:[%s22532_s3 + $0x614] ss:$24 sps:$4 sm:$0xff]  }
0x1c40   : > { %12408 = vmatprep.subr.bf16.mxu0 %v16835_v24  ;;  %v16923_v24 = vld [vmem:[%s22532_s3 + $0x610] ss:$24 sps:$4 sm:$0xff]  }
0x1c43   : > { %12409 = vmatpush1.bf16.msra.mxu0 %v16833_v7  ;;  %v16928_v7 = vld [vmem:[%s22532_s3 + $0x644] ss:$24 sps:$4 sm:$0xff]  }
0x1c44   : > { %12410 = vmatprep.subr.bf16.mxu0 %v16838_v39  ;;  %v16926_v39 = vld [vmem:[%s22532_s3 + $0x640] ss:$24 sps:$4 sm:$0xff]  }
0x1c47   : > { %12411 = vmatpush1.bf16.msra.mxu0 %v16836_v41  ;;  %v16931_v41 = vld [vmem:[%s22532_s3 + $0x674] ss:$24 sps:$4 sm:$0xff]  }
0x1c48   : > { %12412 = vmatprep.subr.bf16.mxu0 %v16841_v61  ;;  %v16929_v61 = vld [vmem:[%s22532_s3 + $0x670] ss:$24 sps:$4 sm:$0xff]  }
0x1c4b   : > { %12413 = vmatpush1.bf16.msra.mxu0 %v16839_v0  ;;  %v16937_v0 = vld [vmem:[%s22532_s3 + $0x6d4] ss:$24 sps:$4 sm:$0xff]  }
0x1c4c   : > { %12414 = vmatprep.subr.bf16.mxu0 %v16844_v45  ;;  %v16935_v45 = vld [vmem:[%s22532_s3 + $0x6d0] ss:$24 sps:$4 sm:$0xff]  }
0x1c4f   : > { %12415 = vmatpush1.bf16.msra.mxu0 %v16842_v56  ;;  %v16940_v56 = vld [vmem:[%s22532_s3 + $0x704] ss:$24 sps:$4 sm:$0xff]  }
0x1c50   : > { %12416 = vmatprep.subr.bf16.mxu0 %v16847_v59  ;;  %v16938_v59 = vld [vmem:[%s22532_s3 + $0x700] ss:$24 sps:$4 sm:$0xff]  }
0x1c53   : > { %12417 = vmatpush1.bf16.msra.mxu0 %v16845_v38  ;;  %v16943_v38 = vld [vmem:[%s22532_s3 + $0x734] ss:$24 sps:$4 sm:$0xff]  }
0x1c54   : > { %12418 = vmatprep.subr.bf16.mxu0 %v16850_v25  ;;  %v16941_v25 = vld [vmem:[%s22532_s3 + $0x730] ss:$24 sps:$4 sm:$0xff]  }
0x1c57   : > { %12419 = vmatpush1.bf16.msra.mxu0 %v16848_v20  ;;  %v16946_v20 = vld [vmem:[%s22532_s3 + $0x764] ss:$24 sps:$4 sm:$0xff]  }
0x1c58   : > { %12420 = vmatprep.subr.bf16.mxu0 %v16853_v37  ;;  %v16944_v37 = vld [vmem:[%s22532_s3 + $0x760] ss:$24 sps:$4 sm:$0xff]  }
0x1c5b   : > { %12421 = vmatpush1.bf16.msra.mxu0 %v16851_v62  ;;  %v16949_v62 = vld [vmem:[%s22532_s3 + $0x794] ss:$24 sps:$4 sm:$0xff]  }
0x1c5c   : > { %12422 = vmatprep.subr.bf16.mxu0 %v16856_v19  ;;  %v16947_v19 = vld [vmem:[%s22532_s3 + $0x790] ss:$24 sps:$4 sm:$0xff]  }
0x1c5f   : > { %12423 = vmatpush1.bf16.msra.mxu0 %v16854_v29  ;;  %v16952_v29 = vld [vmem:[%s22532_s3 + $0x7c4] ss:$24 sps:$4 sm:$0xff]  }
0x1c60   : > { %12424 = vmatprep.subr.bf16.mxu0 %v16859_v43  ;;  %v16950_v43 = vld [vmem:[%s22532_s3 + $0x7c0] ss:$24 sps:$4 sm:$0xff]  }
0x1c63   : > { %12425 = vmatpush1.bf16.msra.mxu0 %v16857_v5  ;;  %v16955_v5 = vld [vmem:[%s22532_s3 + $0x7f4] ss:$24 sps:$4 sm:$0xff]  }
0x1c64   : > { %12426 = vmatprep.subr.bf16.mxu0 %v16862_v26  ;;  %v16953_v26 = vld [vmem:[%s22532_s3 + $0x7f0] ss:$24 sps:$4 sm:$0xff]  }
0x1c67   : > { %12427 = vmatpush1.bf16.msra.mxu0 %v16860_v17  ;;  %v16958_v17 = vld [vmem:[%s22532_s3 + $0x824] ss:$24 sps:$4 sm:$0xff]  }
0x1c68   : > { %12428 = vmatprep.subr.bf16.mxu0 %v16865_v44  ;;  %v16956_v44 = vld [vmem:[%s22532_s3 + $0x820] ss:$24 sps:$4 sm:$0xff]  }
0x1c6b   : > { %12429 = vmatpush1.bf16.msra.mxu0 %v16863_v3  ;;  %v16961_v3 = vld [vmem:[%s22532_s3 + $0x854] ss:$24 sps:$4 sm:$0xff]  }
0x1c6c   : > { %12430 = vmatprep.subr.bf16.mxu0 %v16868_v11  ;;  %v16959_v11 = vld [vmem:[%s22532_s3 + $0x850] ss:$24 sps:$4 sm:$0xff]  }
0x1c6f   : > { %12431 = vmatpush1.bf16.msra.mxu0 %v16866_v35  ;;  %v16964_v35 = vld [vmem:[%s22532_s3 + $0x884] ss:$24 sps:$4 sm:$0xff]  }
0x1c70   : > { %12432 = vmatprep.subr.bf16.mxu0 %v16871_v58  ;;  %v16962_v58 = vld [vmem:[%s22532_s3 + $0x880] ss:$24 sps:$4 sm:$0xff]  }
0x1c73   : > { %12433 = vmatpush1.bf16.msra.mxu0 %v16869_v54  ;;  %v16967_v54 = vld [vmem:[%s22532_s3 + $0x8b4] ss:$24 sps:$4 sm:$0xff]  }
0x1c74   : > { %12434 = vmatprep.subr.bf16.mxu0 %v16874_v23  ;;  %v16965_v23 = vld [vmem:[%s22532_s3 + $0x8b0] ss:$24 sps:$4 sm:$0xff]  }
0x1c77   : > { %12435 = vmatpush1.bf16.msra.mxu0 %v16872_v34  ;;  %v16970_v34 = vld [vmem:[%s22532_s3 + $0x8e4] ss:$24 sps:$4 sm:$0xff]  }
0x1c78   : > { %12445 = vmatprep.subr.bf16.mxu0 %v16877_v50  ;;  %v16968_v50 = vld [vmem:[%s22532_s3 + $0x8e0] ss:$24 sps:$4 sm:$0xff]  }
0x1c7a   : > { %12437 = vmatmul.mubr.bf16.vlgmr.msra.gmra.mrb[144].mxu0 %v21678_v36  ;;  %v16886_v36 = vld [vmem:[%s22532_s3 + $0x3a4] ss:$24 sps:$4 sm:$0xff]  }
0x1c7b   : > { %12446 = vmatpush1.bf16.msra.mxu0 %v16875_v63  ;;  %12477 = vmatprep.mubr.bf16.mxu0 %v21704_v30  ;;  %v16884_v30 = vld [vmem:[%s22532_s3 + $0x3a0] ss:$24 sps:$4 sm:$0xff]  }
0x1c7c   : > { %12447 = vmatprep.subr.bf16.mxu0 %v16880_v9  ;;  %v10665_v63 = vld [vmem:[%s22533_s4] sm:$0x3f]  ;;  %v22764_v9 = vld [vmem:[#allocation9_spill] sm:$0xff] }
0x1c7f   : > { %12448 = vmatpush1.bf16.msra.mxu0 %v16878_v1  ;;  %v10670_v1 = vrot.slane %v10665_v63, %v22764_v9 }
0x1c80   : > { %12449 = vmatprep.subr.bf16.mxu0 %v16883_v33  ;;  %v22765_v33 = vld [vmem:[#allocation16_spill] sm:$0xff] }
0x1c83   : > { %12450 = vmatpush1.bf16.msra.mxu0 %v16881_v42  ;;  %v10678_v42 = vrot.slane %v10665_v63, %v22765_v33 }
0x1c84   : > { %12451 = vmatprep.subr.bf16.mxu0 %v16886_v36  ;;  %v22766_v36 = vld [vmem:[#allocation10_spill] sm:$0xff] }
0x1c87   : > { %12452 = vmatpush1.bf16.msra.mxu0 %v16884_v30  ;;  %v10674_v30 = vrot.slane %v10665_v63, %v22766_v36 }
0x1c88   : > { %12453 = vmatprep.subr.bf16.mxu0 %v16889_v15  ;;  %v22767_v15 = vld [vmem:[#allocation17_spill] sm:$0xff] }
0x1c8b   : > { %12454 = vmatpush1.bf16.msra.mxu0 %v16887_v31  ;;  %v10682_v31 = vrot.slane %v10665_v63, %v22767_v15 }
0x1c8c   : > { %12455 = vmatprep.subr.bf16.mxu0 %v16892_v40 }
0x1c8f   : > { %12456 = vmatpush1.bf16.msra.mxu0 %v16890_v51 }
0x1c90   : > { %12457 = vmatprep.subr.bf16.mxu0 %v16895_v53 }
0x1c93   : > { %12458 = vmatpush1.bf16.msra.mxu0 %v16893_v49 }
0x1c94   : > { %12459 = vmatprep.subr.bf16.mxu0 %v16898_v46 }
0x1c97   : > { %12460 = vmatpush1.bf16.msra.mxu0 %v16896_v48 }
0x1c98   : > { %12461 = vmatprep.subr.bf16.mxu0 %v16901_v13 }
0x1c9b   : > { %12462 = vmatpush1.bf16.msra.mxu0 %v16899_v22 }
0x1c9c   : > { %12463 = vmatprep.subr.bf16.mxu0 %v16904_v60 }
0x1c9f   : > { %12464 = vmatpush1.bf16.msra.mxu0 %v16902_v57 }
0x1ca0   : > { %12465 = vmatprep.subr.bf16.mxu0 %v16907_v27 }
0x1ca3   : > { %12466 = vmatpush1.bf16.msra.mxu0 %v16905_v28  ;;  %v22768_v28 = vld [vmem:[#allocation32_spill] sm:$0xff] }
0x1ca4   : > { %12467 = vmatprep.subr.bf16.mxu0 %v16910_v18  ;;  %v10686_v18 = vrot.slane %v10665_v63, %v22768_v28 }
0x1ca7   : > { %12468 = vmatpush1.bf16.msra.mxu0 %v16908_v10  ;;  %v22769_v10 = vld [vmem:[#allocation33_spill] sm:$0xff] }
0x1ca8   : > { %12469 = vmatprep.subr.bf16.mxu0 %v16913_v47  ;;  %v10690_v47 = vrot.slane %v10665_v63, %v22769_v10 }
0x1cab   : > { %12470 = vmatpush1.bf16.msra.mxu0 %v16911_v12 }
0x1cac   : > { %12471 = vmatprep.subr.bf16.mxu0 %v16916_v21 }
0x1caf   : > { %12472 = vmatpush1.bf16.msra.mxu0 %v16914_v4 }
0x1cb0   : > { %12473 = vmatprep.subr.bf16.mxu0 %v16919_v32 }
0x1cb3   : > { %12474 = vmatpush1.bf16.msra.mxu0 %v16917_v8 }
0x1cb4   : > { %12475 = vmatprep.subr.bf16.mxu0 %v16922_v14 }
0x1cb7   : > { %12476 = vmatpush1.bf16.msra.mxu0 %v16920_v2 }
0x1cb8   : > { %12486 = vmatprep.subr.bf16.mxu0 %v16925_v16 }
0x1cba   : > { %12478 = vmatmul.mubr.bf16.vlgmr.msra.gmra.mrb[144].mxu0 %v21888_v6  ;;  %v16934_v6 = vld [vmem:[%s22532_s3 + $0x6a4] ss:$24 sps:$4 sm:$0xff]  }
0x1cbb   : > { %12487 = vmatpush1.bf16.msra.mxu0 %v16923_v24  ;;  %12518 = vmatprep.mubr.bf16.mxu0 %v22172_v52  ;;  %v16932_v52 = vld [vmem:[%s22532_s3 + $0x6a0] ss:$24 sps:$4 sm:$0xff]  }
0x1cbc   : > { %12488 = vmatprep.subr.bf16.mxu0 %v16928_v7 }
0x1cbf   : > { %12489 = vmatpush1.bf16.msra.mxu0 %v16926_v39 }
0x1cc0   : > { %12490 = vmatprep.subr.bf16.mxu0 %v16931_v41 }
0x1cc3   : > { %12491 = vmatpush1.bf16.msra.mxu0 %v16929_v61 }
0x1cc4   : > { %12492 = vmatprep.subr.bf16.mxu0 %v16934_v6 }
0x1cc7   : > { %12493 = vmatpush1.bf16.msra.mxu0 %v16932_v52 }
0x1cc8   : > { %12494 = vmatprep.subr.bf16.mxu0 %v16937_v0 }
0x1ccb   : > { %12495 = vmatpush1.bf16.msra.mxu0 %v16935_v45 }
0x1ccc   : > { %12496 = vmatprep.subr.bf16.mxu0 %v16940_v56 }
0x1ccf   : > { %12497 = vmatpush1.bf16.msra.mxu0 %v16938_v59 }
0x1cd0   : > { %12498 = vmatprep.subr.bf16.mxu0 %v16943_v38 }
0x1cd3   : > { %12499 = vmatpush1.bf16.msra.mxu0 %v16941_v25 }
0x1cd4   : > { %12500 = vmatprep.subr.bf16.mxu0 %v16946_v20 }
0x1cd7   : > { %12501 = vmatpush1.bf16.msra.mxu0 %v16944_v37 }
0x1cd8   : > { %12502 = vmatprep.subr.bf16.mxu0 %v16949_v62 }
0x1cdb   : > { %12503 = vmatpush1.bf16.msra.mxu0 %v16947_v19 }
0x1cdc   : > { %12504 = vmatprep.subr.bf16.mxu0 %v16952_v29 }
0x1cdf   : > { %12505 = vmatpush1.bf16.msra.mxu0 %v16950_v43 }
0x1ce0   : > { %12506 = vmatprep.subr.bf16.mxu0 %v16955_v5 }
0x1ce3   : > { %12507 = vmatpush1.bf16.msra.mxu0 %v16953_v26 }
0x1ce4   : > { %12508 = vmatprep.subr.bf16.mxu0 %v16958_v17 }
0x1ce7   : > { %12509 = vmatpush1.bf16.msra.mxu0 %v16956_v44 }
0x1ce8   : > { %12510 = vmatprep.subr.bf16.mxu0 %v16961_v3 }
0x1ceb   : > { %12511 = vmatpush1.bf16.msra.mxu0 %v16959_v11 }
0x1cec   : > { %12512 = vmatprep.subr.bf16.mxu0 %v16964_v35 }
0x1cef   : > { %12513 = vmatpush1.bf16.msra.mxu0 %v16962_v58 }
0x1cf0   : > { %12514 = vmatprep.subr.bf16.mxu0 %v16967_v54 }
0x1cf3   : > { %12515 = vmatpush1.bf16.msra.mxu0 %v16965_v23 }
0x1cf4   : > { %12516 = vmatprep.subr.bf16.mxu0 %v16970_v34 }
0x1cf7   : > { %12517 = vmatpush1.bf16.msra.mxu0 %v16968_v50 }
0x1cfa   : > { %12519 = vmatmul.mubr.bf16.vlgmr.msra.gmra.mrb[144].mxu0 %v22170_v55 }
0x1d0d   : > { %v12274_v40 = vpop.f32.mrb[140].mxu0  ;;  %v12397_v51 = vpop.f32.mrb[164].mxu1 }
0x1d0e   : > { %v14750_v53 = vadd.f32 %v12274_v40, %v10670_v1  ;;  %v14752_v49 = vadd.f32 %v12397_v51, %v10678_v42  ;;  %v12276_v55 = vpop.f32.mrb[141].mxu0  ;;  %v12399_v46 = vpop.f32.mrb[165].mxu1 }
0x1d0f   : > { %v14751_v48 = vadd.f32 %v12276_v55, %v10674_v30  ;;  %v14753_v13 = vadd.f32 %v12399_v46, %v10682_v31  ;;  %v12278_v22 = vpop.f32.mrb[142].mxu0  ;;  %v12401_v60 = vpop.f32.mrb[166].mxu1 }
0x1d10   : > { %12527 = vst [vmem:[%s245_s13] sm:$0xff] %v14750_v53  ;;  %12529 = vst [vmem:[%s245_s13 + $0x10] sm:$0xff] %v14752_v49  ;;  %v12279_v57 = vpop.f32.mrb[143].mxu0  ;;  %v12402_v27 = vpop.f32.mrb[167].mxu1 }
0x1d11   : > { %12528 = vst [vmem:[%s245_s13 + $0x8] sm:$0xff] %v14751_v48  ;;  %12530 = vst [vmem:[%s245_s13 + $0x18] sm:$0xff] %v14753_v13 }
0x1dcd   : > { %v12520_v12 = vpop.f32.mrb[144].mxu0 }
0x1dce   : > { %v14754_v21 = vadd.f32 %v12520_v12, %v10686_v18  ;;  %v12522_v4 = vpop.f32.mrb[145].mxu0 }
0x1dcf   : > { %v14755_v32 = vadd.f32 %v12522_v4, %v10690_v47  ;;  %v12524_v8 = vpop.f32.mrb[146].mxu0 }
0x1dd0   : > { %12531 = vst [vmem:[%s245_s13 + $0x20] sm:$0xff] %v14754_v21  ;;  %v12525_v14 = vpop.f32.mrb[147].mxu0 }
0x1dd1   : > { %12532 = vst [vmem:[%s245_s13 + $0x28] sm:$0xff] %v14755_v32 }
0x1dd2   : > { %17035 = shalt.err (!%p17032_p3)
}
0x1dd3   : > { %s17036_s14 = scalar_lea.hbm %s22485_s17, 768  ;;  %s17040_s18 = scalar_lea.hbm %s22534_s5, 1536 }
0x1dd4   : > { %p17037_p4 = scmp.ne.s32.totalorder %s22485_s17, %s17036_s14  ;;  %p17041_p9 = scmp.lt.u32.totalorder %s22485_s17, %s22534_s5 }
0x1dd5   : > { %p17042_p10 = scmp.lt.u32.totalorder %s17040_s18, %s17036_s14  ;;  %p17044_p12 = scmp.lt.u32.totalorder %s17036_s14, %s22485_s17 }
0x1dd6   : > { %p17038_p7 = pnand %p17037_p4, %p17164_p5 }
0x1dd7   : > { %p17043_p11 = por %p17042_p10, %p17041_p9 }
0x1dd8   : > { %p17039_p8 = pneg %p17038_p7 }
0x1dd9   : > { %p17045_p13 = por %p17044_p12, %p17043_p11 }
0x1ddb   : > { %p17046_p0 = pnand %p17045_p13, %p17039_p8 }
0x1ddd   : > { %17049 = shalt.err (!%p17046_p0)
}
0x1dde   : > { %15188 = dma.vmem_to_hbm [thread:$0]  (%p17164_p5), %s22487_s26, 768, %s22485_s17, %s12534_s25  }
0x1ddf PF: > { %p15194_p1 = scmp.ge.s32.totalorder %s17084_s24, 2  ;;  %s12568_s19 = sand.u32 1, %s17072_s21  }
0x1de0   : > { %s12569_s12 = scalar_lea.sflag [#allocation6], %s12568_s19 }
0x1de1   : > { %p15191_p2 = pnand %p15194_p1, %p17168_p6 }
0x1de3   : > { %17067 = dma.done.wait (!%p15191_p2), %s12569_s12, 768  }
0x1de4   : > { %17069 = vsyncadd (!%p15191_p2), %s12569_s12, 4294966528  ;;  %p17_p3 = scmp.ge.s32.totalorder %s17151_s27, 4   ;;  %s22770_s21 = smov %s17076_s22 }
0x1de5   : > { %s22771_s22 = smov %s17080_s23  ;;  %s22772_s23 = smov %s17162_s30 }
0x1de6   : > { %s22773_s24 = smov %s17151_s27  ;;  %19 = sbr.rel (!%p17_p3) target bundleno = 3 (0x3), region = 98 }
0x1ded   :  { %12582 = vsyncpa [#allocation6], 1 }
0x1dee   :  { %12584 = vsyncpa [#allocation6 + $0x1], 1 }

</bundles_post_ra>
